<compile_context>
chip_gen: v7x
topology: tpu7x:2x2x1
jax: 0.10.0
libtpu: 0.0.40
codegen_flags: <defaults>
</compile_context>

<pallas_src>
import math

import numpy as np

import jax
import jax.numpy as jnp
from jax.experimental import pallas as pl
from jax.experimental.pallas import tpu as pltpu

# ---------------- model config (small shapes consistent with the module) ----------------
VOCAB = 50
VOCAB_PAD = 64        # one-hot lane width == zero-padded embedding-table rows
EMBED = 32            # embed_size
SEQ = 16              # seq_length (output_layer acts on this axis)
NHEAD = 4
HEAD_DIM = EMBED // NHEAD
FFN = 64              # dim_feedforward
N_ENC = 2             # num_encoder_layers (small)
N_DEC = 2             # num_decoder_layers (small)
BATCH = 2
LN_EPS = 1e-5
NEG_SLOPE = 0.01      # LeakyReLU default

N_TR = 2 * SEQ        # transformer "batch" axis: para + epi streams stacked (shared weights)
ROWS = BATCH * N_TR   # 64 rows of the flattened (L*N, E) activation; L == BATCH == 2
LANES = 128           # slab lane width (aligned)


# ---------------- parameter/constant slab layout (static, module-level) ----------------
def _layout_entries():
    e = []

    def add(name, nr, nc):
        e.append((name, nr, nc))

    add("embed", VOCAB_PAD, EMBED)
    add("co_wab", EMBED, 2 * EMBED)
    add("co_bab", 1, 2 * EMBED)
    add("co_ww", EMBED, EMBED)
    add("co_bw", 1, EMBED)
    for i in range(N_ENC):
        add(f"enc{i}_qkv_w", EMBED, 3 * EMBED)
        add(f"enc{i}_qkv_b", 1, 3 * EMBED)
        add(f"enc{i}_wo", EMBED, EMBED)
        add(f"enc{i}_bo", 1, EMBED)
        add(f"enc{i}_ln1_g", 1, EMBED)
        add(f"enc{i}_ln1_b", 1, EMBED)
        add(f"enc{i}_w1", EMBED, FFN)
        add(f"enc{i}_b1", 1, FFN)
        add(f"enc{i}_w2", FFN, EMBED)
        add(f"enc{i}_b2", 1, EMBED)
        add(f"enc{i}_ln2_g", 1, EMBED)
        add(f"enc{i}_ln2_b", 1, EMBED)
    add("enc_norm_g", 1, EMBED)
    add("enc_norm_b", 1, EMBED)
    for i in range(N_DEC):
        add(f"dec{i}_sa_qkv_w", EMBED, 3 * EMBED)
        add(f"dec{i}_sa_qkv_b", 1, 3 * EMBED)
        add(f"dec{i}_sa_wo", EMBED, EMBED)
        add(f"dec{i}_sa_bo", 1, EMBED)
        add(f"dec{i}_ln1_g", 1, EMBED)
        add(f"dec{i}_ln1_b", 1, EMBED)
        add(f"dec{i}_ca_q_w", EMBED, EMBED)
        add(f"dec{i}_ca_q_b", 1, EMBED)
        add(f"dec{i}_ca_kv_w", EMBED, 2 * EMBED)
        add(f"dec{i}_ca_kv_b", 1, 2 * EMBED)
        add(f"dec{i}_ca_wo", EMBED, EMBED)
        add(f"dec{i}_ca_bo", 1, EMBED)
        add(f"dec{i}_ln2_g", 1, EMBED)
        add(f"dec{i}_ln2_b", 1, EMBED)
        add(f"dec{i}_w1", EMBED, FFN)
        add(f"dec{i}_b1", 1, FFN)
        add(f"dec{i}_w2", FFN, EMBED)
        add(f"dec{i}_b2", 1, EMBED)
        add(f"dec{i}_ln3_g", 1, EMBED)
        add(f"dec{i}_ln3_b", 1, EMBED)
    add("dec_norm_g", 1, EMBED)
    add("dec_norm_b", 1, EMBED)
    add("mlp_w1", EMBED, EMBED // 2)
    add("mlp_b1", 1, EMBED // 2)
    add("mlp_w2", EMBED // 2, 1)
    add("mlp_b2", 1, 1)
    add("out_w1", SEQ, SEQ // 2)
    add("out_b1", 1, SEQ // 2)
    add("out_w2", SEQ // 2, 1)
    add("out_b2", 1, 1)
    # hoisted constants (0/1 selector matrices)
    add("head_sum", EMBED, NHEAD)       # per-head lane reduction
    add("head_expand", NHEAD, EMBED)    # per-head lane broadcast
    add("p_mean", N_TR, N_TR)           # per-batch row mean + broadcast (block 1/SEQ)
    add("sel_tok", ROWS, N_TR)          # token -> (para|epi, seq) lane selector
    add("pick", BATCH, ROWS)            # row -> original batch selector
    return e


_ENTRIES = _layout_entries()


def _build_layout(entries):
    layout = {}
    row = 0
    for name, nr, nc in entries:
        layout[name] = (row, nr, nc)
        row += ((nr + 7) // 8) * 8          # every block starts 8-row aligned
    return layout, row


_LAYOUT, SLAB_ROWS = _build_layout(_ENTRIES)


def pack_slab(tensors):
    """Pack all parameters + constants into one (SLAB_ROWS, 128) f32 slab (host side)."""
    slab = np.zeros((SLAB_ROWS, LANES), np.float32)
    for name, nr, nc in _ENTRIES:
        a = np.asarray(tensors[name], np.float32)
        assert a.shape == (nr, nc), (name, a.shape, (nr, nc))
        r0 = _LAYOUT[name][0]
        slab[r0:r0 + nr, :nc] = a
    return jnp.asarray(slab)


# ---------------- the single fused kernel ----------------
def _forward_kernel(ids_ref, slab_ref, o_ref):
    f32 = jnp.float32
    scale = 1.0 / math.sqrt(HEAD_DIM)

    def g(name):
        r0, nr, nc = _LAYOUT[name]
        return slab_ref[r0:r0 + nr, 0:nc]

    def leaky(x):
        return jnp.where(x >= 0.0, x, NEG_SLOPE * x)

    def layernorm(x, pfx):
        mu = jnp.mean(x, axis=-1, keepdims=True)
        xc = x - mu
        var = jnp.mean(xc * xc, axis=-1, keepdims=True)
        return xc * jax.lax.rsqrt(var + LN_EPS) * g(pfx + "_g") + g(pfx + "_b")

    head_sum = g("head_sum")        # (E, H)
    head_expand = g("head_expand")  # (H, E)
    HALF = N_TR

    def attend(q, k, v):
        # rows 0:32 = l=0, rows 32:64 = l=1; attention over the length-2 l axis,
        # independently per row: "same" = own l, "cross" = the other l.
        k_sw = jnp.concatenate([k[HALF:], k[:HALF]], axis=0)
        v_sw = jnp.concatenate([v[HALF:], v[:HALF]], axis=0)
        s_same = jnp.dot(q * k, head_sum, preferred_element_type=f32) * scale      # (64, H)
        s_cross = jnp.dot(q * k_sw, head_sum, preferred_element_type=f32) * scale
        m = jnp.maximum(s_same, s_cross)
        e_same = jnp.exp(s_same - m)
        e_cross = jnp.exp(s_cross - m)
        inv = pl.reciprocal(e_same + e_cross, approx=True)                          # EUP
        p_same = e_same * inv
        p_cross = e_cross * inv
        return (jnp.dot(p_same, head_expand, preferred_element_type=f32) * v
                + jnp.dot(p_cross, head_expand, preferred_element_type=f32) * v_sw)

    def self_attn(x, pfx):
        qkv = jnp.dot(x, g(pfx + "_qkv_w"), preferred_element_type=f32) + g(pfx + "_qkv_b")
        q = qkv[:, 0:EMBED]
        k = qkv[:, EMBED:2 * EMBED]
        v = qkv[:, 2 * EMBED:3 * EMBED]
        return jnp.dot(attend(q, k, v), g(pfx + "_wo"), preferred_element_type=f32) + g(pfx + "_bo")

    def cross_attn(y, mem, pfx):
        q = jnp.dot(y, g(pfx + "_q_w"), preferred_element_type=f32) + g(pfx + "_q_b")
        kv = jnp.dot(mem, g(pfx + "_kv_w"), preferred_element_type=f32) + g(pfx + "_kv_b")
        k = kv[:, 0:EMBED]
        v = kv[:, EMBED:2 * EMBED]
        return jnp.dot(attend(q, k, v), g(pfx + "_wo"), preferred_element_type=f32) + g(pfx + "_bo")

    def ffn(x, pfx):
        h = jnp.maximum(
            jnp.dot(x, g(pfx + "_w1"), preferred_element_type=f32) + g(pfx + "_b1"), 0.0)
        return jnp.dot(h, g(pfx + "_w2"), preferred_element_type=f32) + g(pfx + "_b2")

    # ---- embedding gather: one-hot (64, 64) @ zero-padded table (64, E) ----
    ids = ids_ref[...]                                                     # (64, 1) int32
    lane = jax.lax.broadcasted_iota(jnp.int32, (ROWS, VOCAB_PAD), 1)
    onehot = (lane == ids).astype(f32)
    emb = jnp.dot(onehot, g("embed"), preferred_element_type=f32)          # rows 0:32 para, 32:64 epi

    # ---- co-attention, factorized by linearity (no (S,S) score matrix) ----
    proj = jnp.maximum(
        jnp.dot(emb, g("co_wab"), preferred_element_type=f32) + g("co_bab"), 0.0)  # (64, 64)
    ia = proj[0:N_TR, 0:EMBED]                      # relu(linear_a(para))
    ib = proj[N_TR:ROWS, EMBED:2 * EMBED]           # relu(linear_b(epi))
    zz = jnp.dot(ia, g("co_ww"), preferred_element_type=f32) + g("co_bw")           # (32, E)
    p_mean = g("p_mean")
    zz_mean = jnp.dot(p_mean, zz, preferred_element_type=f32)   # per-batch mean_t zz, broadcast
    ib_mean = jnp.dot(p_mean, ib, preferred_element_type=f32)   # per-batch mean_t ib, broadcast
    att_para = jnp.sum(ib * zz_mean, axis=-1, keepdims=True)    # == mean over dim 1 of z
    att_epi = jnp.sum(zz * ib_mean, axis=-1, keepdims=True)     # == mean over dim 2 of z
    para_sc = emb[0:N_TR] * att_para
    epi_sc = emb[N_TR:ROWS] * att_epi

    # transformer input: row = l*N_TR + n ; n < SEQ -> para[l, n], n >= SEQ -> epi[l, n-SEQ]
    x0 = jnp.concatenate([para_sc[0:SEQ], epi_sc[0:SEQ],
                          para_sc[SEQ:2 * SEQ], epi_sc[SEQ:2 * SEQ]], axis=0)       # (64, E)

    # ---- shared transformer: encoder ----
    x = x0
    for i in range(N_ENC):
        x = layernorm(x + self_attn(x, f"enc{i}"), f"enc{i}_ln1")
        x = layernorm(x + ffn(x, f"enc{i}"), f"enc{i}_ln2")
    mem = layernorm(x, "enc_norm")

    # ---- shared transformer: decoder (tgt == same co-attention output) ----
    y = x0
    for i in range(N_DEC):
        y = layernorm(y + self_attn(y, f"dec{i}_sa"), f"dec{i}_ln1")
        y = layernorm(y + cross_attn(y, mem, f"dec{i}_ca"), f"dec{i}_ln2")
        y = layernorm(y + ffn(y, f"dec{i}"), f"dec{i}_ln3")
    y = layernorm(y, "dec_norm")

    # ---- MLP head (per-token scalar) + final output layer ----
    h = leaky(jnp.dot(y, g("mlp_w1"), preferred_element_type=f32) + g("mlp_b1"))     # (64, 16)
    tok = jnp.dot(h, g("mlp_w2"), preferred_element_type=f32) + g("mlp_b2")          # (64, 1)
    # merged regroup: lanes 0:16 = para scores, lanes 16:32 = epi scores, rows = batch
    grouped = jnp.dot(g("pick"), tok * g("sel_tok"), preferred_element_type=f32)     # (2, 32)
    xprod = grouped[:, 0:SEQ] * grouped[:, SEQ:2 * SEQ]                              # (2, 16)
    h2 = leaky(jnp.dot(xprod, g("out_w1"), preferred_element_type=f32) + g("out_b1"))
    logits = jnp.dot(h2, g("out_w2"), preferred_element_type=f32) + g("out_b2")      # (2, 1)
    o_ref[...] = pl.reciprocal(1.0 + jnp.exp(-logits), approx=True)                  # sigmoid


# ---------------- wrapper: one pallas_call, everything resident in VMEM ----------------
@jax.jit
def forward(para_ids, epi_ids, slab):
    ids = jnp.concatenate([para_ids.reshape(-1), epi_ids.reshape(-1)], axis=0)
    ids = ids.reshape(ROWS, 1).astype(jnp.int32)
    vmem = pl.BlockSpec(memory_space=pltpu.MemorySpace.VMEM)
    return pl.pallas_call(
        _forward_kernel,
        out_shape=jax.ShapeDtypeStruct((BATCH, 1), jnp.float32),
        in_specs=[vmem, vmem],
        out_specs=vmem,
    )(ids, slab)


# ---------------- constants + deterministic parameter construction ----------------
def make_constants():
    c = {}
    e_idx = np.arange(EMBED)
    c["head_sum"] = (e_idx[:, None] // HEAD_DIM == np.arange(NHEAD)[None, :]).astype(np.float32)
    c["head_expand"] = np.ascontiguousarray(c["head_sum"].T)
    r32 = np.arange(N_TR)
    c["p_mean"] = (r32[:, None] // SEQ == r32[None, :] // SEQ).astype(np.float32) / SEQ
    r64 = np.arange(ROWS)
    c["sel_tok"] = ((r64[:, None] % N_TR) == r32[None, :]).astype(np.float32)
    c["pick"] = ((r64[None, :] // N_TR) == np.arange(BATCH)[:, None]).astype(np.float32)
    return c


def make_params(key):
    keys = iter(jax.random.split(key, 64))

    def w(fi, fo):
        return jax.random.normal(next(keys), (fi, fo), jnp.float32) * (1.0 / math.sqrt(fi))

    def zeros(r, c):
        return jnp.zeros((r, c), jnp.float32)

    def ones(r, c):
        return jnp.ones((r, c), jnp.float32)

    p = {}
    emb = jax.random.normal(next(keys), (VOCAB, EMBED), jnp.float32) * 0.1
    p["embed"] = jnp.zeros((VOCAB_PAD, EMBED), jnp.float32).at[:VOCAB].set(emb)

    p["co_wab"], p["co_bab"] = w(EMBED, 2 * EMBED), zeros(1, 2 * EMBED)   # [Wa | Wb] fused
    p["co_ww"], p["co_bw"] = w(EMBED, EMBED), zeros(1, EMBED)

    for i in range(N_ENC):
        p[f"enc{i}_qkv_w"], p[f"enc{i}_qkv_b"] = w(EMBED, 3 * EMBED), zeros(1, 3 * EMBED)
        p[f"enc{i}_wo"], p[f"enc{i}_bo"] = w(EMBED, EMBED), zeros(1, EMBED)
        p[f"enc{i}_ln1_g"], p[f"enc{i}_ln1_b"] = ones(1, EMBED), zeros(1, EMBED)
        p[f"enc{i}_w1"], p[f"enc{i}_b1"] = w(EMBED, FFN), zeros(1, FFN)
        p[f"enc{i}_w2"], p[f"enc{i}_b2"] = w(FFN, EMBED), zeros(1, EMBED)
        p[f"enc{i}_ln2_g"], p[f"enc{i}_ln2_b"] = ones(1, EMBED), zeros(1, EMBED)
    p["enc_norm_g"], p["enc_norm_b"] = ones(1, EMBED), zeros(1, EMBED)

    for i in range(N_DEC):
        p[f"dec{i}_sa_qkv_w"], p[f"dec{i}_sa_qkv_b"] = w(EMBED, 3 * EMBED), zeros(1, 3 * EMBED)
        p[f"dec{i}_sa_wo"], p[f"dec{i}_sa_bo"] = w(EMBED, EMBED), zeros(1, EMBED)
        p[f"dec{i}_ln1_g"], p[f"dec{i}_ln1_b"] = ones(1, EMBED), zeros(1, EMBED)
        p[f"dec{i}_ca_q_w"], p[f"dec{i}_ca_q_b"] = w(EMBED, EMBED), zeros(1, EMBED)
        p[f"dec{i}_ca_kv_w"], p[f"dec{i}_ca_kv_b"] = w(EMBED, 2 * EMBED), zeros(1, 2 * EMBED)
        p[f"dec{i}_ca_wo"], p[f"dec{i}_ca_bo"] = w(EMBED, EMBED), zeros(1, EMBED)
        p[f"dec{i}_ln2_g"], p[f"dec{i}_ln2_b"] = ones(1, EMBED), zeros(1, EMBED)
        p[f"dec{i}_w1"], p[f"dec{i}_b1"] = w(EMBED, FFN), zeros(1, FFN)
        p[f"dec{i}_w2"], p[f"dec{i}_b2"] = w(FFN, EMBED), zeros(1, EMBED)
        p[f"dec{i}_ln3_g"], p[f"dec{i}_ln3_b"] = ones(1, EMBED), zeros(1, EMBED)
    p["dec_norm_g"], p["dec_norm_b"] = ones(1, EMBED), zeros(1, EMBED)

    p["mlp_w1"], p["mlp_b1"] = w(EMBED, EMBED // 2), zeros(1, EMBED // 2)
    p["mlp_w2"], p["mlp_b2"] = w(EMBED // 2, 1), zeros(1, 1)
    p["out_w1"], p["out_b1"] = w(SEQ, SEQ // 2), zeros(1, SEQ // 2)
    p["out_w2"], p["out_b2"] = w(SEQ // 2, 1), zeros(1, 1)
    return p


if __name__ == "__main__":
    root = jax.random.PRNGKey(0)
    k_param, k_para, k_epi = jax.random.split(root, 3)

    tensors = make_params(k_param)
    tensors.update(make_constants())
    slab = pack_slab(tensors)

    para_ids = jax.random.randint(k_para, (BATCH, SEQ), 0, VOCAB, dtype=jnp.int32)
    epi_ids = jax.random.randint(k_epi, (BATCH, SEQ), 0, VOCAB, dtype=jnp.int32)

    out = forward(para_ids, epi_ids, slab)
    out = jax.block_until_ready(out)
    assert out.shape == (BATCH, 1)
    assert bool(jnp.all(jnp.isfinite(out)))
    print("KERNEL_OK")
</pallas_src>

<mosaic_0001>
module attributes {stable_mosaic.version = 11 : i64} {
  func.func @_forward_kernel(%arg0: memref<64x1xi32, #tpu.memory_space<vmem>>, %arg1: memref<1592x128xf32, #tpu.memory_space<vmem>>, %arg2: memref<2x1xf32, #tpu.memory_space<vmem>>) attributes {dimension_semantics = [], scalar_prefetch = 0 : i64, scratch_operands = 0 : i64, tpu.core_type = #tpu.core_type<tc>} {
    %c1448 = arith.constant 1448 : index
    %c0 = arith.constant 0 : index
    %0 = vector.load %arg1[%c1448, %c0] : memref<1592x128xf32, #tpu.memory_space<vmem>>, vector<32x4xf32>
    %c1480 = arith.constant 1480 : index
    %c0_0 = arith.constant 0 : index
    %1 = vector.load %arg1[%c1480, %c0_0] : memref<1592x128xf32, #tpu.memory_space<vmem>>, vector<4x32xf32>
    %c0_1 = arith.constant 0 : index
    %c0_2 = arith.constant 0 : index
    %2 = vector.load %arg0[%c0_1, %c0_2] : memref<64x1xi32, #tpu.memory_space<vmem>>, vector<64x1xi32>
    %3 = tpu.iota {dimensions = array<i32: 1>} : vector<64x64xi32>
    %4 = vector.broadcast %2 : vector<64x1xi32> to vector<64x64xi32>
    %5 = arith.cmpi eq, %3, %4 : vector<64x64xi32>
    %6 = arith.extui %5 : vector<64x64xi1> to vector<64x64xi32>
    %7 = arith.sitofp %6 : vector<64x64xi32> to vector<64x64xf32>
    %c0_3 = arith.constant 0 : index
    %c0_4 = arith.constant 0 : index
    %8 = vector.load %arg1[%c0_3, %c0_4] : memref<1592x128xf32, #tpu.memory_space<vmem>>, vector<64x32xf32>
    %cst = arith.constant dense<0.000000e+00> : vector<64x32xf32>
    %9 = tpu.matmul %7, %8, %cst {dimension_numbers = #tpu.dot_dimension_numbers<[1], [0], [0], [1], [0, 0, 1, 1], [], []>} : vector<64x64xf32>, vector<64x32xf32>, vector<64x32xf32> -> vector<64x32xf32>
    %c64 = arith.constant 64 : index
    %c0_5 = arith.constant 0 : index
    %10 = vector.load %arg1[%c64, %c0_5] : memref<1592x128xf32, #tpu.memory_space<vmem>>, vector<32x64xf32>
    %cst_6 = arith.constant dense<0.000000e+00> : vector<64x64xf32>
    %11 = tpu.matmul %9, %10, %cst_6 {dimension_numbers = #tpu.dot_dimension_numbers<[1], [0], [0], [1], [0, 0, 1, 1], [], []>} : vector<64x32xf32>, vector<32x64xf32>, vector<64x64xf32> -> vector<64x64xf32>
    %c96 = arith.constant 96 : index
    %c0_7 = arith.constant 0 : index
    %12 = vector.load %arg1[%c96, %c0_7] : memref<1592x128xf32, #tpu.memory_space<vmem>>, vector<1x64xf32>
    %13 = vector.broadcast %12 : vector<1x64xf32> to vector<64x64xf32>
    %14 = arith.addf %11, %13 : vector<64x64xf32>
    %cst_8 = arith.constant 0.000000e+00 : f32
    %15 = vector.broadcast %cst_8 : f32 to vector<64x64xf32>
    %16 = arith.maximumf %14, %15 : vector<64x64xf32>
    %17 = vector.extract_strided_slice %16 {offsets = [0, 0], sizes = [32, 32], strides = [1, 1]} : vector<64x64xf32> to vector<32x32xf32>
    %18 = vector.extract_strided_slice %16 {offsets = [32, 32], sizes = [32, 32], strides = [1, 1]} : vector<64x64xf32> to vector<32x32xf32>
    %c104 = arith.constant 104 : index
    %c0_9 = arith.constant 0 : index
    %19 = vector.load %arg1[%c104, %c0_9] : memref<1592x128xf32, #tpu.memory_space<vmem>>, vector<32x32xf32>
    %cst_10 = arith.constant dense<0.000000e+00> : vector<32x32xf32>
    %20 = tpu.matmul %17, %19, %cst_10 {dimension_numbers = #tpu.dot_dimension_numbers<[1], [0], [0], [1], [0, 0, 1, 1], [], []>} : vector<32x32xf32>, vector<32x32xf32>, vector<32x32xf32> -> vector<32x32xf32>
    %c136 = arith.constant 136 : index
    %c0_11 = arith.constant 0 : index
    %21 = vector.load %arg1[%c136, %c0_11] : memref<1592x128xf32, #tpu.memory_space<vmem>>, vector<1x32xf32>
    %22 = vector.broadcast %21 : vector<1x32xf32> to vector<32x32xf32>
    %23 = arith.addf %20, %22 : vector<32x32xf32>
    %c1488 = arith.constant 1488 : index
    %c0_12 = arith.constant 0 : index
    %24 = vector.load %arg1[%c1488, %c0_12] : memref<1592x128xf32, #tpu.memory_space<vmem>>, vector<32x32xf32>
    %cst_13 = arith.constant dense<0.000000e+00> : vector<32x32xf32>
    %25 = tpu.matmul %24, %23, %cst_13 {dimension_numbers = #tpu.dot_dimension_numbers<[1], [0], [0], [1], [0, 0, 1, 1], [], []>} : vector<32x32xf32>, vector<32x32xf32>, vector<32x32xf32> -> vector<32x32xf32>
    %cst_14 = arith.constant dense<0.000000e+00> : vector<32x32xf32>
    %26 = tpu.matmul %24, %18, %cst_14 {dimension_numbers = #tpu.dot_dimension_numbers<[1], [0], [0], [1], [0, 0, 1, 1], [], []>} : vector<32x32xf32>, vector<32x32xf32>, vector<32x32xf32> -> vector<32x32xf32>
    %27 = arith.mulf %18, %25 : vector<32x32xf32>
    %cst_15 = arith.constant dense<0.000000e+00> : vector<32xf32>
    %28 = vector.multi_reduction <add>, %27, %cst_15 [1] : vector<32x32xf32> to vector<32xf32>
    %29 = vector.shape_cast %28 : vector<32xf32> to vector<32x1xf32>
    %30 = arith.mulf %23, %26 : vector<32x32xf32>
    %cst_16 = arith.constant dense<0.000000e+00> : vector<32xf32>
    %31 = vector.multi_reduction <add>, %30, %cst_16 [1] : vector<32x32xf32> to vector<32xf32>
    %32 = vector.shape_cast %31 : vector<32xf32> to vector<32x1xf32>
    %33 = vector.extract_strided_slice %9 {offsets = [0, 0], sizes = [32, 32], strides = [1, 1]} : vector<64x32xf32> to vector<32x32xf32>
    %34 = vector.broadcast %29 : vector<32x1xf32> to vector<32x32xf32>
    %35 = arith.mulf %33, %34 : vector<32x32xf32>
    %36 = vector.extract_strided_slice %9 {offsets = [32, 0], sizes = [32, 32], strides = [1, 1]} : vector<64x32xf32> to vector<32x32xf32>
    %37 = vector.broadcast %32 : vector<32x1xf32> to vector<32x32xf32>
    %38 = arith.mulf %36, %37 : vector<32x32xf32>
    %39 = vector.extract_strided_slice %35 {offsets = [0, 0], sizes = [16, 32], strides = [1, 1]} : vector<32x32xf32> to vector<16x32xf32>
    %40 = vector.extract_strided_slice %38 {offsets = [0, 0], sizes = [16, 32], strides = [1, 1]} : vector<32x32xf32> to vector<16x32xf32>
    %41 = vector.extract_strided_slice %35 {offsets = [16, 0], sizes = [16, 32], strides = [1, 1]} : vector<32x32xf32> to vector<16x32xf32>
    %42 = vector.extract_strided_slice %38 {offsets = [16, 0], sizes = [16, 32], strides = [1, 1]} : vector<32x32xf32> to vector<16x32xf32>
    %43 = tpu.concatenate %39, %40, %41, %42 in 0 : vector<16x32xf32>, vector<16x32xf32>, vector<16x32xf32>, vector<16x32xf32> -> vector<64x32xf32>
    %c144 = arith.constant 144 : index
    %c0_17 = arith.constant 0 : index
    %44 = vector.load %arg1[%c144, %c0_17] : memref<1592x128xf32, #tpu.memory_space<vmem>>, vector<32x96xf32>
    %cst_18 = arith.constant dense<0.000000e+00> : vector<64x96xf32>
    %45 = tpu.matmul %43, %44, %cst_18 {dimension_numbers = #tpu.dot_dimension_numbers<[1], [0], [0], [1], [0, 0, 1, 1], [], []>} : vector<64x32xf32>, vector<32x96xf32>, vector<64x96xf32> -> vector<64x96xf32>
    %c176 = arith.constant 176 : index
    %c0_19 = arith.constant 0 : index
    %46 = vector.load %arg1[%c176, %c0_19] : memref<1592x128xf32, #tpu.memory_space<vmem>>, vector<1x96xf32>
    %47 = vector.broadcast %46 : vector<1x96xf32> to vector<64x96xf32>
    %48 = arith.addf %45, %47 : vector<64x96xf32>
    %49 = vector.extract_strided_slice %48 {offsets = [0, 0], sizes = [64, 32], strides = [1, 1]} : vector<64x96xf32> to vector<64x32xf32>
    %50 = vector.extract_strided_slice %48 {offsets = [0, 32], sizes = [64, 32], strides = [1, 1]} : vector<64x96xf32> to vector<64x32xf32>
    %51 = vector.extract_strided_slice %48 {offsets = [0, 64], sizes = [64, 32], strides = [1, 1]} : vector<64x96xf32> to vector<64x32xf32>
    %52 = vector.extract_strided_slice %50 {offsets = [32, 0], sizes = [32, 32], strides = [1, 1]} : vector<64x32xf32> to vector<32x32xf32>
    %53 = vector.extract_strided_slice %50 {offsets = [0, 0], sizes = [32, 32], strides = [1, 1]} : vector<64x32xf32> to vector<32x32xf32>
    %54 = tpu.concatenate %52, %53 in 0 : vector<32x32xf32>, vector<32x32xf32> -> vector<64x32xf32>
    %55 = vector.extract_strided_slice %51 {offsets = [32, 0], sizes = [32, 32], strides = [1, 1]} : vector<64x32xf32> to vector<32x32xf32>
    %56 = vector.extract_strided_slice %51 {offsets = [0, 0], sizes = [32, 32], strides = [1, 1]} : vector<64x32xf32> to vector<32x32xf32>
    %57 = tpu.concatenate %55, %56 in 0 : vector<32x32xf32>, vector<32x32xf32> -> vector<64x32xf32>
    %58 = arith.mulf %49, %50 : vector<64x32xf32>
    %cst_20 = arith.constant dense<0.000000e+00> : vector<64x4xf32>
    %59 = tpu.matmul %58, %0, %cst_20 {dimension_numbers = #tpu.dot_dimension_numbers<[1], [0], [0], [1], [0, 0, 1, 1], [], []>} : vector<64x32xf32>, vector<32x4xf32>, vector<64x4xf32> -> vector<64x4xf32>
    %cst_21 = arith.constant 0.353553385 : f32
    %60 = vector.broadcast %cst_21 : f32 to vector<64x4xf32>
    %61 = arith.mulf %59, %60 : vector<64x4xf32>
    %62 = arith.mulf %49, %54 : vector<64x32xf32>
    %cst_22 = arith.constant dense<0.000000e+00> : vector<64x4xf32>
    %63 = tpu.matmul %62, %0, %cst_22 {dimension_numbers = #tpu.dot_dimension_numbers<[1], [0], [0], [1], [0, 0, 1, 1], [], []>} : vector<64x32xf32>, vector<32x4xf32>, vector<64x4xf32> -> vector<64x4xf32>
    %cst_23 = arith.constant 0.353553385 : f32
    %64 = vector.broadcast %cst_23 : f32 to vector<64x4xf32>
    %65 = arith.mulf %63, %64 : vector<64x4xf32>
    %66 = arith.maximumf %61, %65 : vector<64x4xf32>
    %67 = arith.subf %61, %66 : vector<64x4xf32>
    %68 = math.exp %67 : vector<64x4xf32>
    %69 = arith.subf %65, %66 : vector<64x4xf32>
    %70 = math.exp %69 : vector<64x4xf32>
    %71 = arith.addf %68, %70 : vector<64x4xf32>
    %72 = tpu.reciprocal %71 {approx = true} : vector<64x4xf32> -> vector<64x4xf32>
    %73 = arith.mulf %68, %72 : vector<64x4xf32>
    %74 = arith.mulf %70, %72 : vector<64x4xf32>
    %cst_24 = arith.constant dense<0.000000e+00> : vector<64x32xf32>
    %75 = tpu.matmul %73, %1, %cst_24 {dimension_numbers = #tpu.dot_dimension_numbers<[1], [0], [0], [1], [0, 0, 1, 1], [], []>} : vector<64x4xf32>, vector<4x32xf32>, vector<64x32xf32> -> vector<64x32xf32>
    %76 = arith.mulf %75, %51 : vector<64x32xf32>
    %cst_25 = arith.constant dense<0.000000e+00> : vector<64x32xf32>
    %77 = tpu.matmul %74, %1, %cst_25 {dimension_numbers = #tpu.dot_dimension_numbers<[1], [0], [0], [1], [0, 0, 1, 1], [], []>} : vector<64x4xf32>, vector<4x32xf32>, vector<64x32xf32> -> vector<64x32xf32>
    %78 = arith.mulf %77, %57 : vector<64x32xf32>
    %79 = arith.addf %76, %78 : vector<64x32xf32>
    %c184 = arith.constant 184 : index
    %c0_26 = arith.constant 0 : index
    %80 = vector.load %arg1[%c184, %c0_26] : memref<1592x128xf32, #tpu.memory_space<vmem>>, vector<32x32xf32>
    %cst_27 = arith.constant dense<0.000000e+00> : vector<64x32xf32>
    %81 = tpu.matmul %79, %80, %cst_27 {dimension_numbers = #tpu.dot_dimension_numbers<[1], [0], [0], [1], [0, 0, 1, 1], [], []>} : vector<64x32xf32>, vector<32x32xf32>, vector<64x32xf32> -> vector<64x32xf32>
    %c216 = arith.constant 216 : index
    %c0_28 = arith.constant 0 : index
    %82 = vector.load %arg1[%c216, %c0_28] : memref<1592x128xf32, #tpu.memory_space<vmem>>, vector<1x32xf32>
    %83 = vector.broadcast %82 : vector<1x32xf32> to vector<64x32xf32>
    %84 = arith.addf %81, %83 : vector<64x32xf32>
    %85 = arith.addf %43, %84 : vector<64x32xf32>
    %cst_29 = arith.constant dense<0.000000e+00> : vector<64xf32>
    %86 = vector.multi_reduction <add>, %85, %cst_29 [1] : vector<64x32xf32> to vector<64xf32>
    %87 = vector.shape_cast %86 : vector<64xf32> to vector<64x1xf32>
    %cst_30 = arith.constant 3.200000e+01 : f32
    %88 = vector.broadcast %cst_30 : f32 to vector<64x1xf32>
    %89 = arith.divf %87, %88 : vector<64x1xf32>
    %90 = vector.broadcast %89 : vector<64x1xf32> to vector<64x32xf32>
    %91 = arith.subf %85, %90 : vector<64x32xf32>
    %92 = arith.mulf %91, %91 : vector<64x32xf32>
    %cst_31 = arith.constant dense<0.000000e+00> : vector<64xf32>
    %93 = vector.multi_reduction <add>, %92, %cst_31 [1] : vector<64x32xf32> to vector<64xf32>
    %94 = vector.shape_cast %93 : vector<64xf32> to vector<64x1xf32>
    %cst_32 = arith.constant 3.200000e+01 : f32
    %95 = vector.broadcast %cst_32 : f32 to vector<64x1xf32>
    %96 = arith.divf %94, %95 : vector<64x1xf32>
    %cst_33 = arith.constant 9.99999974E-6 : f32
    %97 = vector.broadcast %cst_33 : f32 to vector<64x1xf32>
    %98 = arith.addf %96, %97 : vector<64x1xf32>
    %99 = math.rsqrt %98 : vector<64x1xf32>
    %100 = vector.broadcast %99 : vector<64x1xf32> to vector<64x32xf32>
    %101 = arith.mulf %91, %100 : vector<64x32xf32>
    %c224 = arith.constant 224 : index
    %c0_34 = arith.constant 0 : index
    %102 = vector.load %arg1[%c224, %c0_34] : memref<1592x128xf32, #tpu.memory_space<vmem>>, vector<1x32xf32>
    %103 = vector.broadcast %102 : vector<1x32xf32> to vector<64x32xf32>
    %104 = arith.mulf %101, %103 : vector<64x32xf32>
    %c232 = arith.constant 232 : index
    %c0_35 = arith.constant 0 : index
    %105 = vector.load %arg1[%c232, %c0_35] : memref<1592x128xf32, #tpu.memory_space<vmem>>, vector<1x32xf32>
    %106 = vector.broadcast %105 : vector<1x32xf32> to vector<64x32xf32>
    %107 = arith.addf %104, %106 : vector<64x32xf32>
    %c240 = arith.constant 240 : index
    %c0_36 = arith.constant 0 : index
    %108 = vector.load %arg1[%c240, %c0_36] : memref<1592x128xf32, #tpu.memory_space<vmem>>, vector<32x64xf32>
    %cst_37 = arith.constant dense<0.000000e+00> : vector<64x64xf32>
    %109 = tpu.matmul %107, %108, %cst_37 {dimension_numbers = #tpu.dot_dimension_numbers<[1], [0], [0], [1], [0, 0, 1, 1], [], []>} : vector<64x32xf32>, vector<32x64xf32>, vector<64x64xf32> -> vector<64x64xf32>
    %c272 = arith.constant 272 : index
    %c0_38 = arith.constant 0 : index
    %110 = vector.load %arg1[%c272, %c0_38] : memref<1592x128xf32, #tpu.memory_space<vmem>>, vector<1x64xf32>
    %111 = vector.broadcast %110 : vector<1x64xf32> to vector<64x64xf32>
    %112 = arith.addf %109, %111 : vector<64x64xf32>
    %cst_39 = arith.constant 0.000000e+00 : f32
    %113 = vector.broadcast %cst_39 : f32 to vector<64x64xf32>
    %114 = arith.maximumf %112, %113 : vector<64x64xf32>
    %c280 = arith.constant 280 : index
    %c0_40 = arith.constant 0 : index
    %115 = vector.load %arg1[%c280, %c0_40] : memref<1592x128xf32, #tpu.memory_space<vmem>>, vector<64x32xf32>
    %cst_41 = arith.constant dense<0.000000e+00> : vector<64x32xf32>
    %116 = tpu.matmul %114, %115, %cst_41 {dimension_numbers = #tpu.dot_dimension_numbers<[1], [0], [0], [1], [0, 0, 1, 1], [], []>} : vector<64x64xf32>, vector<64x32xf32>, vector<64x32xf32> -> vector<64x32xf32>
    %c344 = arith.constant 344 : index
    %c0_42 = arith.constant 0 : index
    %117 = vector.load %arg1[%c344, %c0_42] : memref<1592x128xf32, #tpu.memory_space<vmem>>, vector<1x32xf32>
    %118 = vector.broadcast %117 : vector<1x32xf32> to vector<64x32xf32>
    %119 = arith.addf %116, %118 : vector<64x32xf32>
    %120 = arith.addf %107, %119 : vector<64x32xf32>
    %cst_43 = arith.constant dense<0.000000e+00> : vector<64xf32>
    %121 = vector.multi_reduction <add>, %120, %cst_43 [1] : vector<64x32xf32> to vector<64xf32>
    %122 = vector.shape_cast %121 : vector<64xf32> to vector<64x1xf32>
    %cst_44 = arith.constant 3.200000e+01 : f32
    %123 = vector.broadcast %cst_44 : f32 to vector<64x1xf32>
    %124 = arith.divf %122, %123 : vector<64x1xf32>
    %125 = vector.broadcast %124 : vector<64x1xf32> to vector<64x32xf32>
    %126 = arith.subf %120, %125 : vector<64x32xf32>
    %127 = arith.mulf %126, %126 : vector<64x32xf32>
    %cst_45 = arith.constant dense<0.000000e+00> : vector<64xf32>
    %128 = vector.multi_reduction <add>, %127, %cst_45 [1] : vector<64x32xf32> to vector<64xf32>
    %129 = vector.shape_cast %128 : vector<64xf32> to vector<64x1xf32>
    %cst_46 = arith.constant 3.200000e+01 : f32
    %130 = vector.broadcast %cst_46 : f32 to vector<64x1xf32>
    %131 = arith.divf %129, %130 : vector<64x1xf32>
    %cst_47 = arith.constant 9.99999974E-6 : f32
    %132 = vector.broadcast %cst_47 : f32 to vector<64x1xf32>
    %133 = arith.addf %131, %132 : vector<64x1xf32>
    %134 = math.rsqrt %133 : vector<64x1xf32>
    %135 = vector.broadcast %134 : vector<64x1xf32> to vector<64x32xf32>
    %136 = arith.mulf %126, %135 : vector<64x32xf32>
    %c352 = arith.constant 352 : index
    %c0_48 = arith.constant 0 : index
    %137 = vector.load %arg1[%c352, %c0_48] : memref<1592x128xf32, #tpu.memory_space<vmem>>, vector<1x32xf32>
    %138 = vector.broadcast %137 : vector<1x32xf32> to vector<64x32xf32>
    %139 = arith.mulf %136, %138 : vector<64x32xf32>
    %c360 = arith.constant 360 : index
    %c0_49 = arith.constant 0 : index
    %140 = vector.load %arg1[%c360, %c0_49] : memref<1592x128xf32, #tpu.memory_space<vmem>>, vector<1x32xf32>
    %141 = vector.broadcast %140 : vector<1x32xf32> to vector<64x32xf32>
    %142 = arith.addf %139, %141 : vector<64x32xf32>
    %c368 = arith.constant 368 : index
    %c0_50 = arith.constant 0 : index
    %143 = vector.load %arg1[%c368, %c0_50] : memref<1592x128xf32, #tpu.memory_space<vmem>>, vector<32x96xf32>
    %cst_51 = arith.constant dense<0.000000e+00> : vector<64x96xf32>
    %144 = tpu.matmul %142, %143, %cst_51 {dimension_numbers = #tpu.dot_dimension_numbers<[1], [0], [0], [1], [0, 0, 1, 1], [], []>} : vector<64x32xf32>, vector<32x96xf32>, vector<64x96xf32> -> vector<64x96xf32>
    %c400 = arith.constant 400 : index
    %c0_52 = arith.constant 0 : index
    %145 = vector.load %arg1[%c400, %c0_52] : memref<1592x128xf32, #tpu.memory_space<vmem>>, vector<1x96xf32>
    %146 = vector.broadcast %145 : vector<1x96xf32> to vector<64x96xf32>
    %147 = arith.addf %144, %146 : vector<64x96xf32>
    %148 = vector.extract_strided_slice %147 {offsets = [0, 0], sizes = [64, 32], strides = [1, 1]} : vector<64x96xf32> to vector<64x32xf32>
    %149 = vector.extract_strided_slice %147 {offsets = [0, 32], sizes = [64, 32], strides = [1, 1]} : vector<64x96xf32> to vector<64x32xf32>
    %150 = vector.extract_strided_slice %147 {offsets = [0, 64], sizes = [64, 32], strides = [1, 1]} : vector<64x96xf32> to vector<64x32xf32>
    %151 = vector.extract_strided_slice %149 {offsets = [32, 0], sizes = [32, 32], strides = [1, 1]} : vector<64x32xf32> to vector<32x32xf32>
    %152 = vector.extract_strided_slice %149 {offsets = [0, 0], sizes = [32, 32], strides = [1, 1]} : vector<64x32xf32> to vector<32x32xf32>
    %153 = tpu.concatenate %151, %152 in 0 : vector<32x32xf32>, vector<32x32xf32> -> vector<64x32xf32>
    %154 = vector.extract_strided_slice %150 {offsets = [32, 0], sizes = [32, 32], strides = [1, 1]} : vector<64x32xf32> to vector<32x32xf32>
    %155 = vector.extract_strided_slice %150 {offsets = [0, 0], sizes = [32, 32], strides = [1, 1]} : vector<64x32xf32> to vector<32x32xf32>
    %156 = tpu.concatenate %154, %155 in 0 : vector<32x32xf32>, vector<32x32xf32> -> vector<64x32xf32>
    %157 = arith.mulf %148, %149 : vector<64x32xf32>
    %cst_53 = arith.constant dense<0.000000e+00> : vector<64x4xf32>
    %158 = tpu.matmul %157, %0, %cst_53 {dimension_numbers = #tpu.dot_dimension_numbers<[1], [0], [0], [1], [0, 0, 1, 1], [], []>} : vector<64x32xf32>, vector<32x4xf32>, vector<64x4xf32> -> vector<64x4xf32>
    %cst_54 = arith.constant 0.353553385 : f32
    %159 = vector.broadcast %cst_54 : f32 to vector<64x4xf32>
    %160 = arith.mulf %158, %159 : vector<64x4xf32>
    %161 = arith.mulf %148, %153 : vector<64x32xf32>
    %cst_55 = arith.constant dense<0.000000e+00> : vector<64x4xf32>
    %162 = tpu.matmul %161, %0, %cst_55 {dimension_numbers = #tpu.dot_dimension_numbers<[1], [0], [0], [1], [0, 0, 1, 1], [], []>} : vector<64x32xf32>, vector<32x4xf32>, vector<64x4xf32> -> vector<64x4xf32>
    %cst_56 = arith.constant 0.353553385 : f32
    %163 = vector.broadcast %cst_56 : f32 to vector<64x4xf32>
    %164 = arith.mulf %162, %163 : vector<64x4xf32>
    %165 = arith.maximumf %160, %164 : vector<64x4xf32>
    %166 = arith.subf %160, %165 : vector<64x4xf32>
    %167 = math.exp %166 : vector<64x4xf32>
    %168 = arith.subf %164, %165 : vector<64x4xf32>
    %169 = math.exp %168 : vector<64x4xf32>
    %170 = arith.addf %167, %169 : vector<64x4xf32>
    %171 = tpu.reciprocal %170 {approx = true} : vector<64x4xf32> -> vector<64x4xf32>
    %172 = arith.mulf %167, %171 : vector<64x4xf32>
    %173 = arith.mulf %169, %171 : vector<64x4xf32>
    %cst_57 = arith.constant dense<0.000000e+00> : vector<64x32xf32>
    %174 = tpu.matmul %172, %1, %cst_57 {dimension_numbers = #tpu.dot_dimension_numbers<[1], [0], [0], [1], [0, 0, 1, 1], [], []>} : vector<64x4xf32>, vector<4x32xf32>, vector<64x32xf32> -> vector<64x32xf32>
    %175 = arith.mulf %174, %150 : vector<64x32xf32>
    %cst_58 = arith.constant dense<0.000000e+00> : vector<64x32xf32>
    %176 = tpu.matmul %173, %1, %cst_58 {dimension_numbers = #tpu.dot_dimension_numbers<[1], [0], [0], [1], [0, 0, 1, 1], [], []>} : vector<64x4xf32>, vector<4x32xf32>, vector<64x32xf32> -> vector<64x32xf32>
    %177 = arith.mulf %176, %156 : vector<64x32xf32>
    %178 = arith.addf %175, %177 : vector<64x32xf32>
    %c408 = arith.constant 408 : index
    %c0_59 = arith.constant 0 : index
    %179 = vector.load %arg1[%c408, %c0_59] : memref<1592x128xf32, #tpu.memory_space<vmem>>, vector<32x32xf32>
    %cst_60 = arith.constant dense<0.000000e+00> : vector<64x32xf32>
    %180 = tpu.matmul %178, %179, %cst_60 {dimension_numbers = #tpu.dot_dimension_numbers<[1], [0], [0], [1], [0, 0, 1, 1], [], []>} : vector<64x32xf32>, vector<32x32xf32>, vector<64x32xf32> -> vector<64x32xf32>
    %c440 = arith.constant 440 : index
    %c0_61 = arith.constant 0 : index
    %181 = vector.load %arg1[%c440, %c0_61] : memref<1592x128xf32, #tpu.memory_space<vmem>>, vector<1x32xf32>
    %182 = vector.broadcast %181 : vector<1x32xf32> to vector<64x32xf32>
    %183 = arith.addf %180, %182 : vector<64x32xf32>
    %184 = arith.addf %142, %183 : vector<64x32xf32>
    %cst_62 = arith.constant dense<0.000000e+00> : vector<64xf32>
    %185 = vector.multi_reduction <add>, %184, %cst_62 [1] : vector<64x32xf32> to vector<64xf32>
    %186 = vector.shape_cast %185 : vector<64xf32> to vector<64x1xf32>
    %cst_63 = arith.constant 3.200000e+01 : f32
    %187 = vector.broadcast %cst_63 : f32 to vector<64x1xf32>
    %188 = arith.divf %186, %187 : vector<64x1xf32>
    %189 = vector.broadcast %188 : vector<64x1xf32> to vector<64x32xf32>
    %190 = arith.subf %184, %189 : vector<64x32xf32>
    %191 = arith.mulf %190, %190 : vector<64x32xf32>
    %cst_64 = arith.constant dense<0.000000e+00> : vector<64xf32>
    %192 = vector.multi_reduction <add>, %191, %cst_64 [1] : vector<64x32xf32> to vector<64xf32>
    %193 = vector.shape_cast %192 : vector<64xf32> to vector<64x1xf32>
    %cst_65 = arith.constant 3.200000e+01 : f32
    %194 = vector.broadcast %cst_65 : f32 to vector<64x1xf32>
    %195 = arith.divf %193, %194 : vector<64x1xf32>
    %cst_66 = arith.constant 9.99999974E-6 : f32
    %196 = vector.broadcast %cst_66 : f32 to vector<64x1xf32>
    %197 = arith.addf %195, %196 : vector<64x1xf32>
    %198 = math.rsqrt %197 : vector<64x1xf32>
    %199 = vector.broadcast %198 : vector<64x1xf32> to vector<64x32xf32>
    %200 = arith.mulf %190, %199 : vector<64x32xf32>
    %c448 = arith.constant 448 : index
    %c0_67 = arith.constant 0 : index
    %201 = vector.load %arg1[%c448, %c0_67] : memref<1592x128xf32, #tpu.memory_space<vmem>>, vector<1x32xf32>
    %202 = vector.broadcast %201 : vector<1x32xf32> to vector<64x32xf32>
    %203 = arith.mulf %200, %202 : vector<64x32xf32>
    %c456 = arith.constant 456 : index
    %c0_68 = arith.constant 0 : index
    %204 = vector.load %arg1[%c456, %c0_68] : memref<1592x128xf32, #tpu.memory_space<vmem>>, vector<1x32xf32>
    %205 = vector.broadcast %204 : vector<1x32xf32> to vector<64x32xf32>
    %206 = arith.addf %203, %205 : vector<64x32xf32>
    %c464 = arith.constant 464 : index
    %c0_69 = arith.constant 0 : index
    %207 = vector.load %arg1[%c464, %c0_69] : memref<1592x128xf32, #tpu.memory_space<vmem>>, vector<32x64xf32>
    %cst_70 = arith.constant dense<0.000000e+00> : vector<64x64xf32>
    %208 = tpu.matmul %206, %207, %cst_70 {dimension_numbers = #tpu.dot_dimension_numbers<[1], [0], [0], [1], [0, 0, 1, 1], [], []>} : vector<64x32xf32>, vector<32x64xf32>, vector<64x64xf32> -> vector<64x64xf32>
    %c496 = arith.constant 496 : index
    %c0_71 = arith.constant 0 : index
    %209 = vector.load %arg1[%c496, %c0_71] : memref<1592x128xf32, #tpu.memory_space<vmem>>, vector<1x64xf32>
    %210 = vector.broadcast %209 : vector<1x64xf32> to vector<64x64xf32>
    %211 = arith.addf %208, %210 : vector<64x64xf32>
    %cst_72 = arith.constant 0.000000e+00 : f32
    %212 = vector.broadcast %cst_72 : f32 to vector<64x64xf32>
    %213 = arith.maximumf %211, %212 : vector<64x64xf32>
    %c504 = arith.constant 504 : index
    %c0_73 = arith.constant 0 : index
    %214 = vector.load %arg1[%c504, %c0_73] : memref<1592x128xf32, #tpu.memory_space<vmem>>, vector<64x32xf32>
    %cst_74 = arith.constant dense<0.000000e+00> : vector<64x32xf32>
    %215 = tpu.matmul %213, %214, %cst_74 {dimension_numbers = #tpu.dot_dimension_numbers<[1], [0], [0], [1], [0, 0, 1, 1], [], []>} : vector<64x64xf32>, vector<64x32xf32>, vector<64x32xf32> -> vector<64x32xf32>
    %c568 = arith.constant 568 : index
    %c0_75 = arith.constant 0 : index
    %216 = vector.load %arg1[%c568, %c0_75] : memref<1592x128xf32, #tpu.memory_space<vmem>>, vector<1x32xf32>
    %217 = vector.broadcast %216 : vector<1x32xf32> to vector<64x32xf32>
    %218 = arith.addf %215, %217 : vector<64x32xf32>
    %219 = arith.addf %206, %218 : vector<64x32xf32>
    %cst_76 = arith.constant dense<0.000000e+00> : vector<64xf32>
    %220 = vector.multi_reduction <add>, %219, %cst_76 [1] : vector<64x32xf32> to vector<64xf32>
    %221 = vector.shape_cast %220 : vector<64xf32> to vector<64x1xf32>
    %cst_77 = arith.constant 3.200000e+01 : f32
    %222 = vector.broadcast %cst_77 : f32 to vector<64x1xf32>
    %223 = arith.divf %221, %222 : vector<64x1xf32>
    %224 = vector.broadcast %223 : vector<64x1xf32> to vector<64x32xf32>
    %225 = arith.subf %219, %224 : vector<64x32xf32>
    %226 = arith.mulf %225, %225 : vector<64x32xf32>
    %cst_78 = arith.constant dense<0.000000e+00> : vector<64xf32>
    %227 = vector.multi_reduction <add>, %226, %cst_78 [1] : vector<64x32xf32> to vector<64xf32>
    %228 = vector.shape_cast %227 : vector<64xf32> to vector<64x1xf32>
    %cst_79 = arith.constant 3.200000e+01 : f32
    %229 = vector.broadcast %cst_79 : f32 to vector<64x1xf32>
    %230 = arith.divf %228, %229 : vector<64x1xf32>
    %cst_80 = arith.constant 9.99999974E-6 : f32
    %231 = vector.broadcast %cst_80 : f32 to vector<64x1xf32>
    %232 = arith.addf %230, %231 : vector<64x1xf32>
    %233 = math.rsqrt %232 : vector<64x1xf32>
    %234 = vector.broadcast %233 : vector<64x1xf32> to vector<64x32xf32>
    %235 = arith.mulf %225, %234 : vector<64x32xf32>
    %c576 = arith.constant 576 : index
    %c0_81 = arith.constant 0 : index
    %236 = vector.load %arg1[%c576, %c0_81] : memref<1592x128xf32, #tpu.memory_space<vmem>>, vector<1x32xf32>
    %237 = vector.broadcast %236 : vector<1x32xf32> to vector<64x32xf32>
    %238 = arith.mulf %235, %237 : vector<64x32xf32>
    %c584 = arith.constant 584 : index
    %c0_82 = arith.constant 0 : index
    %239 = vector.load %arg1[%c584, %c0_82] : memref<1592x128xf32, #tpu.memory_space<vmem>>, vector<1x32xf32>
    %240 = vector.broadcast %239 : vector<1x32xf32> to vector<64x32xf32>
    %241 = arith.addf %238, %240 : vector<64x32xf32>
    %cst_83 = arith.constant dense<0.000000e+00> : vector<64xf32>
    %242 = vector.multi_reduction <add>, %241, %cst_83 [1] : vector<64x32xf32> to vector<64xf32>
    %243 = vector.shape_cast %242 : vector<64xf32> to vector<64x1xf32>
    %cst_84 = arith.constant 3.200000e+01 : f32
    %244 = vector.broadcast %cst_84 : f32 to vector<64x1xf32>
    %245 = arith.divf %243, %244 : vector<64x1xf32>
    %246 = vector.broadcast %245 : vector<64x1xf32> to vector<64x32xf32>
    %247 = arith.subf %241, %246 : vector<64x32xf32>
    %248 = arith.mulf %247, %247 : vector<64x32xf32>
    %cst_85 = arith.constant dense<0.000000e+00> : vector<64xf32>
    %249 = vector.multi_reduction <add>, %248, %cst_85 [1] : vector<64x32xf32> to vector<64xf32>
    %250 = vector.shape_cast %249 : vector<64xf32> to vector<64x1xf32>
    %cst_86 = arith.constant 3.200000e+01 : f32
    %251 = vector.broadcast %cst_86 : f32 to vector<64x1xf32>
    %252 = arith.divf %250, %251 : vector<64x1xf32>
    %cst_87 = arith.constant 9.99999974E-6 : f32
    %253 = vector.broadcast %cst_87 : f32 to vector<64x1xf32>
    %254 = arith.addf %252, %253 : vector<64x1xf32>
    %255 = math.rsqrt %254 : vector<64x1xf32>
    %256 = vector.broadcast %255 : vector<64x1xf32> to vector<64x32xf32>
    %257 = arith.mulf %247, %256 : vector<64x32xf32>
    %c592 = arith.constant 592 : index
    %c0_88 = arith.constant 0 : index
    %258 = vector.load %arg1[%c592, %c0_88] : memref<1592x128xf32, #tpu.memory_space<vmem>>, vector<1x32xf32>
    %259 = vector.broadcast %258 : vector<1x32xf32> to vector<64x32xf32>
    %260 = arith.mulf %257, %259 : vector<64x32xf32>
    %c600 = arith.constant 600 : index
    %c0_89 = arith.constant 0 : index
    %261 = vector.load %arg1[%c600, %c0_89] : memref<1592x128xf32, #tpu.memory_space<vmem>>, vector<1x32xf32>
    %262 = vector.broadcast %261 : vector<1x32xf32> to vector<64x32xf32>
    %263 = arith.addf %260, %262 : vector<64x32xf32>
    %c608 = arith.constant 608 : index
    %c0_90 = arith.constant 0 : index
    %264 = vector.load %arg1[%c608, %c0_90] : memref<1592x128xf32, #tpu.memory_space<vmem>>, vector<32x96xf32>
    %cst_91 = arith.constant dense<0.000000e+00> : vector<64x96xf32>
    %265 = tpu.matmul %43, %264, %cst_91 {dimension_numbers = #tpu.dot_dimension_numbers<[1], [0], [0], [1], [0, 0, 1, 1], [], []>} : vector<64x32xf32>, vector<32x96xf32>, vector<64x96xf32> -> vector<64x96xf32>
    %c640 = arith.constant 640 : index
    %c0_92 = arith.constant 0 : index
    %266 = vector.load %arg1[%c640, %c0_92] : memref<1592x128xf32, #tpu.memory_space<vmem>>, vector<1x96xf32>
    %267 = vector.broadcast %266 : vector<1x96xf32> to vector<64x96xf32>
    %268 = arith.addf %265, %267 : vector<64x96xf32>
    %269 = vector.extract_strided_slice %268 {offsets = [0, 0], sizes = [64, 32], strides = [1, 1]} : vector<64x96xf32> to vector<64x32xf32>
    %270 = vector.extract_strided_slice %268 {offsets = [0, 32], sizes = [64, 32], strides = [1, 1]} : vector<64x96xf32> to vector<64x32xf32>
    %271 = vector.extract_strided_slice %268 {offsets = [0, 64], sizes = [64, 32], strides = [1, 1]} : vector<64x96xf32> to vector<64x32xf32>
    %272 = vector.extract_strided_slice %270 {offsets = [32, 0], sizes = [32, 32], strides = [1, 1]} : vector<64x32xf32> to vector<32x32xf32>
    %273 = vector.extract_strided_slice %270 {offsets = [0, 0], sizes = [32, 32], strides = [1, 1]} : vector<64x32xf32> to vector<32x32xf32>
    %274 = tpu.concatenate %272, %273 in 0 : vector<32x32xf32>, vector<32x32xf32> -> vector<64x32xf32>
    %275 = vector.extract_strided_slice %271 {offsets = [32, 0], sizes = [32, 32], strides = [1, 1]} : vector<64x32xf32> to vector<32x32xf32>
    %276 = vector.extract_strided_slice %271 {offsets = [0, 0], sizes = [32, 32], strides = [1, 1]} : vector<64x32xf32> to vector<32x32xf32>
    %277 = tpu.concatenate %275, %276 in 0 : vector<32x32xf32>, vector<32x32xf32> -> vector<64x32xf32>
    %278 = arith.mulf %269, %270 : vector<64x32xf32>
    %cst_93 = arith.constant dense<0.000000e+00> : vector<64x4xf32>
    %279 = tpu.matmul %278, %0, %cst_93 {dimension_numbers = #tpu.dot_dimension_numbers<[1], [0], [0], [1], [0, 0, 1, 1], [], []>} : vector<64x32xf32>, vector<32x4xf32>, vector<64x4xf32> -> vector<64x4xf32>
    %cst_94 = arith.constant 0.353553385 : f32
    %280 = vector.broadcast %cst_94 : f32 to vector<64x4xf32>
    %281 = arith.mulf %279, %280 : vector<64x4xf32>
    %282 = arith.mulf %269, %274 : vector<64x32xf32>
    %cst_95 = arith.constant dense<0.000000e+00> : vector<64x4xf32>
    %283 = tpu.matmul %282, %0, %cst_95 {dimension_numbers = #tpu.dot_dimension_numbers<[1], [0], [0], [1], [0, 0, 1, 1], [], []>} : vector<64x32xf32>, vector<32x4xf32>, vector<64x4xf32> -> vector<64x4xf32>
    %cst_96 = arith.constant 0.353553385 : f32
    %284 = vector.broadcast %cst_96 : f32 to vector<64x4xf32>
    %285 = arith.mulf %283, %284 : vector<64x4xf32>
    %286 = arith.maximumf %281, %285 : vector<64x4xf32>
    %287 = arith.subf %281, %286 : vector<64x4xf32>
    %288 = math.exp %287 : vector<64x4xf32>
    %289 = arith.subf %285, %286 : vector<64x4xf32>
    %290 = math.exp %289 : vector<64x4xf32>
    %291 = arith.addf %288, %290 : vector<64x4xf32>
    %292 = tpu.reciprocal %291 {approx = true} : vector<64x4xf32> -> vector<64x4xf32>
    %293 = arith.mulf %288, %292 : vector<64x4xf32>
    %294 = arith.mulf %290, %292 : vector<64x4xf32>
    %cst_97 = arith.constant dense<0.000000e+00> : vector<64x32xf32>
    %295 = tpu.matmul %293, %1, %cst_97 {dimension_numbers = #tpu.dot_dimension_numbers<[1], [0], [0], [1], [0, 0, 1, 1], [], []>} : vector<64x4xf32>, vector<4x32xf32>, vector<64x32xf32> -> vector<64x32xf32>
    %296 = arith.mulf %295, %271 : vector<64x32xf32>
    %cst_98 = arith.constant dense<0.000000e+00> : vector<64x32xf32>
    %297 = tpu.matmul %294, %1, %cst_98 {dimension_numbers = #tpu.dot_dimension_numbers<[1], [0], [0], [1], [0, 0, 1, 1], [], []>} : vector<64x4xf32>, vector<4x32xf32>, vector<64x32xf32> -> vector<64x32xf32>
    %298 = arith.mulf %297, %277 : vector<64x32xf32>
    %299 = arith.addf %296, %298 : vector<64x32xf32>
    %c648 = arith.constant 648 : index
    %c0_99 = arith.constant 0 : index
    %300 = vector.load %arg1[%c648, %c0_99] : memref<1592x128xf32, #tpu.memory_space<vmem>>, vector<32x32xf32>
    %cst_100 = arith.constant dense<0.000000e+00> : vector<64x32xf32>
    %301 = tpu.matmul %299, %300, %cst_100 {dimension_numbers = #tpu.dot_dimension_numbers<[1], [0], [0], [1], [0, 0, 1, 1], [], []>} : vector<64x32xf32>, vector<32x32xf32>, vector<64x32xf32> -> vector<64x32xf32>
    %c680 = arith.constant 680 : index
    %c0_101 = arith.constant 0 : index
    %302 = vector.load %arg1[%c680, %c0_101] : memref<1592x128xf32, #tpu.memory_space<vmem>>, vector<1x32xf32>
    %303 = vector.broadcast %302 : vector<1x32xf32> to vector<64x32xf32>
    %304 = arith.addf %301, %303 : vector<64x32xf32>
    %305 = arith.addf %43, %304 : vector<64x32xf32>
    %cst_102 = arith.constant dense<0.000000e+00> : vector<64xf32>
    %306 = vector.multi_reduction <add>, %305, %cst_102 [1] : vector<64x32xf32> to vector<64xf32>
    %307 = vector.shape_cast %306 : vector<64xf32> to vector<64x1xf32>
    %cst_103 = arith.constant 3.200000e+01 : f32
    %308 = vector.broadcast %cst_103 : f32 to vector<64x1xf32>
    %309 = arith.divf %307, %308 : vector<64x1xf32>
    %310 = vector.broadcast %309 : vector<64x1xf32> to vector<64x32xf32>
    %311 = arith.subf %305, %310 : vector<64x32xf32>
    %312 = arith.mulf %311, %311 : vector<64x32xf32>
    %cst_104 = arith.constant dense<0.000000e+00> : vector<64xf32>
    %313 = vector.multi_reduction <add>, %312, %cst_104 [1] : vector<64x32xf32> to vector<64xf32>
    %314 = vector.shape_cast %313 : vector<64xf32> to vector<64x1xf32>
    %cst_105 = arith.constant 3.200000e+01 : f32
    %315 = vector.broadcast %cst_105 : f32 to vector<64x1xf32>
    %316 = arith.divf %314, %315 : vector<64x1xf32>
    %cst_106 = arith.constant 9.99999974E-6 : f32
    %317 = vector.broadcast %cst_106 : f32 to vector<64x1xf32>
    %318 = arith.addf %316, %317 : vector<64x1xf32>
    %319 = math.rsqrt %318 : vector<64x1xf32>
    %320 = vector.broadcast %319 : vector<64x1xf32> to vector<64x32xf32>
    %321 = arith.mulf %311, %320 : vector<64x32xf32>
    %c688 = arith.constant 688 : index
    %c0_107 = arith.constant 0 : index
    %322 = vector.load %arg1[%c688, %c0_107] : memref<1592x128xf32, #tpu.memory_space<vmem>>, vector<1x32xf32>
    %323 = vector.broadcast %322 : vector<1x32xf32> to vector<64x32xf32>
    %324 = arith.mulf %321, %323 : vector<64x32xf32>
    %c696 = arith.constant 696 : index
    %c0_108 = arith.constant 0 : index
    %325 = vector.load %arg1[%c696, %c0_108] : memref<1592x128xf32, #tpu.memory_space<vmem>>, vector<1x32xf32>
    %326 = vector.broadcast %325 : vector<1x32xf32> to vector<64x32xf32>
    %327 = arith.addf %324, %326 : vector<64x32xf32>
    %c704 = arith.constant 704 : index
    %c0_109 = arith.constant 0 : index
    %328 = vector.load %arg1[%c704, %c0_109] : memref<1592x128xf32, #tpu.memory_space<vmem>>, vector<32x32xf32>
    %cst_110 = arith.constant dense<0.000000e+00> : vector<64x32xf32>
    %329 = tpu.matmul %327, %328, %cst_110 {dimension_numbers = #tpu.dot_dimension_numbers<[1], [0], [0], [1], [0, 0, 1, 1], [], []>} : vector<64x32xf32>, vector<32x32xf32>, vector<64x32xf32> -> vector<64x32xf32>
    %c736 = arith.constant 736 : index
    %c0_111 = arith.constant 0 : index
    %330 = vector.load %arg1[%c736, %c0_111] : memref<1592x128xf32, #tpu.memory_space<vmem>>, vector<1x32xf32>
    %331 = vector.broadcast %330 : vector<1x32xf32> to vector<64x32xf32>
    %332 = arith.addf %329, %331 : vector<64x32xf32>
    %c744 = arith.constant 744 : index
    %c0_112 = arith.constant 0 : index
    %333 = vector.load %arg1[%c744, %c0_112] : memref<1592x128xf32, #tpu.memory_space<vmem>>, vector<32x64xf32>
    %cst_113 = arith.constant dense<0.000000e+00> : vector<64x64xf32>
    %334 = tpu.matmul %263, %333, %cst_113 {dimension_numbers = #tpu.dot_dimension_numbers<[1], [0], [0], [1], [0, 0, 1, 1], [], []>} : vector<64x32xf32>, vector<32x64xf32>, vector<64x64xf32> -> vector<64x64xf32>
    %c776 = arith.constant 776 : index
    %c0_114 = arith.constant 0 : index
    %335 = vector.load %arg1[%c776, %c0_114] : memref<1592x128xf32, #tpu.memory_space<vmem>>, vector<1x64xf32>
    %336 = vector.broadcast %335 : vector<1x64xf32> to vector<64x64xf32>
    %337 = arith.addf %334, %336 : vector<64x64xf32>
    %338 = vector.extract_strided_slice %337 {offsets = [0, 0], sizes = [64, 32], strides = [1, 1]} : vector<64x64xf32> to vector<64x32xf32>
    %339 = vector.extract_strided_slice %337 {offsets = [0, 32], sizes = [64, 32], strides = [1, 1]} : vector<64x64xf32> to vector<64x32xf32>
    %340 = vector.extract_strided_slice %338 {offsets = [32, 0], sizes = [32, 32], strides = [1, 1]} : vector<64x32xf32> to vector<32x32xf32>
    %341 = vector.extract_strided_slice %338 {offsets = [0, 0], sizes = [32, 32], strides = [1, 1]} : vector<64x32xf32> to vector<32x32xf32>
    %342 = tpu.concatenate %340, %341 in 0 : vector<32x32xf32>, vector<32x32xf32> -> vector<64x32xf32>
    %343 = vector.extract_strided_slice %339 {offsets = [32, 0], sizes = [32, 32], strides = [1, 1]} : vector<64x32xf32> to vector<32x32xf32>
    %344 = vector.extract_strided_slice %339 {offsets = [0, 0], sizes = [32, 32], strides = [1, 1]} : vector<64x32xf32> to vector<32x32xf32>
    %345 = tpu.concatenate %343, %344 in 0 : vector<32x32xf32>, vector<32x32xf32> -> vector<64x32xf32>
    %346 = arith.mulf %332, %338 : vector<64x32xf32>
    %cst_115 = arith.constant dense<0.000000e+00> : vector<64x4xf32>
    %347 = tpu.matmul %346, %0, %cst_115 {dimension_numbers = #tpu.dot_dimension_numbers<[1], [0], [0], [1], [0, 0, 1, 1], [], []>} : vector<64x32xf32>, vector<32x4xf32>, vector<64x4xf32> -> vector<64x4xf32>
    %cst_116 = arith.constant 0.353553385 : f32
    %348 = vector.broadcast %cst_116 : f32 to vector<64x4xf32>
    %349 = arith.mulf %347, %348 : vector<64x4xf32>
    %350 = arith.mulf %332, %342 : vector<64x32xf32>
    %cst_117 = arith.constant dense<0.000000e+00> : vector<64x4xf32>
    %351 = tpu.matmul %350, %0, %cst_117 {dimension_numbers = #tpu.dot_dimension_numbers<[1], [0], [0], [1], [0, 0, 1, 1], [], []>} : vector<64x32xf32>, vector<32x4xf32>, vector<64x4xf32> -> vector<64x4xf32>
    %cst_118 = arith.constant 0.353553385 : f32
    %352 = vector.broadcast %cst_118 : f32 to vector<64x4xf32>
    %353 = arith.mulf %351, %352 : vector<64x4xf32>
    %354 = arith.maximumf %349, %353 : vector<64x4xf32>
    %355 = arith.subf %349, %354 : vector<64x4xf32>
    %356 = math.exp %355 : vector<64x4xf32>
    %357 = arith.subf %353, %354 : vector<64x4xf32>
    %358 = math.exp %357 : vector<64x4xf32>
    %359 = arith.addf %356, %358 : vector<64x4xf32>
    %360 = tpu.reciprocal %359 {approx = true} : vector<64x4xf32> -> vector<64x4xf32>
    %361 = arith.mulf %356, %360 : vector<64x4xf32>
    %362 = arith.mulf %358, %360 : vector<64x4xf32>
    %cst_119 = arith.constant dense<0.000000e+00> : vector<64x32xf32>
    %363 = tpu.matmul %361, %1, %cst_119 {dimension_numbers = #tpu.dot_dimension_numbers<[1], [0], [0], [1], [0, 0, 1, 1], [], []>} : vector<64x4xf32>, vector<4x32xf32>, vector<64x32xf32> -> vector<64x32xf32>
    %364 = arith.mulf %363, %339 : vector<64x32xf32>
    %cst_120 = arith.constant dense<0.000000e+00> : vector<64x32xf32>
    %365 = tpu.matmul %362, %1, %cst_120 {dimension_numbers = #tpu.dot_dimension_numbers<[1], [0], [0], [1], [0, 0, 1, 1], [], []>} : vector<64x4xf32>, vector<4x32xf32>, vector<64x32xf32> -> vector<64x32xf32>
    %366 = arith.mulf %365, %345 : vector<64x32xf32>
    %367 = arith.addf %364, %366 : vector<64x32xf32>
    %c784 = arith.constant 784 : index
    %c0_121 = arith.constant 0 : index
    %368 = vector.load %arg1[%c784, %c0_121] : memref<1592x128xf32, #tpu.memory_space<vmem>>, vector<32x32xf32>
    %cst_122 = arith.constant dense<0.000000e+00> : vector<64x32xf32>
    %369 = tpu.matmul %367, %368, %cst_122 {dimension_numbers = #tpu.dot_dimension_numbers<[1], [0], [0], [1], [0, 0, 1, 1], [], []>} : vector<64x32xf32>, vector<32x32xf32>, vector<64x32xf32> -> vector<64x32xf32>
    %c816 = arith.constant 816 : index
    %c0_123 = arith.constant 0 : index
    %370 = vector.load %arg1[%c816, %c0_123] : memref<1592x128xf32, #tpu.memory_space<vmem>>, vector<1x32xf32>
    %371 = vector.broadcast %370 : vector<1x32xf32> to vector<64x32xf32>
    %372 = arith.addf %369, %371 : vector<64x32xf32>
    %373 = arith.addf %327, %372 : vector<64x32xf32>
    %cst_124 = arith.constant dense<0.000000e+00> : vector<64xf32>
    %374 = vector.multi_reduction <add>, %373, %cst_124 [1] : vector<64x32xf32> to vector<64xf32>
    %375 = vector.shape_cast %374 : vector<64xf32> to vector<64x1xf32>
    %cst_125 = arith.constant 3.200000e+01 : f32
    %376 = vector.broadcast %cst_125 : f32 to vector<64x1xf32>
    %377 = arith.divf %375, %376 : vector<64x1xf32>
    %378 = vector.broadcast %377 : vector<64x1xf32> to vector<64x32xf32>
    %379 = arith.subf %373, %378 : vector<64x32xf32>
    %380 = arith.mulf %379, %379 : vector<64x32xf32>
    %cst_126 = arith.constant dense<0.000000e+00> : vector<64xf32>
    %381 = vector.multi_reduction <add>, %380, %cst_126 [1] : vector<64x32xf32> to vector<64xf32>
    %382 = vector.shape_cast %381 : vector<64xf32> to vector<64x1xf32>
    %cst_127 = arith.constant 3.200000e+01 : f32
    %383 = vector.broadcast %cst_127 : f32 to vector<64x1xf32>
    %384 = arith.divf %382, %383 : vector<64x1xf32>
    %cst_128 = arith.constant 9.99999974E-6 : f32
    %385 = vector.broadcast %cst_128 : f32 to vector<64x1xf32>
    %386 = arith.addf %384, %385 : vector<64x1xf32>
    %387 = math.rsqrt %386 : vector<64x1xf32>
    %388 = vector.broadcast %387 : vector<64x1xf32> to vector<64x32xf32>
    %389 = arith.mulf %379, %388 : vector<64x32xf32>
    %c824 = arith.constant 824 : index
    %c0_129 = arith.constant 0 : index
    %390 = vector.load %arg1[%c824, %c0_129] : memref<1592x128xf32, #tpu.memory_space<vmem>>, vector<1x32xf32>
    %391 = vector.broadcast %390 : vector<1x32xf32> to vector<64x32xf32>
    %392 = arith.mulf %389, %391 : vector<64x32xf32>
    %c832 = arith.constant 832 : index
    %c0_130 = arith.constant 0 : index
    %393 = vector.load %arg1[%c832, %c0_130] : memref<1592x128xf32, #tpu.memory_space<vmem>>, vector<1x32xf32>
    %394 = vector.broadcast %393 : vector<1x32xf32> to vector<64x32xf32>
    %395 = arith.addf %392, %394 : vector<64x32xf32>
    %c840 = arith.constant 840 : index
    %c0_131 = arith.constant 0 : index
    %396 = vector.load %arg1[%c840, %c0_131] : memref<1592x128xf32, #tpu.memory_space<vmem>>, vector<32x64xf32>
    %cst_132 = arith.constant dense<0.000000e+00> : vector<64x64xf32>
    %397 = tpu.matmul %395, %396, %cst_132 {dimension_numbers = #tpu.dot_dimension_numbers<[1], [0], [0], [1], [0, 0, 1, 1], [], []>} : vector<64x32xf32>, vector<32x64xf32>, vector<64x64xf32> -> vector<64x64xf32>
    %c872 = arith.constant 872 : index
    %c0_133 = arith.constant 0 : index
    %398 = vector.load %arg1[%c872, %c0_133] : memref<1592x128xf32, #tpu.memory_space<vmem>>, vector<1x64xf32>
    %399 = vector.broadcast %398 : vector<1x64xf32> to vector<64x64xf32>
    %400 = arith.addf %397, %399 : vector<64x64xf32>
    %cst_134 = arith.constant 0.000000e+00 : f32
    %401 = vector.broadcast %cst_134 : f32 to vector<64x64xf32>
    %402 = arith.maximumf %400, %401 : vector<64x64xf32>
    %c880 = arith.constant 880 : index
    %c0_135 = arith.constant 0 : index
    %403 = vector.load %arg1[%c880, %c0_135] : memref<1592x128xf32, #tpu.memory_space<vmem>>, vector<64x32xf32>
    %cst_136 = arith.constant dense<0.000000e+00> : vector<64x32xf32>
    %404 = tpu.matmul %402, %403, %cst_136 {dimension_numbers = #tpu.dot_dimension_numbers<[1], [0], [0], [1], [0, 0, 1, 1], [], []>} : vector<64x64xf32>, vector<64x32xf32>, vector<64x32xf32> -> vector<64x32xf32>
    %c944 = arith.constant 944 : index
    %c0_137 = arith.constant 0 : index
    %405 = vector.load %arg1[%c944, %c0_137] : memref<1592x128xf32, #tpu.memory_space<vmem>>, vector<1x32xf32>
    %406 = vector.broadcast %405 : vector<1x32xf32> to vector<64x32xf32>
    %407 = arith.addf %404, %406 : vector<64x32xf32>
    %408 = arith.addf %395, %407 : vector<64x32xf32>
    %cst_138 = arith.constant dense<0.000000e+00> : vector<64xf32>
    %409 = vector.multi_reduction <add>, %408, %cst_138 [1] : vector<64x32xf32> to vector<64xf32>
    %410 = vector.shape_cast %409 : vector<64xf32> to vector<64x1xf32>
    %cst_139 = arith.constant 3.200000e+01 : f32
    %411 = vector.broadcast %cst_139 : f32 to vector<64x1xf32>
    %412 = arith.divf %410, %411 : vector<64x1xf32>
    %413 = vector.broadcast %412 : vector<64x1xf32> to vector<64x32xf32>
    %414 = arith.subf %408, %413 : vector<64x32xf32>
    %415 = arith.mulf %414, %414 : vector<64x32xf32>
    %cst_140 = arith.constant dense<0.000000e+00> : vector<64xf32>
    %416 = vector.multi_reduction <add>, %415, %cst_140 [1] : vector<64x32xf32> to vector<64xf32>
    %417 = vector.shape_cast %416 : vector<64xf32> to vector<64x1xf32>
    %cst_141 = arith.constant 3.200000e+01 : f32
    %418 = vector.broadcast %cst_141 : f32 to vector<64x1xf32>
    %419 = arith.divf %417, %418 : vector<64x1xf32>
    %cst_142 = arith.constant 9.99999974E-6 : f32
    %420 = vector.broadcast %cst_142 : f32 to vector<64x1xf32>
    %421 = arith.addf %419, %420 : vector<64x1xf32>
    %422 = math.rsqrt %421 : vector<64x1xf32>
    %423 = vector.broadcast %422 : vector<64x1xf32> to vector<64x32xf32>
    %424 = arith.mulf %414, %423 : vector<64x32xf32>
    %c952 = arith.constant 952 : index
    %c0_143 = arith.constant 0 : index
    %425 = vector.load %arg1[%c952, %c0_143] : memref<1592x128xf32, #tpu.memory_space<vmem>>, vector<1x32xf32>
    %426 = vector.broadcast %425 : vector<1x32xf32> to vector<64x32xf32>
    %427 = arith.mulf %424, %426 : vector<64x32xf32>
    %c960 = arith.constant 960 : index
    %c0_144 = arith.constant 0 : index
    %428 = vector.load %arg1[%c960, %c0_144] : memref<1592x128xf32, #tpu.memory_space<vmem>>, vector<1x32xf32>
    %429 = vector.broadcast %428 : vector<1x32xf32> to vector<64x32xf32>
    %430 = arith.addf %427, %429 : vector<64x32xf32>
    %c968 = arith.constant 968 : index
    %c0_145 = arith.constant 0 : index
    %431 = vector.load %arg1[%c968, %c0_145] : memref<1592x128xf32, #tpu.memory_space<vmem>>, vector<32x96xf32>
    %cst_146 = arith.constant dense<0.000000e+00> : vector<64x96xf32>
    %432 = tpu.matmul %430, %431, %cst_146 {dimension_numbers = #tpu.dot_dimension_numbers<[1], [0], [0], [1], [0, 0, 1, 1], [], []>} : vector<64x32xf32>, vector<32x96xf32>, vector<64x96xf32> -> vector<64x96xf32>
    %c1000 = arith.constant 1000 : index
    %c0_147 = arith.constant 0 : index
    %433 = vector.load %arg1[%c1000, %c0_147] : memref<1592x128xf32, #tpu.memory_space<vmem>>, vector<1x96xf32>
    %434 = vector.broadcast %433 : vector<1x96xf32> to vector<64x96xf32>
    %435 = arith.addf %432, %434 : vector<64x96xf32>
    %436 = vector.extract_strided_slice %435 {offsets = [0, 0], sizes = [64, 32], strides = [1, 1]} : vector<64x96xf32> to vector<64x32xf32>
    %437 = vector.extract_strided_slice %435 {offsets = [0, 32], sizes = [64, 32], strides = [1, 1]} : vector<64x96xf32> to vector<64x32xf32>
    %438 = vector.extract_strided_slice %435 {offsets = [0, 64], sizes = [64, 32], strides = [1, 1]} : vector<64x96xf32> to vector<64x32xf32>
    %439 = vector.extract_strided_slice %437 {offsets = [32, 0], sizes = [32, 32], strides = [1, 1]} : vector<64x32xf32> to vector<32x32xf32>
    %440 = vector.extract_strided_slice %437 {offsets = [0, 0], sizes = [32, 32], strides = [1, 1]} : vector<64x32xf32> to vector<32x32xf32>
    %441 = tpu.concatenate %439, %440 in 0 : vector<32x32xf32>, vector<32x32xf32> -> vector<64x32xf32>
    %442 = vector.extract_strided_slice %438 {offsets = [32, 0], sizes = [32, 32], strides = [1, 1]} : vector<64x32xf32> to vector<32x32xf32>
    %443 = vector.extract_strided_slice %438 {offsets = [0, 0], sizes = [32, 32], strides = [1, 1]} : vector<64x32xf32> to vector<32x32xf32>
    %444 = tpu.concatenate %442, %443 in 0 : vector<32x32xf32>, vector<32x32xf32> -> vector<64x32xf32>
    %445 = arith.mulf %436, %437 : vector<64x32xf32>
    %cst_148 = arith.constant dense<0.000000e+00> : vector<64x4xf32>
    %446 = tpu.matmul %445, %0, %cst_148 {dimension_numbers = #tpu.dot_dimension_numbers<[1], [0], [0], [1], [0, 0, 1, 1], [], []>} : vector<64x32xf32>, vector<32x4xf32>, vector<64x4xf32> -> vector<64x4xf32>
    %cst_149 = arith.constant 0.353553385 : f32
    %447 = vector.broadcast %cst_149 : f32 to vector<64x4xf32>
    %448 = arith.mulf %446, %447 : vector<64x4xf32>
    %449 = arith.mulf %436, %441 : vector<64x32xf32>
    %cst_150 = arith.constant dense<0.000000e+00> : vector<64x4xf32>
    %450 = tpu.matmul %449, %0, %cst_150 {dimension_numbers = #tpu.dot_dimension_numbers<[1], [0], [0], [1], [0, 0, 1, 1], [], []>} : vector<64x32xf32>, vector<32x4xf32>, vector<64x4xf32> -> vector<64x4xf32>
    %cst_151 = arith.constant 0.353553385 : f32
    %451 = vector.broadcast %cst_151 : f32 to vector<64x4xf32>
    %452 = arith.mulf %450, %451 : vector<64x4xf32>
    %453 = arith.maximumf %448, %452 : vector<64x4xf32>
    %454 = arith.subf %448, %453 : vector<64x4xf32>
    %455 = math.exp %454 : vector<64x4xf32>
    %456 = arith.subf %452, %453 : vector<64x4xf32>
    %457 = math.exp %456 : vector<64x4xf32>
    %458 = arith.addf %455, %457 : vector<64x4xf32>
    %459 = tpu.reciprocal %458 {approx = true} : vector<64x4xf32> -> vector<64x4xf32>
    %460 = arith.mulf %455, %459 : vector<64x4xf32>
    %461 = arith.mulf %457, %459 : vector<64x4xf32>
    %cst_152 = arith.constant dense<0.000000e+00> : vector<64x32xf32>
    %462 = tpu.matmul %460, %1, %cst_152 {dimension_numbers = #tpu.dot_dimension_numbers<[1], [0], [0], [1], [0, 0, 1, 1], [], []>} : vector<64x4xf32>, vector<4x32xf32>, vector<64x32xf32> -> vector<64x32xf32>
    %463 = arith.mulf %462, %438 : vector<64x32xf32>
    %cst_153 = arith.constant dense<0.000000e+00> : vector<64x32xf32>
    %464 = tpu.matmul %461, %1, %cst_153 {dimension_numbers = #tpu.dot_dimension_numbers<[1], [0], [0], [1], [0, 0, 1, 1], [], []>} : vector<64x4xf32>, vector<4x32xf32>, vector<64x32xf32> -> vector<64x32xf32>
    %465 = arith.mulf %464, %444 : vector<64x32xf32>
    %466 = arith.addf %463, %465 : vector<64x32xf32>
    %c1008 = arith.constant 1008 : index
    %c0_154 = arith.constant 0 : index
    %467 = vector.load %arg1[%c1008, %c0_154] : memref<1592x128xf32, #tpu.memory_space<vmem>>, vector<32x32xf32>
    %cst_155 = arith.constant dense<0.000000e+00> : vector<64x32xf32>
    %468 = tpu.matmul %466, %467, %cst_155 {dimension_numbers = #tpu.dot_dimension_numbers<[1], [0], [0], [1], [0, 0, 1, 1], [], []>} : vector<64x32xf32>, vector<32x32xf32>, vector<64x32xf32> -> vector<64x32xf32>
    %c1040 = arith.constant 1040 : index
    %c0_156 = arith.constant 0 : index
    %469 = vector.load %arg1[%c1040, %c0_156] : memref<1592x128xf32, #tpu.memory_space<vmem>>, vector<1x32xf32>
    %470 = vector.broadcast %469 : vector<1x32xf32> to vector<64x32xf32>
    %471 = arith.addf %468, %470 : vector<64x32xf32>
    %472 = arith.addf %430, %471 : vector<64x32xf32>
    %cst_157 = arith.constant dense<0.000000e+00> : vector<64xf32>
    %473 = vector.multi_reduction <add>, %472, %cst_157 [1] : vector<64x32xf32> to vector<64xf32>
    %474 = vector.shape_cast %473 : vector<64xf32> to vector<64x1xf32>
    %cst_158 = arith.constant 3.200000e+01 : f32
    %475 = vector.broadcast %cst_158 : f32 to vector<64x1xf32>
    %476 = arith.divf %474, %475 : vector<64x1xf32>
    %477 = vector.broadcast %476 : vector<64x1xf32> to vector<64x32xf32>
    %478 = arith.subf %472, %477 : vector<64x32xf32>
    %479 = arith.mulf %478, %478 : vector<64x32xf32>
    %cst_159 = arith.constant dense<0.000000e+00> : vector<64xf32>
    %480 = vector.multi_reduction <add>, %479, %cst_159 [1] : vector<64x32xf32> to vector<64xf32>
    %481 = vector.shape_cast %480 : vector<64xf32> to vector<64x1xf32>
    %cst_160 = arith.constant 3.200000e+01 : f32
    %482 = vector.broadcast %cst_160 : f32 to vector<64x1xf32>
    %483 = arith.divf %481, %482 : vector<64x1xf32>
    %cst_161 = arith.constant 9.99999974E-6 : f32
    %484 = vector.broadcast %cst_161 : f32 to vector<64x1xf32>
    %485 = arith.addf %483, %484 : vector<64x1xf32>
    %486 = math.rsqrt %485 : vector<64x1xf32>
    %487 = vector.broadcast %486 : vector<64x1xf32> to vector<64x32xf32>
    %488 = arith.mulf %478, %487 : vector<64x32xf32>
    %c1048 = arith.constant 1048 : index
    %c0_162 = arith.constant 0 : index
    %489 = vector.load %arg1[%c1048, %c0_162] : memref<1592x128xf32, #tpu.memory_space<vmem>>, vector<1x32xf32>
    %490 = vector.broadcast %489 : vector<1x32xf32> to vector<64x32xf32>
    %491 = arith.mulf %488, %490 : vector<64x32xf32>
    %c1056 = arith.constant 1056 : index
    %c0_163 = arith.constant 0 : index
    %492 = vector.load %arg1[%c1056, %c0_163] : memref<1592x128xf32, #tpu.memory_space<vmem>>, vector<1x32xf32>
    %493 = vector.broadcast %492 : vector<1x32xf32> to vector<64x32xf32>
    %494 = arith.addf %491, %493 : vector<64x32xf32>
    %c1064 = arith.constant 1064 : index
    %c0_164 = arith.constant 0 : index
    %495 = vector.load %arg1[%c1064, %c0_164] : memref<1592x128xf32, #tpu.memory_space<vmem>>, vector<32x32xf32>
    %cst_165 = arith.constant dense<0.000000e+00> : vector<64x32xf32>
    %496 = tpu.matmul %494, %495, %cst_165 {dimension_numbers = #tpu.dot_dimension_numbers<[1], [0], [0], [1], [0, 0, 1, 1], [], []>} : vector<64x32xf32>, vector<32x32xf32>, vector<64x32xf32> -> vector<64x32xf32>
    %c1096 = arith.constant 1096 : index
    %c0_166 = arith.constant 0 : index
    %497 = vector.load %arg1[%c1096, %c0_166] : memref<1592x128xf32, #tpu.memory_space<vmem>>, vector<1x32xf32>
    %498 = vector.broadcast %497 : vector<1x32xf32> to vector<64x32xf32>
    %499 = arith.addf %496, %498 : vector<64x32xf32>
    %c1104 = arith.constant 1104 : index
    %c0_167 = arith.constant 0 : index
    %500 = vector.load %arg1[%c1104, %c0_167] : memref<1592x128xf32, #tpu.memory_space<vmem>>, vector<32x64xf32>
    %cst_168 = arith.constant dense<0.000000e+00> : vector<64x64xf32>
    %501 = tpu.matmul %263, %500, %cst_168 {dimension_numbers = #tpu.dot_dimension_numbers<[1], [0], [0], [1], [0, 0, 1, 1], [], []>} : vector<64x32xf32>, vector<32x64xf32>, vector<64x64xf32> -> vector<64x64xf32>
    %c1136 = arith.constant 1136 : index
    %c0_169 = arith.constant 0 : index
    %502 = vector.load %arg1[%c1136, %c0_169] : memref<1592x128xf32, #tpu.memory_space<vmem>>, vector<1x64xf32>
    %503 = vector.broadcast %502 : vector<1x64xf32> to vector<64x64xf32>
    %504 = arith.addf %501, %503 : vector<64x64xf32>
    %505 = vector.extract_strided_slice %504 {offsets = [0, 0], sizes = [64, 32], strides = [1, 1]} : vector<64x64xf32> to vector<64x32xf32>
    %506 = vector.extract_strided_slice %504 {offsets = [0, 32], sizes = [64, 32], strides = [1, 1]} : vector<64x64xf32> to vector<64x32xf32>
    %507 = vector.extract_strided_slice %505 {offsets = [32, 0], sizes = [32, 32], strides = [1, 1]} : vector<64x32xf32> to vector<32x32xf32>
    %508 = vector.extract_strided_slice %505 {offsets = [0, 0], sizes = [32, 32], strides = [1, 1]} : vector<64x32xf32> to vector<32x32xf32>
    %509 = tpu.concatenate %507, %508 in 0 : vector<32x32xf32>, vector<32x32xf32> -> vector<64x32xf32>
    %510 = vector.extract_strided_slice %506 {offsets = [32, 0], sizes = [32, 32], strides = [1, 1]} : vector<64x32xf32> to vector<32x32xf32>
    %511 = vector.extract_strided_slice %506 {offsets = [0, 0], sizes = [32, 32], strides = [1, 1]} : vector<64x32xf32> to vector<32x32xf32>
    %512 = tpu.concatenate %510, %511 in 0 : vector<32x32xf32>, vector<32x32xf32> -> vector<64x32xf32>
    %513 = arith.mulf %499, %505 : vector<64x32xf32>
    %cst_170 = arith.constant dense<0.000000e+00> : vector<64x4xf32>
    %514 = tpu.matmul %513, %0, %cst_170 {dimension_numbers = #tpu.dot_dimension_numbers<[1], [0], [0], [1], [0, 0, 1, 1], [], []>} : vector<64x32xf32>, vector<32x4xf32>, vector<64x4xf32> -> vector<64x4xf32>
    %cst_171 = arith.constant 0.353553385 : f32
    %515 = vector.broadcast %cst_171 : f32 to vector<64x4xf32>
    %516 = arith.mulf %514, %515 : vector<64x4xf32>
    %517 = arith.mulf %499, %509 : vector<64x32xf32>
    %cst_172 = arith.constant dense<0.000000e+00> : vector<64x4xf32>
    %518 = tpu.matmul %517, %0, %cst_172 {dimension_numbers = #tpu.dot_dimension_numbers<[1], [0], [0], [1], [0, 0, 1, 1], [], []>} : vector<64x32xf32>, vector<32x4xf32>, vector<64x4xf32> -> vector<64x4xf32>
    %cst_173 = arith.constant 0.353553385 : f32
    %519 = vector.broadcast %cst_173 : f32 to vector<64x4xf32>
    %520 = arith.mulf %518, %519 : vector<64x4xf32>
    %521 = arith.maximumf %516, %520 : vector<64x4xf32>
    %522 = arith.subf %516, %521 : vector<64x4xf32>
    %523 = math.exp %522 : vector<64x4xf32>
    %524 = arith.subf %520, %521 : vector<64x4xf32>
    %525 = math.exp %524 : vector<64x4xf32>
    %526 = arith.addf %523, %525 : vector<64x4xf32>
    %527 = tpu.reciprocal %526 {approx = true} : vector<64x4xf32> -> vector<64x4xf32>
    %528 = arith.mulf %523, %527 : vector<64x4xf32>
    %529 = arith.mulf %525, %527 : vector<64x4xf32>
    %cst_174 = arith.constant dense<0.000000e+00> : vector<64x32xf32>
    %530 = tpu.matmul %528, %1, %cst_174 {dimension_numbers = #tpu.dot_dimension_numbers<[1], [0], [0], [1], [0, 0, 1, 1], [], []>} : vector<64x4xf32>, vector<4x32xf32>, vector<64x32xf32> -> vector<64x32xf32>
    %531 = arith.mulf %530, %506 : vector<64x32xf32>
    %cst_175 = arith.constant dense<0.000000e+00> : vector<64x32xf32>
    %532 = tpu.matmul %529, %1, %cst_175 {dimension_numbers = #tpu.dot_dimension_numbers<[1], [0], [0], [1], [0, 0, 1, 1], [], []>} : vector<64x4xf32>, vector<4x32xf32>, vector<64x32xf32> -> vector<64x32xf32>
    %533 = arith.mulf %532, %512 : vector<64x32xf32>
    %534 = arith.addf %531, %533 : vector<64x32xf32>
    %c1144 = arith.constant 1144 : index
    %c0_176 = arith.constant 0 : index
    %535 = vector.load %arg1[%c1144, %c0_176] : memref<1592x128xf32, #tpu.memory_space<vmem>>, vector<32x32xf32>
    %cst_177 = arith.constant dense<0.000000e+00> : vector<64x32xf32>
    %536 = tpu.matmul %534, %535, %cst_177 {dimension_numbers = #tpu.dot_dimension_numbers<[1], [0], [0], [1], [0, 0, 1, 1], [], []>} : vector<64x32xf32>, vector<32x32xf32>, vector<64x32xf32> -> vector<64x32xf32>
    %c1176 = arith.constant 1176 : index
    %c0_178 = arith.constant 0 : index
    %537 = vector.load %arg1[%c1176, %c0_178] : memref<1592x128xf32, #tpu.memory_space<vmem>>, vector<1x32xf32>
    %538 = vector.broadcast %537 : vector<1x32xf32> to vector<64x32xf32>
    %539 = arith.addf %536, %538 : vector<64x32xf32>
    %540 = arith.addf %494, %539 : vector<64x32xf32>
    %cst_179 = arith.constant dense<0.000000e+00> : vector<64xf32>
    %541 = vector.multi_reduction <add>, %540, %cst_179 [1] : vector<64x32xf32> to vector<64xf32>
    %542 = vector.shape_cast %541 : vector<64xf32> to vector<64x1xf32>
    %cst_180 = arith.constant 3.200000e+01 : f32
    %543 = vector.broadcast %cst_180 : f32 to vector<64x1xf32>
    %544 = arith.divf %542, %543 : vector<64x1xf32>
    %545 = vector.broadcast %544 : vector<64x1xf32> to vector<64x32xf32>
    %546 = arith.subf %540, %545 : vector<64x32xf32>
    %547 = arith.mulf %546, %546 : vector<64x32xf32>
    %cst_181 = arith.constant dense<0.000000e+00> : vector<64xf32>
    %548 = vector.multi_reduction <add>, %547, %cst_181 [1] : vector<64x32xf32> to vector<64xf32>
    %549 = vector.shape_cast %548 : vector<64xf32> to vector<64x1xf32>
    %cst_182 = arith.constant 3.200000e+01 : f32
    %550 = vector.broadcast %cst_182 : f32 to vector<64x1xf32>
    %551 = arith.divf %549, %550 : vector<64x1xf32>
    %cst_183 = arith.constant 9.99999974E-6 : f32
    %552 = vector.broadcast %cst_183 : f32 to vector<64x1xf32>
    %553 = arith.addf %551, %552 : vector<64x1xf32>
    %554 = math.rsqrt %553 : vector<64x1xf32>
    %555 = vector.broadcast %554 : vector<64x1xf32> to vector<64x32xf32>
    %556 = arith.mulf %546, %555 : vector<64x32xf32>
    %c1184 = arith.constant 1184 : index
    %c0_184 = arith.constant 0 : index
    %557 = vector.load %arg1[%c1184, %c0_184] : memref<1592x128xf32, #tpu.memory_space<vmem>>, vector<1x32xf32>
    %558 = vector.broadcast %557 : vector<1x32xf32> to vector<64x32xf32>
    %559 = arith.mulf %556, %558 : vector<64x32xf32>
    %c1192 = arith.constant 1192 : index
    %c0_185 = arith.constant 0 : index
    %560 = vector.load %arg1[%c1192, %c0_185] : memref<1592x128xf32, #tpu.memory_space<vmem>>, vector<1x32xf32>
    %561 = vector.broadcast %560 : vector<1x32xf32> to vector<64x32xf32>
    %562 = arith.addf %559, %561 : vector<64x32xf32>
    %c1200 = arith.constant 1200 : index
    %c0_186 = arith.constant 0 : index
    %563 = vector.load %arg1[%c1200, %c0_186] : memref<1592x128xf32, #tpu.memory_space<vmem>>, vector<32x64xf32>
    %cst_187 = arith.constant dense<0.000000e+00> : vector<64x64xf32>
    %564 = tpu.matmul %562, %563, %cst_187 {dimension_numbers = #tpu.dot_dimension_numbers<[1], [0], [0], [1], [0, 0, 1, 1], [], []>} : vector<64x32xf32>, vector<32x64xf32>, vector<64x64xf32> -> vector<64x64xf32>
    %c1232 = arith.constant 1232 : index
    %c0_188 = arith.constant 0 : index
    %565 = vector.load %arg1[%c1232, %c0_188] : memref<1592x128xf32, #tpu.memory_space<vmem>>, vector<1x64xf32>
    %566 = vector.broadcast %565 : vector<1x64xf32> to vector<64x64xf32>
    %567 = arith.addf %564, %566 : vector<64x64xf32>
    %cst_189 = arith.constant 0.000000e+00 : f32
    %568 = vector.broadcast %cst_189 : f32 to vector<64x64xf32>
    %569 = arith.maximumf %567, %568 : vector<64x64xf32>
    %c1240 = arith.constant 1240 : index
    %c0_190 = arith.constant 0 : index
    %570 = vector.load %arg1[%c1240, %c0_190] : memref<1592x128xf32, #tpu.memory_space<vmem>>, vector<64x32xf32>
    %cst_191 = arith.constant dense<0.000000e+00> : vector<64x32xf32>
    %571 = tpu.matmul %569, %570, %cst_191 {dimension_numbers = #tpu.dot_dimension_numbers<[1], [0], [0], [1], [0, 0, 1, 1], [], []>} : vector<64x64xf32>, vector<64x32xf32>, vector<64x32xf32> -> vector<64x32xf32>
    %c1304 = arith.constant 1304 : index
    %c0_192 = arith.constant 0 : index
    %572 = vector.load %arg1[%c1304, %c0_192] : memref<1592x128xf32, #tpu.memory_space<vmem>>, vector<1x32xf32>
    %573 = vector.broadcast %572 : vector<1x32xf32> to vector<64x32xf32>
    %574 = arith.addf %571, %573 : vector<64x32xf32>
    %575 = arith.addf %562, %574 : vector<64x32xf32>
    %cst_193 = arith.constant dense<0.000000e+00> : vector<64xf32>
    %576 = vector.multi_reduction <add>, %575, %cst_193 [1] : vector<64x32xf32> to vector<64xf32>
    %577 = vector.shape_cast %576 : vector<64xf32> to vector<64x1xf32>
    %cst_194 = arith.constant 3.200000e+01 : f32
    %578 = vector.broadcast %cst_194 : f32 to vector<64x1xf32>
    %579 = arith.divf %577, %578 : vector<64x1xf32>
    %580 = vector.broadcast %579 : vector<64x1xf32> to vector<64x32xf32>
    %581 = arith.subf %575, %580 : vector<64x32xf32>
    %582 = arith.mulf %581, %581 : vector<64x32xf32>
    %cst_195 = arith.constant dense<0.000000e+00> : vector<64xf32>
    %583 = vector.multi_reduction <add>, %582, %cst_195 [1] : vector<64x32xf32> to vector<64xf32>
    %584 = vector.shape_cast %583 : vector<64xf32> to vector<64x1xf32>
    %cst_196 = arith.constant 3.200000e+01 : f32
    %585 = vector.broadcast %cst_196 : f32 to vector<64x1xf32>
    %586 = arith.divf %584, %585 : vector<64x1xf32>
    %cst_197 = arith.constant 9.99999974E-6 : f32
    %587 = vector.broadcast %cst_197 : f32 to vector<64x1xf32>
    %588 = arith.addf %586, %587 : vector<64x1xf32>
    %589 = math.rsqrt %588 : vector<64x1xf32>
    %590 = vector.broadcast %589 : vector<64x1xf32> to vector<64x32xf32>
    %591 = arith.mulf %581, %590 : vector<64x32xf32>
    %c1312 = arith.constant 1312 : index
    %c0_198 = arith.constant 0 : index
    %592 = vector.load %arg1[%c1312, %c0_198] : memref<1592x128xf32, #tpu.memory_space<vmem>>, vector<1x32xf32>
    %593 = vector.broadcast %592 : vector<1x32xf32> to vector<64x32xf32>
    %594 = arith.mulf %591, %593 : vector<64x32xf32>
    %c1320 = arith.constant 1320 : index
    %c0_199 = arith.constant 0 : index
    %595 = vector.load %arg1[%c1320, %c0_199] : memref<1592x128xf32, #tpu.memory_space<vmem>>, vector<1x32xf32>
    %596 = vector.broadcast %595 : vector<1x32xf32> to vector<64x32xf32>
    %597 = arith.addf %594, %596 : vector<64x32xf32>
    %cst_200 = arith.constant dense<0.000000e+00> : vector<64xf32>
    %598 = vector.multi_reduction <add>, %597, %cst_200 [1] : vector<64x32xf32> to vector<64xf32>
    %599 = vector.shape_cast %598 : vector<64xf32> to vector<64x1xf32>
    %cst_201 = arith.constant 3.200000e+01 : f32
    %600 = vector.broadcast %cst_201 : f32 to vector<64x1xf32>
    %601 = arith.divf %599, %600 : vector<64x1xf32>
    %602 = vector.broadcast %601 : vector<64x1xf32> to vector<64x32xf32>
    %603 = arith.subf %597, %602 : vector<64x32xf32>
    %604 = arith.mulf %603, %603 : vector<64x32xf32>
    %cst_202 = arith.constant dense<0.000000e+00> : vector<64xf32>
    %605 = vector.multi_reduction <add>, %604, %cst_202 [1] : vector<64x32xf32> to vector<64xf32>
    %606 = vector.shape_cast %605 : vector<64xf32> to vector<64x1xf32>
    %cst_203 = arith.constant 3.200000e+01 : f32
    %607 = vector.broadcast %cst_203 : f32 to vector<64x1xf32>
    %608 = arith.divf %606, %607 : vector<64x1xf32>
    %cst_204 = arith.constant 9.99999974E-6 : f32
    %609 = vector.broadcast %cst_204 : f32 to vector<64x1xf32>
    %610 = arith.addf %608, %609 : vector<64x1xf32>
    %611 = math.rsqrt %610 : vector<64x1xf32>
    %612 = vector.broadcast %611 : vector<64x1xf32> to vector<64x32xf32>
    %613 = arith.mulf %603, %612 : vector<64x32xf32>
    %c1328 = arith.constant 1328 : index
    %c0_205 = arith.constant 0 : index
    %614 = vector.load %arg1[%c1328, %c0_205] : memref<1592x128xf32, #tpu.memory_space<vmem>>, vector<1x32xf32>
    %615 = vector.broadcast %614 : vector<1x32xf32> to vector<64x32xf32>
    %616 = arith.mulf %613, %615 : vector<64x32xf32>
    %c1336 = arith.constant 1336 : index
    %c0_206 = arith.constant 0 : index
    %617 = vector.load %arg1[%c1336, %c0_206] : memref<1592x128xf32, #tpu.memory_space<vmem>>, vector<1x32xf32>
    %618 = vector.broadcast %617 : vector<1x32xf32> to vector<64x32xf32>
    %619 = arith.addf %616, %618 : vector<64x32xf32>
    %c1344 = arith.constant 1344 : index
    %c0_207 = arith.constant 0 : index
    %620 = vector.load %arg1[%c1344, %c0_207] : memref<1592x128xf32, #tpu.memory_space<vmem>>, vector<32x16xf32>
    %cst_208 = arith.constant dense<0.000000e+00> : vector<64x16xf32>
    %621 = tpu.matmul %619, %620, %cst_208 {dimension_numbers = #tpu.dot_dimension_numbers<[1], [0], [0], [1], [0, 0, 1, 1], [], []>} : vector<64x32xf32>, vector<32x16xf32>, vector<64x16xf32> -> vector<64x16xf32>
    %c1376 = arith.constant 1376 : index
    %c0_209 = arith.constant 0 : index
    %622 = vector.load %arg1[%c1376, %c0_209] : memref<1592x128xf32, #tpu.memory_space<vmem>>, vector<1x16xf32>
    %623 = vector.broadcast %622 : vector<1x16xf32> to vector<64x16xf32>
    %624 = arith.addf %621, %623 : vector<64x16xf32>
    %cst_210 = arith.constant 0.000000e+00 : f32
    %625 = vector.broadcast %cst_210 : f32 to vector<64x16xf32>
    %626 = arith.cmpf oge, %624, %625 : vector<64x16xf32>
    %cst_211 = arith.constant 0.00999999977 : f32
    %627 = vector.broadcast %cst_211 : f32 to vector<64x16xf32>
    %628 = arith.mulf %627, %624 : vector<64x16xf32>
    %629 = arith.select %626, %624, %628 : vector<64x16xi1>, vector<64x16xf32>
    %c1384 = arith.constant 1384 : index
    %c0_212 = arith.constant 0 : index
    %630 = vector.load %arg1[%c1384, %c0_212] : memref<1592x128xf32, #tpu.memory_space<vmem>>, vector<16x1xf32>
    %cst_213 = arith.constant dense<0.000000e+00> : vector<64x1xf32>
    %631 = tpu.matmul %629, %630, %cst_213 {dimension_numbers = #tpu.dot_dimension_numbers<[1], [0], [0], [1], [0, 0, 1, 1], [], []>} : vector<64x16xf32>, vector<16x1xf32>, vector<64x1xf32> -> vector<64x1xf32>
    %c1400 = arith.constant 1400 : index
    %c0_214 = arith.constant 0 : index
    %632 = vector.load %arg1[%c1400, %c0_214] : memref<1592x128xf32, #tpu.memory_space<vmem>>, vector<1x1xf32>
    %633 = vector.broadcast %632 : vector<1x1xf32> to vector<64x1xf32>
    %634 = arith.addf %631, %633 : vector<64x1xf32>
    %c1584 = arith.constant 1584 : index
    %c0_215 = arith.constant 0 : index
    %635 = vector.load %arg1[%c1584, %c0_215] : memref<1592x128xf32, #tpu.memory_space<vmem>>, vector<2x64xf32>
    %c1520 = arith.constant 1520 : index
    %c0_216 = arith.constant 0 : index
    %636 = vector.load %arg1[%c1520, %c0_216] : memref<1592x128xf32, #tpu.memory_space<vmem>>, vector<64x32xf32>
    %637 = vector.broadcast %634 : vector<64x1xf32> to vector<64x32xf32>
    %638 = arith.mulf %637, %636 : vector<64x32xf32>
    %cst_217 = arith.constant dense<0.000000e+00> : vector<2x32xf32>
    %639 = tpu.matmul %635, %638, %cst_217 {dimension_numbers = #tpu.dot_dimension_numbers<[1], [0], [0], [1], [0, 0, 1, 1], [], []>} : vector<2x64xf32>, vector<64x32xf32>, vector<2x32xf32> -> vector<2x32xf32>
    %640 = vector.extract_strided_slice %639 {offsets = [0, 0], sizes = [2, 16], strides = [1, 1]} : vector<2x32xf32> to vector<2x16xf32>
    %641 = vector.extract_strided_slice %639 {offsets = [0, 16], sizes = [2, 16], strides = [1, 1]} : vector<2x32xf32> to vector<2x16xf32>
    %642 = arith.mulf %640, %641 : vector<2x16xf32>
    %c1408 = arith.constant 1408 : index
    %c0_218 = arith.constant 0 : index
    %643 = vector.load %arg1[%c1408, %c0_218] : memref<1592x128xf32, #tpu.memory_space<vmem>>, vector<16x8xf32>
    %cst_219 = arith.constant dense<0.000000e+00> : vector<2x8xf32>
    %644 = tpu.matmul %642, %643, %cst_219 {dimension_numbers = #tpu.dot_dimension_numbers<[1], [0], [0], [1], [0, 0, 1, 1], [], []>} : vector<2x16xf32>, vector<16x8xf32>, vector<2x8xf32> -> vector<2x8xf32>
    %c1424 = arith.constant 1424 : index
    %c0_220 = arith.constant 0 : index
    %645 = vector.load %arg1[%c1424, %c0_220] : memref<1592x128xf32, #tpu.memory_space<vmem>>, vector<1x8xf32>
    %646 = vector.broadcast %645 : vector<1x8xf32> to vector<2x8xf32>
    %647 = arith.addf %644, %646 : vector<2x8xf32>
    %cst_221 = arith.constant 0.000000e+00 : f32
    %648 = vector.broadcast %cst_221 : f32 to vector<2x8xf32>
    %649 = arith.cmpf oge, %647, %648 : vector<2x8xf32>
    %cst_222 = arith.constant 0.00999999977 : f32
    %650 = vector.broadcast %cst_222 : f32 to vector<2x8xf32>
    %651 = arith.mulf %650, %647 : vector<2x8xf32>
    %652 = arith.select %649, %647, %651 : vector<2x8xi1>, vector<2x8xf32>
    %c1432 = arith.constant 1432 : index
    %c0_223 = arith.constant 0 : index
    %653 = vector.load %arg1[%c1432, %c0_223] : memref<1592x128xf32, #tpu.memory_space<vmem>>, vector<8x1xf32>
    %cst_224 = arith.constant dense<0.000000e+00> : vector<2x1xf32>
    %654 = tpu.matmul %652, %653, %cst_224 {dimension_numbers = #tpu.dot_dimension_numbers<[1], [0], [0], [1], [0, 0, 1, 1], [], []>} : vector<2x8xf32>, vector<8x1xf32>, vector<2x1xf32> -> vector<2x1xf32>
    %c1440 = arith.constant 1440 : index
    %c0_225 = arith.constant 0 : index
    %655 = vector.load %arg1[%c1440, %c0_225] : memref<1592x128xf32, #tpu.memory_space<vmem>>, vector<1x1xf32>
    %656 = vector.broadcast %655 : vector<1x1xf32> to vector<2x1xf32>
    %657 = arith.addf %654, %656 : vector<2x1xf32>
    %cst_226 = arith.constant 0.000000e+00 : f32
    %658 = vector.broadcast %cst_226 : f32 to vector<2x1xf32>
    %659 = arith.subf %658, %657 : vector<2x1xf32>
    %660 = math.exp %659 : vector<2x1xf32>
    %cst_227 = arith.constant 1.000000e+00 : f32
    %661 = vector.broadcast %cst_227 : f32 to vector<2x1xf32>
    %662 = arith.addf %661, %660 : vector<2x1xf32>
    %663 = tpu.reciprocal %662 {approx = true} : vector<2x1xf32> -> vector<2x1xf32>
    %c0_228 = arith.constant 0 : index
    %c0_229 = arith.constant 0 : index
    %664 = vector.load %arg2[%c0_228, %c0_229] : memref<2x1xf32, #tpu.memory_space<vmem>>, vector<2x1xf32>
    tpu.vector_store %arg2[%c0_228, %c0_229], %663 {strides = array<i32>} : memref<2x1xf32, #tpu.memory_space<vmem>>, vector<2x1xf32>,
    return
  }
}

</mosaic_0001>

<bundles_post_ra>
// kernel: forward.1
= control target key start
LH: loop header
LB: loop body
LE: loop exit
PB: predicated region body
PF: predicated region fallthrough
CT: control target
= control target key end

     0   :  { %7 = vsyncpa [#allocation3], 0  ;;  %s13351_s9 = smov [#allocation2]   ;;  %s15369_s0 = inlined_call_operand.vmem [shape: s32[64,1], index: 0, kind: input, shape index: {}]   ;;  %s15370_s1 = inlined_call_operand.hbm [shape: f32[1592,128], index: 1, kind: input, shape index: {}]   ;;  %s15371_s2 = inlined_call_operand.vmem [shape: f32[2,1], index: 2, kind: output, shape index: {}]  }
   0x1   :  { %s15_s10 = sshll.u32 %s13351_s9, 4  ;;  %s13327_s13 = scalar_lea.hbm %s15370_s1, 25472  ;;  %s16_s10 = int_to_ptr.vmem [resolvable:$true] %s15_s10 }
   0x2   :  { %p13328_p0 = scmp.ne.s32.totalorder %s15370_s1, %s13327_s13  ;;  %p13331_p1 = scmp.lt.u32.totalorder %s13327_s13, %s15370_s1 }
   0x4   :  { %p13333_p2 = pnand %p13331_p1, %p13328_p0 }
   0x6   :  { %13336 = shalt.err (!%p13333_p2)
}
   0x7   :  { %s13337_s18 = scalar_lea.vmem %s16_s10, 25472  ;;  %p13342_p4 = scmp.lt.s32.totalorder %s16_s10, %s16_s10 }
   0x8   :  { %p13338_p3 = scmp.ne.s32.totalorder %s16_s10, %s13337_s18  ;;  %p13343_p5 = scmp.lt.s32.totalorder %s13337_s18, %s13337_s18 }
   0xa   :  { %p13344_p6 = por %p13343_p5, %p13342_p4 }
   0xc   :  { %p13345_p7 = pnand %p13344_p6, %p13338_p3 }
   0xe   :  { %13348 = shalt.err (!%p13345_p7)
}
   0xf   :  { %s13352_s19 = smov 128   ;;  %s13353_s20 = smov 8  }
  0x10   :  { %21 = dma.hbm_to_vmem [thread:$0]  %s15370_s1, 25472, %s16_s10, [#allocation3], %s13352_s19, %s13352_s19, %s13353_s20  }
  0x11   :  { %13349 = dma.done.wait [#allocation3], 25472  }
  0x12   :  { %13350 = vsyncadd [#allocation3], 4294941824  ;;  %v13354_v0 = vmov 0   ;;  %v32_v1 = vld [vmem:[%s15369_s0 + $0x10] sm:$0xff]  ;;  %v30_v2 = vld [vmem:[%s15369_s0] sm:$0xff]  ;;  %v38_v27 = vlaneseq  ;;  %vm96_vm0 = vcmask 523264  }
  0x13   :  { %12827 = vset.pattern.permute.xlu1 %v13354_v0  ;;  %12826 = vset.pattern.permute.xlu0 %v13354_v0  ;;  %v33_v3 = vld [vmem:[%s15369_s0 + $0x18] sm:$0xff]  ;;  %v31_v4 = vld [vmem:[%s15369_s0 + $0x8] sm:$0xff]  ;;  %v88_v5 = vld [vmem:[#allocation2] sm:$0xff]  ;;  %v13355_v31 = vmov 0.0   ;;  %vm235_vm9 = vcmask 261120   ;;  %s13357_s10 = smov 32  }
  0x14   :  { %47 = vperm.xlu1 %12827, %v32_v1   ;;  %41 = vperm.xlu0 %12826, %v30_v2   ;;  %v89_v6 = vld [vmem:[#allocation2 + $0x8] sm:$0xff]  ;;  %v90_v7 = vld [vmem:[#allocation2 + $0x10] sm:$0xff]  ;;  %v91_v8 = vld [vmem:[#allocation2 + $0x18] sm:$0xff]  ;;  %v39_v28 = vand.u32 127, %v38_v27  ;;  %s13358_s11 = smov 64   ;;  %vm1326_vm10 = vcmask 1043456  }
  0x15   :  { %v12436_v9 = vpack.c.bf16 %v89_v6, %v88_v5  ;;  %v12440_v10 = vpack.c.bf16 %v91_v8, %v90_v7  ;;  %v92_v11 = vld [vmem:[#allocation2 + $0x20] sm:$0xff]  ;;  %v93_v12 = vld [vmem:[#allocation2 + $0x28] sm:$0xff]  ;;  %v94_v16 = vld [vmem:[#allocation2 + $0x30] sm:$0xff]  ;;  %vm1301_vm11 = vcmask 31744   ;;  %vm9852_vm14 = vcmask 130048   ;;  %s13361_s12 = smov 112  }
  0x16   :  { %v35_v13 = vld [vmem:[%s15369_s0 + $0x28] sm:$0xff]  ;;  %v34_v14 = vld [vmem:[%s15369_s0 + $0x20] sm:$0xff]  ;;  %v12444_v15 = vpack.c.bf16 %v93_v12, %v92_v11  ;;  %v95_v17 = vld [vmem:[#allocation2 + $0x38] sm:$0xff] }
  0x17   :  { %12437 = vmatprep.subr.bf16.mxu0 %v12436_v9  ;;  %v37_v18 = vld [vmem:[%s15369_s0 + $0x38] sm:$0xff]  ;;  %v36_v19 = vld [vmem:[%s15369_s0 + $0x30] sm:$0xff]  ;;  %v12448_v20 = vpack.c.bf16 %v95_v17, %v94_v16  ;;  %v226_v21 = vld [vmem:[#allocation2 + $0x40] sm:$0xff]  ;;  %s13356_s0 = smov 96  }
  0x18   :  { %50 = vperm.xlu1 %12827, %v33_v3   ;;  %44 = vperm.xlu0 %12826, %v31_v4   ;;  %v227_v22 = vld [vmem:[#allocation2 + $0x48] sm:$0xff]  ;;  %v228_v23 = vld [vmem:[#allocation2 + $0x50] sm:$0xff]  ;;  %v229_v25 = vld [vmem:[#allocation2 + $0x58] sm:$0xff] }
  0x19   :  { %12439 = vmatpush3.bf16.msra.mxu0 %v12436_v9  ;;  %v12452_v24 = vpack.c.bf16 %v227_v22, %v226_v21  ;;  %v12456_v26 = vpack.c.bf16 %v229_v25, %v228_v23  ;;  %v373_v46 = vld [vmem:[#allocation2 + $0x68] sm:$0xff]  ;;  %v374_v47 = vld [vmem:[#allocation2 + $0x70] sm:$0xff]  ;;  %v375_v57 = vld [vmem:[#allocation2 + $0x78] sm:$0xff] }
  0x1a   :  { %12441 = vmatprep.subr.bf16.mxu0 %v12440_v10  ;;  %v12460_v48 = vpack.c.bf16 %v374_v47, %v373_v46  ;;  %v376_v58 = vld [vmem:[#allocation2 + $0x80] sm:$0xff]  ;;  %v479_v16 = vld [vmem:[#allocation2 + $0x5d0] sm:$0xff] }
  0x1b   :  { %12453 = vmatprep.subr.bf16.mxu1 %v12452_v24  ;;  %v12464_v59 = vpack.c.bf16 %v376_v58, %v375_v57  ;;  %v10308_v60 = vld [vmem:[#allocation2 + $0x60] ss:$0 sm:$0xff] }
  0x1c   :  { %56 = vperm.xlu1 %12827, %v35_v13   ;;  %53 = vperm.xlu0 %12826, %v34_v14  }
  0x1d   :  { %12443 = vmatpush3.bf16.msra.mxu0 %v12440_v10  ;;  %12455 = vmatpush3.bf16.msra.mxu1 %v12452_v24 }
  0x1e   :  { %12445 = vmatprep.subr.bf16.mxu0 %v12444_v15  ;;  %12457 = vmatprep.subr.bf16.mxu1 %v12456_v26 }
  0x20   :  { %62 = vperm.xlu1 %12827, %v37_v18   ;;  %59 = vperm.xlu0 %12826, %v36_v19  }
  0x21   :  { %12447 = vmatpush3.bf16.msra.mxu0 %v12444_v15  ;;  %12459 = vmatpush3.bf16.msra.mxu1 %v12456_v26 }
  0x22   :  { %12449 = vmatprep.subr.bf16.mxu0 %v12448_v20  ;;  %12461 = vmatprep.subr.bf16.mxu1 %v12460_v48 }
  0x25   :  { %12451 = vmatpush3.bf16.msra.mxu0 %v12448_v20 }
  0x93   :  { %v48_v29 = vpop.permute.xlu1 %47  ;;  %v42_v30 = vpop.permute.xlu0 %41 }
  0x94   :  { %vm64_vm1 = vcmp.eq.s32.totalorder %v39_v28, %v42_v30  ;;  %vm66_vm2 = vcmp.eq.s32.totalorder %v39_v28, %v48_v29 }
  0x95   :  { %v10292_v32 = vsel %vm64_vm1, 1.0, %v13355_v31  ;;  %v10294_v35 = vsel %vm66_vm2, 1.0, %v13355_v31 }
  0x96   :  { %11415 = vmatprep.mubr.msk.f32.mxu0 %vm96_vm0, %v10292_v32 }
  0x97   :  { %v51_v33 = vpop.permute.xlu1 %50  ;;  %v45_v34 = vpop.permute.xlu0 %44 }
  0x98   :  { %vm65_vm3 = vcmp.eq.s32.totalorder %v39_v28, %v45_v34  ;;  %vm67_vm4 = vcmp.eq.s32.totalorder %v39_v28, %v51_v33  ;;  %v480_v33 = vld [vmem:[#allocation2 + $0x5d8] sm:$0xff]  ;;  %v481_v34 = vld [vmem:[#allocation2 + $0x5e0] sm:$0xff] }
  0x99   :  { %v10293_v36 = vsel %vm65_vm3, 1.0, %v13355_v31  ;;  %v10295_v39 = vsel %vm67_vm4, 1.0, %v13355_v31 }
  0x9a   :  { %11416 = vmatmul.mubr.msk.f32.vlgmr.msra.gmra.mrb[0].mxu0 %vm96_vm0, %v10293_v36  ;;  %v10317_v36 = vld [vmem:[#allocation2 + $0x88] ss:$0 sm:$0xff] }
  0x9b   :  { %v57_v37 = vpop.permute.xlu1 %56  ;;  %v54_v38 = vpop.permute.xlu0 %53  ;;  %11418 = vmatprep.mubr.msk.f32.mxu0 %vm96_vm0, %v10294_v35  ;;  %v482_v35 = vld [vmem:[#allocation2 + $0x5e8] sm:$0xff] }
  0x9c   :  { %vm68_vm5 = vcmp.eq.s32.totalorder %v39_v28, %v54_v38  ;;  %vm69_vm6 = vcmp.eq.s32.totalorder %v39_v28, %v57_v37 }
  0x9d   :  { %v10296_v40 = vsel %vm68_vm5, 1.0, %v13355_v31  ;;  %v10297_v43 = vsel %vm69_vm6, 1.0, %v13355_v31  ;;  %vm13360_vm6 = vmmov 0  }
  0x9e   :  { %11419 = vmatmul.mubr.msk.f32.gmra.mrb[2].mxu0 %vm96_vm0, %v10295_v39 }
  0x9f   :  { %v63_v41 = vpop.permute.xlu1 %62  ;;  %11421 = vmatprep.mubr.msk.f32.mxu0 %vm96_vm0, %v10296_v40  ;;  %v60_v42 = vpop.permute.xlu0 %59 }
  0xa0   :  { %vm70_vm7 = vcmp.eq.s32.totalorder %v39_v28, %v60_v42  ;;  %vm71_vm8 = vcmp.eq.s32.totalorder %v39_v28, %v63_v41 }
  0xa1   :  { %v10298_v44 = vsel %vm70_vm7, 1.0, %v13355_v31  ;;  %v10299_v45 = vsel %vm71_vm8, 1.0, %v13355_v31  ;;  %vm10206_vm7 = vcmask 64512   ;;  %vm10285_vm8 = vcmask 1024  }
  0xa2   :  { %11422 = vmatmul.mubr.msk.f32.gmra.mrb[4].mxu0 %vm96_vm0, %v10297_v43 }
  0xa3   :  { %11424 = vmatprep.mubr.msk.f32.mxu0 %vm96_vm0, %v10298_v44 }
  0xa6   :  { %11425 = vmatmul.mubr.msk.f32.gmra.mrb[6].mxu0 %vm96_vm0, %v10299_v45 }
  0xa7   :  { %11469 = vmatprep.mubr.msk.f32.mxu0 %vm235_vm9, %v479_v16 }
 0x16d   :  { %v13429_v49 = vpop.f32.mrb[0].mxu0 }
 0x16e   :  { %v13431_v50 = vpop.f32.mrb[1].mxu0 }
 0x16f   :  { %11435 = vmatprep.mubr.msk.f32.mxu1 %vm235_vm9, %v13431_v50 }
 0x170   :  { %11436 = vmatmul.mubr.msk.f32.vlgmr.msra.gmra.mrb[0].mxu1 %vm235_vm9, %v13429_v49 }
 0x171   :  { %v13437_v51 = vpop.f32.mrb[2].mxu0  ;;  %12463 = vmatpush3.bf16.msra.mxu1 %v12460_v48 }
 0x172   :  { %v13439_v52 = vpop.f32.mrb[3].mxu0  ;;  %12465 = vmatprep.subr.bf16.mxu1 %v12464_v59 }
 0x173   :  { %11438 = vmatprep.mubr.msk.f32.mxu1 %vm235_vm9, %v13439_v52 }
 0x174   :  { %11439 = vmatmul.mubr.msk.f32.gmra.mrb[2].mxu1 %vm235_vm9, %v13437_v51 }
 0x175   :  { %v13445_v53 = vpop.f32.mrb[4].mxu0  ;;  %12467 = vmatpush3.bf16.msra.mxu1 %v12464_v59 }
 0x176   :  { %v13447_v54 = vpop.f32.mrb[5].mxu0 }
 0x177   :  { %11441 = vmatprep.mubr.msk.f32.mxu1 %vm235_vm9, %v13447_v54 }
 0x178   :  { %11442 = vmatmul.mubr.msk.f32.gmra.mrb[4].mxu1 %vm235_vm9, %v13445_v53 }
 0x179   :  { %v13453_v55 = vpop.f32.mrb[6].mxu0 }
 0x17a   :  { %v13455_v56 = vpop.f32.mrb[7].mxu0 }
 0x17b   :  { %11444 = vmatprep.mubr.msk.f32.mxu1 %vm235_vm9, %v13455_v56 }
 0x17c   :  { %11445 = vmatmul.mubr.msk.f32.gmra.mrb[6].mxu1 %vm235_vm9, %v13453_v55 }
 0x243   :  { %v11437_v61 = vpop.f32.mrb[0].mxu1 }
 0x244   :  { %v332_v62 = vadd.f32 %v11437_v61, %v10308_v60  ;;  %v326_v63 = vpop.f32.mrb[1].mxu1 }
 0x245   :  { %v327_v0 = vadd.f32 %v10308_v60, %v326_v63 }
 0x246   :  { %v366_v3 = vmax.f32 %v332_v62, 0.0 }
 0x247   :  { %v365_v1 = vmax.f32 %v327_v0, 0.0  ;;  %v11440_v2 = vpop.f32.mrb[2].mxu1 }
 0x248   :  { %v342_v4 = vadd.f32 %v11440_v2, %v10308_v60  ;;  %v336_v5 = vpop.f32.mrb[3].mxu1 }
 0x249   :  { %v337_v6 = vadd.f32 %v10308_v60, %v336_v5  ;;  %11455 = vmatprep.mubr.msk.f32.mxu1 %vm235_vm9, %v365_v1 }
 0x24a   :  { %11456 = vmatmul.mubr.msk.f32.vlgmr.msra.gmra.mrb[8].mxu1 %vm235_vm9, %v366_v3  ;;  %v368_v9 = vmax.f32 %v342_v4, 0.0 }
 0x24b   :  { %v367_v7 = vmax.f32 %v337_v6, 0.0  ;;  %v11443_v8 = vpop.f32.mrb[4].mxu1 }
 0x24c   :  { %v13463_v10 = vadd.f32 %v11443_v8, %v10308_v60  ;;  %v346_v11 = vpop.f32.mrb[5].mxu1  ;;  %v754_v8 = vld [vmem:[#allocation2 + $0x98] sm:$0xff] }
 0x24d   :  { %v13465_v12 = vadd.f32 %v10308_v60, %v346_v11  ;;  %11458 = vmatprep.mubr.msk.f32.mxu1 %vm235_vm9, %v367_v7  ;;  %v753_v7 = vld [vmem:[#allocation2 + $0x90] sm:$0xff] }
 0x24e   :  { %v370_v13 = vmax.f32 %v13463_v10, 0.0  ;;  %11459 = vmatmul.mubr.msk.f32.gmra.mrb[10].mxu1 %vm235_vm9, %v368_v9  ;;  %v12484_v9 = vpack.c.bf16 %v754_v8, %v753_v7 }
 0x24f   :  { %v369_v14 = vmax.f32 %v13465_v12, 0.0  ;;  %v11446_v15 = vpop.f32.mrb[6].mxu1  ;;  %11483 = vmatprep.mubr.msk.f32.mxu1 %vm235_vm9, %v479_v16 }
 0x250   :  { %v13471_v17 = vadd.f32 %v11446_v15, %v10308_v60  ;;  %v356_v18 = vpop.f32.mrb[7].mxu1 }
 0x251   :  { %v12828_v19 = vpack.i.bf16 %v370_v13, %v369_v14  ;;  %v13479_v20 = vadd.f32 %v10308_v60, %v356_v18 }
 0x252   :  { %v372_v21 = vmax.f32 %v13471_v17, 0.0 }
 0x253   :  { %v371_v22 = vmax.f32 %v13479_v20, 0.0  ;;  %12829 = vrot.lane.b32.xlu0 %v12828_v19, %s13356_s0 }
 0x255   :  { %v12833_v23 = vpack.i.bf16 %v372_v21, %v371_v22 }
 0x257   :  { %12834 = vrot.lane.b32.xlu1 %v12833_v23, %s13356_s0  ;;  %v755_v23 = vld [vmem:[#allocation2 + $0xa0] sm:$0xff] }
 0x2c5   :  { %v12830_v24 = vpop.permute.xlu0 %12829 }
 0x2c6   :  { %v12832_v25 = vunpack.i.h.bf16 %v12830_v24  ;;  %v12831_v26 = vunpack.i.l.bf16 %v12830_v24  ;;  %v756_v24 = vld [vmem:[#allocation2 + $0xa8] sm:$0xff] }
 0x2c8   :  { %v12476_v27 = vpack.c.bf16 %v12832_v25, %v12831_v26 }
 0x2c9   :  { %v12835_v28 = vpop.permute.xlu1 %12834 }
 0x2ca   :  { %v12837_v29 = vunpack.i.h.bf16 %v12835_v28  ;;  %v12836_v30 = vunpack.i.l.bf16 %v12835_v28  ;;  %12477 = vmatprep.subr.bf16.mxu1 %v12476_v27 }
 0x2cb   :  { %12479 = vmatpush3.bf16.msra.mxu1 %v12476_v27  ;;  %v12488_v27 = vpack.c.bf16 %v756_v24, %v755_v23 }
 0x2cc   :  { %v12480_v32 = vpack.c.bf16 %v12837_v29, %v12836_v30 }
 0x2ce   :  { %12481 = vmatprep.subr.bf16.mxu1 %v12480_v32 }
 0x2cf   :  { %12483 = vmatpush3.bf16.msra.mxu1 %v12480_v32 }
 0x2d2   :  { %11484 = vmatmul.mubr.msk.f32.vlgmr.msra.gmra.mrb[12].mxu1 %vm235_vm9, %v480_v33 }
 0x2d3   :  { %11486 = vmatprep.mubr.msk.f32.mxu1 %vm235_vm9, %v481_v34 }
 0x2d6   :  { %11487 = vmatmul.mubr.msk.f32.gmra.mrb[14].mxu1 %vm235_vm9, %v482_v35 }
 0x31d   :  { %v11457_v37 = vpop.f32.mrb[8].mxu1 }
 0x31e   :  { %v466_v38 = vadd.f32 %v11457_v37, %v10317_v36  ;;  %v460_v39 = vpop.f32.mrb[9].mxu1 }
 0x31f   :  { %v461_v40 = vadd.f32 %v10317_v36, %v460_v39 }
 0x321   :  { %v12468_v41 = vpack.c.bf16 %v466_v38, %v461_v40  ;;  %v11460_v42 = vpop.f32.mrb[10].mxu1 }
 0x322   :  { %v476_v43 = vadd.f32 %v11460_v42, %v10317_v36  ;;  %v470_v44 = vpop.f32.mrb[11].mxu1  ;;  %v26_v42 = vld [vmem:[#allocation2 + $0x5b0] sm:$0xff] }
 0x323   :  { %v471_v45 = vadd.f32 %v10317_v36, %v470_v44  ;;  %12469 = vmatprep.subr.bf16.mxu0 %v12468_v41 }
 0x324   :  { %12471 = vmatpush3.bf16.msra.mxu0 %v12468_v41  ;;  %v25_v41 = vld [vmem:[#allocation2 + $0x5a8] sm:$0xff] }
 0x325   :  { %v12472_v46 = vpack.c.bf16 %v476_v43, %v471_v45 }
 0x327   :  { %12473 = vmatprep.subr.bf16.mxu0 %v12472_v46 }
 0x328   :  { %12475 = vmatpush3.bf16.msra.mxu0 %v12472_v46 }
 0x329   :  { %12485 = vmatprep.subr.bf16.mxu0 %v12484_v9 }
 0x32b   :  { %11470 = vmatmul.mubr.msk.f32.vlgmr.msra.gmra.mrb[8].mxu0 %vm235_vm9, %v480_v33 }
 0x32c   :  { %11472 = vmatprep.mubr.msk.f32.mxu0 %vm235_vm9, %v481_v34  ;;  %12487 = vmatpush3.bf16.msra.mxu0 %v12484_v9 }
 0x32d   :  { %12489 = vmatprep.subr.bf16.mxu0 %v12488_v27 }
 0x32f   :  { %11473 = vmatmul.mubr.msk.f32.gmra.mrb[10].mxu0 %vm235_vm9, %v482_v35 }
 0x330   :  { %12491 = vmatpush3.bf16.msra.mxu0 %v12488_v27 }
 0x3a5   :  { %v11485_v47 = vpop.f32.mrb[12].mxu1 }
 0x3a6   :  { %v662_v48 = vpop.f32.mrb[13].mxu1  ;;  %v730_v16 = vmul.f32 %v11485_v47, %v466_v38 }
 0x3a8   :  { %v736_v20 = vsel %vm235_vm9, %v730_v16, 0.0 }
 0x3a9   :  { %v11488_v57 = vpop.f32.mrb[14].mxu1 }
 0x3aa   :  { %v672_v58 = vpop.f32.mrb[15].mxu1  ;;  %v732_v25 = vmul.f32 %v11488_v57, %v476_v43  ;;  %v28_v43 = vld [vmem:[#allocation2 + $0x5c0] sm:$0xff] }
 0x3ab   :  { %v731_v17 = vmul.f32 %v672_v58, %v471_v45 }
 0x3ac   :  { %v742_v28 = vsel %vm235_vm9, %v732_v25, 0.0 }
 0x3fe   :  { %v11471_v59 = vpop.f32.mrb[8].mxu0 }
 0x3ff   :  { %v561_v60 = vpop.f32.mrb[9].mxu0  ;;  %687 = vrot.lane.b32.xlu1 %v11471_v59, %s13357_s10 }
 0x400   :  { %685 = vrot.lane.b32.xlu0 %v561_v60, %s13357_s10 }
 0x402   :  { %v11474_v61 = vpop.f32.mrb[10].mxu0 }
 0x403   :  { %v571_v62 = vpop.f32.mrb[11].mxu0  ;;  %691 = vrot.lane.b32.xlu1 %v11474_v61, %s13357_s10 }
 0x404   :  { %689 = vrot.lane.b32.xlu0 %v571_v62, %s13357_s10 }
 0x471   :  { %v688_v63 = vpop.permute.xlu1 %687 }
 0x472   :  { %v698_v0 = vmul.f32 %v688_v63, %v370_v13  ;;  %v686_v1 = vpop.permute.xlu0 %685  ;;  %v729_v13 = vmul.f32 %v662_v48, %v461_v40 }
 0x473   :  { %v697_v2 = vmul.f32 %v686_v1, %v369_v14 }
 0x474   :  { %707 = vrot.lane.b32.xlu1 %v698_v0, %s13356_s0  ;;  %v733_v19 = vsel %vm235_vm9, %v729_v13, 0.0 }
 0x475   :  { %v692_v3 = vpop.permute.xlu1 %691  ;;  %705 = vrot.lane.b32.xlu0 %v697_v2, %s13356_s0 }
 0x476   :  { %v700_v4 = vmul.f32 %v692_v3, %v372_v21  ;;  %v690_v5 = vpop.permute.xlu0 %689  ;;  %v739_v21 = vsel %vm235_vm9, %v731_v17, 0.0 }
 0x477   :  { %v699_v6 = vmul.f32 %v690_v5, %v371_v22 }
 0x478   :  { %711 = vrot.lane.b32.xlu1 %v700_v4, %s13356_s0 }
 0x479   :  { %709 = vrot.lane.b32.xlu0 %v699_v6, %s13356_s0 }
 0x4e6   :  { %v708_v10 = vpop.permute.xlu1 %707 }
 0x4e7   :  { %v706_v11 = vpop.permute.xlu0 %705  ;;  %v720_v12 = vsel %vm235_vm9, %v708_v10, 0.0 }
 0x4e8   :  { %721 = vadd.xlane.f32.xlu1 %v720_v12  ;;  %v717_v14 = vsel %vm235_vm9, %v706_v11, 0.0 }
 0x4e9   :  { %718 = vadd.xlane.f32.xlu0 %v717_v14 }
 0x4ea   :  { %v712_v22 = vpop.permute.xlu1 %711 }
 0x4eb   :  { %v710_v15 = vpop.permute.xlu0 %709  ;;  %v726_v26 = vsel %vm235_vm9, %v712_v22, 0.0 }
 0x4ec   :  { %v723_v18 = vsel %vm235_vm9, %v710_v15, 0.0 }
 0x4ed   :  { %724 = vadd.xlane.f32.xlu1 %v723_v18  ;;  %734 = vadd.xlane.f32.xlu0 %v733_v19 }
 0x4f1   :  { %737 = vadd.xlane.f32.xlu0 %v736_v20  ;;  %740 = vadd.xlane.f32.xlu1 %v739_v21 }
 0x4f5   :  { %727 = vadd.xlane.f32.xlu0 %v726_v26 }
 0x4f9   :  { %743 = vadd.xlane.f32.xlu0 %v742_v28 }
 0x575   :  { %v722_v29 = vpop.xlane.xlu1 %721 }
 0x576   :  { %v719_v30 = vpop.xlane.xlu0 %718  ;;  %v13515_v33 = vmul.f32 %v13429_v49, %v722_v29  ;;  %v13595_v29 = vld [vmem:[#allocation2 + $0x5c8] sm:$0xf] }
 0x577   :  { %v13512_v32 = vmul.f32 %v719_v30, %v13431_v50  ;;  %v1612_v30 = vld [vmem:[#allocation2 + $0xb8] sm:$0xff] }
 0x579   :  { %11497 = vmatprep.mubr.msk.f32.mxu0 %vm235_vm9, %v13512_v32 }
 0x57a   :  { %11498 = vmatmul.mubr.msk.f32.vlgmr.msra.gmra.mrb[12].mxu0 %vm235_vm9, %v13515_v33  ;;  %v735_v34 = vpop.xlane.xlu0 %734  ;;  %v725_v35 = vpop.xlane.xlu1 %724 }
 0x57b   :  { %v13522_v36 = vmul.f32 %v735_v34, %v13447_v54  ;;  %v13530_v49 = vmul.f32 %v725_v35, %v13439_v52  ;;  %v1613_v34 = vld [vmem:[#allocation2 + $0xc0] sm:$0xff] }
 0x57c   :  { %v13605_v35 = vpack.c.bf16 %v1613_v34, %v1612_v30 }
 0x57d   :  { %11500 = vmatprep.mubr.msk.f32.mxu0 %vm235_vm9, %v13522_v36 }
 0x57e   :  { %v738_v37 = vpop.xlane.xlu0 %737  ;;  %v741_v38 = vpop.xlane.xlu1 %740 }
 0x57f   :  { %v13527_v50 = vmul.f32 %v13445_v53, %v738_v37  ;;  %v13540_v40 = vmul.f32 %v741_v38, %v13455_v56  ;;  %v27_v56 = vld [vmem:[#allocation2 + $0x5b8] sm:$0xff] }
 0x580   :  { %v13557_v44 = vpack.c.bf16 %v28_v43, %v27_v56 }
 0x581   :  { %11501 = vmatmul.mubr.msk.f32.gmra.mrb[14].mxu0 %vm235_vm9, %v13527_v50 }
 0x582   :  { %11503 = vmatprep.mubr.msk.f32.mxu0 %vm235_vm9, %v13530_v49  ;;  %v728_v39 = vpop.xlane.xlu0 %727 }
 0x583   :  { %v13537_v54 = vmul.f32 %v13437_v51, %v728_v39  ;;  %v13551_v51 = vpack.c.bf16 %v26_v42, %v25_v41 }
 0x585   :  { %11504 = vmatmul.mubr.msk.f32.gmra.mrb[16].mxu0 %vm235_vm9, %v13537_v54  ;;  %12493 = vmatprep.subr.bf16.mxu1 %v13551_v51 }
 0x586   :  { %v744_v53 = vpop.xlane.xlu0 %743  ;;  %11506 = vmatprep.mubr.msk.f32.mxu0 %vm235_vm9, %v13540_v40  ;;  %12501 = vmatprep.subr.bf16.mxu0 %v13551_v51 }
 0x587   :  { %v13547_v52 = vmul.f32 %v13453_v55, %v744_v53  ;;  %12495 = vmatpush3.bf16.msra.mxu1 %v13551_v51  ;;  %12503 = vmatpush3.bf16.msra.mxu0 %v13551_v51  ;;  %v10330_v55 = vld [vmem:[#allocation2 + $0xb0] ss:$0 sm:$0xff] }
 0x588   :  { %12497 = vmatprep.subr.bf16.mxu1 %v13557_v44  ;;  %12505 = vmatprep.subr.bf16.mxu0 %v13557_v44 }
 0x589   :  { %11507 = vmatmul.mubr.msk.f32.gmra.mrb[18].mxu0 %vm235_vm9, %v13547_v52 }
 0x58b   :  { %12499 = vmatpush3.bf16.msra.mxu1 %v13557_v44  ;;  %12507 = vmatpush3.bf16.msra.mxu0 %v13557_v44 }
 0x58c   :  { %11549 = vmatprep.subr.msk.mxu1 %vm1326_vm10, %v13595_v29  ;;  %11563 = vmatprep.subr.msk.mxu0 %vm1326_vm10, %v13595_v29 }
 0x64d   :  { %v11499_v45 = vpop.f32.mrb[12].mxu0 }
 0x64e   :  { %v858_v46 = vadd.f32 %v11499_v45, %v10330_v55  ;;  %v852_v47 = vpop.f32.mrb[13].mxu0 }
 0x64f   :  { %v853_v48 = vadd.f32 %v10330_v55, %v852_v47 }
 0x650   :  { %901 = vrot.lane.b32.xlu1 %v858_v46, %s13356_s0 }
 0x654   :  { %v11502_v57 = vpop.f32.mrb[14].mxu0  ;;  %899 = vrot.lane.b32.xlu1 %v853_v48, %s13356_s0 }
 0x655   :  { %v862_v58 = vpop.f32.mrb[15].mxu0  ;;  %v868_v3 = vadd.f32 %v11502_v57, %v10330_v55 }
 0x656   :  { %v863_v1 = vadd.f32 %v10330_v55, %v862_v58 }
 0x658   :  { %v11505_v59 = vpop.f32.mrb[16].mxu0 }
 0x659   :  { %v878_v60 = vadd.f32 %v11505_v59, %v10330_v55  ;;  %v872_v61 = vpop.f32.mrb[17].mxu0 }
 0x65a   :  { %v873_v62 = vadd.f32 %v10330_v55, %v872_v61 }
 0x65b   :  { %909 = vrot.lane.b32.xlu1 %v878_v60, %s13356_s0 }
 0x65c   :  { %907 = vrot.lane.b32.xlu0 %v873_v62, %s13356_s0  ;;  %v11508_v63 = vpop.f32.mrb[18].mxu0 }
 0x65d   :  { %v882_v0 = vpop.f32.mrb[19].mxu0  ;;  %v888_v4 = vadd.f32 %v11508_v63, %v10330_v55 }
 0x65e   :  { %v883_v2 = vadd.f32 %v10330_v55, %v882_v0 }
 0x660   :  { %903 = vrot.lane.b32.xlu0 %v863_v1, %s13356_s0  ;;  %911 = vrot.lane.b32.xlu1 %v883_v2, %s13356_s0 }
 0x664   :  { %905 = vrot.lane.b32.xlu0 %v868_v3, %s13356_s0  ;;  %913 = vrot.lane.b32.xlu1 %v888_v4, %s13356_s0 }
 0x668   :  { %1435 = vrot.lane.b32.xlu0 %v853_v48, %s13358_s11  ;;  %1443 = vrot.lane.b32.xlu1 %v873_v62, %s13358_s11 }
 0x66c   :  { %1437 = vrot.lane.b32.xlu0 %v858_v46, %s13358_s11  ;;  %1445 = vrot.lane.b32.xlu1 %v878_v60, %s13358_s11 }
 0x670   :  { %1439 = vrot.lane.b32.xlu0 %v863_v1, %s13358_s11  ;;  %1447 = vrot.lane.b32.xlu1 %v883_v2, %s13358_s11 }
 0x674   :  { %1441 = vrot.lane.b32.xlu0 %v868_v3, %s13358_s11  ;;  %1449 = vrot.lane.b32.xlu1 %v888_v4, %s13358_s11 }
 0x6c2   :  { %v902_v5 = vpop.permute.xlu1 %901 }
 0x6c3   :  { %v924_v8 = vmul.f32 %v902_v5, %v858_v46  ;;  %v1073_v23 = vmul.f32 %v902_v5, %v878_v60 }
 0x6c6   :  { %v900_v6 = vpop.permute.xlu1 %899 }
 0x6c7   :  { %v923_v7 = vmul.f32 %v900_v6, %v853_v48  ;;  %v1072_v21 = vmul.f32 %v900_v6, %v873_v62 }
 0x6c9   :  { %11517 = vmatprep.mubr.msk.f32.mxu1 %vm235_vm9, %v923_v7 }
 0x6ca   :  { %11518 = vmatmul.mubr.msk.f32.vlgmr.msra.gmra.mrb[16].mxu1 %vm235_vm9, %v924_v8 }
 0x6cb   :  { %11550 = vmatpush3.msk.msra.mxu1 %vm1326_vm10, %v13595_v29 }
 0x6cc   :  { %12509 = vmatprep.subr.bf16.mxu1 %v13605_v35 }
 0x6cd   :  { %v910_v9 = vpop.permute.xlu1 %909 }
 0x6ce   :  { %v908_v10 = vpop.permute.xlu0 %907  ;;  %v1069_v12 = vmul.f32 %v910_v9, %v858_v46  ;;  %v928_v24 = vmul.f32 %v910_v9, %v878_v60 }
 0x6cf   :  { %v1068_v11 = vmul.f32 %v908_v10, %v853_v48  ;;  %v927_v22 = vmul.f32 %v908_v10, %v873_v62 }
 0x6d1   :  { %11537 = vmatprep.mubr.msk.f32.mxu0 %vm235_vm9, %v1068_v11 }
 0x6d2   :  { %v904_v13 = vpop.permute.xlu0 %903  ;;  %v912_v14 = vpop.permute.xlu1 %911  ;;  %11538 = vmatmul.mubr.msk.f32.vlgmr.msra.gmra.mrb[20].mxu0 %vm235_vm9, %v1069_v12 }
 0x6d3   :  { %v925_v15 = vmul.f32 %v904_v13, %v863_v1  ;;  %v1070_v16 = vmul.f32 %v912_v14, %v863_v1  ;;  %v1074_v25 = vmul.f32 %v904_v13, %v883_v2  ;;  %v929_v26 = vmul.f32 %v912_v14, %v883_v2  ;;  %11564 = vmatpush3.msk.msra.mxu0 %vm1326_vm10, %v13595_v29 }
 0x6d5   :  { %11520 = vmatprep.mubr.msk.f32.mxu1 %vm235_vm9, %v925_v15  ;;  %11540 = vmatprep.mubr.msk.f32.mxu0 %vm235_vm9, %v1070_v16 }
 0x6d6   :  { %v906_v17 = vpop.permute.xlu0 %905  ;;  %v914_v18 = vpop.permute.xlu1 %913 }
 0x6d7   :  { %v926_v19 = vmul.f32 %v906_v17, %v868_v3  ;;  %v1071_v20 = vmul.f32 %v914_v18, %v868_v3  ;;  %v1075_v27 = vmul.f32 %v906_v17, %v888_v4  ;;  %v930_v28 = vmul.f32 %v914_v18, %v888_v4 }
 0x6d9   :  { %11521 = vmatmul.mubr.msk.f32.gmra.mrb[18].mxu1 %vm235_vm9, %v926_v19  ;;  %11541 = vmatmul.mubr.msk.f32.gmra.mrb[22].mxu0 %vm235_vm9, %v1071_v20 }
 0x6da   :  { %11523 = vmatprep.mubr.msk.f32.mxu1 %vm235_vm9, %v927_v22  ;;  %11543 = vmatprep.mubr.msk.f32.mxu0 %vm235_vm9, %v1072_v21 }
 0x6dd   :  { %11524 = vmatmul.mubr.msk.f32.gmra.mrb[20].mxu1 %vm235_vm9, %v928_v24  ;;  %11544 = vmatmul.mubr.msk.f32.gmra.mrb[24].mxu0 %vm235_vm9, %v1073_v23 }
 0x6de   :  { %11526 = vmatprep.mubr.msk.f32.mxu1 %vm235_vm9, %v929_v26  ;;  %11546 = vmatprep.mubr.msk.f32.mxu0 %vm235_vm9, %v1074_v25 }
 0x6e1   :  { %11527 = vmatmul.mubr.msk.f32.gmra.mrb[22].mxu1 %vm235_vm9, %v930_v28  ;;  %11547 = vmatmul.mubr.msk.f32.gmra.mrb[26].mxu0 %vm235_vm9, %v1075_v27 }
 0x79d   :  { %v11519_v37 = vpop.f32.mrb[16].mxu1 }
 0x79e   :  { %v1021_v38 = vpop.f32.mrb[17].mxu1  ;;  %v1061_v53 = vmul.f32 0.35355338, %v11519_v37 }
 0x79f   :  { %v1060_v56 = vmul.f32 0.35355338, %v1021_v38 }
 0x7a5   :  { %v11539_v39 = vpop.f32.mrb[20].mxu0 }
 0x7a6   :  { %v1206_v41 = vmul.f32 0.35355338, %v11539_v39  ;;  %v1166_v42 = vpop.f32.mrb[21].mxu0 }
 0x7a7   :  { %v1205_v43 = vmul.f32 0.35355338, %v1166_v42 }
 0x7a8   :  { %v1214_v55 = vmax.f32 %v1061_v53, %v1206_v41 }
 0x7a9   :  { %v1213_v45 = vmax.f32 %v1060_v56, %v1205_v43 }
 0x7aa   :  { %v1222_v46 = vsub.f32 %v1061_v53, %v1214_v55  ;;  %v1246_v47 = vsub.f32 %v1206_v41, %v1214_v55 }
 0x7ab   :  { %v1221_v48 = vsub.f32 %v1060_v56, %v1213_v45  ;;  %v1245_v57 = vsub.f32 %v1205_v43, %v1213_v45 }
 0x7ac   :  { %v1231_v58 = vmul.f32 1.442695, %v1222_v46  ;;  %v1255_v59 = vmul.f32 1.442695, %v1246_v47  ;;  %v11522_v60 = vpop.f32.mrb[18].mxu1  ;;  %v11542_v61 = vpop.f32.mrb[22].mxu0 }
 0x7ad   :  { %v1229_v62 = vmul.f32 1.442695, %v1221_v48  ;;  %v1253_v63 = vmul.f32 1.442695, %v1245_v57  ;;  %v1063_v0 = vmul.f32 0.35355338, %v11522_v60 }
 0x7ae   :  { %12838 = vpow2.f32 %v1231_v58  ;;  %v1208_v1 = vmul.f32 0.35355338, %v11542_v61  ;;  %v1031_v2 = vpop.f32.mrb[19].mxu1  ;;  %v1176_v3 = vpop.f32.mrb[23].mxu0 }
 0x7af   :  { %12840 = vpow2.f32 %v1255_v59  ;;  %v1062_v4 = vmul.f32 0.35355338, %v1031_v2  ;;  %v1207_v5 = vmul.f32 0.35355338, %v1176_v3 }
 0x7b0   :  { %12842 = vpow2.f32 %v1229_v62  ;;  %v1216_v6 = vmax.f32 %v1063_v0, %v1208_v1  ;;  %v11525_v7 = vpop.f32.mrb[20].mxu1  ;;  %v11545_v8 = vpop.f32.mrb[24].mxu0 }
 0x7b1   :  { %12844 = vpow2.f32 %v1253_v63  ;;  %v1215_v9 = vmax.f32 %v1062_v4, %v1207_v5  ;;  %v1065_v10 = vmul.f32 0.35355338, %v11525_v7  ;;  %v1210_v11 = vmul.f32 0.35355338, %v11545_v8  ;;  %v1041_v12 = vpop.f32.mrb[21].mxu1  ;;  %v1186_v13 = vpop.f32.mrb[25].mxu0 }
 0x7b2   :  { %v1224_v14 = vsub.f32 %v1063_v0, %v1216_v6  ;;  %v1248_v15 = vsub.f32 %v1208_v1, %v1216_v6  ;;  %v1064_v16 = vmul.f32 0.35355338, %v1041_v12  ;;  %v1209_v17 = vmul.f32 0.35355338, %v1186_v13 }
 0x7b3   :  { %v1223_v18 = vsub.f32 %v1062_v4, %v1215_v9  ;;  %v1247_v19 = vsub.f32 %v1207_v5, %v1215_v9  ;;  %v1218_v20 = vmax.f32 %v1065_v10, %v1210_v11 }
 0x7b4   :  { %v1235_v21 = vmul.f32 1.442695, %v1224_v14  ;;  %v1259_v22 = vmul.f32 1.442695, %v1248_v15  ;;  %v1217_v23 = vmax.f32 %v1064_v16, %v1209_v17  ;;  %v11528_v24 = vpop.f32.mrb[22].mxu1  ;;  %v11548_v25 = vpop.f32.mrb[26].mxu0 }
 0x7b5   :  { %v1233_v26 = vmul.f32 1.442695, %v1223_v18  ;;  %v1257_v27 = vmul.f32 1.442695, %v1247_v19  ;;  %v1226_v28 = vsub.f32 %v1065_v10, %v1218_v20  ;;  %v1250_v30 = vsub.f32 %v1210_v11, %v1218_v20  ;;  %v1051_v34 = vpop.f32.mrb[23].mxu1  ;;  %v1196_v37 = vpop.f32.mrb[27].mxu0 }
 0x7b6   :  { %12846 = vpow2.f32 %v1235_v21  ;;  %v1225_v38 = vsub.f32 %v1064_v16, %v1217_v23  ;;  %v1249_v39 = vsub.f32 %v1209_v17, %v1217_v23  ;;  %v1067_v53 = vmul.f32 0.35355338, %v11528_v24 }
 0x7b7   :  { %12848 = vpow2.f32 %v1259_v22  ;;  %v1239_v41 = vmul.f32 1.442695, %v1226_v28  ;;  %v1263_v42 = vmul.f32 1.442695, %v1250_v30  ;;  %v1212_v56 = vmul.f32 0.35355338, %v11548_v25 }
 0x7b8   :  { %v12839_v43 = vpop.eup %12838  ;;  %12850 = vpow2.f32 %v1233_v26  ;;  %v1066_v55 = vmul.f32 0.35355338, %v1051_v34  ;;  %v1237_v46 = vmul.f32 1.442695, %v1225_v38  ;;  %v1211_v48 = vmul.f32 0.35355338, %v1196_v37 }
 0x7b9   :  { %v12841_v45 = vpop.eup %12840  ;;  %12852 = vpow2.f32 %v1257_v27  ;;  %v1220_v47 = vmax.f32 %v1067_v53, %v1212_v56  ;;  %v1261_v59 = vmul.f32 1.442695, %v1249_v39 }
 0x7ba   :  { %v12843_v57 = vpop.eup %12842  ;;  %v1270_v58 = vadd.f32 %v12841_v45, %v12839_v43  ;;  %12854 = vpow2.f32 %v1239_v41  ;;  %v1219_v63 = vmax.f32 %v1066_v55, %v1211_v48 }
 0x7bb   :  { %v12845_v60 = vpop.eup %12844  ;;  %12856 = vpow2.f32 %v1263_v42  ;;  %v1228_v61 = vsub.f32 %v1067_v53, %v1220_v47  ;;  %v1252_v62 = vsub.f32 %v1212_v56, %v1220_v47 }
 0x7bc   :  { %12858 = vrcp.f32 %v1270_v58  ;;  %v1269_v0 = vadd.f32 %v12845_v60, %v12843_v57  ;;  %v1227_v3 = vsub.f32 %v1066_v55, %v1219_v63  ;;  %v1251_v4 = vsub.f32 %v1211_v48, %v1219_v63 }
 0x7bd   :  { %12860 = vpow2.f32 %v1237_v46  ;;  %v1243_v1 = vmul.f32 1.442695, %v1228_v61  ;;  %v1267_v2 = vmul.f32 1.442695, %v1252_v62  ;;  %v1614_v61 = vld [vmem:[#allocation2 + $0xc8] sm:$0xff]  ;;  %v1615_v62 = vld [vmem:[#allocation2 + $0xd0] sm:$0xff] }
 0x7be   :  { %12862 = vrcp.f32 %v1269_v0  ;;  %v1241_v5 = vmul.f32 1.442695, %v1227_v3  ;;  %v1265_v7 = vmul.f32 1.442695, %v1251_v4  ;;  %v12512_v63 = vpack.c.bf16 %v1615_v62, %v1614_v61  ;;  %v1436_v0 = vpop.permute.xlu0 %1435 }
 0x7bf   :  { %12864 = vpow2.f32 %v1261_v59 }
 0x7c0   :  { %v12847_v6 = vpop.eup %12846  ;;  %12866 = vpow2.f32 %v1243_v1  ;;  %v1444_v1 = vpop.permute.xlu1 %1443 }
 0x7c1   :  { %v12849_v8 = vpop.eup %12848  ;;  %12868 = vpow2.f32 %v1267_v2 }
 0x7c2   :  { %v12851_v9 = vpop.eup %12850  ;;  %v1272_v10 = vadd.f32 %v12849_v8, %v12847_v6  ;;  %12870 = vpow2.f32 %v1241_v5  ;;  %v1438_v2 = vpop.permute.xlu0 %1437 }
 0x7c3   :  { %v12853_v11 = vpop.eup %12852  ;;  %12872 = vpow2.f32 %v1265_v7 }
 0x7c4   :  { %v12855_v12 = vpop.eup %12854  ;;  %12874 = vrcp.f32 %v1272_v10  ;;  %v1271_v13 = vadd.f32 %v12853_v11, %v12851_v9  ;;  %v1446_v3 = vpop.permute.xlu1 %1445 }
 0x7c5   :  { %v12857_v14 = vpop.eup %12856 }
 0x7c6   :  { %v12859_v15 = vpop.eup %12858  ;;  %12876 = vrcp.f32 %v1271_v13  ;;  %v1274_v16 = vadd.f32 %v12857_v14, %v12855_v12  ;;  %v1440_v4 = vpop.permute.xlu0 %1439 }
 0x7c7   :  { %v12861_v17 = vpop.eup %12860  ;;  %v1286_v18 = vmul.f32 %v12859_v15, %v12839_v43  ;;  %v1294_v19 = vmul.f32 %v12859_v15, %v12841_v45 }
 0x7c8   :  { %v12863_v20 = vpop.eup %12862  ;;  %12878 = vrcp.f32 %v1274_v16  ;;  %v1448_v5 = vpop.permute.xlu1 %1447 }
 0x7c9   :  { %v12865_v21 = vpop.eup %12864  ;;  %v1285_v22 = vmul.f32 %v12863_v20, %v12843_v57  ;;  %v1293_v23 = vmul.f32 %v12863_v20, %v12845_v60 }
 0x7ca   :  { %v12867_v24 = vpop.eup %12866  ;;  %v1273_v25 = vadd.f32 %v12865_v21, %v12861_v17  ;;  %v1442_v16 = vpop.permute.xlu0 %1441 }
 0x7cb   :  { %v12869_v26 = vpop.eup %12868  ;;  %11551 = vmatprep.mubr.msk.f32.mxu1 %vm1301_vm11, %v1285_v22  ;;  %11565 = vmatprep.mubr.msk.f32.mxu0 %vm1301_vm11, %v1293_v23 }
 0x7cc   :  { %v12871_v27 = vpop.eup %12870  ;;  %12880 = vrcp.f32 %v1273_v25  ;;  %v1276_v28 = vadd.f32 %v12869_v26, %v12867_v24  ;;  %11552 = vmatmul.mubr.msk.f32.vlgmr.msra.gmra.mrb[24].mxu1 %vm1301_vm11, %v1286_v18  ;;  %11566 = vmatmul.mubr.msk.f32.vlgmr.msra.gmra.mrb[28].mxu0 %vm1301_vm11, %v1294_v19 }
 0x7cd   :  { %v12873_v30 = vpop.eup %12872  ;;  %12511 = vmatpush3.bf16.msra.mxu1 %v13605_v35 }
 0x7ce   :  { %v12875_v34 = vpop.eup %12874  ;;  %12882 = vrcp.f32 %v1276_v28  ;;  %v1275_v37 = vadd.f32 %v12873_v30, %v12871_v27  ;;  %12513 = vmatprep.subr.bf16.mxu1 %v12512_v63 }
 0x7cf   :  { %v1288_v38 = vmul.f32 %v12875_v34, %v12847_v6  ;;  %v1296_v39 = vmul.f32 %v12875_v34, %v12849_v8 }
 0x7d0   :  { %v12877_v53 = vpop.eup %12876  ;;  %12884 = vrcp.f32 %v1275_v37 }
 0x7d1   :  { %v1287_v41 = vmul.f32 %v12877_v53, %v12851_v9  ;;  %v1295_v42 = vmul.f32 %v12877_v53, %v12853_v11  ;;  %12515 = vmatpush3.bf16.msra.mxu1 %v12512_v63 }
 0x7d2   :  { %v12879_v56 = vpop.eup %12878 }
 0x7d3   :  { %11554 = vmatprep.mubr.msk.f32.mxu1 %vm1301_vm11, %v1287_v41  ;;  %11568 = vmatprep.mubr.msk.f32.mxu0 %vm1301_vm11, %v1295_v42  ;;  %v1290_v43 = vmul.f32 %v12879_v56, %v12855_v12  ;;  %v1298_v55 = vmul.f32 %v12879_v56, %v12857_v14 }
 0x7d4   :  { %11555 = vmatmul.mubr.msk.f32.gmra.mrb[26].mxu1 %vm1301_vm11, %v1288_v38  ;;  %11569 = vmatmul.mubr.msk.f32.gmra.mrb[30].mxu0 %vm1301_vm11, %v1296_v39 }
 0x7d6   :  { %v12881_v35 = vpop.eup %12880 }
 0x7d7   :  { %v1289_v45 = vmul.f32 %v12881_v35, %v12861_v17  ;;  %v1297_v46 = vmul.f32 %v12881_v35, %v12865_v21  ;;  %v1450_v17 = vpop.permute.xlu1 %1449 }
 0x7d8   :  { %v12883_v47 = vpop.eup %12882 }
 0x7d9   :  { %11557 = vmatprep.mubr.msk.f32.mxu1 %vm1301_vm11, %v1289_v45  ;;  %11571 = vmatprep.mubr.msk.f32.mxu0 %vm1301_vm11, %v1297_v46  ;;  %v1292_v48 = vmul.f32 %v12883_v47, %v12867_v24  ;;  %v1300_v57 = vmul.f32 %v12883_v47, %v12869_v26 }
 0x7da   :  { %v12885_v58 = vpop.eup %12884  ;;  %11558 = vmatmul.mubr.msk.f32.gmra.mrb[28].mxu1 %vm1301_vm11, %v1290_v43  ;;  %11572 = vmatmul.mubr.msk.f32.gmra.mrb[32].mxu0 %vm1301_vm11, %v1298_v55 }
 0x7db   :  { %v1291_v59 = vmul.f32 %v12885_v58, %v12871_v27  ;;  %v1299_v60 = vmul.f32 %v12885_v58, %v12873_v30 }
 0x7dd   :  { %11560 = vmatprep.mubr.msk.f32.mxu1 %vm1301_vm11, %v1291_v59  ;;  %11574 = vmatprep.mubr.msk.f32.mxu0 %vm1301_vm11, %v1299_v60  ;;  %v10373_v60 = vld [vmem:[#allocation2 + $0xd8] ss:$0 sm:$0xff] }
 0x7de   :  { %11561 = vmatmul.mubr.msk.f32.gmra.mrb[30].mxu1 %vm1301_vm11, %v1292_v48  ;;  %11575 = vmatmul.mubr.msk.f32.gmra.mrb[34].mxu0 %vm1301_vm11, %v1300_v57 }
 0x89f   :  { %v11553_v6 = vpop.f32.mrb[24].mxu1  ;;  %v11567_v7 = vpop.f32.mrb[28].mxu0 }
 0x8a0   :  { %v1460_v8 = vmul.f32 %v11553_v6, %v1438_v2  ;;  %v1597_v9 = vmul.f32 %v11567_v7, %v1446_v3  ;;  %v1396_v10 = vpop.f32.mrb[25].mxu1  ;;  %v1557_v11 = vpop.f32.mrb[29].mxu0 }
 0x8a1   :  { %v1459_v12 = vmul.f32 %v1436_v0, %v1396_v10  ;;  %v1596_v13 = vmul.f32 %v1557_v11, %v1444_v1 }
 0x8a2   :  { %v1605_v14 = vadd.f32 %v1597_v9, %v1460_v8 }
 0x8a3   :  { %v1604_v15 = vadd.f32 %v1596_v13, %v1459_v12 }
 0x8a5   :  { %11585 = vmatprep.mubr.msk.f32.mxu1 %vm235_vm9, %v1604_v15 }
 0x8a6   :  { %11586 = vmatmul.mubr.msk.f32.vlgmr.msra.gmra.mrb[32].mxu1 %vm235_vm9, %v1605_v14 }
 0x8a7   :  { %v11556_v18 = vpop.f32.mrb[26].mxu1  ;;  %v11570_v19 = vpop.f32.mrb[30].mxu0 }
 0x8a8   :  { %v1462_v20 = vmul.f32 %v11556_v18, %v1442_v16  ;;  %v1599_v21 = vmul.f32 %v11570_v19, %v1450_v17  ;;  %v1406_v22 = vpop.f32.mrb[27].mxu1  ;;  %v1567_v23 = vpop.f32.mrb[31].mxu0 }
 0x8a9   :  { %v1461_v24 = vmul.f32 %v1440_v4, %v1406_v22  ;;  %v1598_v25 = vmul.f32 %v1567_v23, %v1448_v5 }
 0x8aa   :  { %v1607_v26 = vadd.f32 %v1599_v21, %v1462_v20 }
 0x8ab   :  { %v1606_v27 = vadd.f32 %v1598_v25, %v1461_v24 }
 0x8ad   :  { %v11559_v28 = vpop.f32.mrb[28].mxu1  ;;  %v11573_v30 = vpop.f32.mrb[32].mxu0  ;;  %11588 = vmatprep.mubr.msk.f32.mxu1 %vm235_vm9, %v1606_v27 }
 0x8ae   :  { %v1464_v34 = vmul.f32 %v11559_v28, %v1446_v3  ;;  %v1601_v37 = vmul.f32 %v11573_v30, %v1438_v2  ;;  %v1416_v38 = vpop.f32.mrb[29].mxu1  ;;  %v1577_v39 = vpop.f32.mrb[33].mxu0  ;;  %11589 = vmatmul.mubr.msk.f32.gmra.mrb[34].mxu1 %vm235_vm9, %v1607_v26 }
 0x8af   :  { %v1463_v53 = vmul.f32 %v1444_v1, %v1416_v38  ;;  %v1600_v41 = vmul.f32 %v1577_v39, %v1436_v0 }
 0x8b0   :  { %v1609_v42 = vadd.f32 %v1601_v37, %v1464_v34 }
 0x8b1   :  { %v1608_v56 = vadd.f32 %v1600_v41, %v1463_v53  ;;  %v11562_v43 = vpop.f32.mrb[30].mxu1  ;;  %v11576_v55 = vpop.f32.mrb[34].mxu0 }
 0x8b2   :  { %v1466_v35 = vmul.f32 %v11562_v43, %v1450_v17  ;;  %v1603_v45 = vmul.f32 %v11576_v55, %v1442_v16  ;;  %v1426_v46 = vpop.f32.mrb[31].mxu1  ;;  %v1587_v47 = vpop.f32.mrb[35].mxu0 }
 0x8b3   :  { %v1465_v48 = vmul.f32 %v1448_v5, %v1426_v46  ;;  %v1602_v57 = vmul.f32 %v1587_v47, %v1440_v4  ;;  %11591 = vmatprep.mubr.msk.f32.mxu1 %vm235_vm9, %v1608_v56 }
 0x8b4   :  { %v1611_v58 = vadd.f32 %v1603_v45, %v1466_v35  ;;  %11592 = vmatmul.mubr.msk.f32.gmra.mrb[36].mxu1 %vm235_vm9, %v1609_v42 }
 0x8b5   :  { %v1610_v59 = vadd.f32 %v1602_v57, %v1465_v48 }
 0x8b7   :  { %11594 = vmatprep.mubr.msk.f32.mxu1 %vm235_vm9, %v1610_v59 }
 0x8b8   :  { %11595 = vmatmul.mubr.msk.f32.gmra.mrb[38].mxu1 %vm235_vm9, %v1611_v58 }
 0x979   :  { %v11587_v61 = vpop.f32.mrb[32].mxu1 }
 0x97a   :  { %v1717_v62 = vadd.f32 %v11587_v61, %v10373_v60  ;;  %v1711_v63 = vpop.f32.mrb[33].mxu1 }
 0x97b   :  { %v1712_v0 = vadd.f32 %v10373_v60, %v1711_v63 }
 0x97c   :  { %v1751_v1 = vadd.f32 %v1717_v62, %v13515_v33 }
 0x97d   :  { %v1750_v2 = vadd.f32 %v1712_v0, %v13512_v32 }
 0x97e   :  { %v1761_v3 = vsel %vm235_vm9, %v1751_v1, 0.0 }
 0x97f   :  { %1762 = vadd.xlane.f32.xlu1 %v1761_v3  ;;  %v1758_v4 = vsel %vm235_vm9, %v1750_v2, 0.0 }
 0x980   :  { %1759 = vadd.xlane.f32.xlu0 %v1758_v4 }
 0x981   :  { %v11590_v5 = vpop.f32.mrb[34].mxu1 }
 0x982   :  { %v1721_v6 = vpop.f32.mrb[35].mxu1  ;;  %v1727_v7 = vadd.f32 %v11590_v5, %v10373_v60 }
 0x983   :  { %v1722_v8 = vadd.f32 %v10373_v60, %v1721_v6 }
 0x984   :  { %v1753_v12 = vadd.f32 %v1727_v7, %v13527_v50 }
 0x985   :  { %v1752_v9 = vadd.f32 %v1722_v8, %v13522_v36 }
 0x986   :  { %v1767_v18 = vsel %vm235_vm9, %v1753_v12, 0.0 }
 0x987   :  { %v11593_v10 = vpop.f32.mrb[36].mxu1  ;;  %v1764_v11 = vsel %vm235_vm9, %v1752_v9, 0.0 }
 0x988   :  { %v1737_v13 = vadd.f32 %v11593_v10, %v10373_v60  ;;  %v1731_v14 = vpop.f32.mrb[37].mxu1  ;;  %1765 = vadd.xlane.f32.xlu0 %v1764_v11 }
 0x989   :  { %v1732_v15 = vadd.f32 %v10373_v60, %v1731_v14 }
 0x98a   :  { %v1755_v19 = vadd.f32 %v1737_v13, %v13537_v54 }
 0x98b   :  { %v11596_v16 = vpop.f32.mrb[38].mxu1  ;;  %v1754_v17 = vadd.f32 %v1732_v15, %v13530_v49 }
 0x98c   :  { %v1747_v20 = vadd.f32 %v11596_v16, %v10373_v60  ;;  %v1741_v21 = vpop.f32.mrb[39].mxu1  ;;  %1768 = vadd.xlane.f32.xlu0 %v1767_v18  ;;  %v1773_v24 = vsel %vm235_vm9, %v1755_v19, 0.0  ;;  %v1890_v18 = vld [vmem:[#allocation2 + $0xf8] sm:$0xff] }
 0x98d   :  { %v1742_v22 = vadd.f32 %v10373_v60, %v1741_v21  ;;  %v1770_v23 = vsel %vm235_vm9, %v1754_v17, 0.0  ;;  %v1892_v21 = vld [vmem:[#allocation2 + $0x108] sm:$0xff] }
 0x98e   :  { %1771 = vadd.xlane.f32.xlu1 %v1770_v23  ;;  %v1757_v26 = vadd.f32 %v1747_v20, %v13547_v52  ;;  %v1891_v20 = vld [vmem:[#allocation2 + $0x100] sm:$0xff]  ;;  %v2035_v23 = vld [vmem:[#allocation2 + $0x118] sm:$0xff] }
 0x98f   :  { %v1756_v25 = vadd.f32 %v1742_v22, %v13540_v40  ;;  %v12520_v22 = vpack.c.bf16 %v1892_v21, %v1891_v20 }
 0x990   :  { %1774 = vadd.xlane.f32.xlu0 %v1773_v24  ;;  %v1779_v28 = vsel %vm235_vm9, %v1757_v26, 0.0  ;;  %v2036_v24 = vld [vmem:[#allocation2 + $0x120] sm:$0xff] }
 0x991   :  { %v1776_v27 = vsel %vm235_vm9, %v1756_v25, 0.0 }
 0x992   :  { %1777 = vadd.xlane.f32.xlu1 %v1776_v27  ;;  %v2038_v27 = vld [vmem:[#allocation2 + $0x130] sm:$0xff] }
 0x994   :  { %1780 = vadd.xlane.f32.xlu0 %v1779_v28 }
 0xa0c   :  { %v1763_v30 = vpop.xlane.xlu1 %1762 }
 0xa0d   :  { %v1784_v34 = vmul.f32 0.03125, %v1763_v30  ;;  %v1760_v37 = vpop.xlane.xlu0 %1759  ;;  %v2039_v30 = vld [vmem:[#allocation2 + $0x138] sm:$0xff] }
 0xa0e   :  { %v1783_v38 = vmul.f32 0.03125, %v1760_v37 }
 0xa0f   :  { %v13649_v39 = vsub.f32 %v1751_v1, %v1784_v34  ;;  %v2040_v34 = vld [vmem:[#allocation2 + $0x140] sm:$0xff] }
 0xa10   :  { %v13651_v53 = vsub.f32 %v1750_v2, %v1783_v38  ;;  %v12532_v37 = vpack.c.bf16 %v2040_v34, %v2039_v30 }
 0xa11   :  { %v1800_v41 = vmul.f32 %v13649_v39, %v13649_v39 }
 0xa12   :  { %v1799_v42 = vmul.f32 %v13651_v53, %v13651_v53 }
 0xa13   :  { %v1810_v56 = vsel %vm235_vm9, %v1800_v41, 0.0 }
 0xa14   :  { %1811 = vadd.xlane.f32.xlu0 %v1810_v56  ;;  %v1807_v43 = vsel %vm235_vm9, %v1799_v42, 0.0 }
 0xa15   :  { %v1766_v55 = vpop.xlane.xlu0 %1765  ;;  %1808 = vadd.xlane.f32.xlu1 %v1807_v43 }
 0xa16   :  { %v1785_v35 = vmul.f32 0.03125, %v1766_v55 }
 0xa18   :  { %v13659_v45 = vsub.f32 %v1752_v9, %v1785_v35 }
 0xa19   :  { %v1769_v46 = vpop.xlane.xlu0 %1768 }
 0xa1a   :  { %v1786_v47 = vmul.f32 0.03125, %v1769_v46  ;;  %v1801_v48 = vmul.f32 %v13659_v45, %v13659_v45 }
 0xa1b   :  { %v1772_v57 = vpop.xlane.xlu1 %1771 }
 0xa1c   :  { %v1787_v58 = vmul.f32 0.03125, %v1772_v57  ;;  %v13663_v59 = vsub.f32 %v1753_v12, %v1786_v47  ;;  %v1813_v60 = vsel %vm235_vm9, %v1801_v48, 0.0 }
 0xa1d   :  { %v1775_v61 = vpop.xlane.xlu0 %1774  ;;  %1814 = vadd.xlane.f32.xlu1 %v1813_v60  ;;  %v10382_v60 = vld [vmem:[#allocation2 + $0xe0] ss:$0 sm:$0xff] }
 0xa1e   :  { %v13666_v62 = vsub.f32 %v1754_v17, %v1787_v58  ;;  %v1788_v63 = vmul.f32 0.03125, %v1775_v61  ;;  %v1802_v0 = vmul.f32 %v13663_v59, %v13663_v59  ;;  %v1889_v17 = vld [vmem:[#allocation2 + $0xf0] sm:$0xff] }
 0xa1f   :  { %v1778_v1 = vpop.xlane.xlu1 %1777 }
 0xa20   :  { %v13670_v2 = vsub.f32 %v1755_v19, %v1788_v63  ;;  %v1789_v3 = vmul.f32 0.03125, %v1778_v1  ;;  %v1816_v4 = vsel %vm235_vm9, %v1802_v0, 0.0  ;;  %v1803_v5 = vmul.f32 %v13666_v62, %v13666_v62 }
 0xa21   :  { %1817 = vadd.xlane.f32.xlu0 %v1816_v4  ;;  %v1781_v6 = vpop.xlane.xlu0 %1780  ;;  %v12516_v19 = vpack.c.bf16 %v1890_v18, %v1889_v17 }
 0xa22   :  { %v13675_v7 = vsub.f32 %v1756_v25, %v1789_v3  ;;  %v1790_v8 = vmul.f32 0.03125, %v1781_v6  ;;  %v1819_v9 = vsel %vm235_vm9, %v1803_v5, 0.0  ;;  %v1804_v10 = vmul.f32 %v13670_v2, %v13670_v2  ;;  %v2037_v25 = vld [vmem:[#allocation2 + $0x128] sm:$0xff] }
 0xa23   :  { %1820 = vadd.xlane.f32.xlu1 %v1819_v9  ;;  %12517 = vmatprep.subr.bf16.mxu0 %v12516_v19  ;;  %v12528_v28 = vpack.c.bf16 %v2038_v27, %v2037_v25 }
 0xa24   :  { %v13680_v11 = vsub.f32 %v1757_v26, %v1790_v8  ;;  %v1822_v12 = vsel %vm235_vm9, %v1804_v10, 0.0  ;;  %v1805_v13 = vmul.f32 %v13675_v7, %v13675_v7  ;;  %12519 = vmatpush3.bf16.msra.mxu0 %v12516_v19  ;;  %v12524_v26 = vpack.c.bf16 %v2036_v24, %v2035_v23  ;;  %v10383_v10 = vld [vmem:[#allocation2 + $0xe8] ss:$0 sm:$0xff] }
 0xa25   :  { %1823 = vadd.xlane.f32.xlu0 %v1822_v12  ;;  %12521 = vmatprep.subr.bf16.mxu0 %v12520_v22 }
 0xa26   :  { %v1825_v14 = vsel %vm235_vm9, %v1805_v13, 0.0  ;;  %v1806_v15 = vmul.f32 %v13680_v11, %v13680_v11  ;;  %12525 = vmatprep.subr.bf16.mxu1 %v12524_v26 }
 0xa27   :  { %1826 = vadd.xlane.f32.xlu1 %v1825_v14  ;;  %12527 = vmatpush3.bf16.msra.mxu1 %v12524_v26 }
 0xa28   :  { %v1828_v16 = vsel %vm235_vm9, %v1806_v15, 0.0  ;;  %12523 = vmatpush3.bf16.msra.mxu0 %v12520_v22  ;;  %12529 = vmatprep.subr.bf16.mxu1 %v12528_v28 }
 0xa29   :  { %1829 = vadd.xlane.f32.xlu0 %v1828_v16 }
 0xa2b   :  { %12531 = vmatpush3.bf16.msra.mxu1 %v12528_v28 }
 0xa2c   :  { %12533 = vmatprep.subr.bf16.mxu1 %v12532_v37 }
 0xa2f   :  { %12535 = vmatpush3.bf16.msra.mxu1 %v12532_v37 }
 0xaa1   :  { %v1812_v38 = vpop.xlane.xlu0 %1811 }
 0xaa2   :  { %v1832_v41 = vmul.f32 0.03125, %v1812_v38  ;;  %v1809_v42 = vpop.xlane.xlu1 %1808 }
 0xaa3   :  { %v1831_v56 = vmul.f32 0.03125, %v1809_v42 }
 0xaa4   :  { %v1840_v43 = vadd.f32 1e-05, %v1832_v41 }
 0xaa5   :  { %v1839_v55 = vadd.f32 1e-05, %v1831_v56 }
 0xaa6   :  { %12886 = vrsqrt.f32 %v1840_v43 }
 0xaa7   :  { %12888 = vrsqrt.f32 %v1839_v55 }
 0xaaa   :  { %v1815_v35 = vpop.xlane.xlu1 %1814 }
 0xaab   :  { %v1833_v46 = vmul.f32 0.03125, %v1815_v35 }
 0xaad   :  { %v1841_v47 = vadd.f32 1e-05, %v1833_v46 }
 0xaae   :  { %v1818_v48 = vpop.xlane.xlu0 %1817 }
 0xaaf   :  { %12890 = vrsqrt.f32 %v1841_v47  ;;  %v1834_v57 = vmul.f32 0.03125, %v1818_v48  ;;  %v2042_v47 = vld [vmem:[#allocation2 + $0x150] sm:$0xff] }
 0xab0   :  { %v12887_v58 = vpop.eup %12886  ;;  %v1821_v61 = vpop.xlane.xlu1 %1820 }
 0xab1   :  { %v12889_v63 = vpop.eup %12888  ;;  %v1856_v0 = vmul.f32 %v12887_v58, %v13649_v39  ;;  %v1842_v1 = vadd.f32 1e-05, %v1834_v57  ;;  %v1835_v3 = vmul.f32 0.03125, %v1821_v61 }
 0xab2   :  { %v1824_v4 = vpop.xlane.xlu0 %1823  ;;  %v1855_v5 = vmul.f32 %v12889_v63, %v13651_v53 }
 0xab3   :  { %v1869_v6 = vmul.f32 %v10382_v60, %v1856_v0  ;;  %12892 = vrsqrt.f32 %v1842_v1  ;;  %v1843_v8 = vadd.f32 1e-05, %v1835_v3  ;;  %v1836_v9 = vmul.f32 0.03125, %v1824_v4 }
 0xab4   :  { %v1827_v12 = vpop.xlane.xlu1 %1826  ;;  %v1868_v13 = vmul.f32 %v10382_v60, %v1855_v5 }
 0xab5   :  { %12894 = vrsqrt.f32 %v1843_v8  ;;  %v1844_v14 = vadd.f32 1e-05, %v1836_v9  ;;  %v1837_v15 = vmul.f32 0.03125, %v1827_v12  ;;  %v13693_v19 = vadd.f32 %v10383_v10, %v1869_v6 }
 0xab6   :  { %v1830_v16 = vpop.xlane.xlu0 %1829  ;;  %v13691_v17 = vadd.f32 %v10383_v10, %v1868_v13 }
 0xab7   :  { %12896 = vrsqrt.f32 %v1844_v14  ;;  %v1845_v39 = vadd.f32 1e-05, %v1837_v15  ;;  %v1838_v18 = vmul.f32 0.03125, %v1830_v16 }
 0xab8   :  { %11605 = vmatprep.mubr.msk.f32.mxu0 %vm235_vm9, %v13691_v17 }
 0xab9   :  { %v12891_v53 = vpop.eup %12890  ;;  %12898 = vrsqrt.f32 %v1845_v39  ;;  %v1846_v20 = vadd.f32 1e-05, %v1838_v18  ;;  %11606 = vmatmul.mubr.msk.f32.vlgmr.msra.gmra.mrb[36].mxu0 %vm235_vm9, %v13693_v19 }
 0xaba   :  { %v1857_v21 = vmul.f32 %v12891_v53, %v13659_v45 }
 0xabb   :  { %12900 = vrsqrt.f32 %v1846_v20 }
 0xabc   :  { %v1870_v22 = vmul.f32 %v10382_v60, %v1857_v21  ;;  %v10393_v21 = vld [vmem:[#allocation2 + $0x158] ss:$0 sm:$0xff] }
 0xabd   :  { %v12893_v23 = vpop.eup %12892 }
 0xabe   :  { %v13700_v24 = vadd.f32 %v10383_v10, %v1870_v22  ;;  %v1858_v25 = vmul.f32 %v12893_v23, %v13663_v59 }
 0xabf   :  { %v12895_v26 = vpop.eup %12894 }
 0xac0   :  { %11608 = vmatprep.mubr.msk.f32.mxu0 %vm235_vm9, %v13700_v24  ;;  %v1871_v27 = vmul.f32 %v10382_v60, %v1858_v25  ;;  %v1859_v28 = vmul.f32 %v12895_v26, %v13666_v62 }
 0xac1   :  { %v12897_v30 = vpop.eup %12896 }
 0xac2   :  { %v13706_v34 = vadd.f32 %v10383_v10, %v1871_v27  ;;  %v1872_v37 = vmul.f32 %v10382_v60, %v1859_v28  ;;  %v1860_v45 = vmul.f32 %v12897_v30, %v13670_v2 }
 0xac3   :  { %v12899_v38 = vpop.eup %12898 }
 0xac4   :  { %11609 = vmatmul.mubr.msk.f32.gmra.mrb[38].mxu0 %vm235_vm9, %v13706_v34  ;;  %v13711_v41 = vadd.f32 %v10383_v10, %v1872_v37  ;;  %v1873_v59 = vmul.f32 %v10382_v60, %v1860_v45  ;;  %v1861_v42 = vmul.f32 %v12899_v38, %v13675_v7  ;;  %v2041_v7 = vld [vmem:[#allocation2 + $0x148] sm:$0xff] }
 0xac5   :  { %v12901_v56 = vpop.eup %12900  ;;  %v12536_v48 = vpack.c.bf16 %v2042_v47, %v2041_v7 }
 0xac6   :  { %11611 = vmatprep.mubr.msk.f32.mxu0 %vm235_vm9, %v13711_v41  ;;  %v13716_v62 = vadd.f32 %v10383_v10, %v1873_v59  ;;  %v1874_v43 = vmul.f32 %v10382_v60, %v1861_v42  ;;  %v1862_v55 = vmul.f32 %v12901_v56, %v13680_v11  ;;  %v10384_v11 = vld [vmem:[#allocation2 + $0x110] ss:$0 sm:$0xff] }
 0xac7   :  { %12537 = vmatprep.subr.bf16.mxu1 %v12536_v48 }
 0xac8   :  { %11612 = vmatmul.mubr.msk.f32.gmra.mrb[40].mxu0 %vm235_vm9, %v13716_v62  ;;  %v13721_v2 = vadd.f32 %v10383_v10, %v1874_v43  ;;  %v1875_v35 = vmul.f32 %v10382_v60, %v1862_v55  ;;  %12539 = vmatpush3.bf16.msra.mxu1 %v12536_v48 }
 0xac9   :  { %12549 = vmatprep.subr.bf16.mxu1 %v13551_v51 }
 0xaca   :  { %11614 = vmatprep.mubr.msk.f32.mxu0 %vm235_vm9, %v13721_v2  ;;  %v13725_v46 = vadd.f32 %v10383_v10, %v1875_v35 }
 0xacc   :  { %11615 = vmatmul.mubr.msk.f32.gmra.mrb[42].mxu0 %vm235_vm9, %v13725_v46 }
 0xb8c   :  { %v11607_v57 = vpop.f32.mrb[36].mxu0 }
 0xb8d   :  { %v1994_v58 = vadd.f32 %v11607_v57, %v10384_v11  ;;  %v1988_v61 = vpop.f32.mrb[37].mxu0 }
 0xb8e   :  { %v1989_v60 = vadd.f32 %v10384_v11, %v1988_v61 }
 0xb8f   :  { %v2028_v0 = vmax.f32 %v1994_v58, 0.0 }
 0xb90   :  { %v2027_v63 = vmax.f32 %v1989_v60, 0.0 }
 0xb92   :  { %11633 = vmatprep.mubr.msk.f32.mxu1 %vm96_vm0, %v2027_v63 }
 0xb93   :  { %11634 = vmatmul.mubr.msk.f32.vlgmr.msra.gmra.mrb[40].mxu1 %vm96_vm0, %v2028_v0 }
 0xb94   :  { %12551 = vmatpush3.bf16.msra.mxu1 %v13551_v51 }
 0xb95   :  { %12553 = vmatprep.subr.bf16.mxu1 %v13557_v44 }
 0xb97   :  { %v11610_v1 = vpop.f32.mrb[38].mxu0 }
 0xb98   :  { %v2004_v3 = vadd.f32 %v11610_v1, %v10384_v11  ;;  %v1998_v4 = vpop.f32.mrb[39].mxu0  ;;  %12555 = vmatpush3.bf16.msra.mxu1 %v13557_v44 }
 0xb99   :  { %v1999_v5 = vadd.f32 %v10384_v11, %v1998_v4  ;;  %11705 = vmatprep.subr.msk.mxu1 %vm1326_vm10, %v13595_v29 }
 0xb9a   :  { %v2030_v9 = vmax.f32 %v2004_v3, 0.0 }
 0xb9b   :  { %v2029_v6 = vmax.f32 %v1999_v5, 0.0  ;;  %v11613_v8 = vpop.f32.mrb[40].mxu0 }
 0xb9c   :  { %v2014_v10 = vadd.f32 %v11613_v8, %v10384_v11  ;;  %v2008_v12 = vpop.f32.mrb[41].mxu0 }
 0xb9d   :  { %v2009_v13 = vadd.f32 %v10384_v11, %v2008_v12  ;;  %11636 = vmatprep.mubr.msk.f32.mxu1 %vm96_vm0, %v2029_v6 }
 0xb9e   :  { %11637 = vmatmul.mubr.msk.f32.gmra.mrb[42].mxu1 %vm96_vm0, %v2030_v9  ;;  %v2032_v16 = vmax.f32 %v2014_v10, 0.0 }
 0xb9f   :  { %v2031_v14 = vmax.f32 %v2009_v13, 0.0  ;;  %v11616_v15 = vpop.f32.mrb[42].mxu0 }
 0xba0   :  { %v2024_v39 = vadd.f32 %v11616_v15, %v10384_v11  ;;  %v2018_v18 = vpop.f32.mrb[43].mxu0 }
 0xba1   :  { %v2019_v53 = vadd.f32 %v10384_v11, %v2018_v18  ;;  %11639 = vmatprep.mubr.msk.f32.mxu1 %vm96_vm0, %v2031_v14 }
 0xba2   :  { %11640 = vmatmul.mubr.msk.f32.gmra.mrb[44].mxu1 %vm96_vm0, %v2032_v16  ;;  %v2034_v20 = vmax.f32 %v2024_v39, 0.0 }
 0xba3   :  { %v2033_v29 = vmax.f32 %v2019_v53, 0.0 }
 0xba5   :  { %11642 = vmatprep.mubr.msk.f32.mxu1 %vm96_vm0, %v2033_v29 }
 0xba6   :  { %11643 = vmatmul.mubr.msk.f32.gmra.mrb[46].mxu1 %vm96_vm0, %v2034_v20 }
 0xc66   :  { %v11635_v22 = vpop.f32.mrb[40].mxu1 }
 0xc67   :  { %v2144_v23 = vadd.f32 %v11635_v22, %v10393_v21  ;;  %v2138_v25 = vpop.f32.mrb[41].mxu1 }
 0xc68   :  { %v2139_v26 = vadd.f32 %v10393_v21, %v2138_v25 }
 0xc69   :  { %v2178_v27 = vadd.f32 %v2144_v23, %v13693_v19 }
 0xc6a   :  { %v2177_v28 = vadd.f32 %v2139_v26, %v13691_v17 }
 0xc6b   :  { %v2188_v30 = vsel %vm235_vm9, %v2178_v27, 0.0 }
 0xc6c   :  { %2189 = vadd.xlane.f32.xlu0 %v2188_v30  ;;  %v2185_v37 = vsel %vm235_vm9, %v2177_v28, 0.0 }
 0xc6d   :  { %2186 = vadd.xlane.f32.xlu1 %v2185_v37 }
 0xc71   :  { %v11638_v45 = vpop.f32.mrb[42].mxu1 }
 0xc72   :  { %v2154_v38 = vadd.f32 %v11638_v45, %v10393_v21  ;;  %v2148_v59 = vpop.f32.mrb[43].mxu1 }
 0xc73   :  { %v2149_v42 = vadd.f32 %v10393_v21, %v2148_v59 }
 0xc74   :  { %v2180_v56 = vadd.f32 %v2154_v38, %v13706_v34 }
 0xc75   :  { %v11641_v43 = vpop.f32.mrb[44].mxu1  ;;  %v2179_v55 = vadd.f32 %v2149_v42, %v13700_v24 }
 0xc76   :  { %v2164_v35 = vadd.f32 %v11641_v43, %v10393_v21  ;;  %v2158_v7 = vpop.f32.mrb[45].mxu1  ;;  %v2194_v19 = vsel %vm235_vm9, %v2180_v56, 0.0 }
 0xc77   :  { %v2159_v17 = vadd.f32 %v10393_v21, %v2158_v7  ;;  %2195 = vadd.xlane.f32.xlu0 %v2194_v19  ;;  %v2191_v47 = vsel %vm235_vm9, %v2179_v55, 0.0 }
 0xc78   :  { %2192 = vadd.xlane.f32.xlu1 %v2191_v47  ;;  %v2182_v48 = vadd.f32 %v2164_v35, %v13716_v62  ;;  %v2315_v47 = vld [vmem:[#allocation2 + $0x170] sm:$0xff] }
 0xc79   :  { %v11644_v11 = vpop.f32.mrb[46].mxu1  ;;  %v2181_v57 = vadd.f32 %v2159_v17, %v13711_v41 }
 0xc7a   :  { %v2174_v58 = vadd.f32 %v11644_v11, %v10393_v21  ;;  %v2168_v61 = vpop.f32.mrb[47].mxu1  ;;  %v2200_v34 = vsel %vm235_vm9, %v2182_v48, 0.0 }
 0xc7b   :  { %v2169_v60 = vadd.f32 %v10393_v21, %v2168_v61  ;;  %2201 = vadd.xlane.f32.xlu0 %v2200_v34  ;;  %v2197_v24 = vsel %vm235_vm9, %v2181_v57, 0.0 }
 0xc7c   :  { %2198 = vadd.xlane.f32.xlu1 %v2197_v24  ;;  %v2184_v63 = vadd.f32 %v2174_v58, %v13725_v46  ;;  %v2318_v58 = vld [vmem:[#allocation2 + $0x188] sm:$0xff] }
 0xc7d   :  { %v2183_v0 = vadd.f32 %v2169_v60, %v13721_v2 }
 0xc7e   :  { %v2206_v1 = vsel %vm235_vm9, %v2184_v63, 0.0 }
 0xc7f   :  { %2207 = vadd.xlane.f32.xlu0 %v2206_v1  ;;  %v2203_v62 = vsel %vm235_vm9, %v2183_v0, 0.0 }
 0xc80   :  { %2204 = vadd.xlane.f32.xlu1 %v2203_v62 }
 0xcf9   :  { %v2190_v41 = vpop.xlane.xlu0 %2189 }
 0xcfa   :  { %v2210_v3 = vmul.f32 0.03125, %v2190_v41  ;;  %v2187_v4 = vpop.xlane.xlu1 %2186 }
 0xcfb   :  { %v2209_v5 = vmul.f32 0.03125, %v2187_v4 }
 0xcfc   :  { %v13759_v6 = vsub.f32 %v2178_v27, %v2210_v3 }
 0xcfd   :  { %v13761_v8 = vsub.f32 %v2177_v28, %v2209_v5 }
 0xcfe   :  { %v2226_v9 = vmul.f32 %v13759_v6, %v13759_v6 }
 0xcff   :  { %v2225_v2 = vmul.f32 %v13761_v8, %v13761_v8 }
 0xd00   :  { %v2236_v46 = vsel %vm235_vm9, %v2226_v9, 0.0 }
 0xd01   :  { %2237 = vadd.xlane.f32.xlu0 %v2236_v46  ;;  %v2233_v10 = vsel %vm235_vm9, %v2225_v2, 0.0  ;;  %v10402_v2 = vld [vmem:[#allocation2 + $0x160] ss:$0 sm:$0xff] }
 0xd02   :  { %2234 = vadd.xlane.f32.xlu1 %v2233_v10 }
 0xd04   :  { %v2196_v12 = vpop.xlane.xlu0 %2195 }
 0xd05   :  { %v2212_v13 = vmul.f32 0.03125, %v2196_v12  ;;  %v2193_v14 = vpop.xlane.xlu1 %2192 }
 0xd06   :  { %v2211_v15 = vmul.f32 0.03125, %v2193_v14 }
 0xd07   :  { %v13769_v16 = vsub.f32 %v2180_v56, %v2212_v13 }
 0xd08   :  { %v13771_v39 = vsub.f32 %v2179_v55, %v2211_v15  ;;  %v2202_v18 = vpop.xlane.xlu0 %2201 }
 0xd09   :  { %v2214_v53 = vmul.f32 0.03125, %v2202_v18  ;;  %v2199_v29 = vpop.xlane.xlu1 %2198  ;;  %v2228_v20 = vmul.f32 %v13769_v16, %v13769_v16 }
 0xd0a   :  { %v2213_v21 = vmul.f32 0.03125, %v2199_v29  ;;  %v2227_v22 = vmul.f32 %v13771_v39, %v13771_v39 }
 0xd0b   :  { %v13777_v23 = vsub.f32 %v2182_v48, %v2214_v53  ;;  %v2242_v25 = vsel %vm235_vm9, %v2228_v20, 0.0  ;;  %v2316_v48 = vld [vmem:[#allocation2 + $0x178] sm:$0xff] }
 0xd0c   :  { %v13780_v26 = vsub.f32 %v2181_v57, %v2213_v21  ;;  %2243 = vadd.xlane.f32.xlu0 %v2242_v25  ;;  %v2208_v27 = vpop.xlane.xlu0 %2207  ;;  %v2239_v28 = vsel %vm235_vm9, %v2227_v22, 0.0  ;;  %v12540_v11 = vpack.c.bf16 %v2316_v48, %v2315_v47  ;;  %v2317_v57 = vld [vmem:[#allocation2 + $0x180] sm:$0xff]  ;;  %v10403_v21 = vld [vmem:[#allocation2 + $0x168] ss:$0 sm:$0xff] }
 0xd0d   :  { %v2216_v30 = vmul.f32 0.03125, %v2208_v27  ;;  %2240 = vadd.xlane.f32.xlu1 %v2239_v28  ;;  %v2205_v37 = vpop.xlane.xlu1 %2204  ;;  %v2230_v45 = vmul.f32 %v13777_v23, %v13777_v23  ;;  %v12544_v61 = vpack.c.bf16 %v2318_v58, %v2317_v57  ;;  %v13815_v47 = vld [vmem:[#allocation2 + $0x5c8] sm:$0xf] }
 0xd0e   :  { %v2215_v38 = vmul.f32 0.03125, %v2205_v37  ;;  %v2229_v59 = vmul.f32 %v13780_v26, %v13780_v26  ;;  %12541 = vmatprep.subr.bf16.mxu0 %v12540_v11 }
 0xd0f   :  { %v13787_v42 = vsub.f32 %v2184_v63, %v2216_v30  ;;  %v2248_v56 = vsel %vm235_vm9, %v2230_v45, 0.0  ;;  %12543 = vmatpush3.bf16.msra.mxu0 %v12540_v11 }
 0xd10   :  { %v13790_v43 = vsub.f32 %v2183_v0, %v2215_v38  ;;  %2249 = vadd.xlane.f32.xlu0 %v2248_v56  ;;  %v2245_v55 = vsel %vm235_vm9, %v2229_v59, 0.0  ;;  %12545 = vmatprep.subr.bf16.mxu0 %v12544_v61 }
 0xd11   :  { %2246 = vadd.xlane.f32.xlu1 %v2245_v55  ;;  %v2232_v35 = vmul.f32 %v13787_v42, %v13787_v42 }
 0xd12   :  { %v2231_v7 = vmul.f32 %v13790_v43, %v13790_v43 }
 0xd13   :  { %v2254_v19 = vsel %vm235_vm9, %v2232_v35, 0.0  ;;  %12547 = vmatpush3.bf16.msra.mxu0 %v12544_v61 }
 0xd14   :  { %2255 = vadd.xlane.f32.xlu0 %v2254_v19  ;;  %v2251_v17 = vsel %vm235_vm9, %v2231_v7, 0.0  ;;  %12557 = vmatprep.subr.bf16.mxu0 %v13551_v51 }
 0xd15   :  { %2252 = vadd.xlane.f32.xlu1 %v2251_v17 }
 0xd8e   :  { %v2238_v34 = vpop.xlane.xlu0 %2237 }
 0xd8f   :  { %v2258_v60 = vmul.f32 0.03125, %v2238_v34  ;;  %v2235_v24 = vpop.xlane.xlu1 %2234 }
 0xd90   :  { %v2257_v63 = vmul.f32 0.03125, %v2235_v24 }
 0xd91   :  { %v2266_v0 = vadd.f32 1e-05, %v2258_v60 }
 0xd92   :  { %v2265_v1 = vadd.f32 1e-05, %v2257_v63 }
 0xd93   :  { %12902 = vrsqrt.f32 %v2266_v0 }
 0xd94   :  { %12904 = vrsqrt.f32 %v2265_v1 }
 0xd99   :  { %v2244_v62 = vpop.xlane.xlu0 %2243 }
 0xd9a   :  { %v2260_v41 = vmul.f32 0.03125, %v2244_v62  ;;  %v2241_v3 = vpop.xlane.xlu1 %2240 }
 0xd9b   :  { %v2259_v4 = vmul.f32 0.03125, %v2241_v3 }
 0xd9c   :  { %v2268_v5 = vadd.f32 1e-05, %v2260_v41 }
 0xd9d   :  { %v12903_v9 = vpop.eup %12902  ;;  %v2267_v46 = vadd.f32 1e-05, %v2259_v4  ;;  %v2250_v10 = vpop.xlane.xlu0 %2249 }
 0xd9e   :  { %v12905_v12 = vpop.eup %12904  ;;  %v2282_v13 = vmul.f32 %v12903_v9, %v13759_v6  ;;  %12906 = vrsqrt.f32 %v2268_v5  ;;  %v2262_v14 = vmul.f32 0.03125, %v2250_v10  ;;  %v2247_v15 = vpop.xlane.xlu1 %2246 }
 0xd9f   :  { %12908 = vrsqrt.f32 %v2267_v46  ;;  %v2261_v18 = vmul.f32 0.03125, %v2247_v15  ;;  %v2281_v53 = vmul.f32 %v12905_v12, %v13761_v8 }
 0xda0   :  { %v2295_v29 = vmul.f32 %v10402_v2, %v2282_v13  ;;  %v2270_v20 = vadd.f32 1e-05, %v2262_v14 }
 0xda1   :  { %v2269_v22 = vadd.f32 1e-05, %v2261_v18  ;;  %v2256_v25 = vpop.xlane.xlu0 %2255  ;;  %v2294_v27 = vmul.f32 %v10402_v2, %v2281_v53 }
 0xda2   :  { %12910 = vrsqrt.f32 %v2270_v20  ;;  %v2264_v28 = vmul.f32 0.03125, %v2256_v25  ;;  %v2253_v30 = vpop.xlane.xlu1 %2252  ;;  %v13804_v38 = vadd.f32 %v10403_v21, %v2295_v29 }
 0xda3   :  { %12912 = vrsqrt.f32 %v2269_v22  ;;  %v2263_v37 = vmul.f32 0.03125, %v2253_v30  ;;  %v13802_v45 = vadd.f32 %v10403_v21, %v2294_v27 }
 0xda4   :  { %v2272_v6 = vadd.f32 1e-05, %v2264_v28 }
 0xda5   :  { %v2271_v59 = vadd.f32 1e-05, %v2263_v37  ;;  %11653 = vmatprep.mubr.msk.f32.mxu0 %vm235_vm9, %v13802_v45 }
 0xda6   :  { %12914 = vrsqrt.f32 %v2272_v6  ;;  %11654 = vmatmul.mubr.msk.f32.vlgmr.msra.gmra.mrb[44].mxu0 %vm235_vm9, %v13804_v38 }
 0xda7   :  { %12916 = vrsqrt.f32 %v2271_v59  ;;  %12559 = vmatpush3.bf16.msra.mxu0 %v13551_v51 }
 0xda8   :  { %v12907_v8 = vpop.eup %12906  ;;  %12561 = vmatprep.subr.bf16.mxu0 %v13557_v44 }
 0xda9   :  { %v12909_v56 = vpop.eup %12908  ;;  %v2284_v55 = vmul.f32 %v12907_v8, %v13769_v16 }
 0xdaa   :  { %v2283_v35 = vmul.f32 %v12909_v56, %v13771_v39 }
 0xdab   :  { %v2297_v7 = vmul.f32 %v10402_v2, %v2284_v55  ;;  %12563 = vmatpush3.bf16.msra.mxu0 %v13557_v44 }
 0xdac   :  { %v12911_v19 = vpop.eup %12910  ;;  %v2296_v17 = vmul.f32 %v10402_v2, %v2283_v35  ;;  %11719 = vmatprep.subr.msk.mxu0 %vm1326_vm10, %v13815_v47 }
 0xdad   :  { %v12913_v48 = vpop.eup %12912  ;;  %v2286_v11 = vmul.f32 %v12911_v19, %v13777_v23  ;;  %v13823_v16 = vadd.f32 %v10403_v21, %v2297_v7 }
 0xdae   :  { %v13820_v57 = vadd.f32 %v10403_v21, %v2296_v17  ;;  %v2285_v58 = vmul.f32 %v12913_v48, %v13780_v26 }
 0xdaf   :  { %v2299_v39 = vmul.f32 %v10402_v2, %v2286_v11 }
 0xdb0   :  { %v12915_v61 = vpop.eup %12914  ;;  %11656 = vmatprep.mubr.msk.f32.mxu0 %vm235_vm9, %v13820_v57  ;;  %v2298_v34 = vmul.f32 %v10402_v2, %v2285_v58 }
 0xdb1   :  { %v12917_v60 = vpop.eup %12916  ;;  %11657 = vmatmul.mubr.msk.f32.gmra.mrb[46].mxu0 %vm235_vm9, %v13823_v16  ;;  %v2288_v24 = vmul.f32 %v12915_v61, %v13787_v42  ;;  %v13833_v0 = vadd.f32 %v10403_v21, %v2299_v39  ;;  %v10404_v42 = vld [vmem:[#allocation2 + $0x190] ss:$0 sm:$0xff] }
 0xdb2   :  { %v13830_v63 = vadd.f32 %v10403_v21, %v2298_v34  ;;  %v2287_v23 = vmul.f32 %v12917_v60, %v13790_v43 }
 0xdb3   :  { %v2301_v26 = vmul.f32 %v10402_v2, %v2288_v24  ;;  %v3169_v24 = vld [vmem:[#allocation2 + $0x198] sm:$0xff] }
 0xdb4   :  { %11659 = vmatprep.mubr.msk.f32.mxu0 %vm235_vm9, %v13830_v63  ;;  %v2300_v1 = vmul.f32 %v10402_v2, %v2287_v23  ;;  %v3170_v23 = vld [vmem:[#allocation2 + $0x1a0] sm:$0xff] }
 0xdb5   :  { %11660 = vmatmul.mubr.msk.f32.gmra.mrb[48].mxu0 %vm235_vm9, %v13833_v0  ;;  %v13841_v41 = vadd.f32 %v10403_v21, %v2301_v26  ;;  %v13883_v26 = vpack.c.bf16 %v3170_v23, %v3169_v24 }
 0xdb6   :  { %v13839_v62 = vadd.f32 %v10403_v21, %v2300_v1 }
 0xdb8   :  { %11662 = vmatprep.mubr.msk.f32.mxu0 %vm235_vm9, %v13839_v62 }
 0xdb9   :  { %11663 = vmatmul.mubr.msk.f32.gmra.mrb[50].mxu0 %vm235_vm9, %v13841_v41 }
 0xe79   :  { %v11655_v43 = vpop.f32.mrb[44].mxu0 }
 0xe7a   :  { %v2420_v3 = vadd.f32 %v11655_v43, %v10404_v42  ;;  %v2414_v4 = vpop.f32.mrb[45].mxu0 }
 0xe7b   :  { %v2415_v5 = vadd.f32 %v10404_v42, %v2414_v4 }
 0xe7c   :  { %2463 = vrot.lane.b32.xlu1 %v2420_v3, %s13356_s0 }
 0xe80   :  { %2461 = vrot.lane.b32.xlu1 %v2415_v5, %s13356_s0 }
 0xe84   :  { %v11658_v9 = vpop.f32.mrb[46].mxu0 }
 0xe85   :  { %v2424_v2 = vpop.f32.mrb[47].mxu0  ;;  %v2430_v29 = vadd.f32 %v11658_v9, %v10404_v42 }
 0xe86   :  { %v2425_v18 = vadd.f32 %v10404_v42, %v2424_v2 }
 0xe88   :  { %v11661_v46 = vpop.f32.mrb[48].mxu0 }
 0xe89   :  { %v2440_v10 = vadd.f32 %v11661_v46, %v10404_v42  ;;  %v2434_v12 = vpop.f32.mrb[49].mxu0 }
 0xe8a   :  { %v2435_v13 = vadd.f32 %v10404_v42, %v2434_v12 }
 0xe8b   :  { %2471 = vrot.lane.b32.xlu1 %v2440_v10, %s13356_s0 }
 0xe8c   :  { %2469 = vrot.lane.b32.xlu0 %v2435_v13, %s13356_s0  ;;  %v11664_v14 = vpop.f32.mrb[50].mxu0 }
 0xe8d   :  { %v2444_v15 = vpop.f32.mrb[51].mxu0  ;;  %v2450_v20 = vadd.f32 %v11664_v14, %v10404_v42 }
 0xe8e   :  { %v2445_v53 = vadd.f32 %v10404_v42, %v2444_v15 }
 0xe90   :  { %2465 = vrot.lane.b32.xlu0 %v2425_v18, %s13356_s0  ;;  %2473 = vrot.lane.b32.xlu1 %v2445_v53, %s13356_s0 }
 0xe94   :  { %2467 = vrot.lane.b32.xlu0 %v2430_v29, %s13356_s0  ;;  %2475 = vrot.lane.b32.xlu1 %v2450_v20, %s13356_s0 }
 0xe98   :  { %2992 = vrot.lane.b32.xlu0 %v2415_v5, %s13358_s11  ;;  %3000 = vrot.lane.b32.xlu1 %v2435_v13, %s13358_s11 }
 0xe9c   :  { %2994 = vrot.lane.b32.xlu0 %v2420_v3, %s13358_s11  ;;  %3002 = vrot.lane.b32.xlu1 %v2440_v10, %s13358_s11 }
 0xea0   :  { %2996 = vrot.lane.b32.xlu0 %v2425_v18, %s13358_s11  ;;  %3004 = vrot.lane.b32.xlu1 %v2445_v53, %s13358_s11 }
 0xea4   :  { %2998 = vrot.lane.b32.xlu0 %v2430_v29, %s13358_s11  ;;  %3006 = vrot.lane.b32.xlu1 %v2450_v20, %s13358_s11 }
 0xeee   :  { %v2464_v21 = vpop.permute.xlu1 %2463 }
 0xeef   :  { %v2486_v27 = vmul.f32 %v2464_v21, %v2420_v3  ;;  %v2635_v58 = vmul.f32 %v2464_v21, %v2440_v10 }
 0xef2   :  { %v2462_v22 = vpop.permute.xlu1 %2461 }
 0xef3   :  { %v2485_v25 = vmul.f32 %v2462_v22, %v2415_v5  ;;  %v2634_v48 = vmul.f32 %v2462_v22, %v2435_v13 }
 0xef5   :  { %11673 = vmatprep.mubr.msk.f32.mxu1 %vm235_vm9, %v2485_v25 }
 0xef6   :  { %11674 = vmatmul.mubr.msk.f32.vlgmr.msra.gmra.mrb[48].mxu1 %vm235_vm9, %v2486_v27 }
 0xef7   :  { %11706 = vmatpush3.msk.msra.mxu1 %vm1326_vm10, %v13815_v47 }
 0xef8   :  { %12565 = vmatprep.subr.bf16.mxu1 %v13883_v26 }
 0xefd   :  { %v2472_v28 = vpop.permute.xlu1 %2471 }
 0xefe   :  { %v2470_v30 = vpop.permute.xlu0 %2469  ;;  %v2631_v6 = vmul.f32 %v2472_v28, %v2420_v3 }
 0xeff   :  { %v2630_v37 = vmul.f32 %v2470_v30, %v2415_v5  ;;  %v2489_v11 = vmul.f32 %v2470_v30, %v2435_v13 }
 0xf01   :  { %11693 = vmatprep.mubr.msk.f32.mxu0 %vm235_vm9, %v2630_v37 }
 0xf02   :  { %v2466_v59 = vpop.permute.xlu0 %2465  ;;  %11694 = vmatmul.mubr.msk.f32.vlgmr.msra.gmra.mrb[52].mxu0 %vm235_vm9, %v2631_v6  ;;  %v2474_v8 = vpop.permute.xlu1 %2473 }
 0xf03   :  { %v2487_v56 = vmul.f32 %v2466_v59, %v2425_v18  ;;  %v2632_v55 = vmul.f32 %v2474_v8, %v2425_v18  ;;  %11720 = vmatpush3.msk.msra.mxu0 %vm1326_vm10, %v13815_v47  ;;  %v2490_v47 = vmul.f32 %v2472_v28, %v2440_v10  ;;  %v2636_v39 = vmul.f32 %v2466_v59, %v2445_v53 }
 0xf04   :  { %v2491_v61 = vmul.f32 %v2474_v8, %v2445_v53 }
 0xf05   :  { %11676 = vmatprep.mubr.msk.f32.mxu1 %vm235_vm9, %v2487_v56  ;;  %11696 = vmatprep.mubr.msk.f32.mxu0 %vm235_vm9, %v2632_v55 }
 0xf06   :  { %v2468_v35 = vpop.permute.xlu0 %2467  ;;  %v2476_v7 = vpop.permute.xlu1 %2475 }
 0xf07   :  { %v2488_v19 = vmul.f32 %v2468_v35, %v2430_v29  ;;  %v2633_v17 = vmul.f32 %v2476_v7, %v2430_v29  ;;  %v2637_v34 = vmul.f32 %v2468_v35, %v2450_v20  ;;  %v2492_v60 = vmul.f32 %v2476_v7, %v2450_v20 }
 0xf09   :  { %11677 = vmatmul.mubr.msk.f32.gmra.mrb[50].mxu1 %vm235_vm9, %v2488_v19  ;;  %11697 = vmatmul.mubr.msk.f32.gmra.mrb[54].mxu0 %vm235_vm9, %v2633_v17 }
 0xf0a   :  { %11679 = vmatprep.mubr.msk.f32.mxu1 %vm235_vm9, %v2489_v11  ;;  %11699 = vmatprep.mubr.msk.f32.mxu0 %vm235_vm9, %v2634_v48 }
 0xf0d   :  { %11680 = vmatmul.mubr.msk.f32.gmra.mrb[52].mxu1 %vm235_vm9, %v2490_v47  ;;  %11700 = vmatmul.mubr.msk.f32.gmra.mrb[56].mxu0 %vm235_vm9, %v2635_v58 }
 0xf0e   :  { %11682 = vmatprep.mubr.msk.f32.mxu1 %vm235_vm9, %v2491_v61  ;;  %11702 = vmatprep.mubr.msk.f32.mxu0 %vm235_vm9, %v2636_v39 }
 0xf11   :  { %11683 = vmatmul.mubr.msk.f32.gmra.mrb[54].mxu1 %vm235_vm9, %v2492_v60  ;;  %11703 = vmatmul.mubr.msk.f32.gmra.mrb[58].mxu0 %vm235_vm9, %v2637_v34 }
 0xfc9   :  { %v11675_v1 = vpop.f32.mrb[48].mxu1 }
 0xfca   :  { %v2583_v42 = vpop.f32.mrb[49].mxu1  ;;  %v2623_v3 = vmul.f32 0.35355338, %v11675_v1 }
 0xfcb   :  { %v2622_v9 = vmul.f32 0.35355338, %v2583_v42 }
 0xfd5   :  { %v11695_v43 = vpop.f32.mrb[52].mxu0 }
 0xfd6   :  { %v2768_v4 = vmul.f32 0.35355338, %v11695_v43  ;;  %v2728_v5 = vpop.f32.mrb[53].mxu0 }
 0xfd7   :  { %v2767_v2 = vmul.f32 0.35355338, %v2728_v5 }
 0xfd8   :  { %v2776_v46 = vmax.f32 %v2623_v3, %v2768_v4 }
 0xfd9   :  { %v2775_v10 = vmax.f32 %v2622_v9, %v2767_v2 }
 0xfda   :  { %v2784_v12 = vsub.f32 %v2623_v3, %v2776_v46  ;;  %v2808_v13 = vsub.f32 %v2768_v4, %v2776_v46 }
 0xfdb   :  { %v2783_v14 = vsub.f32 %v2622_v9, %v2775_v10  ;;  %v2807_v15 = vsub.f32 %v2767_v2, %v2775_v10 }
 0xfdc   :  { %v2793_v18 = vmul.f32 1.442695, %v2784_v12  ;;  %v2817_v53 = vmul.f32 1.442695, %v2808_v13  ;;  %v11678_v29 = vpop.f32.mrb[50].mxu1  ;;  %v11698_v20 = vpop.f32.mrb[54].mxu0 }
 0xfdd   :  { %v2791_v21 = vmul.f32 1.442695, %v2783_v14  ;;  %v2815_v22 = vmul.f32 1.442695, %v2807_v15  ;;  %v2625_v25 = vmul.f32 0.35355338, %v11678_v29 }
 0xfde   :  { %12918 = vpow2.f32 %v2793_v18  ;;  %v2770_v27 = vmul.f32 0.35355338, %v11698_v20  ;;  %v2593_v28 = vpop.f32.mrb[51].mxu1  ;;  %v2738_v30 = vpop.f32.mrb[55].mxu0 }
 0xfdf   :  { %12920 = vpow2.f32 %v2817_v53  ;;  %v2624_v37 = vmul.f32 0.35355338, %v2593_v28  ;;  %v2769_v6 = vmul.f32 0.35355338, %v2738_v30 }
 0xfe0   :  { %12922 = vpow2.f32 %v2791_v21  ;;  %v2778_v59 = vmax.f32 %v2625_v25, %v2770_v27  ;;  %v11681_v8 = vpop.f32.mrb[52].mxu1  ;;  %v11701_v56 = vpop.f32.mrb[56].mxu0 }
 0xfe1   :  { %12924 = vpow2.f32 %v2815_v22  ;;  %v2777_v55 = vmax.f32 %v2624_v37, %v2769_v6  ;;  %v2627_v35 = vmul.f32 0.35355338, %v11681_v8  ;;  %v2772_v7 = vmul.f32 0.35355338, %v11701_v56  ;;  %v2603_v19 = vpop.f32.mrb[53].mxu1  ;;  %v2748_v17 = vpop.f32.mrb[57].mxu0 }
 0xfe2   :  { %v2786_v48 = vsub.f32 %v2625_v25, %v2778_v59  ;;  %v2810_v11 = vsub.f32 %v2770_v27, %v2778_v59  ;;  %v2626_v58 = vmul.f32 0.35355338, %v2603_v19  ;;  %v2771_v47 = vmul.f32 0.35355338, %v2748_v17 }
 0xfe3   :  { %v2785_v39 = vsub.f32 %v2624_v37, %v2777_v55  ;;  %v2809_v61 = vsub.f32 %v2769_v6, %v2777_v55  ;;  %v2780_v34 = vmax.f32 %v2627_v35, %v2772_v7 }
 0xfe4   :  { %v2797_v60 = vmul.f32 1.442695, %v2786_v48  ;;  %v2821_v24 = vmul.f32 1.442695, %v2810_v11  ;;  %v2779_v23 = vmax.f32 %v2626_v58, %v2771_v47  ;;  %v11684_v1 = vpop.f32.mrb[54].mxu1  ;;  %v11704_v42 = vpop.f32.mrb[58].mxu0 }
 0xfe5   :  { %v2795_v43 = vmul.f32 1.442695, %v2785_v39  ;;  %v2819_v3 = vmul.f32 1.442695, %v2809_v61  ;;  %v2788_v4 = vsub.f32 %v2627_v35, %v2780_v34  ;;  %v2812_v5 = vsub.f32 %v2772_v7, %v2780_v34  ;;  %v2613_v9 = vpop.f32.mrb[55].mxu1  ;;  %v2758_v2 = vpop.f32.mrb[59].mxu0 }
 0xfe6   :  { %12926 = vpow2.f32 %v2797_v60  ;;  %v2787_v46 = vsub.f32 %v2626_v58, %v2779_v23  ;;  %v2811_v10 = vsub.f32 %v2771_v47, %v2779_v23  ;;  %v2629_v12 = vmul.f32 0.35355338, %v11684_v1 }
 0xfe7   :  { %12928 = vpow2.f32 %v2821_v24  ;;  %v2801_v13 = vmul.f32 1.442695, %v2788_v4  ;;  %v2825_v14 = vmul.f32 1.442695, %v2812_v5  ;;  %v2774_v15 = vmul.f32 0.35355338, %v11704_v42 }
 0xfe8   :  { %v12919_v18 = vpop.eup %12918  ;;  %12930 = vpow2.f32 %v2795_v43  ;;  %v2628_v53 = vmul.f32 0.35355338, %v2613_v9  ;;  %v2799_v20 = vmul.f32 1.442695, %v2787_v46  ;;  %v2773_v22 = vmul.f32 0.35355338, %v2758_v2 }
 0xfe9   :  { %v12921_v29 = vpop.eup %12920  ;;  %12932 = vpow2.f32 %v2819_v3  ;;  %v2782_v21 = vmax.f32 %v2629_v12, %v2774_v15  ;;  %v2823_v28 = vmul.f32 1.442695, %v2811_v10 }
 0xfea   :  { %v12923_v25 = vpop.eup %12922  ;;  %v2832_v27 = vadd.f32 %v12921_v29, %v12919_v18  ;;  %12934 = vpow2.f32 %v2801_v13  ;;  %v2781_v59 = vmax.f32 %v2628_v53, %v2773_v22 }
 0xfeb   :  { %v12925_v30 = vpop.eup %12924  ;;  %12936 = vpow2.f32 %v2825_v14  ;;  %v2790_v37 = vsub.f32 %v2629_v12, %v2782_v21  ;;  %v2814_v6 = vsub.f32 %v2774_v15, %v2782_v21 }
 0xfec   :  { %12938 = vrcp.f32 %v2832_v27  ;;  %v2831_v8 = vadd.f32 %v12925_v30, %v12923_v25  ;;  %v2789_v35 = vsub.f32 %v2628_v53, %v2781_v59  ;;  %v2813_v7 = vsub.f32 %v2773_v22, %v2781_v59 }
 0xfed   :  { %12940 = vpow2.f32 %v2799_v20  ;;  %v2805_v56 = vmul.f32 1.442695, %v2790_v37  ;;  %v2829_v55 = vmul.f32 1.442695, %v2814_v6 }
 0xfee   :  { %12942 = vrcp.f32 %v2831_v8  ;;  %v2803_v19 = vmul.f32 1.442695, %v2789_v35  ;;  %v2827_v48 = vmul.f32 1.442695, %v2813_v7  ;;  %v3171_v7 = vld [vmem:[#allocation2 + $0x1a8] sm:$0xff] }
 0xfef   :  { %12944 = vpow2.f32 %v2823_v28 }
 0xff0   :  { %v12927_v17 = vpop.eup %12926  ;;  %12946 = vpow2.f32 %v2805_v56 }
 0xff1   :  { %v12929_v11 = vpop.eup %12928  ;;  %12948 = vpow2.f32 %v2829_v55 }
 0xff2   :  { %v12931_v58 = vpop.eup %12930  ;;  %v2834_v47 = vadd.f32 %v12929_v11, %v12927_v17  ;;  %12950 = vpow2.f32 %v2803_v19  ;;  %v3172_v19 = vld [vmem:[#allocation2 + $0x1b0] sm:$0xff] }
 0xff3   :  { %v12933_v39 = vpop.eup %12932  ;;  %12952 = vpow2.f32 %v2827_v48  ;;  %v2993_v48 = vpop.permute.xlu0 %2992 }
 0xff4   :  { %v12935_v61 = vpop.eup %12934  ;;  %12954 = vrcp.f32 %v2834_v47  ;;  %v2833_v34 = vadd.f32 %v12933_v39, %v12931_v58 }
 0xff5   :  { %v12937_v60 = vpop.eup %12936 }
 0xff6   :  { %v12939_v24 = vpop.eup %12938  ;;  %12956 = vrcp.f32 %v2833_v34  ;;  %v2836_v23 = vadd.f32 %v12937_v60, %v12935_v61 }
 0xff7   :  { %v12941_v1 = vpop.eup %12940  ;;  %v2848_v42 = vmul.f32 %v12939_v24, %v12919_v18  ;;  %v2856_v43 = vmul.f32 %v12939_v24, %v12921_v29 }
 0xff8   :  { %v12943_v3 = vpop.eup %12942  ;;  %12958 = vrcp.f32 %v2836_v23 }
 0xff9   :  { %v12945_v4 = vpop.eup %12944  ;;  %v2847_v5 = vmul.f32 %v12943_v3, %v12923_v25  ;;  %v2855_v9 = vmul.f32 %v12943_v3, %v12925_v30 }
 0xffa   :  { %v12947_v2 = vpop.eup %12946  ;;  %v2835_v46 = vadd.f32 %v12945_v4, %v12941_v1 }
 0xffb   :  { %v12949_v10 = vpop.eup %12948  ;;  %11707 = vmatprep.mubr.msk.f32.mxu1 %vm1301_vm11, %v2847_v5  ;;  %11721 = vmatprep.mubr.msk.f32.mxu0 %vm1301_vm11, %v2855_v9 }
 0xffc   :  { %v12951_v12 = vpop.eup %12950  ;;  %12960 = vrcp.f32 %v2835_v46  ;;  %v2838_v13 = vadd.f32 %v12949_v10, %v12947_v2  ;;  %11708 = vmatmul.mubr.msk.f32.vlgmr.msra.gmra.mrb[56].mxu1 %vm1301_vm11, %v2848_v42  ;;  %11722 = vmatmul.mubr.msk.f32.vlgmr.msra.gmra.mrb[60].mxu0 %vm1301_vm11, %v2856_v43 }
 0xffd   :  { %v12953_v14 = vpop.eup %12952  ;;  %12567 = vmatpush3.bf16.msra.mxu1 %v13883_v26 }
 0xffe   :  { %v12955_v15 = vpop.eup %12954  ;;  %12962 = vrcp.f32 %v2838_v13  ;;  %v2837_v18 = vadd.f32 %v12953_v14, %v12951_v12 }
 0xfff   :  { %v2850_v53 = vmul.f32 %v12955_v15, %v12927_v17  ;;  %v2858_v29 = vmul.f32 %v12955_v15, %v12929_v11  ;;  %v12568_v17 = vpack.c.bf16 %v3172_v19, %v3171_v7  ;;  %v3001_v11 = vpop.permute.xlu1 %3000 }
0x1000   :  { %v12957_v20 = vpop.eup %12956  ;;  %12964 = vrcp.f32 %v2837_v18 }
0x1001   :  { %v2849_v21 = vmul.f32 %v12957_v20, %v12931_v58  ;;  %v2857_v22 = vmul.f32 %v12957_v20, %v12933_v39  ;;  %12569 = vmatprep.subr.bf16.mxu1 %v12568_v17  ;;  %v2995_v58 = vpop.permute.xlu0 %2994 }
0x1002   :  { %v12959_v25 = vpop.eup %12958  ;;  %12571 = vmatpush3.bf16.msra.mxu1 %v12568_v17 }
0x1003   :  { %11710 = vmatprep.mubr.msk.f32.mxu1 %vm1301_vm11, %v2849_v21  ;;  %11724 = vmatprep.mubr.msk.f32.mxu0 %vm1301_vm11, %v2857_v22  ;;  %v2852_v27 = vmul.f32 %v12959_v25, %v12935_v61  ;;  %v2860_v28 = vmul.f32 %v12959_v25, %v12937_v60  ;;  %v3003_v47 = vpop.permute.xlu1 %3002 }
0x1004   :  { %11711 = vmatmul.mubr.msk.f32.gmra.mrb[58].mxu1 %vm1301_vm11, %v2850_v53  ;;  %11725 = vmatmul.mubr.msk.f32.gmra.mrb[62].mxu0 %vm1301_vm11, %v2858_v29 }
0x1005   :  { %v2997_v39 = vpop.permute.xlu0 %2996 }
0x1006   :  { %v12961_v26 = vpop.eup %12960 }
0x1007   :  { %v2851_v30 = vmul.f32 %v12961_v26, %v12941_v1  ;;  %v2859_v37 = vmul.f32 %v12961_v26, %v12945_v4  ;;  %v3005_v61 = vpop.permute.xlu1 %3004 }
0x1008   :  { %v12963_v6 = vpop.eup %12962 }
0x1009   :  { %11713 = vmatprep.mubr.msk.f32.mxu1 %vm1301_vm11, %v2851_v30  ;;  %11727 = vmatprep.mubr.msk.f32.mxu0 %vm1301_vm11, %v2859_v37  ;;  %v2854_v59 = vmul.f32 %v12963_v6, %v12947_v2  ;;  %v2862_v8 = vmul.f32 %v12963_v6, %v12949_v10  ;;  %v2999_v9 = vpop.permute.xlu0 %2998 }
0x100a   :  { %v12965_v56 = vpop.eup %12964  ;;  %11714 = vmatmul.mubr.msk.f32.gmra.mrb[60].mxu1 %vm1301_vm11, %v2852_v27  ;;  %11728 = vmatmul.mubr.msk.f32.gmra.mrb[64].mxu0 %vm1301_vm11, %v2860_v28 }
0x100b   :  { %v2853_v55 = vmul.f32 %v12965_v56, %v12951_v12  ;;  %v2861_v35 = vmul.f32 %v12965_v56, %v12953_v14  ;;  %v3007_v2 = vpop.permute.xlu1 %3006 }
0x100d   :  { %11716 = vmatprep.mubr.msk.f32.mxu1 %vm1301_vm11, %v2853_v55  ;;  %11730 = vmatprep.mubr.msk.f32.mxu0 %vm1301_vm11, %v2861_v35 }
0x100e   :  { %11717 = vmatmul.mubr.msk.f32.gmra.mrb[62].mxu1 %vm1301_vm11, %v2854_v59  ;;  %11731 = vmatmul.mubr.msk.f32.gmra.mrb[66].mxu0 %vm1301_vm11, %v2862_v8 }
0x10cf   :  { %v11709_v34 = vpop.f32.mrb[56].mxu1  ;;  %v11723_v60 = vpop.f32.mrb[60].mxu0 }
0x10d0   :  { %v3017_v24 = vmul.f32 %v11709_v34, %v2995_v58  ;;  %v3154_v23 = vmul.f32 %v11723_v60, %v3003_v47  ;;  %v2953_v1 = vpop.f32.mrb[57].mxu1  ;;  %v3114_v42 = vpop.f32.mrb[61].mxu0 }
0x10d1   :  { %v3016_v43 = vmul.f32 %v2993_v48, %v2953_v1  ;;  %v3153_v3 = vmul.f32 %v3114_v42, %v3001_v11 }
0x10d2   :  { %v3162_v4 = vadd.f32 %v3154_v23, %v3017_v24 }
0x10d3   :  { %v3161_v5 = vadd.f32 %v3153_v3, %v3016_v43 }
0x10d5   :  { %11741 = vmatprep.mubr.msk.f32.mxu1 %vm235_vm9, %v3161_v5 }
0x10d6   :  { %11742 = vmatmul.mubr.msk.f32.vlgmr.msra.gmra.mrb[64].mxu1 %vm235_vm9, %v3162_v4 }
0x10d7   :  { %v11712_v46 = vpop.f32.mrb[58].mxu1  ;;  %v11726_v10 = vpop.f32.mrb[62].mxu0 }
0x10d8   :  { %v3019_v12 = vmul.f32 %v11712_v46, %v2999_v9  ;;  %v3156_v13 = vmul.f32 %v11726_v10, %v3007_v2  ;;  %v2963_v14 = vpop.f32.mrb[59].mxu1  ;;  %v3124_v15 = vpop.f32.mrb[63].mxu0 }
0x10d9   :  { %v3018_v18 = vmul.f32 %v2997_v39, %v2963_v14  ;;  %v3155_v53 = vmul.f32 %v3124_v15, %v3005_v61 }
0x10da   :  { %v3164_v29 = vadd.f32 %v3156_v13, %v3019_v12 }
0x10db   :  { %v3163_v20 = vadd.f32 %v3155_v53, %v3018_v18 }
0x10dd   :  { %v11715_v21 = vpop.f32.mrb[60].mxu1  ;;  %v11729_v22 = vpop.f32.mrb[64].mxu0  ;;  %11744 = vmatprep.mubr.msk.f32.mxu1 %vm235_vm9, %v3163_v20 }
0x10de   :  { %v3021_v25 = vmul.f32 %v11715_v21, %v3003_v47  ;;  %v3158_v27 = vmul.f32 %v11729_v22, %v2995_v58  ;;  %v2973_v28 = vpop.f32.mrb[61].mxu1  ;;  %v3134_v26 = vpop.f32.mrb[65].mxu0  ;;  %11745 = vmatmul.mubr.msk.f32.gmra.mrb[66].mxu1 %vm235_vm9, %v3164_v29 }
0x10df   :  { %v3020_v30 = vmul.f32 %v3001_v11, %v2973_v28  ;;  %v3157_v37 = vmul.f32 %v3134_v26, %v2993_v48  ;;  %v10447_v48 = vld [vmem:[#allocation2 + $0x1b8] ss:$0 sm:$0xff] }
0x10e0   :  { %v3166_v6 = vadd.f32 %v3158_v27, %v3021_v25 }
0x10e1   :  { %v3165_v59 = vadd.f32 %v3157_v37, %v3020_v30  ;;  %v11718_v8 = vpop.f32.mrb[62].mxu1  ;;  %v11732_v56 = vpop.f32.mrb[66].mxu0 }
0x10e2   :  { %v3023_v55 = vmul.f32 %v11718_v8, %v3007_v2  ;;  %v3160_v35 = vmul.f32 %v11732_v56, %v2999_v9  ;;  %v2983_v7 = vpop.f32.mrb[63].mxu1  ;;  %v3144_v19 = vpop.f32.mrb[67].mxu0 }
0x10e3   :  { %v3022_v17 = vmul.f32 %v3005_v61, %v2983_v7  ;;  %v3159_v34 = vmul.f32 %v3144_v19, %v2997_v39  ;;  %11747 = vmatprep.mubr.msk.f32.mxu1 %vm235_vm9, %v3165_v59 }
0x10e4   :  { %v3168_v47 = vadd.f32 %v3160_v35, %v3023_v55  ;;  %11748 = vmatmul.mubr.msk.f32.gmra.mrb[68].mxu1 %vm235_vm9, %v3166_v6 }
0x10e5   :  { %v3167_v58 = vadd.f32 %v3159_v34, %v3022_v17 }
0x10e7   :  { %11750 = vmatprep.mubr.msk.f32.mxu1 %vm235_vm9, %v3167_v58 }
0x10e8   :  { %11751 = vmatmul.mubr.msk.f32.gmra.mrb[70].mxu1 %vm235_vm9, %v3168_v47 }
0x11a9   :  { %v11743_v11 = vpop.f32.mrb[64].mxu1 }
0x11aa   :  { %v3274_v60 = vadd.f32 %v11743_v11, %v10447_v48  ;;  %v3268_v24 = vpop.f32.mrb[65].mxu1 }
0x11ab   :  { %v3269_v23 = vadd.f32 %v10447_v48, %v3268_v24 }
0x11ac   :  { %v3308_v1 = vadd.f32 %v3274_v60, %v13804_v38 }
0x11ad   :  { %v3307_v61 = vadd.f32 %v3269_v23, %v13802_v45 }
0x11ae   :  { %v3318_v39 = vsel %vm235_vm9, %v3308_v1, 0.0 }
0x11af   :  { %3319 = vadd.xlane.f32.xlu1 %v3318_v39  ;;  %v3315_v42 = vsel %vm235_vm9, %v3307_v61, 0.0 }
0x11b0   :  { %3316 = vadd.xlane.f32.xlu0 %v3315_v42 }
0x11b1   :  { %v11746_v43 = vpop.f32.mrb[66].mxu1 }
0x11b2   :  { %v3278_v3 = vpop.f32.mrb[67].mxu1  ;;  %v3284_v4 = vadd.f32 %v11746_v43, %v10447_v48 }
0x11b3   :  { %v3279_v5 = vadd.f32 %v10447_v48, %v3278_v3 }
0x11b4   :  { %v3310_v10 = vadd.f32 %v3284_v4, %v13823_v16 }
0x11b5   :  { %v3309_v9 = vadd.f32 %v3279_v5, %v13820_v57 }
0x11b6   :  { %v3324_v15 = vsel %vm235_vm9, %v3310_v10, 0.0 }
0x11b7   :  { %v11749_v2 = vpop.f32.mrb[68].mxu1  ;;  %v3321_v46 = vsel %vm235_vm9, %v3309_v9, 0.0 }
0x11b8   :  { %v3294_v38 = vadd.f32 %v11749_v2, %v10447_v48  ;;  %v3288_v12 = vpop.f32.mrb[69].mxu1  ;;  %3322 = vadd.xlane.f32.xlu0 %v3321_v46 }
0x11b9   :  { %v3289_v45 = vadd.f32 %v10447_v48, %v3288_v12 }
0x11ba   :  { %v3312_v18 = vadd.f32 %v3294_v38, %v13833_v0 }
0x11bb   :  { %v11752_v13 = vpop.f32.mrb[70].mxu1  ;;  %v3311_v14 = vadd.f32 %v3289_v45, %v13830_v63 }
0x11bc   :  { %v3304_v53 = vadd.f32 %v11752_v13, %v10447_v48  ;;  %v3298_v29 = vpop.f32.mrb[71].mxu1  ;;  %3325 = vadd.xlane.f32.xlu0 %v3324_v15  ;;  %v3330_v22 = vsel %vm235_vm9, %v3312_v18, 0.0  ;;  %v3445_v13 = vld [vmem:[#allocation2 + $0x1d0] sm:$0xff] }
0x11bd   :  { %v3299_v57 = vadd.f32 %v10447_v48, %v3298_v29  ;;  %v3327_v20 = vsel %vm235_vm9, %v3311_v14, 0.0 }
0x11be   :  { %3328 = vadd.xlane.f32.xlu1 %v3327_v20  ;;  %v3314_v16 = vadd.f32 %v3304_v53, %v13841_v41  ;;  %v3448_v53 = vld [vmem:[#allocation2 + $0x1e8] sm:$0xff] }
0x11bf   :  { %v3313_v21 = vadd.f32 %v3299_v57, %v13839_v62  ;;  %v4001_v57 = vld [vmem:[#allocation2 + $0x260] sm:$0xff]  ;;  %v4002_v20 = vld [vmem:[#allocation2 + $0x268] sm:$0xff] }
0x11c0   :  { %3331 = vadd.xlane.f32.xlu0 %v3330_v22  ;;  %v3336_v25 = vsel %vm235_vm9, %v3314_v16, 0.0  ;;  %v3592_v22 = vld [vmem:[#allocation2 + $0x200] sm:$0xff] }
0x11c1   :  { %v3333_v63 = vsel %vm235_vm9, %v3313_v21, 0.0 }
0x11c2   :  { %3334 = vadd.xlane.f32.xlu1 %v3333_v63  ;;  %v3593_v63 = vld [vmem:[#allocation2 + $0x208] sm:$0xff] }
0x11c4   :  { %3337 = vadd.xlane.f32.xlu0 %v3336_v25 }
0x123c   :  { %v3320_v0 = vpop.xlane.xlu1 %3319 }
0x123d   :  { %v3340_v27 = vmul.f32 0.03125, %v3320_v0  ;;  %v3317_v28 = vpop.xlane.xlu0 %3316  ;;  %v3594_v0 = vld [vmem:[#allocation2 + $0x210] sm:$0xff] }
0x123e   :  { %v3339_v26 = vmul.f32 0.03125, %v3317_v28  ;;  %v3595_v28 = vld [vmem:[#allocation2 + $0x218] sm:$0xff] }
0x123f   :  { %v13927_v30 = vsub.f32 %v3308_v1, %v3340_v27  ;;  %v12584_v27 = vpack.c.bf16 %v3594_v0, %v3593_v63 }
0x1240   :  { %v13929_v37 = vsub.f32 %v3307_v61, %v3339_v26  ;;  %v3596_v26 = vld [vmem:[#allocation2 + $0x220] sm:$0xff] }
0x1241   :  { %v3356_v62 = vmul.f32 %v13927_v30, %v13927_v30 }
0x1242   :  { %v3355_v41 = vmul.f32 %v13929_v37, %v13929_v37 }
0x1243   :  { %v3366_v6 = vsel %vm235_vm9, %v3356_v62, 0.0  ;;  %v12588_v62 = vpack.c.bf16 %v3596_v26, %v3595_v28 }
0x1244   :  { %3367 = vadd.xlane.f32.xlu0 %v3366_v6  ;;  %v3363_v59 = vsel %vm235_vm9, %v3355_v41, 0.0 }
0x1245   :  { %v3323_v8 = vpop.xlane.xlu0 %3322  ;;  %3364 = vadd.xlane.f32.xlu1 %v3363_v59 }
0x1246   :  { %v3341_v56 = vmul.f32 0.03125, %v3323_v8 }
0x1248   :  { %v13937_v55 = vsub.f32 %v3309_v9, %v3341_v56 }
0x1249   :  { %v3326_v35 = vpop.xlane.xlu0 %3325 }
0x124a   :  { %v3342_v7 = vmul.f32 0.03125, %v3326_v35  ;;  %v3357_v19 = vmul.f32 %v13937_v55, %v13937_v55 }
0x124b   :  { %v3329_v17 = vpop.xlane.xlu1 %3328 }
0x124c   :  { %v13941_v34 = vsub.f32 %v3310_v10, %v3342_v7  ;;  %v3343_v47 = vmul.f32 0.03125, %v3329_v17  ;;  %v3369_v58 = vsel %vm235_vm9, %v3357_v19, 0.0 }
0x124d   :  { %3370 = vadd.xlane.f32.xlu1 %v3369_v58  ;;  %v3332_v48 = vpop.xlane.xlu0 %3331 }
0x124e   :  { %v13944_v11 = vsub.f32 %v3311_v14, %v3343_v47  ;;  %v3344_v60 = vmul.f32 0.03125, %v3332_v48  ;;  %v3358_v24 = vmul.f32 %v13941_v34, %v13941_v34  ;;  %v3446_v14 = vld [vmem:[#allocation2 + $0x1d8] sm:$0xff] }
0x124f   :  { %v3335_v23 = vpop.xlane.xlu1 %3334  ;;  %v12572_v15 = vpack.c.bf16 %v3446_v14, %v3445_v13 }
0x1250   :  { %v13948_v1 = vsub.f32 %v3312_v18, %v3344_v60  ;;  %v3345_v61 = vmul.f32 0.03125, %v3335_v23  ;;  %v3372_v39 = vsel %vm235_vm9, %v3358_v24, 0.0  ;;  %v3359_v42 = vmul.f32 %v13944_v11, %v13944_v11  ;;  %v3447_v18 = vld [vmem:[#allocation2 + $0x1e0] sm:$0xff] }
0x1251   :  { %v3338_v43 = vpop.xlane.xlu0 %3337  ;;  %3373 = vadd.xlane.f32.xlu0 %v3372_v39  ;;  %12573 = vmatprep.subr.bf16.mxu0 %v12572_v15  ;;  %v12576_v29 = vpack.c.bf16 %v3448_v53, %v3447_v18  ;;  %v10456_v60 = vld [vmem:[#allocation2 + $0x1c0] ss:$0 sm:$0xff] }
0x1252   :  { %v13953_v3 = vsub.f32 %v3313_v21, %v3345_v61  ;;  %v3346_v4 = vmul.f32 0.03125, %v3338_v43  ;;  %v3375_v5 = vsel %vm235_vm9, %v3359_v42, 0.0  ;;  %v3360_v9 = vmul.f32 %v13948_v1, %v13948_v1  ;;  %12575 = vmatpush3.bf16.msra.mxu0 %v12572_v15  ;;  %v3591_v21 = vld [vmem:[#allocation2 + $0x1f8] sm:$0xff] }
0x1253   :  { %3376 = vadd.xlane.f32.xlu1 %v3375_v5  ;;  %12577 = vmatprep.subr.bf16.mxu0 %v12576_v29  ;;  %v12580_v25 = vpack.c.bf16 %v3592_v22, %v3591_v21  ;;  %v10457_v5 = vld [vmem:[#allocation2 + $0x1c8] ss:$0 sm:$0xff] }
0x1254   :  { %v13958_v2 = vsub.f32 %v3314_v16, %v3346_v4  ;;  %v3378_v46 = vsel %vm235_vm9, %v3360_v9, 0.0  ;;  %v3361_v10 = vmul.f32 %v13953_v3, %v13953_v3  ;;  %v13967_v16 = vpack.c.bf16 %v4002_v20, %v4001_v57 }
0x1255   :  { %3379 = vadd.xlane.f32.xlu0 %v3378_v46  ;;  %12581 = vmatprep.subr.bf16.mxu1 %v12580_v25 }
0x1256   :  { %v3381_v38 = vsel %vm235_vm9, %v3361_v10, 0.0  ;;  %v3362_v12 = vmul.f32 %v13958_v2, %v13958_v2  ;;  %12579 = vmatpush3.bf16.msra.mxu0 %v12576_v29  ;;  %12583 = vmatpush3.bf16.msra.mxu1 %v12580_v25 }
0x1257   :  { %3382 = vadd.xlane.f32.xlu1 %v3381_v38  ;;  %12597 = vmatprep.subr.bf16.mxu0 %v13967_v16  ;;  %v4003_v38 = vld [vmem:[#allocation2 + $0x270] sm:$0xff] }
0x1258   :  { %v3384_v45 = vsel %vm235_vm9, %v3362_v12, 0.0  ;;  %12585 = vmatprep.subr.bf16.mxu1 %v12584_v27  ;;  %v4004_v12 = vld [vmem:[#allocation2 + $0x278] sm:$0xff] }
0x1259   :  { %3385 = vadd.xlane.f32.xlu0 %v3384_v45 }
0x125a   :  { %12587 = vmatpush3.bf16.msra.mxu1 %v12584_v27 }
0x125b   :  { %12589 = vmatprep.subr.bf16.mxu1 %v12588_v62 }
0x125e   :  { %12591 = vmatpush3.bf16.msra.mxu1 %v12588_v62 }
0x12d1   :  { %v3368_v41 = vpop.xlane.xlu0 %3367 }
0x12d2   :  { %v3388_v6 = vmul.f32 0.03125, %v3368_v41  ;;  %v3365_v59 = vpop.xlane.xlu1 %3364 }
0x12d3   :  { %v3387_v8 = vmul.f32 0.03125, %v3365_v59 }
0x12d4   :  { %v3396_v56 = vadd.f32 1e-05, %v3388_v6 }
0x12d5   :  { %v3395_v35 = vadd.f32 1e-05, %v3387_v8 }
0x12d6   :  { %12966 = vrsqrt.f32 %v3396_v56 }
0x12d7   :  { %12968 = vrsqrt.f32 %v3395_v35 }
0x12da   :  { %v3371_v7 = vpop.xlane.xlu1 %3370 }
0x12db   :  { %v3389_v19 = vmul.f32 0.03125, %v3371_v7 }
0x12dd   :  { %v3397_v17 = vadd.f32 1e-05, %v3389_v19 }
0x12de   :  { %v3374_v47 = vpop.xlane.xlu0 %3373 }
0x12df   :  { %12970 = vrsqrt.f32 %v3397_v17  ;;  %v3390_v58 = vmul.f32 0.03125, %v3374_v47 }
0x12e0   :  { %v12967_v48 = vpop.eup %12966  ;;  %v3377_v24 = vpop.xlane.xlu1 %3376 }
0x12e1   :  { %v12969_v23 = vpop.eup %12968  ;;  %v3412_v61 = vmul.f32 %v12967_v48, %v13927_v30  ;;  %v3398_v39 = vadd.f32 1e-05, %v3390_v58  ;;  %v3391_v42 = vmul.f32 0.03125, %v3377_v24  ;;  %v12600_v30 = vpack.c.bf16 %v4004_v12, %v4003_v38  ;;  %v3598_v58 = vld [vmem:[#allocation2 + $0x230] sm:$0xff] }
0x12e2   :  { %v3380_v43 = vpop.xlane.xlu0 %3379  ;;  %v3411_v4 = vmul.f32 %v12969_v23, %v13929_v37 }
0x12e3   :  { %v3425_v9 = vmul.f32 %v10456_v60, %v3412_v61  ;;  %12972 = vrsqrt.f32 %v3398_v39  ;;  %v3399_v46 = vadd.f32 1e-05, %v3391_v42  ;;  %v3392_v10 = vmul.f32 0.03125, %v3380_v43 }
0x12e4   :  { %v3383_v45 = vpop.xlane.xlu1 %3382  ;;  %v3424_v13 = vmul.f32 %v10456_v60, %v3411_v4 }
0x12e5   :  { %12974 = vrsqrt.f32 %v3399_v46  ;;  %v3400_v14 = vadd.f32 1e-05, %v3392_v10  ;;  %v3393_v15 = vmul.f32 0.03125, %v3383_v45  ;;  %v13974_v37 = vadd.f32 %v10457_v5, %v3425_v9 }
0x12e6   :  { %v3386_v18 = vpop.xlane.xlu0 %3385  ;;  %v13972_v53 = vadd.f32 %v10457_v5, %v3424_v13 }
0x12e7   :  { %12976 = vrsqrt.f32 %v3400_v14  ;;  %v3401_v29 = vadd.f32 1e-05, %v3393_v15  ;;  %v3394_v57 = vmul.f32 0.03125, %v3386_v18 }
0x12e8   :  { %11761 = vmatprep.mubr.msk.f32.mxu0 %vm235_vm9, %v13972_v53 }
0x12e9   :  { %v12971_v20 = vpop.eup %12970  ;;  %12978 = vrsqrt.f32 %v3401_v29  ;;  %v3402_v21 = vadd.f32 1e-05, %v3394_v57  ;;  %11762 = vmatmul.mubr.msk.f32.vlgmr.msra.gmra.mrb[68].mxu0 %vm235_vm9, %v13974_v37 }
0x12ea   :  { %v3413_v22 = vmul.f32 %v12971_v20, %v13937_v55  ;;  %12599 = vmatpush3.bf16.msra.mxu0 %v13967_v16 }
0x12eb   :  { %12980 = vrsqrt.f32 %v3402_v21  ;;  %12601 = vmatprep.subr.bf16.mxu0 %v12600_v30  ;;  %v10480_v21 = vld [vmem:[#allocation2 + $0x280] ss:$0 sm:$0xff] }
0x12ec   :  { %v3426_v63 = vmul.f32 %v10456_v60, %v3413_v22 }
0x12ed   :  { %v12973_v25 = vpop.eup %12972 }
0x12ee   :  { %v13982_v0 = vadd.f32 %v10457_v5, %v3426_v63  ;;  %v3414_v27 = vmul.f32 %v12973_v25, %v13941_v34  ;;  %12603 = vmatpush3.bf16.msra.mxu0 %v12600_v30 }
0x12ef   :  { %v12975_v28 = vpop.eup %12974  ;;  %12613 = vmatprep.subr.bf16.mxu0 %v13551_v51 }
0x12f0   :  { %11764 = vmatprep.mubr.msk.f32.mxu0 %vm235_vm9, %v13982_v0  ;;  %v3427_v26 = vmul.f32 %v10456_v60, %v3414_v27  ;;  %v3415_v55 = vmul.f32 %v12975_v28, %v13944_v11 }
0x12f1   :  { %v12977_v62 = vpop.eup %12976 }
0x12f2   :  { %v13989_v16 = vadd.f32 %v10457_v5, %v3427_v26  ;;  %v3428_v41 = vmul.f32 %v10456_v60, %v3415_v55  ;;  %v3416_v6 = vmul.f32 %v12977_v62, %v13948_v1 }
0x12f3   :  { %v12979_v59 = vpop.eup %12978 }
0x12f4   :  { %11765 = vmatmul.mubr.msk.f32.gmra.mrb[70].mxu0 %vm235_vm9, %v13989_v16  ;;  %v13994_v34 = vadd.f32 %v10457_v5, %v3428_v41  ;;  %v3429_v8 = vmul.f32 %v10456_v60, %v3416_v6  ;;  %v3417_v56 = vmul.f32 %v12979_v59, %v13953_v3  ;;  %v14025_v3 = vld [vmem:[#allocation2 + $0x5c8] sm:$0xf] }
0x12f5   :  { %v12981_v35 = vpop.eup %12980 }
0x12f6   :  { %11767 = vmatprep.mubr.msk.f32.mxu0 %vm235_vm9, %v13994_v34  ;;  %v13999_v11 = vadd.f32 %v10457_v5, %v3429_v8  ;;  %v3430_v7 = vmul.f32 %v10456_v60, %v3417_v56  ;;  %v3418_v19 = vmul.f32 %v12981_v35, %v13958_v2  ;;  %v3597_v2 = vld [vmem:[#allocation2 + $0x228] sm:$0xff] }
0x12f7   :  { %v12592_v48 = vpack.c.bf16 %v3598_v58, %v3597_v2 }
0x12f8   :  { %11768 = vmatmul.mubr.msk.f32.gmra.mrb[72].mxu0 %vm235_vm9, %v13999_v11  ;;  %v14004_v1 = vadd.f32 %v10457_v5, %v3430_v7  ;;  %v3431_v17 = vmul.f32 %v10456_v60, %v3418_v19  ;;  %v10458_v60 = vld [vmem:[#allocation2 + $0x1f0] ss:$0 sm:$0xff] }
0x12f9   :  { %12593 = vmatprep.subr.bf16.mxu1 %v12592_v48 }
0x12fa   :  { %11770 = vmatprep.mubr.msk.f32.mxu0 %vm235_vm9, %v14004_v1  ;;  %v14008_v47 = vadd.f32 %v10457_v5, %v3431_v17  ;;  %12595 = vmatpush3.bf16.msra.mxu1 %v12592_v48 }
0x12fb   :  { %12605 = vmatprep.subr.bf16.mxu1 %v13551_v51 }
0x12fc   :  { %11771 = vmatmul.mubr.msk.f32.gmra.mrb[74].mxu0 %vm235_vm9, %v14008_v47 }
0x12fd   :  { %11809 = vmatprep.mubr.msk.f32.mxu0 %vm235_vm9, %v13512_v32 }
0x1300   :  { %11810 = vmatmul.mubr.msk.f32.vlgmr.msra.gmra.mrb[76].mxu0 %vm235_vm9, %v13515_v33 }
0x1301   :  { %11812 = vmatprep.mubr.msk.f32.mxu0 %vm235_vm9, %v13522_v36  ;;  %12615 = vmatpush3.bf16.msra.mxu0 %v13551_v51 }
0x1302   :  { %12617 = vmatprep.subr.bf16.mxu0 %v13557_v44 }
0x1304   :  { %11813 = vmatmul.mubr.msk.f32.gmra.mrb[78].mxu0 %vm235_vm9, %v13527_v50 }
0x1305   :  { %11815 = vmatprep.mubr.msk.f32.mxu0 %vm235_vm9, %v13530_v49  ;;  %12619 = vmatpush3.bf16.msra.mxu0 %v13557_v44 }
0x1306   :  { %11875 = vmatprep.subr.msk.mxu0 %vm1326_vm10, %v14025_v3 }
0x1308   :  { %11816 = vmatmul.mubr.msk.f32.gmra.mrb[80].mxu0 %vm235_vm9, %v13537_v54 }
0x1309   :  { %11818 = vmatprep.mubr.msk.f32.mxu0 %vm235_vm9, %v13540_v40 }
0x130c   :  { %11819 = vmatmul.mubr.msk.f32.gmra.mrb[82].mxu0 %vm235_vm9, %v13547_v52 }
0x13bc   :  { %v11763_v24 = vpop.f32.mrb[68].mxu0 }
0x13bd   :  { %v3550_v23 = vadd.f32 %v11763_v24, %v10458_v60  ;;  %v3544_v61 = vpop.f32.mrb[69].mxu0 }
0x13be   :  { %v3545_v39 = vadd.f32 %v10458_v60, %v3544_v61 }
0x13bf   :  { %v3584_v43 = vmax.f32 %v3550_v23, 0.0 }
0x13c0   :  { %v3583_v42 = vmax.f32 %v3545_v39, 0.0 }
0x13c2   :  { %11789 = vmatprep.mubr.msk.f32.mxu1 %vm96_vm0, %v3583_v42 }
0x13c3   :  { %11790 = vmatmul.mubr.msk.f32.vlgmr.msra.gmra.mrb[72].mxu1 %vm96_vm0, %v3584_v43 }
0x13c4   :  { %12607 = vmatpush3.bf16.msra.mxu1 %v13551_v51 }
0x13c5   :  { %12609 = vmatprep.subr.bf16.mxu1 %v13557_v44 }
0x13c7   :  { %v11766_v4 = vpop.f32.mrb[70].mxu0 }
0x13c8   :  { %v3560_v5 = vadd.f32 %v11766_v4, %v10458_v60  ;;  %v3554_v9 = vpop.f32.mrb[71].mxu0  ;;  %12611 = vmatpush3.bf16.msra.mxu1 %v13557_v44 }
0x13c9   :  { %v3555_v46 = vadd.f32 %v10458_v60, %v3554_v9  ;;  %11861 = vmatprep.subr.msk.mxu1 %vm1326_vm10, %v14025_v3 }
0x13ca   :  { %v3586_v12 = vmax.f32 %v3560_v5, 0.0 }
0x13cb   :  { %v3585_v10 = vmax.f32 %v3555_v46, 0.0  ;;  %v11769_v38 = vpop.f32.mrb[72].mxu0 }
0x13cc   :  { %v3570_v45 = vadd.f32 %v11769_v38, %v10458_v60  ;;  %v3564_v13 = vpop.f32.mrb[73].mxu0 }
0x13cd   :  { %v3565_v14 = vadd.f32 %v10458_v60, %v3564_v13  ;;  %11792 = vmatprep.mubr.msk.f32.mxu1 %vm96_vm0, %v3585_v10 }
0x13ce   :  { %11793 = vmatmul.mubr.msk.f32.gmra.mrb[74].mxu1 %vm96_vm0, %v3586_v12  ;;  %v3588_v30 = vmax.f32 %v3570_v45, 0.0 }
0x13cf   :  { %v3587_v15 = vmax.f32 %v3565_v14, 0.0  ;;  %v11772_v18 = vpop.f32.mrb[74].mxu0 }
0x13d0   :  { %v3580_v29 = vadd.f32 %v11772_v18, %v10458_v60  ;;  %v3574_v57 = vpop.f32.mrb[75].mxu0 }
0x13d1   :  { %v3575_v20 = vadd.f32 %v10458_v60, %v3574_v57  ;;  %11795 = vmatprep.mubr.msk.f32.mxu1 %vm96_vm0, %v3587_v15  ;;  %v10467_v57 = vld [vmem:[#allocation2 + $0x238] ss:$0 sm:$0xff] }
0x13d2   :  { %11796 = vmatmul.mubr.msk.f32.gmra.mrb[76].mxu1 %vm96_vm0, %v3588_v30  ;;  %v3590_v25 = vmax.f32 %v3580_v29, 0.0 }
0x13d3   :  { %v3589_v22 = vmax.f32 %v3575_v20, 0.0  ;;  %v11811_v63 = vpop.f32.mrb[76].mxu0 }
0x13d4   :  { %v4082_v27 = vadd.f32 %v11811_v63, %v10480_v21  ;;  %v4076_v28 = vpop.f32.mrb[77].mxu0 }
0x13d5   :  { %11798 = vmatprep.mubr.msk.f32.mxu1 %vm96_vm0, %v3589_v22  ;;  %v4077_v55 = vadd.f32 %v10480_v21, %v4076_v28 }
0x13d6   :  { %4125 = vrot.lane.b32.xlu1 %v4082_v27, %s13356_s0  ;;  %11799 = vmatmul.mubr.msk.f32.gmra.mrb[78].mxu1 %vm96_vm0, %v3590_v25 }
0x13d7   :  { %v11814_v26 = vpop.f32.mrb[78].mxu0 }
0x13d8   :  { %v4086_v62 = vpop.f32.mrb[79].mxu0  ;;  %v4092_v17 = vadd.f32 %v11814_v26, %v10480_v21 }
0x13d9   :  { %v4087_v7 = vadd.f32 %v10480_v21, %v4086_v62 }
0x13da   :  { %4123 = vrot.lane.b32.xlu1 %v4077_v55, %s13356_s0 }
0x13db   :  { %v11817_v41 = vpop.f32.mrb[80].mxu0 }
0x13dc   :  { %v4102_v6 = vadd.f32 %v11817_v41, %v10480_v21  ;;  %v4096_v59 = vpop.f32.mrb[81].mxu0 }
0x13dd   :  { %v4097_v8 = vadd.f32 %v10480_v21, %v4096_v59 }
0x13de   :  { %4133 = vrot.lane.b32.xlu1 %v4102_v6, %s13356_s0 }
0x13df   :  { %v11820_v56 = vpop.f32.mrb[82].mxu0  ;;  %4131 = vrot.lane.b32.xlu0 %v4097_v8, %s13356_s0 }
0x13e0   :  { %v4106_v35 = vpop.f32.mrb[83].mxu0  ;;  %v4112_v2 = vadd.f32 %v11820_v56, %v10480_v21 }
0x13e1   :  { %v4107_v19 = vadd.f32 %v10480_v21, %v4106_v35 }
0x13e3   :  { %4127 = vrot.lane.b32.xlu0 %v4087_v7, %s13356_s0  ;;  %4135 = vrot.lane.b32.xlu1 %v4107_v19, %s13356_s0 }
0x13e7   :  { %4129 = vrot.lane.b32.xlu0 %v4092_v17, %s13356_s0  ;;  %4137 = vrot.lane.b32.xlu1 %v4112_v2, %s13356_s0 }
0x13eb   :  { %4654 = vrot.lane.b32.xlu0 %v4077_v55, %s13358_s11  ;;  %4662 = vrot.lane.b32.xlu1 %v4097_v8, %s13358_s11 }
0x13ef   :  { %4656 = vrot.lane.b32.xlu0 %v4082_v27, %s13358_s11  ;;  %4664 = vrot.lane.b32.xlu1 %v4102_v6, %s13358_s11 }
0x13f3   :  { %4658 = vrot.lane.b32.xlu0 %v4087_v7, %s13358_s11  ;;  %4666 = vrot.lane.b32.xlu1 %v4107_v19, %s13358_s11 }
0x13f7   :  { %4660 = vrot.lane.b32.xlu0 %v4092_v17, %s13358_s11  ;;  %4668 = vrot.lane.b32.xlu1 %v4112_v2, %s13358_s11 }
0x1448   :  { %v4126_v58 = vpop.permute.xlu1 %4125 }
0x1449   :  { %v4148_v24 = vmul.f32 %v4126_v58, %v4082_v27  ;;  %v4297_v14 = vmul.f32 %v4126_v58, %v4102_v6 }
0x144c   :  { %v4124_v48 = vpop.permute.xlu1 %4123 }
0x144d   :  { %v4147_v60 = vmul.f32 %v4124_v48, %v4077_v55  ;;  %v4296_v45 = vmul.f32 %v4124_v48, %v4097_v8 }
0x144f   :  { %11829 = vmatprep.mubr.msk.f32.mxu1 %vm235_vm9, %v4147_v60 }
0x1450   :  { %v4134_v23 = vpop.permute.xlu1 %4133  ;;  %11830 = vmatmul.mubr.msk.f32.vlgmr.msra.gmra.mrb[80].mxu1 %vm235_vm9, %v4148_v24 }
0x1451   :  { %v4132_v61 = vpop.permute.xlu0 %4131  ;;  %11862 = vmatpush3.msk.msra.mxu1 %vm1326_vm10, %v14025_v3  ;;  %v4293_v42 = vmul.f32 %v4134_v23, %v4082_v27 }
0x1452   :  { %v4292_v39 = vmul.f32 %v4132_v61, %v4077_v55  ;;  %v4151_v13 = vmul.f32 %v4132_v61, %v4097_v8 }
0x1454   :  { %11849 = vmatprep.mubr.msk.f32.mxu0 %vm235_vm9, %v4292_v39 }
0x1455   :  { %v4128_v43 = vpop.permute.xlu0 %4127  ;;  %v4136_v4 = vpop.permute.xlu1 %4135  ;;  %11850 = vmatmul.mubr.msk.f32.vlgmr.msra.gmra.mrb[84].mxu0 %vm235_vm9, %v4293_v42 }
0x1456   :  { %v4149_v5 = vmul.f32 %v4128_v43, %v4087_v7  ;;  %v4294_v9 = vmul.f32 %v4136_v4, %v4087_v7  ;;  %11876 = vmatpush3.msk.msra.mxu0 %vm1326_vm10, %v14025_v3  ;;  %v4152_v3 = vmul.f32 %v4134_v23, %v4102_v6  ;;  %v4298_v15 = vmul.f32 %v4128_v43, %v4107_v19 }
0x1457   :  { %v4153_v18 = vmul.f32 %v4136_v4, %v4107_v19 }
0x1458   :  { %11832 = vmatprep.mubr.msk.f32.mxu1 %vm235_vm9, %v4149_v5  ;;  %11852 = vmatprep.mubr.msk.f32.mxu0 %vm235_vm9, %v4294_v9 }
0x1459   :  { %v4130_v46 = vpop.permute.xlu0 %4129  ;;  %v4138_v10 = vpop.permute.xlu1 %4137 }
0x145a   :  { %v4150_v38 = vmul.f32 %v4130_v46, %v4092_v17  ;;  %v4295_v12 = vmul.f32 %v4138_v10, %v4092_v17  ;;  %v4299_v30 = vmul.f32 %v4130_v46, %v4112_v2  ;;  %v4154_v29 = vmul.f32 %v4138_v10, %v4112_v2 }
0x145c   :  { %11833 = vmatmul.mubr.msk.f32.gmra.mrb[82].mxu1 %vm235_vm9, %v4150_v38  ;;  %11853 = vmatmul.mubr.msk.f32.gmra.mrb[86].mxu0 %vm235_vm9, %v4295_v12 }
0x145d   :  { %11835 = vmatprep.mubr.msk.f32.mxu1 %vm235_vm9, %v4151_v13  ;;  %11855 = vmatprep.mubr.msk.f32.mxu0 %vm235_vm9, %v4296_v45  ;;  %v14119_v39 = vpop.permute.xlu1 %4662  ;;  %v14121_v42 = vpop.permute.xlu0 %4654 }
0x1460   :  { %11836 = vmatmul.mubr.msk.f32.gmra.mrb[84].mxu1 %vm235_vm9, %v4152_v3  ;;  %11856 = vmatmul.mubr.msk.f32.gmra.mrb[88].mxu0 %vm235_vm9, %v4297_v14 }
0x1461   :  { %11838 = vmatprep.mubr.msk.f32.mxu1 %vm235_vm9, %v4153_v18  ;;  %11858 = vmatprep.mubr.msk.f32.mxu0 %vm235_vm9, %v4298_v15 }
0x1464   :  { %11839 = vmatmul.mubr.msk.f32.gmra.mrb[86].mxu1 %vm235_vm9, %v4154_v29  ;;  %11859 = vmatmul.mubr.msk.f32.gmra.mrb[90].mxu0 %vm235_vm9, %v4299_v30 }
0x1496   :  { %v11791_v20 = vpop.f32.mrb[72].mxu1 }
0x1497   :  { %v3700_v21 = vadd.f32 %v11791_v20, %v10467_v57  ;;  %v3694_v22 = vpop.f32.mrb[73].mxu1 }
0x1498   :  { %v3695_v63 = vadd.f32 %v10467_v57, %v3694_v22 }
0x1499   :  { %v3734_v25 = vadd.f32 %v3700_v21, %v13974_v37 }
0x149a   :  { %v3733_v27 = vadd.f32 %v3695_v63, %v13972_v53 }
0x149b   :  { %v3744_v28 = vsel %vm235_vm9, %v3734_v25, 0.0 }
0x149c   :  { %3745 = vadd.xlane.f32.xlu1 %v3744_v28  ;;  %v3741_v26 = vsel %vm235_vm9, %v3733_v27, 0.0 }
0x149d   :  { %3742 = vadd.xlane.f32.xlu0 %v3741_v26 }
0x14a1   :  { %v11794_v55 = vpop.f32.mrb[74].mxu1 }
0x14a2   :  { %v3710_v62 = vadd.f32 %v11794_v55, %v10467_v57  ;;  %v3704_v41 = vpop.f32.mrb[75].mxu1 }
0x14a3   :  { %v3705_v6 = vadd.f32 %v10467_v57, %v3704_v41 }
0x14a4   :  { %v14093_v56 = vadd.f32 %v3710_v62, %v13989_v16 }
0x14a5   :  { %v14090_v59 = vadd.f32 %v3705_v6, %v13982_v0  ;;  %v11797_v8 = vpop.f32.mrb[76].mxu1 }
0x14a6   :  { %v3714_v37 = vpop.f32.mrb[77].mxu1  ;;  %v3720_v35 = vadd.f32 %v11797_v8, %v10467_v57  ;;  %v3750_v0 = vsel %vm235_vm9, %v14093_v56, 0.0 }
0x14a7   :  { %v3715_v53 = vadd.f32 %v10467_v57, %v3714_v37  ;;  %v3747_v7 = vsel %vm235_vm9, %v14090_v59, 0.0 }
0x14a8   :  { %3748 = vadd.xlane.f32.xlu0 %v3747_v7  ;;  %v14103_v58 = vadd.f32 %v3720_v35, %v13999_v11 }
0x14a9   :  { %v14098_v19 = vadd.f32 %v3715_v53, %v13994_v34  ;;  %v11800_v17 = vpop.f32.mrb[78].mxu1 }
0x14aa   :  { %v3724_v2 = vpop.f32.mrb[79].mxu1  ;;  %v3730_v16 = vadd.f32 %v11800_v17, %v10467_v57  ;;  %v3756_v23 = vsel %vm235_vm9, %v14103_v58, 0.0 }
0x14ab   :  { %v3725_v48 = vadd.f32 %v10467_v57, %v3724_v2  ;;  %v3753_v60 = vsel %vm235_vm9, %v14098_v19, 0.0 }
0x14ac   :  { %3751 = vadd.xlane.f32.xlu0 %v3750_v0  ;;  %3754 = vadd.xlane.f32.xlu1 %v3753_v60  ;;  %v14111_v34 = vadd.f32 %v3730_v16, %v14008_v47  ;;  %v14125_v47 = vpop.permute.xlu0 %4656 }
0x14ad   :  { %v14108_v24 = vadd.f32 %v3725_v48, %v14004_v1  ;;  %v14123_v1 = vpop.permute.xlu1 %4664 }
0x14ae   :  { %v3762_v61 = vsel %vm235_vm9, %v14111_v34, 0.0 }
0x14af   :  { %v3759_v11 = vsel %vm235_vm9, %v14108_v24, 0.0 }
0x14b0   :  { %3757 = vadd.xlane.f32.xlu0 %v3756_v23  ;;  %3760 = vadd.xlane.f32.xlu1 %v3759_v11  ;;  %v14129_v4 = vpop.permute.xlu0 %4658 }
0x14b1   :  { %v14127_v43 = vpop.permute.xlu1 %4666 }
0x14b4   :  { %3763 = vadd.xlane.f32.xlu0 %v3762_v61  ;;  %v14133_v10 = vpop.permute.xlu0 %4660 }
0x14b5   :  { %v14131_v46 = vpop.permute.xlu1 %4668 }
0x1523   :  { %v11831_v5 = vpop.f32.mrb[80].mxu1 }
0x1524   :  { %v4245_v9 = vpop.f32.mrb[81].mxu1  ;;  %v4285_v12 = vmul.f32 0.35355338, %v11831_v5 }
0x1525   :  { %v4284_v3 = vmul.f32 0.35355338, %v4245_v9 }
0x1528   :  { %v11851_v38 = vpop.f32.mrb[84].mxu0 }
0x1529   :  { %v4430_v45 = vmul.f32 0.35355338, %v11851_v38  ;;  %v4390_v13 = vpop.f32.mrb[85].mxu0  ;;  %v3746_v14 = vpop.xlane.xlu1 %3745 }
0x152a   :  { %v4429_v15 = vmul.f32 0.35355338, %v4390_v13  ;;  %v3766_v18 = vmul.f32 0.03125, %v3746_v14  ;;  %v3743_v30 = vpop.xlane.xlu0 %3742 }
0x152b   :  { %v4438_v29 = vmax.f32 %v4285_v12, %v4430_v45  ;;  %v3765_v57 = vmul.f32 0.03125, %v3743_v30 }
0x152c   :  { %v4437_v20 = vmax.f32 %v4284_v3, %v4429_v15  ;;  %v14135_v21 = vsub.f32 %v3734_v25, %v3766_v18 }
0x152d   :  { %v4446_v22 = vsub.f32 %v4285_v12, %v4438_v29  ;;  %v4470_v63 = vsub.f32 %v4430_v45, %v4438_v29  ;;  %v14137_v28 = vsub.f32 %v3733_v27, %v3765_v57 }
0x152e   :  { %v4445_v26 = vsub.f32 %v4284_v3, %v4437_v20  ;;  %v4469_v55 = vsub.f32 %v4429_v15, %v4437_v20  ;;  %v3782_v62 = vmul.f32 %v14135_v21, %v14135_v21 }
0x152f   :  { %v4455_v41 = vmul.f32 1.442695, %v4446_v22  ;;  %v4479_v6 = vmul.f32 1.442695, %v4470_v63  ;;  %v11834_v8 = vpop.f32.mrb[82].mxu1  ;;  %v11854_v37 = vpop.f32.mrb[86].mxu0  ;;  %v3781_v35 = vmul.f32 %v14137_v28, %v14137_v28 }
0x1530   :  { %v4453_v53 = vmul.f32 1.442695, %v4445_v26  ;;  %v4477_v7 = vmul.f32 1.442695, %v4469_v55  ;;  %v4287_v25 = vmul.f32 0.35355338, %v11834_v8 }
0x1531   :  { %12982 = vpow2.f32 %v4455_v41  ;;  %v4432_v17 = vmul.f32 0.35355338, %v11854_v37  ;;  %v4255_v2 = vpop.f32.mrb[83].mxu1  ;;  %v4400_v27 = vpop.f32.mrb[87].mxu0  ;;  %v3792_v0 = vsel %vm235_vm9, %v3782_v62, 0.0  ;;  %v3789_v16 = vsel %vm235_vm9, %v3781_v35, 0.0 }
0x1532   :  { %12984 = vpow2.f32 %v4479_v6  ;;  %v4286_v48 = vmul.f32 0.35355338, %v4255_v2  ;;  %v4431_v60 = vmul.f32 0.35355338, %v4400_v27  ;;  %3793 = vadd.xlane.f32.xlu0 %v3792_v0  ;;  %3790 = vadd.xlane.f32.xlu1 %v3789_v16 }
0x1533   :  { %12986 = vpow2.f32 %v4453_v53  ;;  %v4440_v23 = vmax.f32 %v4287_v25, %v4432_v17  ;;  %v11837_v11 = vpop.f32.mrb[84].mxu1  ;;  %v11857_v61 = vpop.f32.mrb[88].mxu0 }
0x1534   :  { %12988 = vpow2.f32 %v4477_v7  ;;  %v4439_v5 = vmax.f32 %v4286_v48, %v4431_v60  ;;  %v4289_v9 = vmul.f32 0.35355338, %v11837_v11  ;;  %v4434_v38 = vmul.f32 0.35355338, %v11857_v61  ;;  %v4265_v12 = vpop.f32.mrb[85].mxu1  ;;  %v4410_v45 = vpop.f32.mrb[89].mxu0 }
0x1535   :  { %v4448_v13 = vsub.f32 %v4287_v25, %v4440_v23  ;;  %v4472_v14 = vsub.f32 %v4432_v17, %v4440_v23  ;;  %v4288_v3 = vmul.f32 0.35355338, %v4265_v12  ;;  %v4433_v15 = vmul.f32 0.35355338, %v4410_v45  ;;  %v3749_v18 = vpop.xlane.xlu0 %3748 }
0x1536   :  { %v4447_v30 = vsub.f32 %v4286_v48, %v4439_v5  ;;  %v4471_v29 = vsub.f32 %v4431_v60, %v4439_v5  ;;  %v4442_v57 = vmax.f32 %v4289_v9, %v4434_v38  ;;  %v3767_v20 = vmul.f32 0.03125, %v3749_v18 }
0x1537   :  { %v4459_v22 = vmul.f32 1.442695, %v4448_v13  ;;  %v4483_v63 = vmul.f32 1.442695, %v4472_v14  ;;  %v4441_v26 = vmax.f32 %v4288_v3, %v4433_v15  ;;  %v11840_v55 = vpop.f32.mrb[86].mxu1  ;;  %v11860_v62 = vpop.f32.mrb[90].mxu0 }
0x1538   :  { %v4457_v41 = vmul.f32 1.442695, %v4447_v30  ;;  %v4481_v6 = vmul.f32 1.442695, %v4471_v29  ;;  %v4450_v8 = vsub.f32 %v4289_v9, %v4442_v57  ;;  %v4474_v37 = vsub.f32 %v4434_v38, %v4442_v57  ;;  %v4275_v35 = vpop.f32.mrb[87].mxu1  ;;  %v4420_v53 = vpop.f32.mrb[91].mxu0 }
0x1539   :  { %12990 = vpow2.f32 %v4459_v22  ;;  %v4449_v7 = vsub.f32 %v4288_v3, %v4441_v26  ;;  %v4473_v25 = vsub.f32 %v4433_v15, %v4441_v26  ;;  %v14146_v17 = vsub.f32 %v14090_v59, %v3767_v20  ;;  %v3752_v2 = vpop.xlane.xlu0 %3751  ;;  %v3755_v48 = vpop.xlane.xlu1 %3754 }
0x153a   :  { %12992 = vpow2.f32 %v4483_v63  ;;  %v4463_v27 = vmul.f32 1.442695, %v4450_v8  ;;  %v4487_v0 = vmul.f32 1.442695, %v4474_v37  ;;  %v4291_v16 = vmul.f32 0.35355338, %v11840_v55 }
0x153b   :  { %v14148_v60 = vpop.eup %12982  ;;  %12994 = vpow2.f32 %v4457_v41  ;;  %v4461_v23 = vmul.f32 1.442695, %v4449_v7  ;;  %v4485_v11 = vmul.f32 1.442695, %v4473_v25  ;;  %v4436_v61 = vmul.f32 0.35355338, %v11860_v62 }
0x153c   :  { %v14150_v5 = vpop.eup %12984  ;;  %12996 = vpow2.f32 %v4481_v6  ;;  %v4290_v9 = vmul.f32 0.35355338, %v4275_v35  ;;  %v4435_v38 = vmul.f32 0.35355338, %v4420_v53  ;;  %v3768_v12 = vmul.f32 0.03125, %v3752_v2 }
0x153d   :  { %v14152_v59 = vpop.eup %12986  ;;  %v4494_v45 = vadd.f32 %v14150_v5, %v14148_v60  ;;  %12998 = vpow2.f32 %v4463_v27  ;;  %v4444_v13 = vmax.f32 %v4291_v16, %v4436_v61  ;;  %v3769_v14 = vmul.f32 0.03125, %v3755_v48  ;;  %v3758_v3 = vpop.xlane.xlu0 %3757 }
0x153e   :  { %v14156_v15 = vpop.eup %12988  ;;  %13000 = vpow2.f32 %v4487_v0  ;;  %v4443_v18 = vmax.f32 %v4290_v9, %v4435_v38  ;;  %v14159_v30 = vsub.f32 %v14093_v56, %v3768_v12  ;;  %v3770_v29 = vmul.f32 0.03125, %v3758_v3  ;;  %v3761_v62 = vpop.xlane.xlu1 %3760 }
0x153f   :  { %13002 = vrcp.f32 %v4494_v45  ;;  %v4493_v57 = vadd.f32 %v14156_v15, %v14152_v59  ;;  %v4452_v20 = vsub.f32 %v4291_v16, %v4444_v13  ;;  %v4476_v22 = vsub.f32 %v4436_v61, %v4444_v13 }
0x1540   :  { %13004 = vpow2.f32 %v4461_v23  ;;  %v4451_v63 = vsub.f32 %v4290_v9, %v4443_v18  ;;  %v4475_v26 = vsub.f32 %v4435_v38, %v4443_v18  ;;  %v14164_v55 = vsub.f32 %v14098_v19, %v3769_v14 }
0x1541   :  { %13006 = vrcp.f32 %v4493_v57  ;;  %v4467_v41 = vmul.f32 1.442695, %v4452_v20  ;;  %v4491_v6 = vmul.f32 1.442695, %v4476_v22  ;;  %v14167_v56 = vsub.f32 %v14103_v58, %v3770_v29  ;;  %v3764_v8 = vpop.xlane.xlu0 %3763 }
0x1542   :  { %13008 = vpow2.f32 %v4485_v11  ;;  %v4465_v37 = vmul.f32 1.442695, %v4451_v63  ;;  %v4489_v35 = vmul.f32 1.442695, %v4475_v26  ;;  %v3783_v53 = vmul.f32 %v14146_v17, %v14146_v17 }
0x1543   :  { %v12991_v7 = vpop.eup %12990  ;;  %13010 = vpow2.f32 %v4467_v41  ;;  %v3771_v25 = vmul.f32 0.03125, %v3761_v62  ;;  %v3784_v19 = vmul.f32 %v14159_v30, %v14159_v30  ;;  %v3772_v2 = vmul.f32 0.03125, %v3764_v8 }
0x1544   :  { %v12993_v27 = vpop.eup %12992  ;;  %13012 = vpow2.f32 %v4491_v6  ;;  %v3795_v0 = vsel %vm235_vm9, %v3783_v53, 0.0  ;;  %v3785_v58 = vmul.f32 %v14164_v55, %v14164_v55  ;;  %v3786_v16 = vmul.f32 %v14167_v56, %v14167_v56 }
0x1545   :  { %v12995_v48 = vpop.eup %12994  ;;  %v4496_v23 = vadd.f32 %v12993_v27, %v12991_v7  ;;  %13014 = vpow2.f32 %v4465_v37  ;;  %3796 = vadd.xlane.f32.xlu1 %v3795_v0  ;;  %v14179_v11 = vsub.f32 %v14108_v24, %v3771_v25  ;;  %v3798_v61 = vsel %vm235_vm9, %v3784_v19, 0.0 }
0x1546   :  { %v12997_v9 = vpop.eup %12996  ;;  %13016 = vpow2.f32 %v4489_v35  ;;  %3799 = vadd.xlane.f32.xlu0 %v3798_v61  ;;  %v14183_v38 = vsub.f32 %v14111_v34, %v3772_v2  ;;  %v3801_v12 = vsel %vm235_vm9, %v3785_v58, 0.0  ;;  %v3804_v14 = vsel %vm235_vm9, %v3786_v16, 0.0 }
0x1547   :  { %v12999_v45 = vpop.eup %12998  ;;  %13018 = vrcp.f32 %v4496_v23  ;;  %v4495_v13 = vadd.f32 %v12997_v9, %v12995_v48  ;;  %v3787_v3 = vmul.f32 %v14179_v11, %v14179_v11 }
0x1548   :  { %v13001_v24 = vpop.eup %13000  ;;  %v3788_v18 = vmul.f32 %v14183_v38, %v14183_v38 }
0x1549   :  { %v13003_v29 = vpop.eup %13002  ;;  %13020 = vrcp.f32 %v4495_v13  ;;  %v4498_v57 = vadd.f32 %v13001_v24, %v12999_v45  ;;  %3802 = vadd.xlane.f32.xlu1 %v3801_v12  ;;  %v3807_v63 = vsel %vm235_vm9, %v3787_v3, 0.0 }
0x154a   :  { %v13005_v34 = vpop.eup %13004  ;;  %v4510_v20 = vmul.f32 %v13003_v29, %v14148_v60  ;;  %v4518_v22 = vmul.f32 %v13003_v29, %v14150_v5  ;;  %3805 = vadd.xlane.f32.xlu0 %v3804_v14  ;;  %v3810_v62 = vsel %vm235_vm9, %v3788_v18, 0.0  ;;  %v4831_v18 = vld [vmem:[#allocation2 + $0x288] sm:$0xff]  ;;  %v4832_v29 = vld [vmem:[#allocation2 + $0x290] sm:$0xff] }
0x154b   :  { %v13007_v26 = vpop.eup %13006  ;;  %13022 = vrcp.f32 %v4498_v57  ;;  %v12620_v57 = vpack.c.bf16 %v4832_v29, %v4831_v18 }
0x154c   :  { %v13009_v41 = vpop.eup %13008  ;;  %v4509_v6 = vmul.f32 %v13007_v26, %v14152_v59  ;;  %v4517_v8 = vmul.f32 %v13007_v26, %v14156_v15 }
0x154d   :  { %v13011_v37 = vpop.eup %13010  ;;  %v4497_v35 = vadd.f32 %v13009_v41, %v13005_v34  ;;  %3808 = vadd.xlane.f32.xlu1 %v3807_v63  ;;  %12621 = vmatprep.subr.bf16.mxu1 %v12620_v57 }
0x154e   :  { %v13013_v53 = vpop.eup %13012  ;;  %3811 = vadd.xlane.f32.xlu0 %v3810_v62  ;;  %11863 = vmatprep.mubr.msk.f32.mxu1 %vm1301_vm11, %v4509_v6 }
0x154f   :  { %v13015_v60 = vpop.eup %13014  ;;  %13024 = vrcp.f32 %v4497_v35  ;;  %v4500_v5 = vadd.f32 %v13013_v53, %v13011_v37  ;;  %11877 = vmatprep.mubr.msk.f32.mxu0 %vm1301_vm11, %v4517_v8  ;;  %11864 = vmatmul.mubr.msk.f32.vlgmr.msra.gmra.mrb[88].mxu1 %vm1301_vm11, %v4510_v20  ;;  %v4834_v20 = vld [vmem:[#allocation2 + $0x2a0] sm:$0xff] }
0x1550   :  { %v13017_v25 = vpop.eup %13016  ;;  %11878 = vmatmul.mubr.msk.f32.vlgmr.msra.gmra.mrb[92].mxu0 %vm1301_vm11, %v4518_v22  ;;  %12623 = vmatpush3.bf16.msra.mxu1 %v12620_v57  ;;  %v14213_v35 = vld [vmem:[#allocation2 + $0x240] ss:$0 sm:$0xff] }
0x1551   :  { %v13019_v59 = vpop.eup %13018  ;;  %13026 = vrcp.f32 %v4500_v5  ;;  %v4499_v15 = vadd.f32 %v13017_v25, %v13015_v60  ;;  %v14216_v5 = vld [vmem:[#allocation2 + $0x248] ss:$0 sm:$0xff] }
0x1552   :  { %v4512_v19 = vmul.f32 %v13019_v59, %v12991_v7  ;;  %v4520_v2 = vmul.f32 %v13019_v59, %v12993_v27 }
0x1553   :  { %v13021_v0 = vpop.eup %13020  ;;  %13028 = vrcp.f32 %v4499_v15 }
0x1554   :  { %v4511_v58 = vmul.f32 %v13021_v0, %v12995_v48  ;;  %v4519_v16 = vmul.f32 %v13021_v0, %v12997_v9 }
0x1555   :  { %v13023_v23 = vpop.eup %13022 }
0x1556   :  { %11866 = vmatprep.mubr.msk.f32.mxu1 %vm1301_vm11, %v4511_v58  ;;  %11880 = vmatprep.mubr.msk.f32.mxu0 %vm1301_vm11, %v4519_v16  ;;  %v4514_v61 = vmul.f32 %v13023_v23, %v12999_v45  ;;  %v4522_v12 = vmul.f32 %v13023_v23, %v13001_v24 }
0x1557   :  { %11867 = vmatmul.mubr.msk.f32.gmra.mrb[90].mxu1 %vm1301_vm11, %v4512_v19  ;;  %11881 = vmatmul.mubr.msk.f32.gmra.mrb[94].mxu0 %vm1301_vm11, %v4520_v2 }
0x1559   :  { %v13025_v13 = vpop.eup %13024 }
0x155a   :  { %v4513_v14 = vmul.f32 %v13025_v13, %v13005_v34  ;;  %v4521_v3 = vmul.f32 %v13025_v13, %v13009_v41  ;;  %v4833_v34 = vld [vmem:[#allocation2 + $0x298] sm:$0xff] }
0x155b   :  { %v13027_v7 = vpop.eup %13026  ;;  %v12624_v22 = vpack.c.bf16 %v4834_v20, %v4833_v34 }
0x155c   :  { %11869 = vmatprep.mubr.msk.f32.mxu1 %vm1301_vm11, %v4513_v14  ;;  %11883 = vmatprep.mubr.msk.f32.mxu0 %vm1301_vm11, %v4521_v3  ;;  %v4516_v27 = vmul.f32 %v13027_v7, %v13011_v37  ;;  %v4524_v48 = vmul.f32 %v13027_v7, %v13013_v53 }
0x155d   :  { %v13029_v9 = vpop.eup %13028  ;;  %11870 = vmatmul.mubr.msk.f32.gmra.mrb[92].mxu1 %vm1301_vm11, %v4514_v61  ;;  %11884 = vmatmul.mubr.msk.f32.gmra.mrb[96].mxu0 %vm1301_vm11, %v4522_v12 }
0x155e   :  { %v4515_v45 = vmul.f32 %v13029_v9, %v13015_v60  ;;  %v4523_v24 = vmul.f32 %v13029_v9, %v13017_v25  ;;  %12625 = vmatprep.subr.bf16.mxu1 %v12624_v22 }
0x155f   :  { %12627 = vmatpush3.bf16.msra.mxu1 %v12624_v22 }
0x1560   :  { %11872 = vmatprep.mubr.msk.f32.mxu1 %vm1301_vm11, %v4515_v45  ;;  %11886 = vmatprep.mubr.msk.f32.mxu0 %vm1301_vm11, %v4523_v24 }
0x1561   :  { %11873 = vmatmul.mubr.msk.f32.gmra.mrb[94].mxu1 %vm1301_vm11, %v4516_v27  ;;  %11887 = vmatmul.mubr.msk.f32.gmra.mrb[98].mxu0 %vm1301_vm11, %v4524_v48 }
0x15bf   :  { %v3794_v63 = vpop.xlane.xlu0 %3793  ;;  %v3791_v26 = vpop.xlane.xlu1 %3790 }
0x15c0   :  { %v3814_v62 = vmul.f32 0.03125, %v3794_v63  ;;  %v3813_v41 = vmul.f32 0.03125, %v3791_v26 }
0x15c2   :  { %v3822_v6 = vadd.f32 1e-05, %v3814_v62  ;;  %v3821_v8 = vadd.f32 1e-05, %v3813_v41 }
0x15c4   :  { %13030 = vrsqrt.f32 %v3822_v6 }
0x15c5   :  { %13032 = vrsqrt.f32 %v3821_v8 }
0x15ce   :  { %v13031_v37 = vpop.eup %13030 }
0x15cf   :  { %v13033_v53 = vpop.eup %13032  ;;  %v3838_v60 = vmul.f32 %v13031_v37, %v14135_v21 }
0x15d0   :  { %v3837_v25 = vmul.f32 %v13033_v53, %v14137_v28 }
0x15d1   :  { %v3851_v59 = vmul.f32 %v14213_v35, %v3838_v60 }
0x15d2   :  { %v3797_v15 = vpop.xlane.xlu1 %3796  ;;  %v3850_v19 = vmul.f32 %v14213_v35, %v3837_v25 }
0x15d3   :  { %v3815_v2 = vmul.f32 0.03125, %v3797_v15  ;;  %v3800_v0 = vpop.xlane.xlu0 %3799  ;;  %v14222_v58 = vadd.f32 %v14216_v5, %v3851_v59 }
0x15d4   :  { %v3816_v16 = vmul.f32 0.03125, %v3800_v0  ;;  %v14225_v23 = vadd.f32 %v14216_v5, %v3850_v19 }
0x15d5   :  { %v3823_v61 = vadd.f32 1e-05, %v3815_v2  ;;  %v3874_v21 = vsel %vm235_vm9, %v14222_v58, 0.0 }
0x15d6   :  { %v3824_v12 = vadd.f32 1e-05, %v3816_v16  ;;  %v3803_v28 = vpop.xlane.xlu1 %3802  ;;  %3875 = vadd.xlane.f32.xlu0 %v3874_v21  ;;  %v3871_v13 = vsel %vm235_vm9, %v14225_v23, 0.0 }
0x15d7   :  { %13034 = vrsqrt.f32 %v3823_v61  ;;  %v3817_v14 = vmul.f32 0.03125, %v3803_v28  ;;  %v3806_v3 = vpop.xlane.xlu0 %3805  ;;  %3872 = vadd.xlane.f32.xlu1 %v3871_v13 }
0x15d8   :  { %13036 = vrsqrt.f32 %v3824_v12  ;;  %v3818_v7 = vmul.f32 0.03125, %v3806_v3 }
0x15d9   :  { %v3825_v27 = vadd.f32 1e-05, %v3817_v14 }
0x15da   :  { %v3826_v48 = vadd.f32 1e-05, %v3818_v7  ;;  %v3809_v9 = vpop.xlane.xlu1 %3808 }
0x15db   :  { %13038 = vrsqrt.f32 %v3825_v27  ;;  %v3819_v45 = vmul.f32 0.03125, %v3809_v9  ;;  %v3812_v24 = vpop.xlane.xlu0 %3811 }
0x15dc   :  { %13040 = vrsqrt.f32 %v3826_v48  ;;  %v3820_v18 = vmul.f32 0.03125, %v3812_v24 }
0x15dd   :  { %v3827_v29 = vadd.f32 1e-05, %v3819_v45 }
0x15de   :  { %v3828_v57 = vadd.f32 1e-05, %v3820_v18 }
0x15df   :  { %13042 = vrsqrt.f32 %v3827_v29 }
0x15e0   :  { %13044 = vrsqrt.f32 %v3828_v57 }
0x15e1   :  { %v13035_v34 = vpop.eup %13034 }
0x15e2   :  { %v13037_v20 = vpop.eup %13036  ;;  %v3839_v22 = vmul.f32 %v13035_v34, %v14146_v17 }
0x15e3   :  { %v3840_v63 = vmul.f32 %v13037_v20, %v14159_v30 }
0x15e4   :  { %v3852_v26 = vmul.f32 %v14213_v35, %v3839_v22 }
0x15e5   :  { %v13039_v62 = vpop.eup %13038  ;;  %v3853_v41 = vmul.f32 %v14213_v35, %v3840_v63 }
0x15e6   :  { %v13041_v6 = vpop.eup %13040  ;;  %v14236_v8 = vadd.f32 %v14216_v5, %v3852_v26  ;;  %v3841_v37 = vmul.f32 %v13039_v62, %v14164_v55 }
0x15e7   :  { %v14240_v53 = vadd.f32 %v14216_v5, %v3853_v41  ;;  %v3842_v60 = vmul.f32 %v13041_v6, %v14167_v56 }
0x15e8   :  { %v3877_v17 = vsel %vm235_vm9, %v14236_v8, 0.0  ;;  %v3854_v15 = vmul.f32 %v14213_v35, %v3841_v37 }
0x15e9   :  { %v13043_v30 = vpop.eup %13042  ;;  %3878 = vadd.xlane.f32.xlu1 %v3877_v17  ;;  %v3880_v25 = vsel %vm235_vm9, %v14240_v53, 0.0  ;;  %v3855_v59 = vmul.f32 %v14213_v35, %v3842_v60 }
0x15ea   :  { %v13045_v19 = vpop.eup %13044  ;;  %3881 = vadd.xlane.f32.xlu0 %v3880_v25  ;;  %v14256_v0 = vadd.f32 %v14216_v5, %v3854_v15  ;;  %v3843_v61 = vmul.f32 %v13043_v30, %v14179_v11 }
0x15eb   :  { %v14250_v55 = vadd.f32 %v14216_v5, %v3855_v59  ;;  %v3844_v2 = vmul.f32 %v13045_v19, %v14183_v38 }
0x15ec   :  { %v3883_v21 = vsel %vm235_vm9, %v14256_v0, 0.0  ;;  %v3856_v28 = vmul.f32 %v14213_v35, %v3843_v61 }
0x15ed   :  { %v3886_v56 = vsel %vm235_vm9, %v14250_v55, 0.0  ;;  %v3857_v16 = vmul.f32 %v14213_v35, %v3844_v2 }
0x15ee   :  { %3887 = vadd.xlane.f32.xlu1 %v3886_v56  ;;  %v14269_v13 = vadd.f32 %v14216_v5, %v3856_v28 }
0x15ef   :  { %v14263_v12 = vadd.f32 %v14216_v5, %v3857_v16 }
0x15f0   :  { %v3889_v11 = vsel %vm235_vm9, %v14269_v13, 0.0 }
0x15f1   :  { %v3892_v38 = vsel %vm235_vm9, %v14263_v12, 0.0 }
0x15f2   :  { %3884 = vadd.xlane.f32.xlu1 %v3883_v21 }
0x15f6   :  { %3893 = vadd.xlane.f32.xlu1 %v3892_v38 }
0x15fa   :  { %3890 = vadd.xlane.f32.xlu1 %v3889_v11 }
0x1622   :  { %v11865_v14 = vpop.f32.mrb[88].mxu1 }
0x1623   :  { %v4679_v3 = vmul.f32 %v11865_v14, %v14125_v47  ;;  %v11879_v7 = vpop.f32.mrb[92].mxu0  ;;  %v4615_v27 = vpop.f32.mrb[89].mxu1 }
0x1624   :  { %v4816_v48 = vmul.f32 %v11879_v7, %v14123_v1  ;;  %v4678_v35 = vmul.f32 %v14121_v42, %v4615_v27  ;;  %v4776_v9 = vpop.f32.mrb[93].mxu0 }
0x1625   :  { %v4815_v45 = vmul.f32 %v4776_v9, %v14119_v39 }
0x1626   :  { %v4824_v24 = vadd.f32 %v4816_v48, %v4679_v3 }
0x1627   :  { %v4823_v5 = vadd.f32 %v4815_v45, %v4678_v35 }
0x1629   :  { %11897 = vmatprep.mubr.msk.f32.mxu1 %vm235_vm9, %v4823_v5 }
0x162a   :  { %v11868_v18 = vpop.f32.mrb[90].mxu1  ;;  %v11882_v29 = vpop.f32.mrb[94].mxu0  ;;  %11898 = vmatmul.mubr.msk.f32.vlgmr.msra.gmra.mrb[96].mxu1 %vm235_vm9, %v4824_v24 }
0x162b   :  { %v4681_v57 = vmul.f32 %v11868_v18, %v14133_v10  ;;  %v4818_v34 = vmul.f32 %v11882_v29, %v14131_v46  ;;  %v4625_v20 = vpop.f32.mrb[91].mxu1  ;;  %v4786_v22 = vpop.f32.mrb[95].mxu0 }
0x162c   :  { %v4680_v63 = vmul.f32 %v14129_v4, %v4625_v20  ;;  %v4817_v26 = vmul.f32 %v4786_v22, %v14127_v43 }
0x162d   :  { %v4826_v62 = vadd.f32 %v4818_v34, %v4681_v57 }
0x162e   :  { %v4825_v41 = vadd.f32 %v4817_v26, %v4680_v63 }
0x1630   :  { %v11871_v6 = vpop.f32.mrb[92].mxu1  ;;  %v11885_v37 = vpop.f32.mrb[96].mxu0  ;;  %11900 = vmatprep.mubr.msk.f32.mxu1 %vm235_vm9, %v4825_v41 }
0x1631   :  { %v4683_v60 = vmul.f32 %v11871_v6, %v14123_v1  ;;  %v4820_v17 = vmul.f32 %v11885_v37, %v14125_v47  ;;  %v4635_v30 = vpop.f32.mrb[93].mxu1  ;;  %v4796_v25 = vpop.f32.mrb[97].mxu0  ;;  %11901 = vmatmul.mubr.msk.f32.gmra.mrb[98].mxu1 %vm235_vm9, %v4826_v62 }
0x1632   :  { %v4682_v59 = vmul.f32 %v14119_v39, %v4635_v30  ;;  %v4819_v15 = vmul.f32 %v4796_v25, %v14121_v42  ;;  %v10523_v42 = vld [vmem:[#allocation2 + $0x2a8] ss:$0 sm:$0xff] }
0x1633   :  { %v4828_v19 = vadd.f32 %v4820_v17, %v4683_v60 }
0x1634   :  { %v4827_v2 = vadd.f32 %v4819_v15, %v4682_v59  ;;  %v11874_v56 = vpop.f32.mrb[94].mxu1  ;;  %v11888_v16 = vpop.f32.mrb[98].mxu0 }
0x1635   :  { %v4685_v61 = vmul.f32 %v11874_v56, %v14131_v46  ;;  %v4822_v21 = vmul.f32 %v11888_v16, %v14133_v10  ;;  %v4645_v28 = vpop.f32.mrb[95].mxu1  ;;  %v4806_v1 = vpop.f32.mrb[99].mxu0 }
0x1636   :  { %v4684_v47 = vmul.f32 %v14127_v43, %v4645_v28  ;;  %v4821_v38 = vmul.f32 %v4806_v1, %v14129_v4  ;;  %11903 = vmatprep.mubr.msk.f32.mxu1 %vm235_vm9, %v4827_v2 }
0x1637   :  { %v4830_v11 = vadd.f32 %v4822_v21, %v4685_v61  ;;  %11904 = vmatmul.mubr.msk.f32.gmra.mrb[100].mxu1 %vm235_vm9, %v4828_v19 }
0x1638   :  { %v4829_v39 = vadd.f32 %v4821_v38, %v4684_v47 }
0x163a   :  { %11906 = vmatprep.mubr.msk.f32.mxu1 %vm235_vm9, %v4829_v39 }
0x163b   :  { %11907 = vmatmul.mubr.msk.f32.gmra.mrb[102].mxu1 %vm235_vm9, %v4830_v11 }
0x1663   :  { %v3876_v29 = vpop.xlane.xlu0 %3875 }
0x1664   :  { %v3873_v3 = vpop.xlane.xlu1 %3872  ;;  %v3896_v62 = vmul.f32 0.03125, %v3876_v29  ;;  %v5246_v29 = vld [vmem:[#allocation2 + $0x2f0] sm:$0xff] }
0x1665   :  { %v3895_v63 = vmul.f32 0.03125, %v3873_v3 }
0x1666   :  { %v14329_v19 = vsub.f32 %v14222_v58, %v3896_v62 }
0x1667   :  { %v14324_v25 = vsub.f32 %v14225_v23, %v3895_v63 }
0x1668   :  { %v3912_v1 = vmul.f32 %v14329_v19, %v14329_v19 }
0x1669   :  { %v3911_v28 = vmul.f32 %v14324_v25, %v14324_v25 }
0x166b   :  { %v3919_v38 = vsel %vm235_vm9, %v3911_v28, 0.0 }
0x1676   :  { %v3879_v48 = vpop.xlane.xlu1 %3878 }
0x1677   :  { %v3882_v60 = vpop.xlane.xlu0 %3881  ;;  %v3897_v59 = vmul.f32 0.03125, %v3879_v48 }
0x1679   :  { %v14340_v61 = vsub.f32 %v14236_v8, %v3897_v59 }
0x167b   :  { %v3888_v18 = vpop.xlane.xlu1 %3887  ;;  %v3913_v11 = vmul.f32 %v14340_v61, %v14340_v61 }
0x167c   :  { %v3900_v8 = vmul.f32 0.03125, %v3888_v18  ;;  %v5245_v18 = vld [vmem:[#allocation2 + $0x2e8] sm:$0xff] }
0x167f   :  { %v3885_v41 = vpop.xlane.xlu1 %3884 }
0x1680   :  { %v3899_v21 = vmul.f32 0.03125, %v3885_v41 }
0x1682   :  { %v14354_v47 = vsub.f32 %v14256_v0, %v3899_v21  ;;  %v3925_v0 = vsel %vm235_vm9, %v3913_v11, 0.0 }
0x1683   :  { %v3894_v16 = vpop.xlane.xlu1 %3893 }
0x1687   :  { %v3891_v39 = vpop.xlane.xlu1 %3890 }
0x16fd   :  { %v11899_v46 = vpop.f32.mrb[96].mxu1 }
0x16fe   :  { %v4936_v14 = vadd.f32 %v11899_v46, %v10523_v42  ;;  %v4930_v10 = vpop.f32.mrb[97].mxu1  ;;  %v14363_v46 = vsub.f32 %v14250_v55, %v3900_v8 }
0x16ff   :  { %v4931_v7 = vadd.f32 %v10523_v42, %v4930_v10  ;;  %v3915_v10 = vmul.f32 %v14354_v47, %v14354_v47 }
0x1700   :  { %v14298_v43 = vadd.f32 %v4936_v14, %v13515_v33  ;;  %v3901_v14 = vmul.f32 0.03125, %v3891_v39  ;;  %v3916_v55 = vmul.f32 %v14363_v46, %v14363_v46 }
0x1701   :  { %v14301_v4 = vadd.f32 %v4931_v7, %v13512_v32  ;;  %v3902_v7 = vmul.f32 0.03125, %v3894_v16  ;;  %v3931_v48 = vsel %vm235_vm9, %v3915_v10, 0.0 }
0x1702   :  { %v4980_v27 = vsel %vm235_vm9, %v14298_v43, 0.0 }
0x1703   :  { %4981 = vadd.xlane.f32.xlu0 %v4980_v27  ;;  %v4977_v5 = vsel %vm235_vm9, %v14301_v4, 0.0  ;;  %v14370_v27 = vsub.f32 %v14269_v13, %v3901_v14 }
0x1704   :  { %v11902_v35 = vpop.f32.mrb[98].mxu1 }
0x1705   :  { %v4940_v9 = vpop.f32.mrb[99].mxu1  ;;  %v4946_v45 = vadd.f32 %v11902_v35, %v10523_v42  ;;  %v14376_v35 = vsub.f32 %v14263_v12, %v3902_v7  ;;  %v5247_v12 = vld [vmem:[#allocation2 + $0x2f8] sm:$0xff] }
0x1706   :  { %v4941_v24 = vadd.f32 %v10523_v42, %v4940_v9  ;;  %v3934_v9 = vsel %vm235_vm9, %v3916_v55, 0.0 }
0x1707   :  { %4978 = vadd.xlane.f32.xlu0 %v4977_v5  ;;  %v14311_v32 = vadd.f32 %v4946_v45, %v13527_v50  ;;  %v3917_v45 = vmul.f32 %v14370_v27, %v14370_v27  ;;  %v3918_v13 = vmul.f32 %v14376_v35, %v14376_v35 }
0x1708   :  { %v14308_v33 = vadd.f32 %v4941_v24, %v13522_v36 }
0x1709   :  { %v4986_v50 = vsel %vm235_vm9, %v14311_v32, 0.0  ;;  %v3937_v24 = vsel %vm235_vm9, %v3917_v45, 0.0  ;;  %v3940_v5 = vsel %vm235_vm9, %v3918_v13, 0.0 }
0x170a   :  { %v11905_v57 = vpop.f32.mrb[100].mxu1  ;;  %v4983_v34 = vsel %vm235_vm9, %v14308_v33, 0.0 }
0x170b   :  { %v4956_v20 = vadd.f32 %v11905_v57, %v10523_v42  ;;  %v4950_v22 = vpop.f32.mrb[101].mxu1  ;;  %4984 = vadd.xlane.f32.xlu0 %v4983_v34  ;;  %v12636_v57 = vpack.c.bf16 %v5246_v29, %v5245_v18  ;;  %v5248_v34 = vld [vmem:[#allocation2 + $0x300] sm:$0xff] }
0x170c   :  { %v4951_v26 = vadd.f32 %v10523_v42, %v4950_v22 }
0x170d   :  { %v14316_v6 = vadd.f32 %v4956_v20, %v13537_v54  ;;  %12637 = vmatprep.subr.bf16.mxu1 %v12636_v57  ;;  %v12640_v20 = vpack.c.bf16 %v5248_v34, %v5247_v12 }
0x170e   :  { %v14319_v36 = vadd.f32 %v4951_v26, %v13530_v49  ;;  %v11908_v37 = vpop.f32.mrb[102].mxu1  ;;  %v3898_v49 = vmul.f32 0.03125, %v3882_v60  ;;  %12639 = vmatpush3.bf16.msra.mxu1 %v12636_v57 }
0x170f   :  { %v4966_v17 = vadd.f32 %v11908_v37, %v10523_v42  ;;  %v4960_v30 = vpop.f32.mrb[103].mxu1  ;;  %4987 = vadd.xlane.f32.xlu0 %v4986_v50  ;;  %v4992_v23 = vsel %vm235_vm9, %v14316_v6, 0.0  ;;  %12641 = vmatprep.subr.bf16.mxu1 %v12640_v20 }
0x1710   :  { %v4961_v15 = vadd.f32 %v10523_v42, %v4960_v30  ;;  %v4989_v54 = vsel %vm235_vm9, %v14319_v36, 0.0 }
0x1711   :  { %4990 = vadd.xlane.f32.xlu1 %v4989_v54  ;;  %v14332_v2 = vadd.f32 %v4966_v17, %v13547_v52  ;;  %v14347_v52 = vsub.f32 %v14240_v53, %v3898_v49  ;;  %v3922_v53 = vsel %vm235_vm9, %v3912_v1, 0.0 }
0x1712   :  { %v14335_v56 = vadd.f32 %v4961_v15, %v13540_v40  ;;  %12643 = vmatpush3.bf16.msra.mxu1 %v12640_v20 }
0x1713   :  { %4993 = vadd.xlane.f32.xlu0 %v4992_v23  ;;  %v4998_v40 = vsel %vm235_vm9, %v14332_v2, 0.0  ;;  %v3914_v42 = vmul.f32 %v14347_v52, %v14347_v52  ;;  %12653 = vmatprep.subr.bf16.mxu1 %v13551_v51 }
0x1714   :  { %v4995_v58 = vsel %vm235_vm9, %v14335_v56, 0.0 }
0x1715   :  { %4996 = vadd.xlane.f32.xlu1 %v4995_v58  ;;  %v3928_v3 = vsel %vm235_vm9, %v3914_v42, 0.0 }
0x1717   :  { %4999 = vadd.xlane.f32.xlu0 %v4998_v40 }
0x1719   :  { %3920 = vadd.xlane.f32.xlu1 %v3919_v38 }
0x171b   :  { %3923 = vadd.xlane.f32.xlu0 %v3922_v53 }
0x171d   :  { %3926 = vadd.xlane.f32.xlu1 %v3925_v0 }
0x171f   :  { %3929 = vadd.xlane.f32.xlu0 %v3928_v3 }
0x1721   :  { %3932 = vadd.xlane.f32.xlu1 %v3931_v48 }
0x1725   :  { %3935 = vadd.xlane.f32.xlu1 %v3934_v9 }
0x1729   :  { %3938 = vadd.xlane.f32.xlu1 %v3937_v24 }
0x172d   :  { %3941 = vadd.xlane.f32.xlu1 %v3940_v5 }
0x1790   :  { %v4982_v22 = vpop.xlane.xlu0 %4981 }
0x1791   :  { %v5002_v63 = vmul.f32 0.03125, %v4982_v22 }
0x1793   :  { %v14387_v26 = vsub.f32 %v14298_v43, %v5002_v63 }
0x1794   :  { %v4979_v62 = vpop.xlane.xlu0 %4978 }
0x1795   :  { %v5001_v41 = vmul.f32 0.03125, %v4979_v62  ;;  %v5018_v37 = vmul.f32 %v14387_v26, %v14387_v26 }
0x1797   :  { %v14392_v50 = vsub.f32 %v14301_v4, %v5001_v41  ;;  %v5028_v60 = vsel %vm235_vm9, %v5018_v37, 0.0 }
0x1798   :  { %v4985_v17 = vpop.xlane.xlu0 %4984  ;;  %5029 = vadd.xlane.f32.xlu0 %v5028_v60  ;;  %v14434_v60 = vld [vmem:[#allocation2 + $0x250] ss:$0 sm:$0xff] }
0x1799   :  { %v5003_v30 = vmul.f32 0.03125, %v4985_v17  ;;  %v5017_v59 = vmul.f32 %v14392_v50, %v14392_v50 }
0x179b   :  { %v14398_v15 = vsub.f32 %v14308_v33, %v5003_v30  ;;  %v5025_v43 = vsel %vm235_vm9, %v5017_v59, 0.0 }
0x179c   :  { %v4988_v54 = vpop.xlane.xlu0 %4987  ;;  %5026 = vadd.xlane.f32.xlu0 %v5025_v43 }
0x179d   :  { %v5004_v49 = vmul.f32 0.03125, %v4988_v54  ;;  %v5019_v4 = vmul.f32 %v14398_v15, %v14398_v15 }
0x179e   :  { %v4991_v23 = vpop.xlane.xlu1 %4990 }
0x179f   :  { %v14404_v16 = vsub.f32 %v14311_v32, %v5004_v49  ;;  %v5005_v21 = vmul.f32 0.03125, %v4991_v23  ;;  %v5031_v58 = vsel %vm235_vm9, %v5019_v4, 0.0  ;;  %v10479_v49 = vld [vmem:[#allocation2 + $0x258] ss:$0 sm:$0xff] }
0x17a0   :  { %v4994_v28 = vpop.xlane.xlu0 %4993  ;;  %5032 = vadd.xlane.f32.xlu0 %v5031_v58 }
0x17a1   :  { %v14408_v33 = vsub.f32 %v14319_v36, %v5005_v21  ;;  %v5006_v40 = vmul.f32 0.03125, %v4994_v28  ;;  %v5020_v1 = vmul.f32 %v14404_v16, %v14404_v16 }
0x17a2   :  { %v4997_v8 = vpop.xlane.xlu1 %4996 }
0x17a3   :  { %v14413_v38 = vsub.f32 %v14316_v6, %v5006_v40  ;;  %v5007_v11 = vmul.f32 0.03125, %v4997_v8  ;;  %v5034_v32 = vsel %vm235_vm9, %v5020_v1, 0.0  ;;  %v5021_v39 = vmul.f32 %v14408_v33, %v14408_v33 }
0x17a4   :  { %5035 = vadd.xlane.f32.xlu0 %v5034_v32  ;;  %v5000_v53 = vpop.xlane.xlu0 %4999  ;;  %v5108_v32 = vld [vmem:[#allocation2 + $0x2c8] sm:$0xff] }
0x17a5   :  { %v14419_v42 = vsub.f32 %v14335_v56, %v5007_v11  ;;  %v5008_v36 = vmul.f32 0.03125, %v5000_v53  ;;  %v5037_v14 = vsel %vm235_vm9, %v5021_v39, 0.0  ;;  %v5022_v0 = vmul.f32 %v14413_v38, %v14413_v38  ;;  %v5107_v11 = vld [vmem:[#allocation2 + $0x2c0] sm:$0xff] }
0x17a6   :  { %5038 = vadd.xlane.f32.xlu1 %v5037_v14  ;;  %v3921_v6 = vpop.xlane.xlu1 %3920  ;;  %v12628_v53 = vpack.c.bf16 %v5108_v32, %v5107_v11 }
0x17a7   :  { %v14425_v10 = vsub.f32 %v14332_v2, %v5008_v36  ;;  %v3943_v3 = vmul.f32 0.03125, %v3921_v6  ;;  %v5040_v7 = vsel %vm235_vm9, %v5022_v0, 0.0  ;;  %v5023_v48 = vmul.f32 %v14419_v42, %v14419_v42 }
0x17a8   :  { %5041 = vadd.xlane.f32.xlu0 %v5040_v7  ;;  %v3924_v56 = vpop.xlane.xlu0 %3923  ;;  %12629 = vmatprep.subr.bf16.mxu0 %v12628_v53 }
0x17a9   :  { %v3951_v55 = vadd.f32 1e-05, %v3943_v3  ;;  %v3944_v9 = vmul.f32 0.03125, %v3924_v56  ;;  %v5043_v45 = vsel %vm235_vm9, %v5023_v48, 0.0  ;;  %v5024_v24 = vmul.f32 %v14425_v10, %v14425_v10  ;;  %12631 = vmatpush3.bf16.msra.mxu0 %v12628_v53  ;;  %v5109_v48 = vld [vmem:[#allocation2 + $0x2d0] sm:$0xff]  ;;  %v5110_v56 = vld [vmem:[#allocation2 + $0x2d8] sm:$0xff] }
0x17aa   :  { %5044 = vadd.xlane.f32.xlu1 %v5043_v45  ;;  %v3927_v13 = vpop.xlane.xlu1 %3926 }
0x17ab   :  { %13046 = vrsqrt.f32 %v3951_v55  ;;  %v3952_v2 = vadd.f32 1e-05, %v3944_v9  ;;  %v3945_v5 = vmul.f32 0.03125, %v3927_v13  ;;  %v5046_v18 = vsel %vm235_vm9, %v5024_v24, 0.0 }
0x17ac   :  { %5047 = vadd.xlane.f32.xlu0 %v5046_v18  ;;  %v3930_v29 = vpop.xlane.xlu0 %3929  ;;  %v12632_v55 = vpack.c.bf16 %v5110_v56, %v5109_v48 }
0x17ad   :  { %13048 = vrsqrt.f32 %v3952_v2  ;;  %v3953_v57 = vadd.f32 1e-05, %v3945_v5  ;;  %v3946_v12 = vmul.f32 0.03125, %v3930_v29  ;;  %v14472_v2 = vld [vmem:[#allocation2 + $0x5c8] sm:$0xf] }
0x17ae   :  { %v3933_v34 = vpop.xlane.xlu1 %3932  ;;  %12633 = vmatprep.subr.bf16.mxu0 %v12632_v55 }
0x17af   :  { %13050 = vrsqrt.f32 %v3953_v57  ;;  %v3954_v20 = vadd.f32 1e-05, %v3946_v12  ;;  %v3947_v22 = vmul.f32 0.03125, %v3933_v34  ;;  %12635 = vmatpush3.bf16.msra.mxu0 %v12632_v55 }
0x17b0   :  { %12645 = vmatprep.subr.bf16.mxu0 %v13551_v51 }
0x17b1   :  { %13052 = vrsqrt.f32 %v3954_v20  ;;  %v3955_v63 = vadd.f32 1e-05, %v3947_v22 }
0x17b2   :  { %v3936_v62 = vpop.xlane.xlu1 %3935 }
0x17b3   :  { %13054 = vrsqrt.f32 %v3955_v63  ;;  %v3948_v41 = vmul.f32 0.03125, %v3936_v62 }
0x17b5   :  { %v13047_v37 = vpop.eup %13046  ;;  %v3956_v17 = vadd.f32 1e-05, %v3948_v41 }
0x17b6   :  { %v3939_v30 = vpop.xlane.xlu1 %3938  ;;  %v3967_v59 = vmul.f32 %v13047_v37, %v14324_v25 }
0x17b7   :  { %v13049_v43 = vpop.eup %13048  ;;  %13056 = vrsqrt.f32 %v3956_v17  ;;  %v3949_v54 = vmul.f32 0.03125, %v3939_v30 }
0x17b8   :  { %v3968_v4 = vmul.f32 %v13049_v43, %v14329_v19  ;;  %v3980_v23 = vmul.f32 %v14434_v60, %v3967_v59 }
0x17b9   :  { %v13051_v21 = vpop.eup %13050  ;;  %v3957_v58 = vadd.f32 1e-05, %v3949_v54 }
0x17ba   :  { %v3981_v28 = vmul.f32 %v14434_v60, %v3968_v4  ;;  %v3942_v40 = vpop.xlane.xlu1 %3941  ;;  %v14440_v1 = vadd.f32 %v10479_v49, %v3980_v23  ;;  %v3969_v8 = vmul.f32 %v13051_v21, %v14340_v61 }
0x17bb   :  { %v13053_v25 = vpop.eup %13052  ;;  %13058 = vrsqrt.f32 %v3957_v58  ;;  %v3950_v39 = vmul.f32 0.03125, %v3942_v40 }
0x17bc   :  { %11937 = vmatprep.mubr.msk.f32.mxu1 %vm235_vm9, %v14440_v1  ;;  %v14445_v19 = vadd.f32 %v10479_v49, %v3981_v28  ;;  %v3982_v36 = vmul.f32 %v14434_v60, %v3969_v8  ;;  %v3970_v14 = vmul.f32 %v13053_v25, %v14347_v52  ;;  %v10532_v8 = vld [vmem:[#allocation2 + $0x2b0] ss:$0 sm:$0xff] }
0x17bd   :  { %v13055_v0 = vpop.eup %13054  ;;  %v3958_v6 = vadd.f32 1e-05, %v3950_v39 }
0x17be   :  { %11938 = vmatmul.mubr.msk.f32.vlgmr.msra.gmra.mrb[104].mxu1 %vm235_vm9, %v14445_v19  ;;  %v14451_v61 = vadd.f32 %v10479_v49, %v3982_v36  ;;  %v3983_v3 = vmul.f32 %v14434_v60, %v3970_v14  ;;  %v3971_v7 = vmul.f32 %v13055_v0, %v14354_v47 }
0x17bf   :  { %13060 = vrsqrt.f32 %v3958_v6  ;;  %12655 = vmatpush3.bf16.msra.mxu1 %v13551_v51 }
0x17c0   :  { %11940 = vmatprep.mubr.msk.f32.mxu1 %vm235_vm9, %v14451_v61  ;;  %v14458_v52 = vadd.f32 %v10479_v49, %v3983_v3  ;;  %v3984_v9 = vmul.f32 %v14434_v60, %v3971_v7  ;;  %12657 = vmatprep.subr.bf16.mxu1 %v13557_v44  ;;  %v10533_v7 = vld [vmem:[#allocation2 + $0x2b8] ss:$0 sm:$0xff] }
0x17c1   :  { %v13057_v45 = vpop.eup %13056 }
0x17c2   :  { %11941 = vmatmul.mubr.msk.f32.gmra.mrb[106].mxu1 %vm235_vm9, %v14458_v52  ;;  %v14464_v47 = vadd.f32 %v10479_v49, %v3984_v9  ;;  %v3972_v24 = vmul.f32 %v13057_v45, %v14363_v46 }
0x17c3   :  { %12659 = vmatpush3.bf16.msra.mxu1 %v13557_v44 }
0x17c4   :  { %11943 = vmatprep.mubr.msk.f32.mxu1 %vm235_vm9, %v14464_v47  ;;  %v3985_v13 = vmul.f32 %v14434_v60, %v3972_v24  ;;  %12003 = vmatprep.subr.msk.mxu1 %vm1326_vm10, %v14472_v2 }
0x17c5   :  { %v13059_v5 = vpop.eup %13058 }
0x17c6   :  { %v14476_v18 = vadd.f32 %v10479_v49, %v3985_v13  ;;  %v3973_v46 = vmul.f32 %v13059_v5, %v14370_v27 }
0x17c8   :  { %11944 = vmatmul.mubr.msk.f32.gmra.mrb[108].mxu1 %vm235_vm9, %v14476_v18  ;;  %v3986_v29 = vmul.f32 %v14434_v60, %v3973_v46 }
0x17c9   :  { %v13061_v57 = vpop.eup %13060 }
0x17ca   :  { %v14482_v12 = vadd.f32 %v10479_v49, %v3986_v29  ;;  %v3974_v34 = vmul.f32 %v13061_v57, %v14376_v35 }
0x17cc   :  { %11946 = vmatprep.mubr.msk.f32.mxu1 %vm235_vm9, %v14482_v12  ;;  %v3987_v20 = vmul.f32 %v14434_v60, %v3974_v34 }
0x17ce   :  { %v14488_v22 = vadd.f32 %v10479_v49, %v3987_v20 }
0x17d0   :  { %11947 = vmatmul.mubr.msk.f32.gmra.mrb[110].mxu1 %vm235_vm9, %v14488_v22 }
0x1825   :  { %v5030_v27 = vpop.xlane.xlu0 %5029 }
0x1826   :  { %v5050_v63 = vmul.f32 0.03125, %v5030_v27 }
0x1828   :  { %v5058_v62 = vadd.f32 1e-05, %v5050_v63 }
0x1829   :  { %v5027_v41 = vpop.xlane.xlu0 %5026 }
0x182a   :  { %13062 = vrsqrt.f32 %v5058_v62  ;;  %v5049_v37 = vmul.f32 0.03125, %v5027_v41 }
0x182c   :  { %v5057_v17 = vadd.f32 1e-05, %v5049_v37 }
0x182d   :  { %v5033_v30 = vpop.xlane.xlu0 %5032 }
0x182e   :  { %13064 = vrsqrt.f32 %v5057_v17  ;;  %v5051_v35 = vmul.f32 0.03125, %v5033_v30 }
0x1830   :  { %v5059_v59 = vadd.f32 1e-05, %v5051_v35 }
0x1831   :  { %v5036_v43 = vpop.xlane.xlu0 %5035 }
0x1832   :  { %13066 = vrsqrt.f32 %v5059_v59  ;;  %v5052_v54 = vmul.f32 0.03125, %v5036_v43 }
0x1833   :  { %v5039_v60 = vpop.xlane.xlu1 %5038 }
0x1834   :  { %v13063_v49 = vpop.eup %13062  ;;  %v5060_v4 = vadd.f32 1e-05, %v5052_v54  ;;  %v5053_v23 = vmul.f32 0.03125, %v5039_v60 }
0x1835   :  { %v5042_v21 = vpop.xlane.xlu0 %5041  ;;  %v5074_v58 = vmul.f32 %v13063_v49, %v14387_v26 }
0x1836   :  { %13068 = vrsqrt.f32 %v5060_v4  ;;  %v5061_v28 = vadd.f32 1e-05, %v5053_v23  ;;  %v5054_v40 = vmul.f32 0.03125, %v5042_v21 }
0x1837   :  { %v5045_v11 = vpop.xlane.xlu1 %5044  ;;  %v5087_v14 = vmul.f32 %v10532_v8, %v5074_v58 }
0x1838   :  { %v13065_v32 = vpop.eup %13064  ;;  %13070 = vrsqrt.f32 %v5061_v28  ;;  %v5062_v25 = vadd.f32 1e-05, %v5054_v40  ;;  %v5055_v39 = vmul.f32 0.03125, %v5045_v11 }
0x1839   :  { %v5048_v53 = vpop.xlane.xlu0 %5047  ;;  %v5073_v36 = vmul.f32 %v13065_v32, %v14392_v50  ;;  %v14497_v9 = vadd.f32 %v10533_v7, %v5087_v14 }
0x183a   :  { %13072 = vrsqrt.f32 %v5062_v25  ;;  %v5063_v0 = vadd.f32 1e-05, %v5055_v39  ;;  %v5056_v6 = vmul.f32 0.03125, %v5048_v53  ;;  %v10534_v39 = vld [vmem:[#allocation2 + $0x2e0] ss:$0 sm:$0xff] }
0x183b   :  { %v5086_v3 = vmul.f32 %v10532_v8, %v5073_v36 }
0x183c   :  { %v13067_v48 = vpop.eup %13066  ;;  %13074 = vrsqrt.f32 %v5063_v0  ;;  %v5064_v26 = vadd.f32 1e-05, %v5056_v6 }
0x183d   :  { %v14494_v56 = vadd.f32 %v10533_v7, %v5086_v3  ;;  %v5075_v55 = vmul.f32 %v13067_v48, %v14398_v15 }
0x183e   :  { %13076 = vrsqrt.f32 %v5064_v26 }
0x183f   :  { %11917 = vmatprep.mubr.msk.f32.mxu0 %vm235_vm9, %v14494_v56  ;;  %v5088_v50 = vmul.f32 %v10532_v8, %v5075_v55 }
0x1840   :  { %v13069_v45 = vpop.eup %13068  ;;  %11918 = vmatmul.mubr.msk.f32.vlgmr.msra.gmra.mrb[100].mxu0 %vm235_vm9, %v14497_v9 }
0x1841   :  { %v14503_v24 = vadd.f32 %v10533_v7, %v5088_v50  ;;  %v5076_v13 = vmul.f32 %v13069_v45, %v14404_v16  ;;  %12647 = vmatpush3.bf16.msra.mxu0 %v13551_v51 }
0x1842   :  { %v13071_v5 = vpop.eup %13070  ;;  %12649 = vmatprep.subr.bf16.mxu0 %v13557_v44 }
0x1843   :  { %11920 = vmatprep.mubr.msk.f32.mxu0 %vm235_vm9, %v14503_v24  ;;  %v5089_v15 = vmul.f32 %v10532_v8, %v5076_v13  ;;  %v5077_v46 = vmul.f32 %v13071_v5, %v14408_v33 }
0x1844   :  { %v13073_v29 = vpop.eup %13072 }
0x1845   :  { %v14511_v57 = vadd.f32 %v10533_v7, %v5089_v15  ;;  %v5090_v34 = vmul.f32 %v10532_v8, %v5077_v46  ;;  %v5078_v20 = vmul.f32 %v13073_v29, %v14413_v38  ;;  %12651 = vmatpush3.bf16.msra.mxu0 %v13557_v44 }
0x1846   :  { %v13075_v16 = vpop.eup %13074  ;;  %11989 = vmatprep.subr.msk.mxu0 %vm1326_vm10, %v14472_v2 }
0x1847   :  { %11921 = vmatmul.mubr.msk.f32.gmra.mrb[102].mxu0 %vm235_vm9, %v14511_v57  ;;  %v14519_v27 = vadd.f32 %v10533_v7, %v5090_v34  ;;  %v5091_v63 = vmul.f32 %v10532_v8, %v5078_v20  ;;  %v5079_v33 = vmul.f32 %v13075_v16, %v14419_v42  ;;  %v10543_v42 = vld [vmem:[#allocation2 + $0x308] ss:$0 sm:$0xff] }
0x1848   :  { %v13077_v62 = vpop.eup %13076 }
0x1849   :  { %11923 = vmatprep.mubr.msk.f32.mxu0 %vm235_vm9, %v14519_v27  ;;  %v14524_v41 = vadd.f32 %v10533_v7, %v5091_v63  ;;  %v5092_v38 = vmul.f32 %v10532_v8, %v5079_v33  ;;  %v5080_v37 = vmul.f32 %v13077_v62, %v14425_v10 }
0x184b   :  { %11924 = vmatmul.mubr.msk.f32.gmra.mrb[104].mxu0 %vm235_vm9, %v14524_v41  ;;  %v14529_v17 = vadd.f32 %v10533_v7, %v5092_v38  ;;  %v5093_v30 = vmul.f32 %v10532_v8, %v5080_v37 }
0x184d   :  { %11926 = vmatprep.mubr.msk.f32.mxu0 %vm235_vm9, %v14529_v17  ;;  %v14533_v35 = vadd.f32 %v10533_v7, %v5093_v30 }
0x184f   :  { %11927 = vmatmul.mubr.msk.f32.gmra.mrb[106].mxu0 %vm235_vm9, %v14533_v35 }
0x1891   :  { %v11939_v59 = vpop.f32.mrb[104].mxu1 }
0x1892   :  { %v5350_v43 = vadd.f32 %v11939_v59, %v10543_v42  ;;  %v5344_v54 = vpop.f32.mrb[105].mxu1 }
0x1893   :  { %v5345_v60 = vadd.f32 %v10543_v42, %v5344_v54 }
0x1894   :  { %5900 = vrot.lane.b32.xlu1 %v5350_v43, %s13356_s0 }
0x1895   :  { %v11942_v10 = vpop.f32.mrb[106].mxu1 }
0x1896   :  { %v5354_v49 = vpop.f32.mrb[107].mxu1  ;;  %v5360_v11 = vadd.f32 %v11942_v10, %v10543_v42 }
0x1897   :  { %v5355_v28 = vadd.f32 %v10543_v42, %v5354_v49 }
0x1898   :  { %5898 = vrot.lane.b32.xlu1 %v5345_v60, %s13356_s0 }
0x189b   :  { %v11945_v4 = vpop.f32.mrb[108].mxu1 }
0x189c   :  { %v5370_v23 = vadd.f32 %v11945_v4, %v10543_v42  ;;  %v5364_v21 = vpop.f32.mrb[109].mxu1 }
0x189d   :  { %v5365_v58 = vadd.f32 %v10543_v42, %v5364_v21 }
0x189e   :  { %5908 = vrot.lane.b32.xlu1 %v5370_v23, %s13356_s0 }
0x189f   :  { %5906 = vrot.lane.b32.xlu0 %v5365_v58, %s13356_s0 }
0x18a3   :  { %5902 = vrot.lane.b32.xlu0 %v5355_v28, %s13356_s0  ;;  %v11948_v40 = vpop.f32.mrb[110].mxu1 }
0x18a4   :  { %v5374_v8 = vpop.f32.mrb[111].mxu1  ;;  %v5380_v25 = vadd.f32 %v11948_v40, %v10543_v42 }
0x18a5   :  { %v5375_v32 = vadd.f32 %v10543_v42, %v5374_v8 }
0x18a7   :  { %5904 = vrot.lane.b32.xlu0 %v5360_v11, %s13356_s0  ;;  %5910 = vrot.lane.b32.xlu1 %v5375_v32, %s13356_s0 }
0x18ab   :  { %5912 = vrot.lane.b32.xlu1 %v5380_v25, %s13356_s0 }
0x1913   :  { %v11919_v53 = vpop.f32.mrb[100].mxu0 }
0x1914   :  { %v5212_v36 = vadd.f32 %v11919_v53, %v10534_v39  ;;  %v5206_v14 = vpop.f32.mrb[101].mxu0 }
0x1915   :  { %v5207_v0 = vadd.f32 %v10534_v39, %v5206_v14 }
0x1916   :  { %v5384_v7 = vmul.f32 %v5350_v43, %v5212_v36  ;;  %v5529_v48 = vmul.f32 %v5370_v23, %v5212_v36 }
0x1917   :  { %v5383_v6 = vmul.f32 %v5345_v60, %v5207_v0  ;;  %v5528_v3 = vmul.f32 %v5365_v58, %v5207_v0 }
0x1919   :  { %11957 = vmatprep.mubr.msk.f32.mxu0 %vm235_vm9, %v5383_v6  ;;  %11977 = vmatprep.mubr.msk.f32.mxu1 %vm235_vm9, %v5528_v3 }
0x191a   :  { %v11922_v26 = vpop.f32.mrb[102].mxu0  ;;  %11958 = vmatmul.mubr.msk.f32.vlgmr.msra.gmra.mrb[108].mxu0 %vm235_vm9, %v5384_v7  ;;  %11978 = vmatmul.mubr.msk.f32.vlgmr.msra.gmra.mrb[112].mxu1 %vm235_vm9, %v5529_v48 }
0x191b   :  { %v5222_v55 = vadd.f32 %v11922_v26, %v10534_v39  ;;  %v5216_v50 = vpop.f32.mrb[103].mxu0  ;;  %11990 = vmatpush3.msk.msra.mxu0 %vm1326_vm10, %v14472_v2  ;;  %12004 = vmatpush3.msk.msra.mxu1 %vm1326_vm10, %v14472_v2 }
0x191c   :  { %v5217_v45 = vadd.f32 %v10534_v39, %v5216_v50 }
0x191d   :  { %v5386_v46 = vmul.f32 %v5360_v11, %v5222_v55  ;;  %v5531_v29 = vmul.f32 %v5380_v25, %v5222_v55 }
0x191e   :  { %v5385_v13 = vmul.f32 %v5355_v28, %v5217_v45  ;;  %v5530_v5 = vmul.f32 %v5375_v32, %v5217_v45  ;;  %v11925_v15 = vpop.f32.mrb[104].mxu0 }
0x191f   :  { %v5232_v34 = vadd.f32 %v11925_v15, %v10534_v39  ;;  %v5226_v20 = vpop.f32.mrb[105].mxu0 }
0x1920   :  { %v5227_v16 = vadd.f32 %v10534_v39, %v5226_v20  ;;  %11960 = vmatprep.mubr.msk.f32.mxu0 %vm235_vm9, %v5385_v13  ;;  %11980 = vmatprep.mubr.msk.f32.mxu1 %vm235_vm9, %v5530_v5 }
0x1921   :  { %11961 = vmatmul.mubr.msk.f32.gmra.mrb[110].mxu0 %vm235_vm9, %v5386_v46  ;;  %11981 = vmatmul.mubr.msk.f32.gmra.mrb[114].mxu1 %vm235_vm9, %v5531_v29  ;;  %v5388_v62 = vmul.f32 %v5370_v23, %v5232_v34  ;;  %v5533_v38 = vmul.f32 %v5350_v43, %v5232_v34  ;;  %v6075_v43 = vld [vmem:[#allocation2 + $0x310] sm:$0xff] }
0x1922   :  { %v5387_v63 = vmul.f32 %v5365_v58, %v5227_v16  ;;  %v5532_v33 = vmul.f32 %v5345_v60, %v5227_v16  ;;  %v11928_v2 = vpop.f32.mrb[106].mxu0  ;;  %v6076_v60 = vld [vmem:[#allocation2 + $0x318] sm:$0xff] }
0x1923   :  { %v5242_v37 = vadd.f32 %v11928_v2, %v10534_v39  ;;  %v5236_v30 = vpop.f32.mrb[107].mxu0  ;;  %v14565_v4 = vpack.c.bf16 %v6076_v60, %v6075_v43 }
0x1924   :  { %v5237_v42 = vadd.f32 %v10534_v39, %v5236_v30  ;;  %11963 = vmatprep.mubr.msk.f32.mxu0 %vm235_vm9, %v5387_v63  ;;  %11983 = vmatprep.mubr.msk.f32.mxu1 %vm235_vm9, %v5532_v33 }
0x1925   :  { %11964 = vmatmul.mubr.msk.f32.gmra.mrb[112].mxu0 %vm235_vm9, %v5388_v62  ;;  %11984 = vmatmul.mubr.msk.f32.gmra.mrb[116].mxu1 %vm235_vm9, %v5533_v38  ;;  %v5390_v10 = vmul.f32 %v5380_v25, %v5242_v37  ;;  %v5535_v49 = vmul.f32 %v5360_v11, %v5242_v37 }
0x1926   :  { %v5389_v59 = vmul.f32 %v5375_v32, %v5237_v42  ;;  %v5534_v54 = vmul.f32 %v5355_v28, %v5237_v42  ;;  %12661 = vmatprep.subr.bf16.mxu0 %v14565_v4 }
0x1928   :  { %11966 = vmatprep.mubr.msk.f32.mxu0 %vm235_vm9, %v5389_v59  ;;  %11986 = vmatprep.mubr.msk.f32.mxu1 %vm235_vm9, %v5534_v54 }
0x1929   :  { %11967 = vmatmul.mubr.msk.f32.gmra.mrb[114].mxu0 %vm235_vm9, %v5390_v10  ;;  %11987 = vmatmul.mubr.msk.f32.gmra.mrb[118].mxu1 %vm235_vm9, %v5535_v49 }
0x19ed   :  { %v11959_v23 = vpop.f32.mrb[108].mxu0  ;;  %v11979_v21 = vpop.f32.mrb[112].mxu1 }
0x19ee   :  { %v5521_v58 = vmul.f32 0.35355338, %v11959_v23  ;;  %v5666_v28 = vmul.f32 0.35355338, %v11979_v21  ;;  %v5481_v40 = vpop.f32.mrb[109].mxu0  ;;  %v5626_v8 = vpop.f32.mrb[113].mxu1 }
0x19ef   :  { %v5520_v11 = vmul.f32 0.35355338, %v5481_v40  ;;  %v5665_v32 = vmul.f32 0.35355338, %v5626_v8 }
0x19f0   :  { %v5674_v25 = vmax.f32 %v5521_v58, %v5666_v28 }
0x19f1   :  { %v5673_v39 = vmax.f32 %v5520_v11, %v5665_v32 }
0x19f2   :  { %v5682_v53 = vsub.f32 %v5521_v58, %v5674_v25  ;;  %v5706_v36 = vsub.f32 %v5666_v28, %v5674_v25 }
0x19f3   :  { %v5681_v14 = vsub.f32 %v5520_v11, %v5673_v39  ;;  %v5705_v0 = vsub.f32 %v5665_v32, %v5673_v39 }
0x19f4   :  { %v5691_v6 = vmul.f32 1.442695, %v5682_v53  ;;  %v5715_v3 = vmul.f32 1.442695, %v5706_v36  ;;  %v11962_v7 = vpop.f32.mrb[110].mxu0  ;;  %v11982_v48 = vpop.f32.mrb[114].mxu1 }
0x19f5   :  { %v5689_v26 = vmul.f32 1.442695, %v5681_v14  ;;  %v5713_v55 = vmul.f32 1.442695, %v5705_v0  ;;  %v5523_v50 = vmul.f32 0.35355338, %v11962_v7 }
0x19f6   :  { %13078 = vpow2.f32 %v5691_v6  ;;  %v5668_v45 = vmul.f32 0.35355338, %v11982_v48  ;;  %v5491_v13 = vpop.f32.mrb[111].mxu0  ;;  %v5636_v5 = vpop.f32.mrb[115].mxu1 }
0x19f7   :  { %13080 = vpow2.f32 %v5715_v3  ;;  %v5522_v15 = vmul.f32 0.35355338, %v5491_v13  ;;  %v5667_v46 = vmul.f32 0.35355338, %v5636_v5 }
0x19f8   :  { %13082 = vpow2.f32 %v5689_v26  ;;  %v5676_v29 = vmax.f32 %v5523_v50, %v5668_v45  ;;  %v11965_v34 = vpop.f32.mrb[112].mxu0  ;;  %v11985_v20 = vpop.f32.mrb[116].mxu1 }
0x19f9   :  { %13084 = vpow2.f32 %v5713_v55  ;;  %v5675_v16 = vmax.f32 %v5522_v15, %v5667_v46  ;;  %v5525_v63 = vmul.f32 0.35355338, %v11965_v34  ;;  %v5670_v33 = vmul.f32 0.35355338, %v11985_v20  ;;  %v5501_v2 = vpop.f32.mrb[113].mxu0  ;;  %v5646_v62 = vpop.f32.mrb[117].mxu1 }
0x19fa   :  { %v5684_v38 = vsub.f32 %v5523_v50, %v5676_v29  ;;  %v5708_v37 = vsub.f32 %v5668_v45, %v5676_v29  ;;  %v5524_v30 = vmul.f32 0.35355338, %v5501_v2  ;;  %v5669_v42 = vmul.f32 0.35355338, %v5646_v62 }
0x19fb   :  { %v5683_v59 = vsub.f32 %v5522_v15, %v5675_v16  ;;  %v5707_v54 = vsub.f32 %v5667_v46, %v5675_v16  ;;  %v5678_v10 = vmax.f32 %v5525_v63, %v5670_v33 }
0x19fc   :  { %v5695_v49 = vmul.f32 1.442695, %v5684_v38  ;;  %v5719_v43 = vmul.f32 1.442695, %v5708_v37  ;;  %v5677_v60 = vmax.f32 %v5524_v30, %v5669_v42  ;;  %v11968_v23 = vpop.f32.mrb[114].mxu0  ;;  %v11988_v21 = vpop.f32.mrb[118].mxu1 }
0x19fd   :  { %v5693_v58 = vmul.f32 1.442695, %v5683_v59  ;;  %v5717_v28 = vmul.f32 1.442695, %v5707_v54  ;;  %v5686_v40 = vsub.f32 %v5525_v63, %v5678_v10  ;;  %v5710_v8 = vsub.f32 %v5670_v33, %v5678_v10  ;;  %v5511_v11 = vpop.f32.mrb[115].mxu0  ;;  %v5656_v32 = vpop.f32.mrb[119].mxu1 }
0x19fe   :  { %13086 = vpow2.f32 %v5695_v49  ;;  %v5685_v25 = vsub.f32 %v5524_v30, %v5677_v60  ;;  %v5709_v39 = vsub.f32 %v5669_v42, %v5677_v60  ;;  %v5527_v53 = vmul.f32 0.35355338, %v11968_v23 }
0x19ff   :  { %13088 = vpow2.f32 %v5719_v43  ;;  %v5699_v36 = vmul.f32 1.442695, %v5686_v40  ;;  %v5723_v14 = vmul.f32 1.442695, %v5710_v8  ;;  %v5672_v0 = vmul.f32 0.35355338, %v11988_v21 }
0x1a00   :  { %v13079_v6 = vpop.eup %13078  ;;  %13090 = vpow2.f32 %v5693_v58  ;;  %v5526_v3 = vmul.f32 0.35355338, %v5511_v11  ;;  %v5697_v48 = vmul.f32 1.442695, %v5685_v25  ;;  %v5671_v55 = vmul.f32 0.35355338, %v5656_v32 }
0x1a01   :  { %v13081_v7 = vpop.eup %13080  ;;  %13092 = vpow2.f32 %v5717_v28  ;;  %v5680_v26 = vmax.f32 %v5527_v53, %v5672_v0  ;;  %v5721_v13 = vmul.f32 1.442695, %v5709_v39 }
0x1a02   :  { %v13083_v50 = vpop.eup %13082  ;;  %v5730_v45 = vadd.f32 %v13081_v7, %v13079_v6  ;;  %13094 = vpow2.f32 %v5699_v36  ;;  %v5679_v29 = vmax.f32 %v5526_v3, %v5671_v55 }
0x1a03   :  { %v13085_v5 = vpop.eup %13084  ;;  %13096 = vpow2.f32 %v5723_v14  ;;  %v5688_v15 = vsub.f32 %v5527_v53, %v5680_v26  ;;  %v5712_v46 = vsub.f32 %v5672_v0, %v5680_v26 }
0x1a04   :  { %13098 = vrcp.f32 %v5730_v45  ;;  %v5729_v34 = vadd.f32 %v13085_v5, %v13083_v50  ;;  %v5687_v63 = vsub.f32 %v5526_v3, %v5679_v29  ;;  %v5711_v33 = vsub.f32 %v5671_v55, %v5679_v29 }
0x1a05   :  { %13100 = vpow2.f32 %v5697_v48  ;;  %v5703_v20 = vmul.f32 1.442695, %v5688_v15  ;;  %v5727_v16 = vmul.f32 1.442695, %v5712_v46 }
0x1a06   :  { %13102 = vrcp.f32 %v5729_v34  ;;  %v5701_v2 = vmul.f32 1.442695, %v5687_v63  ;;  %v5725_v38 = vmul.f32 1.442695, %v5711_v33  ;;  %v6077_v33 = vld [vmem:[#allocation2 + $0x320] sm:$0xff] }
0x1a07   :  { %13104 = vpow2.f32 %v5721_v13 }
0x1a08   :  { %v13087_v62 = vpop.eup %13086  ;;  %13106 = vpow2.f32 %v5703_v20 }
0x1a09   :  { %v13089_v37 = vpop.eup %13088  ;;  %13108 = vpow2.f32 %v5727_v16 }
0x1a0a   :  { %v13091_v30 = vpop.eup %13090  ;;  %v5732_v42 = vadd.f32 %v13089_v37, %v13087_v62  ;;  %13110 = vpow2.f32 %v5701_v2  ;;  %v6078_v2 = vld [vmem:[#allocation2 + $0x328] sm:$0xff] }
0x1a0b   :  { %v13093_v59 = vpop.eup %13092  ;;  %13112 = vpow2.f32 %v5725_v38  ;;  %v5901_v38 = vpop.permute.xlu1 %5900 }
0x1a0c   :  { %v13095_v54 = vpop.eup %13094  ;;  %13114 = vrcp.f32 %v5732_v42  ;;  %v5731_v10 = vadd.f32 %v13093_v59, %v13091_v30 }
0x1a0d   :  { %v13097_v49 = vpop.eup %13096 }
0x1a0e   :  { %v13099_v43 = vpop.eup %13098  ;;  %13116 = vrcp.f32 %v5731_v10  ;;  %v5734_v60 = vadd.f32 %v13097_v49, %v13095_v54 }
0x1a0f   :  { %v13101_v23 = vpop.eup %13100  ;;  %v5746_v21 = vmul.f32 %v13099_v43, %v13079_v6  ;;  %v5754_v58 = vmul.f32 %v13099_v43, %v13081_v7 }
0x1a10   :  { %v13103_v28 = vpop.eup %13102  ;;  %13118 = vrcp.f32 %v5734_v60 }
0x1a11   :  { %v13105_v40 = vpop.eup %13104  ;;  %v5745_v8 = vmul.f32 %v13103_v28, %v13083_v50  ;;  %v5753_v11 = vmul.f32 %v13103_v28, %v13085_v5 }
0x1a12   :  { %v13107_v32 = vpop.eup %13106  ;;  %v5733_v25 = vadd.f32 %v13105_v40, %v13101_v23 }
0x1a13   :  { %v13109_v39 = vpop.eup %13108  ;;  %11991 = vmatprep.mubr.msk.f32.mxu0 %vm1301_vm11, %v5745_v8  ;;  %12005 = vmatprep.mubr.msk.f32.mxu1 %vm1301_vm11, %v5753_v11 }
0x1a14   :  { %v13111_v53 = vpop.eup %13110  ;;  %13120 = vrcp.f32 %v5733_v25  ;;  %v5736_v36 = vadd.f32 %v13109_v39, %v13107_v32  ;;  %11992 = vmatmul.mubr.msk.f32.vlgmr.msra.gmra.mrb[116].mxu0 %vm1301_vm11, %v5746_v21  ;;  %12006 = vmatmul.mubr.msk.f32.vlgmr.msra.gmra.mrb[120].mxu1 %vm1301_vm11, %v5754_v58 }
0x1a15   :  { %v13113_v14 = vpop.eup %13112  ;;  %12663 = vmatpush3.bf16.msra.mxu0 %v14565_v4 }
0x1a16   :  { %v13115_v0 = vpop.eup %13114  ;;  %13122 = vrcp.f32 %v5736_v36  ;;  %v5735_v6 = vadd.f32 %v13113_v14, %v13111_v53 }
0x1a17   :  { %v5748_v3 = vmul.f32 %v13115_v0, %v13087_v62  ;;  %v5756_v7 = vmul.f32 %v13115_v0, %v13089_v37  ;;  %v12664_v62 = vpack.c.bf16 %v6078_v2, %v6077_v33  ;;  %v5899_v37 = vpop.permute.xlu1 %5898 }
0x1a18   :  { %v13117_v48 = vpop.eup %13116  ;;  %13124 = vrcp.f32 %v5735_v6 }
0x1a19   :  { %v5747_v26 = vmul.f32 %v13117_v48, %v13091_v30  ;;  %v5755_v55 = vmul.f32 %v13117_v48, %v13093_v59  ;;  %12665 = vmatprep.subr.bf16.mxu0 %v12664_v62  ;;  %v5907_v30 = vpop.permute.xlu0 %5906 }
0x1a1a   :  { %v13119_v50 = vpop.eup %13118  ;;  %12667 = vmatpush3.bf16.msra.mxu0 %v12664_v62 }
0x1a1b   :  { %11994 = vmatprep.mubr.msk.f32.mxu0 %vm1301_vm11, %v5747_v26  ;;  %12008 = vmatprep.mubr.msk.f32.mxu1 %vm1301_vm11, %v5755_v55  ;;  %v5750_v45 = vmul.f32 %v13119_v50, %v13095_v54  ;;  %v5758_v13 = vmul.f32 %v13119_v50, %v13097_v49  ;;  %v5909_v42 = vpop.permute.xlu1 %5908 }
0x1a1c   :  { %11995 = vmatmul.mubr.msk.f32.gmra.mrb[118].mxu0 %vm1301_vm11, %v5748_v3  ;;  %12009 = vmatmul.mubr.msk.f32.gmra.mrb[122].mxu1 %vm1301_vm11, %v5756_v7 }
0x1a1d   :  { %v5903_v59 = vpop.permute.xlu0 %5902 }
0x1a1e   :  { %v13121_v4 = vpop.eup %13120 }
0x1a1f   :  { %v5749_v5 = vmul.f32 %v13121_v4, %v13101_v23  ;;  %v5757_v15 = vmul.f32 %v13121_v4, %v13105_v40  ;;  %v5911_v54 = vpop.permute.xlu1 %5910 }
0x1a20   :  { %v13123_v46 = vpop.eup %13122 }
0x1a21   :  { %11997 = vmatprep.mubr.msk.f32.mxu0 %vm1301_vm11, %v5749_v5  ;;  %12011 = vmatprep.mubr.msk.f32.mxu1 %vm1301_vm11, %v5757_v15  ;;  %v5752_v29 = vmul.f32 %v13123_v46, %v13107_v32  ;;  %v5760_v34 = vmul.f32 %v13123_v46, %v13109_v39  ;;  %v5905_v11 = vpop.permute.xlu0 %5904 }
0x1a22   :  { %v13125_v20 = vpop.eup %13124  ;;  %11998 = vmatmul.mubr.msk.f32.gmra.mrb[120].mxu0 %vm1301_vm11, %v5750_v45  ;;  %12012 = vmatmul.mubr.msk.f32.gmra.mrb[124].mxu1 %vm1301_vm11, %v5758_v13 }
0x1a23   :  { %v5751_v16 = vmul.f32 %v13125_v20, %v13111_v53  ;;  %v5759_v63 = vmul.f32 %v13125_v20, %v13113_v14  ;;  %v5913_v32 = vpop.permute.xlu1 %5912 }
0x1a25   :  { %12000 = vmatprep.mubr.msk.f32.mxu0 %vm1301_vm11, %v5751_v16  ;;  %12014 = vmatprep.mubr.msk.f32.mxu1 %vm1301_vm11, %v5759_v63 }
0x1a26   :  { %12001 = vmatmul.mubr.msk.f32.gmra.mrb[122].mxu0 %vm1301_vm11, %v5752_v29  ;;  %12015 = vmatmul.mubr.msk.f32.gmra.mrb[126].mxu1 %vm1301_vm11, %v5760_v34 }
0x1ae7   :  { %v11993_v10 = vpop.f32.mrb[116].mxu0  ;;  %v12007_v49 = vpop.f32.mrb[120].mxu1 }
0x1ae8   :  { %v5923_v43 = vmul.f32 %v11993_v10, %v5901_v38  ;;  %v6060_v60 = vmul.f32 %v12007_v49, %v5909_v42  ;;  %v5851_v23 = vpop.f32.mrb[117].mxu0  ;;  %v6020_v21 = vpop.f32.mrb[121].mxu1 }
0x1ae9   :  { %v5922_v58 = vmul.f32 %v5899_v37, %v5851_v23  ;;  %v6059_v28 = vmul.f32 %v6020_v21, %v5907_v30 }
0x1aea   :  { %v6068_v40 = vadd.f32 %v6060_v60, %v5923_v43 }
0x1aeb   :  { %v6067_v8 = vadd.f32 %v6059_v28, %v5922_v58 }
0x1aed   :  { %12025 = vmatprep.mubr.msk.f32.mxu0 %vm235_vm9, %v6067_v8 }
0x1aee   :  { %12026 = vmatmul.mubr.msk.f32.vlgmr.msra.gmra.mrb[124].mxu0 %vm235_vm9, %v6068_v40 }
0x1aef   :  { %v11996_v25 = vpop.f32.mrb[118].mxu0  ;;  %v12010_v39 = vpop.f32.mrb[122].mxu1 }
0x1af0   :  { %v5925_v53 = vmul.f32 %v11996_v25, %v5905_v11  ;;  %v6062_v36 = vmul.f32 %v12010_v39, %v5913_v32  ;;  %v5861_v14 = vpop.f32.mrb[119].mxu0  ;;  %v6030_v0 = vpop.f32.mrb[123].mxu1 }
0x1af1   :  { %v5924_v6 = vmul.f32 %v5903_v59, %v5861_v14  ;;  %v6061_v3 = vmul.f32 %v6030_v0, %v5911_v54 }
0x1af2   :  { %v6070_v7 = vadd.f32 %v6062_v36, %v5925_v53 }
0x1af3   :  { %v6069_v48 = vadd.f32 %v6061_v3, %v5924_v6 }
0x1af5   :  { %v11999_v26 = vpop.f32.mrb[120].mxu0  ;;  %v12013_v55 = vpop.f32.mrb[124].mxu1  ;;  %12028 = vmatprep.mubr.msk.f32.mxu0 %vm235_vm9, %v6069_v48 }
0x1af6   :  { %v5927_v50 = vmul.f32 %v11999_v26, %v5909_v42  ;;  %v6064_v45 = vmul.f32 %v12013_v55, %v5901_v38  ;;  %v5871_v13 = vpop.f32.mrb[121].mxu0  ;;  %v6040_v4 = vpop.f32.mrb[125].mxu1  ;;  %12029 = vmatmul.mubr.msk.f32.gmra.mrb[126].mxu0 %vm235_vm9, %v6070_v7 }
0x1af7   :  { %v5926_v5 = vmul.f32 %v5907_v30, %v5871_v13  ;;  %v6063_v15 = vmul.f32 %v6040_v4, %v5899_v37  ;;  %v10586_v37 = vld [vmem:[#allocation2 + $0x330] ss:$0 sm:$0xff] }
0x1af8   :  { %v6072_v46 = vadd.f32 %v6064_v45, %v5927_v50 }
0x1af9   :  { %v6071_v29 = vadd.f32 %v6063_v15, %v5926_v5  ;;  %v12002_v34 = vpop.f32.mrb[122].mxu0  ;;  %v12016_v20 = vpop.f32.mrb[126].mxu1 }
0x1afa   :  { %v5929_v16 = vmul.f32 %v12002_v34, %v5913_v32  ;;  %v6066_v63 = vmul.f32 %v12016_v20, %v5905_v11  ;;  %v5881_v33 = vpop.f32.mrb[123].mxu0  ;;  %v6050_v2 = vpop.f32.mrb[127].mxu1 }
0x1afb   :  { %v5928_v62 = vmul.f32 %v5911_v54, %v5881_v33  ;;  %v6065_v10 = vmul.f32 %v6050_v2, %v5903_v59  ;;  %12031 = vmatprep.mubr.msk.f32.mxu0 %vm235_vm9, %v6071_v29 }
0x1afc   :  { %v6074_v42 = vadd.f32 %v6066_v63, %v5929_v16  ;;  %12032 = vmatmul.mubr.msk.f32.gmra.mrb[128].mxu0 %vm235_vm9, %v6072_v46 }
0x1afd   :  { %v6073_v38 = vadd.f32 %v6065_v10, %v5928_v62 }
0x1aff   :  { %12034 = vmatprep.mubr.msk.f32.mxu0 %vm235_vm9, %v6073_v38 }
0x1b00   :  { %12035 = vmatmul.mubr.msk.f32.gmra.mrb[130].mxu0 %vm235_vm9, %v6074_v42 }
0x1bc1   :  { %v12027_v30 = vpop.f32.mrb[124].mxu0 }
0x1bc2   :  { %v6180_v49 = vadd.f32 %v12027_v30, %v10586_v37  ;;  %v6174_v43 = vpop.f32.mrb[125].mxu0 }
0x1bc3   :  { %v6175_v60 = vadd.f32 %v10586_v37, %v6174_v43 }
0x1bc4   :  { %v6214_v23 = vadd.f32 %v6180_v49, %v14497_v9 }
0x1bc5   :  { %v6213_v54 = vadd.f32 %v6175_v60, %v14494_v56 }
0x1bc6   :  { %v6224_v59 = vsel %vm235_vm9, %v6214_v23, 0.0 }
0x1bc7   :  { %6225 = vadd.xlane.f32.xlu1 %v6224_v59  ;;  %v6221_v21 = vsel %vm235_vm9, %v6213_v54, 0.0 }
0x1bc8   :  { %6222 = vadd.xlane.f32.xlu0 %v6221_v21 }
0x1bc9   :  { %v12030_v58 = vpop.f32.mrb[126].mxu0 }
0x1bca   :  { %v6184_v28 = vpop.f32.mrb[127].mxu0  ;;  %v6190_v40 = vadd.f32 %v12030_v58, %v10586_v37 }
0x1bcb   :  { %v6185_v8 = vadd.f32 %v10586_v37, %v6184_v28 }
0x1bcc   :  { %v6216_v32 = vadd.f32 %v6190_v40, %v14511_v57 }
0x1bcd   :  { %v6215_v11 = vadd.f32 %v6185_v8, %v14503_v24 }
0x1bce   :  { %v6230_v6 = vsel %vm235_vm9, %v6216_v32, 0.0 }
0x1bcf   :  { %v12033_v25 = vpop.f32.mrb[128].mxu0  ;;  %v6227_v39 = vsel %vm235_vm9, %v6215_v11, 0.0 }
0x1bd0   :  { %v6200_v9 = vadd.f32 %v12033_v25, %v10586_v37  ;;  %v6194_v53 = vpop.f32.mrb[129].mxu0  ;;  %6228 = vadd.xlane.f32.xlu0 %v6227_v39 }
0x1bd1   :  { %v6195_v56 = vadd.f32 %v10586_v37, %v6194_v53 }
0x1bd2   :  { %v6218_v36 = vadd.f32 %v6200_v9, %v14524_v41 }
0x1bd3   :  { %v6217_v14 = vadd.f32 %v6195_v56, %v14519_v27  ;;  %v12036_v0 = vpop.f32.mrb[130].mxu0 }
0x1bd4   :  { %v6210_v3 = vadd.f32 %v12036_v0, %v10586_v37  ;;  %v6204_v7 = vpop.f32.mrb[131].mxu0  ;;  %6231 = vadd.xlane.f32.xlu0 %v6230_v6  ;;  %v6236_v55 = vsel %vm235_vm9, %v6218_v36, 0.0  ;;  %v6353_v6 = vld [vmem:[#allocation2 + $0x358] sm:$0xff] }
0x1bd5   :  { %v6205_v24 = vadd.f32 %v10586_v37, %v6204_v7  ;;  %v6233_v57 = vsel %vm235_vm9, %v6217_v14, 0.0 }
0x1bd6   :  { %6234 = vadd.xlane.f32.xlu1 %v6233_v57  ;;  %v6220_v48 = vadd.f32 %v6210_v3, %v14533_v35  ;;  %v6354_v3 = vld [vmem:[#allocation2 + $0x360] sm:$0xff]  ;;  %v6498_v57 = vld [vmem:[#allocation2 + $0x378] sm:$0xff] }
0x1bd7   :  { %v6219_v26 = vadd.f32 %v6205_v24, %v14529_v17  ;;  %v12672_v7 = vpack.c.bf16 %v6354_v3, %v6353_v6  ;;  %v6497_v24 = vld [vmem:[#allocation2 + $0x370] sm:$0xff] }
0x1bd8   :  { %6237 = vadd.xlane.f32.xlu0 %v6236_v55  ;;  %v6242_v27 = vsel %vm235_vm9, %v6220_v48, 0.0  ;;  %v6500_v55 = vld [vmem:[#allocation2 + $0x388] sm:$0xff] }
0x1bd9   :  { %v6239_v41 = vsel %vm235_vm9, %v6219_v26, 0.0 }
0x1bda   :  { %6240 = vadd.xlane.f32.xlu1 %v6239_v41 }
0x1bdc   :  { %6243 = vadd.xlane.f32.xlu0 %v6242_v27  ;;  %v6501_v27 = vld [vmem:[#allocation2 + $0x390] sm:$0xff] }
0x1c54   :  { %v6226_v50 = vpop.xlane.xlu1 %6225 }
0x1c55   :  { %v6246_v45 = vmul.f32 0.03125, %v6226_v50  ;;  %v6223_v13 = vpop.xlane.xlu0 %6222  ;;  %v6502_v50 = vld [vmem:[#allocation2 + $0x398] sm:$0xff] }
0x1c56   :  { %v6245_v4 = vmul.f32 0.03125, %v6223_v13 }
0x1c57   :  { %v14609_v5 = vsub.f32 %v6214_v23, %v6246_v45  ;;  %v12684_v45 = vpack.c.bf16 %v6502_v50, %v6501_v27 }
0x1c58   :  { %v14611_v15 = vsub.f32 %v6213_v54, %v6245_v4 }
0x1c59   :  { %v6262_v17 = vmul.f32 %v14609_v5, %v14609_v5 }
0x1c5a   :  { %v6261_v35 = vmul.f32 %v14611_v15, %v14611_v15 }
0x1c5b   :  { %v6272_v46 = vsel %vm235_vm9, %v6262_v17, 0.0 }
0x1c5c   :  { %6273 = vadd.xlane.f32.xlu0 %v6272_v46  ;;  %v6269_v29 = vsel %vm235_vm9, %v6261_v35, 0.0 }
0x1c5d   :  { %v6229_v34 = vpop.xlane.xlu0 %6228  ;;  %6270 = vadd.xlane.f32.xlu1 %v6269_v29 }
0x1c5e   :  { %v6247_v20 = vmul.f32 0.03125, %v6229_v34 }
0x1c60   :  { %v14619_v16 = vsub.f32 %v6215_v11, %v6247_v20 }
0x1c61   :  { %v6232_v63 = vpop.xlane.xlu0 %6231 }
0x1c62   :  { %v6248_v33 = vmul.f32 0.03125, %v6232_v63  ;;  %v6263_v2 = vmul.f32 %v14619_v16, %v14619_v16 }
0x1c63   :  { %v6235_v62 = vpop.xlane.xlu1 %6234 }
0x1c64   :  { %v14623_v10 = vsub.f32 %v6216_v32, %v6248_v33  ;;  %v6249_v42 = vmul.f32 0.03125, %v6235_v62  ;;  %v6275_v38 = vsel %vm235_vm9, %v6263_v2, 0.0 }
0x1c65   :  { %6276 = vadd.xlane.f32.xlu1 %v6275_v38  ;;  %v6238_v37 = vpop.xlane.xlu0 %6237 }
0x1c66   :  { %v14626_v30 = vsub.f32 %v6217_v14, %v6249_v42  ;;  %v6250_v49 = vmul.f32 0.03125, %v6238_v37  ;;  %v6264_v43 = vmul.f32 %v14623_v10, %v14623_v10  ;;  %v6352_v14 = vld [vmem:[#allocation2 + $0x350] sm:$0xff]  ;;  %v10595_v42 = vld [vmem:[#allocation2 + $0x338] ss:$0 sm:$0xff] }
0x1c67   :  { %v6241_v60 = vpop.xlane.xlu1 %6240 }
0x1c68   :  { %v14630_v23 = vsub.f32 %v6218_v36, %v6250_v49  ;;  %v6251_v54 = vmul.f32 0.03125, %v6241_v60  ;;  %v6278_v59 = vsel %vm235_vm9, %v6264_v43, 0.0  ;;  %v6265_v21 = vmul.f32 %v14626_v30, %v14626_v30  ;;  %v6351_v36 = vld [vmem:[#allocation2 + $0x348] sm:$0xff] }
0x1c69   :  { %v6244_v58 = vpop.xlane.xlu0 %6243  ;;  %6279 = vadd.xlane.f32.xlu0 %v6278_v59  ;;  %v12668_v0 = vpack.c.bf16 %v6352_v14, %v6351_v36 }
0x1c6a   :  { %v14635_v28 = vsub.f32 %v6219_v26, %v6251_v54  ;;  %v6252_v40 = vmul.f32 0.03125, %v6244_v58  ;;  %v6281_v8 = vsel %vm235_vm9, %v6265_v21, 0.0  ;;  %v6266_v11 = vmul.f32 %v14630_v23, %v14630_v23 }
0x1c6b   :  { %6282 = vadd.xlane.f32.xlu1 %v6281_v8  ;;  %12669 = vmatprep.subr.bf16.mxu1 %v12668_v0  ;;  %v12676_v26 = vpack.c.bf16 %v6498_v57, %v6497_v24  ;;  %v10596_v8 = vld [vmem:[#allocation2 + $0x340] ss:$0 sm:$0xff] }
0x1c6c   :  { %v14640_v32 = vsub.f32 %v6220_v48, %v6252_v40  ;;  %v6284_v25 = vsel %vm235_vm9, %v6266_v11, 0.0  ;;  %v6267_v39 = vmul.f32 %v14635_v28, %v14635_v28  ;;  %12671 = vmatpush3.bf16.msra.mxu1 %v12668_v0  ;;  %v6499_v48 = vld [vmem:[#allocation2 + $0x380] sm:$0xff] }
0x1c6d   :  { %6285 = vadd.xlane.f32.xlu0 %v6284_v25  ;;  %12673 = vmatprep.subr.bf16.mxu1 %v12672_v7  ;;  %v12680_v41 = vpack.c.bf16 %v6500_v55, %v6499_v48 }
0x1c6e   :  { %v6287_v9 = vsel %vm235_vm9, %v6267_v39, 0.0  ;;  %v6268_v53 = vmul.f32 %v14640_v32, %v14640_v32  ;;  %12677 = vmatprep.subr.bf16.mxu0 %v12676_v26 }
0x1c6f   :  { %6288 = vadd.xlane.f32.xlu1 %v6287_v9  ;;  %12679 = vmatpush3.bf16.msra.mxu0 %v12676_v26 }
0x1c70   :  { %v6290_v56 = vsel %vm235_vm9, %v6268_v53, 0.0  ;;  %12675 = vmatpush3.bf16.msra.mxu1 %v12672_v7  ;;  %12681 = vmatprep.subr.bf16.mxu0 %v12680_v41 }
0x1c71   :  { %6291 = vadd.xlane.f32.xlu0 %v6290_v56 }
0x1c73   :  { %12683 = vmatpush3.bf16.msra.mxu0 %v12680_v41 }
0x1c74   :  { %12685 = vmatprep.subr.bf16.mxu0 %v12684_v45 }
0x1c77   :  { %12687 = vmatpush3.bf16.msra.mxu0 %v12684_v45 }
0x1ce9   :  { %v6274_v13 = vpop.xlane.xlu0 %6273 }
0x1cea   :  { %v6294_v4 = vmul.f32 0.03125, %v6274_v13  ;;  %v6271_v17 = vpop.xlane.xlu1 %6270 }
0x1ceb   :  { %v6293_v35 = vmul.f32 0.03125, %v6271_v17 }
0x1cec   :  { %v6302_v46 = vadd.f32 1e-05, %v6294_v4 }
0x1ced   :  { %v6301_v29 = vadd.f32 1e-05, %v6293_v35 }
0x1cee   :  { %13126 = vrsqrt.f32 %v6302_v46 }
0x1cef   :  { %13128 = vrsqrt.f32 %v6301_v29 }
0x1cf2   :  { %v6277_v34 = vpop.xlane.xlu1 %6276 }
0x1cf3   :  { %v6295_v20 = vmul.f32 0.03125, %v6277_v34 }
0x1cf5   :  { %v6303_v63 = vadd.f32 1e-05, %v6295_v20  ;;  %v6504_v20 = vld [vmem:[#allocation2 + $0x3a8] sm:$0xff] }
0x1cf6   :  { %v6280_v33 = vpop.xlane.xlu0 %6279 }
0x1cf7   :  { %13130 = vrsqrt.f32 %v6303_v63  ;;  %v6296_v2 = vmul.f32 0.03125, %v6280_v33 }
0x1cf8   :  { %v13127_v62 = vpop.eup %13126  ;;  %v6283_v38 = vpop.xlane.xlu1 %6282 }
0x1cf9   :  { %v13129_v37 = vpop.eup %13128  ;;  %v6318_v49 = vmul.f32 %v13127_v62, %v14609_v5  ;;  %v6304_v43 = vadd.f32 1e-05, %v6296_v2  ;;  %v6297_v60 = vmul.f32 0.03125, %v6283_v38 }
0x1cfa   :  { %v6286_v54 = vpop.xlane.xlu0 %6285  ;;  %v6317_v59 = vmul.f32 %v13129_v37, %v14611_v15 }
0x1cfb   :  { %v6331_v21 = vmul.f32 %v10595_v42, %v6318_v49  ;;  %13132 = vrsqrt.f32 %v6304_v43  ;;  %v6305_v58 = vadd.f32 1e-05, %v6297_v60  ;;  %v6298_v40 = vmul.f32 0.03125, %v6286_v54 }
0x1cfc   :  { %v6289_v11 = vpop.xlane.xlu1 %6288  ;;  %v6330_v25 = vmul.f32 %v10595_v42, %v6317_v59  ;;  %v14695_v59 = vld [vmem:[#allocation2 + $0x5c8] sm:$0xf] }
0x1cfd   :  { %13134 = vrsqrt.f32 %v6305_v58  ;;  %v6306_v39 = vadd.f32 1e-05, %v6298_v40  ;;  %v6299_v9 = vmul.f32 0.03125, %v6289_v11  ;;  %v14653_v14 = vadd.f32 %v10596_v8, %v6331_v21 }
0x1cfe   :  { %v6292_v53 = vpop.xlane.xlu0 %6291  ;;  %v14651_v56 = vadd.f32 %v10596_v8, %v6330_v25 }
0x1cff   :  { %13136 = vrsqrt.f32 %v6306_v39  ;;  %v6307_v5 = vadd.f32 1e-05, %v6299_v9  ;;  %v6300_v36 = vmul.f32 0.03125, %v6292_v53 }
0x1d00   :  { %12045 = vmatprep.mubr.msk.f32.mxu1 %vm235_vm9, %v14651_v56 }
0x1d01   :  { %v13131_v15 = vpop.eup %13130  ;;  %13138 = vrsqrt.f32 %v6307_v5  ;;  %v6308_v0 = vadd.f32 1e-05, %v6300_v36  ;;  %12046 = vmatmul.mubr.msk.f32.vlgmr.msra.gmra.mrb[128].mxu1 %vm235_vm9, %v14653_v14 }
0x1d02   :  { %v6319_v6 = vmul.f32 %v13131_v15, %v14619_v16 }
0x1d03   :  { %13140 = vrsqrt.f32 %v6308_v0 }
0x1d04   :  { %v6332_v3 = vmul.f32 %v10595_v42, %v6319_v6 }
0x1d05   :  { %v13133_v7 = vpop.eup %13132 }
0x1d06   :  { %v14660_v24 = vadd.f32 %v10596_v8, %v6332_v3  ;;  %v6320_v57 = vmul.f32 %v13133_v7, %v14623_v10  ;;  %v10606_v3 = vld [vmem:[#allocation2 + $0x3b0] ss:$0 sm:$0xff] }
0x1d07   :  { %v13135_v48 = vpop.eup %13134 }
0x1d08   :  { %12048 = vmatprep.mubr.msk.f32.mxu1 %vm235_vm9, %v14660_v24  ;;  %v6333_v26 = vmul.f32 %v10595_v42, %v6320_v57  ;;  %v6321_v55 = vmul.f32 %v13135_v48, %v14626_v30 }
0x1d09   :  { %v13137_v41 = vpop.eup %13136 }
0x1d0a   :  { %v14666_v27 = vadd.f32 %v10596_v8, %v6333_v26  ;;  %v6334_v50 = vmul.f32 %v10595_v42, %v6321_v55  ;;  %v6322_v16 = vmul.f32 %v13137_v41, %v14630_v23 }
0x1d0b   :  { %v13139_v45 = vpop.eup %13138 }
0x1d0c   :  { %12049 = vmatmul.mubr.msk.f32.gmra.mrb[130].mxu1 %vm235_vm9, %v14666_v27  ;;  %v14671_v13 = vadd.f32 %v10596_v8, %v6334_v50  ;;  %v6335_v10 = vmul.f32 %v10595_v42, %v6322_v16  ;;  %v6323_v4 = vmul.f32 %v13139_v45, %v14635_v28  ;;  %v6503_v28 = vld [vmem:[#allocation2 + $0x3a0] sm:$0xff] }
0x1d0d   :  { %v13141_v17 = vpop.eup %13140  ;;  %v12688_v63 = vpack.c.bf16 %v6504_v20, %v6503_v28 }
0x1d0e   :  { %12051 = vmatprep.mubr.msk.f32.mxu1 %vm235_vm9, %v14671_v13  ;;  %v14676_v30 = vadd.f32 %v10596_v8, %v6335_v10  ;;  %v6336_v35 = vmul.f32 %v10595_v42, %v6323_v4  ;;  %v6324_v46 = vmul.f32 %v13141_v17, %v14640_v32  ;;  %v10597_v32 = vld [vmem:[#allocation2 + $0x368] ss:$0 sm:$0xff] }
0x1d0f   :  { %12689 = vmatprep.subr.bf16.mxu0 %v12688_v63 }
0x1d10   :  { %12052 = vmatmul.mubr.msk.f32.gmra.mrb[132].mxu1 %vm235_vm9, %v14676_v30  ;;  %v14681_v23 = vadd.f32 %v10596_v8, %v6336_v35  ;;  %v6337_v29 = vmul.f32 %v10595_v42, %v6324_v46  ;;  %12691 = vmatpush3.bf16.msra.mxu0 %v12688_v63 }
0x1d11   :  { %12701 = vmatprep.subr.bf16.mxu0 %v13551_v51 }
0x1d12   :  { %12054 = vmatprep.mubr.msk.f32.mxu1 %vm235_vm9, %v14681_v23  ;;  %v14685_v34 = vadd.f32 %v10596_v8, %v6337_v29 }
0x1d14   :  { %12055 = vmatmul.mubr.msk.f32.gmra.mrb[134].mxu1 %vm235_vm9, %v14685_v34 }
0x1dd4   :  { %v12047_v33 = vpop.f32.mrb[128].mxu1 }
0x1dd5   :  { %v6456_v2 = vadd.f32 %v12047_v33, %v10597_v32  ;;  %v6450_v62 = vpop.f32.mrb[129].mxu1 }
0x1dd6   :  { %v6451_v42 = vadd.f32 %v10597_v32, %v6450_v62 }
0x1dd7   :  { %v6490_v37 = vmax.f32 %v6456_v2, 0.0 }
0x1dd8   :  { %v6489_v38 = vmax.f32 %v6451_v42, 0.0 }
0x1dda   :  { %12073 = vmatprep.mubr.msk.f32.mxu0 %vm96_vm0, %v6489_v38 }
0x1ddb   :  { %12074 = vmatmul.mubr.msk.f32.vlgmr.msra.gmra.mrb[132].mxu0 %vm96_vm0, %v6490_v37 }
0x1ddc   :  { %12703 = vmatpush3.bf16.msra.mxu0 %v13551_v51 }
0x1ddd   :  { %12705 = vmatprep.subr.bf16.mxu0 %v13557_v44 }
0x1ddf   :  { %v12050_v49 = vpop.f32.mrb[130].mxu1 }
0x1de0   :  { %v6466_v43 = vadd.f32 %v12050_v49, %v10597_v32  ;;  %v6460_v60 = vpop.f32.mrb[131].mxu1  ;;  %12707 = vmatpush3.bf16.msra.mxu0 %v13557_v44 }
0x1de1   :  { %v6461_v54 = vadd.f32 %v10597_v32, %v6460_v60  ;;  %12145 = vmatprep.subr.msk.mxu0 %vm1326_vm10, %v14695_v59 }
0x1de2   :  { %v6492_v40 = vmax.f32 %v6466_v43, 0.0 }
0x1de3   :  { %v6491_v21 = vmax.f32 %v6461_v54, 0.0  ;;  %v12053_v58 = vpop.f32.mrb[132].mxu1 }
0x1de4   :  { %v6476_v8 = vadd.f32 %v12053_v58, %v10597_v32  ;;  %v6470_v11 = vpop.f32.mrb[133].mxu1 }
0x1de5   :  { %v6471_v25 = vadd.f32 %v10597_v32, %v6470_v11  ;;  %12076 = vmatprep.mubr.msk.f32.mxu0 %vm96_vm0, %v6491_v21 }
0x1de6   :  { %12077 = vmatmul.mubr.msk.f32.gmra.mrb[134].mxu0 %vm96_vm0, %v6492_v40  ;;  %v6494_v53 = vmax.f32 %v6476_v8, 0.0 }
0x1de7   :  { %v6493_v39 = vmax.f32 %v6471_v25, 0.0  ;;  %v12056_v9 = vpop.f32.mrb[134].mxu1 }
0x1de8   :  { %v6486_v5 = vadd.f32 %v12056_v9, %v10597_v32  ;;  %v6480_v36 = vpop.f32.mrb[135].mxu1 }
0x1de9   :  { %v6481_v15 = vadd.f32 %v10597_v32, %v6480_v36  ;;  %12079 = vmatprep.mubr.msk.f32.mxu0 %vm96_vm0, %v6493_v39 }
0x1dea   :  { %12080 = vmatmul.mubr.msk.f32.gmra.mrb[136].mxu0 %vm96_vm0, %v6494_v53  ;;  %v6496_v6 = vmax.f32 %v6486_v5, 0.0 }
0x1deb   :  { %v6495_v0 = vmax.f32 %v6481_v15, 0.0 }
0x1ded   :  { %12082 = vmatprep.mubr.msk.f32.mxu0 %vm96_vm0, %v6495_v0 }
0x1dee   :  { %12083 = vmatmul.mubr.msk.f32.gmra.mrb[138].mxu0 %vm96_vm0, %v6496_v6 }
0x1eae   :  { %v12075_v7 = vpop.f32.mrb[132].mxu0 }
0x1eaf   :  { %v6606_v57 = vadd.f32 %v12075_v7, %v10606_v3  ;;  %v6600_v48 = vpop.f32.mrb[133].mxu0 }
0x1eb0   :  { %v6601_v26 = vadd.f32 %v10606_v3, %v6600_v48 }
0x1eb1   :  { %v6640_v55 = vadd.f32 %v6606_v57, %v14653_v14 }
0x1eb2   :  { %v6639_v41 = vadd.f32 %v6601_v26, %v14651_v56 }
0x1eb3   :  { %v6650_v50 = vsel %vm235_vm9, %v6640_v55, 0.0 }
0x1eb4   :  { %6651 = vadd.xlane.f32.xlu0 %v6650_v50  ;;  %v6647_v16 = vsel %vm235_vm9, %v6639_v41, 0.0 }
0x1eb5   :  { %6648 = vadd.xlane.f32.xlu1 %v6647_v16 }
0x1eb9   :  { %v12078_v45 = vpop.f32.mrb[134].mxu0 }
0x1eba   :  { %v6616_v10 = vadd.f32 %v12078_v45, %v10606_v3  ;;  %v6610_v4 = vpop.f32.mrb[135].mxu0 }
0x1ebb   :  { %v6611_v17 = vadd.f32 %v10606_v3, %v6610_v4 }
0x1ebc   :  { %v6642_v35 = vadd.f32 %v6616_v10, %v14666_v27 }
0x1ebd   :  { %v6641_v46 = vadd.f32 %v6611_v17, %v14660_v24  ;;  %v12081_v29 = vpop.f32.mrb[136].mxu0 }
0x1ebe   :  { %v6626_v28 = vadd.f32 %v12081_v29, %v10606_v3  ;;  %v6620_v20 = vpop.f32.mrb[137].mxu0  ;;  %v6656_v14 = vsel %vm235_vm9, %v6642_v35, 0.0 }
0x1ebf   :  { %v6621_v56 = vadd.f32 %v10606_v3, %v6620_v20  ;;  %6657 = vadd.xlane.f32.xlu0 %v6656_v14  ;;  %v6653_v63 = vsel %vm235_vm9, %v6641_v46, 0.0 }
0x1ec0   :  { %v6644_v32 = vadd.f32 %v6626_v28, %v14676_v30  ;;  %6654 = vadd.xlane.f32.xlu1 %v6653_v63 }
0x1ec1   :  { %v6643_v33 = vadd.f32 %v6621_v56, %v14671_v13  ;;  %v12084_v2 = vpop.f32.mrb[138].mxu0 }
0x1ec2   :  { %v6636_v62 = vadd.f32 %v12084_v2, %v10606_v3  ;;  %v6630_v42 = vpop.f32.mrb[139].mxu0  ;;  %v6662_v27 = vsel %vm235_vm9, %v6644_v32, 0.0 }
0x1ec3   :  { %v6631_v24 = vadd.f32 %v10606_v3, %v6630_v42  ;;  %6663 = vadd.xlane.f32.xlu0 %v6662_v27  ;;  %v6659_v38 = vsel %vm235_vm9, %v6643_v33, 0.0  ;;  %v6780_v42 = vld [vmem:[#allocation2 + $0x3e0] sm:$0xff] }
0x1ec4   :  { %v6646_v37 = vadd.f32 %v6636_v62, %v14685_v34  ;;  %6660 = vadd.xlane.f32.xlu1 %v6659_v38  ;;  %v6779_v62 = vld [vmem:[#allocation2 + $0x3d8] sm:$0xff] }
0x1ec5   :  { %v6645_v49 = vadd.f32 %v6631_v24, %v14681_v23  ;;  %v12696_v27 = vpack.c.bf16 %v6780_v42, %v6779_v62 }
0x1ec6   :  { %v6668_v43 = vsel %vm235_vm9, %v6646_v37, 0.0 }
0x1ec7   :  { %6669 = vadd.xlane.f32.xlu0 %v6668_v43  ;;  %v6665_v30 = vsel %vm235_vm9, %v6645_v49, 0.0 }
0x1ec8   :  { %6666 = vadd.xlane.f32.xlu1 %v6665_v30 }
0x1f41   :  { %v6652_v13 = vpop.xlane.xlu0 %6651 }
0x1f42   :  { %v6672_v60 = vmul.f32 0.03125, %v6652_v13  ;;  %v6649_v54 = vpop.xlane.xlu1 %6648 }
0x1f43   :  { %v6671_v21 = vmul.f32 0.03125, %v6649_v54 }
0x1f44   :  { %v14721_v58 = vsub.f32 %v6640_v55, %v6672_v60 }
0x1f45   :  { %v14723_v40 = vsub.f32 %v6639_v41, %v6671_v21 }
0x1f46   :  { %v6688_v34 = vmul.f32 %v14721_v58, %v14721_v58 }
0x1f47   :  { %v6687_v23 = vmul.f32 %v14723_v40, %v14723_v40 }
0x1f48   :  { %v6698_v8 = vsel %vm235_vm9, %v6688_v34, 0.0 }
0x1f49   :  { %6699 = vadd.xlane.f32.xlu0 %v6698_v8  ;;  %v6695_v11 = vsel %vm235_vm9, %v6687_v23, 0.0  ;;  %v10615_v8 = vld [vmem:[#allocation2 + $0x3b8] ss:$0 sm:$0xff] }
0x1f4a   :  { %6696 = vadd.xlane.f32.xlu1 %v6695_v11 }
0x1f4c   :  { %v6658_v25 = vpop.xlane.xlu0 %6657 }
0x1f4d   :  { %v6674_v39 = vmul.f32 0.03125, %v6658_v25  ;;  %v6655_v9 = vpop.xlane.xlu1 %6654 }
0x1f4e   :  { %v6673_v53 = vmul.f32 0.03125, %v6655_v9 }
0x1f4f   :  { %v14731_v5 = vsub.f32 %v6642_v35, %v6674_v39 }
0x1f50   :  { %v14733_v36 = vsub.f32 %v6641_v46, %v6673_v53  ;;  %v6664_v15 = vpop.xlane.xlu0 %6663 }
0x1f51   :  { %v6676_v0 = vmul.f32 0.03125, %v6664_v15  ;;  %v6661_v6 = vpop.xlane.xlu1 %6660  ;;  %v6690_v3 = vmul.f32 %v14731_v5, %v14731_v5 }
0x1f52   :  { %v6675_v7 = vmul.f32 0.03125, %v6661_v6  ;;  %v6689_v57 = vmul.f32 %v14733_v36, %v14733_v36 }
0x1f53   :  { %v14739_v48 = vsub.f32 %v6644_v32, %v6676_v0  ;;  %v6704_v26 = vsel %vm235_vm9, %v6690_v3, 0.0  ;;  %v6777_v32 = vld [vmem:[#allocation2 + $0x3c8] sm:$0xff] }
0x1f54   :  { %v14742_v55 = vsub.f32 %v6643_v33, %v6675_v7  ;;  %6705 = vadd.xlane.f32.xlu0 %v6704_v26  ;;  %v6670_v41 = vpop.xlane.xlu0 %6669  ;;  %v6701_v50 = vsel %vm235_vm9, %v6689_v57, 0.0  ;;  %v6778_v33 = vld [vmem:[#allocation2 + $0x3d0] sm:$0xff]  ;;  %v10616_v57 = vld [vmem:[#allocation2 + $0x3c0] ss:$0 sm:$0xff] }
0x1f55   :  { %v6678_v16 = vmul.f32 0.03125, %v6670_v41  ;;  %6702 = vadd.xlane.f32.xlu1 %v6701_v50  ;;  %v6667_v45 = vpop.xlane.xlu1 %6666  ;;  %v6692_v10 = vmul.f32 %v14739_v48, %v14739_v48  ;;  %v12692_v2 = vpack.c.bf16 %v6778_v33, %v6777_v32 }
0x1f56   :  { %v6677_v4 = vmul.f32 0.03125, %v6667_v45  ;;  %v6691_v17 = vmul.f32 %v14742_v55, %v14742_v55 }
0x1f57   :  { %v14749_v35 = vsub.f32 %v6646_v37, %v6678_v16  ;;  %v6710_v46 = vsel %vm235_vm9, %v6692_v10, 0.0  ;;  %12693 = vmatprep.subr.bf16.mxu1 %v12692_v2 }
0x1f58   :  { %v14752_v29 = vsub.f32 %v6645_v49, %v6677_v4  ;;  %6711 = vadd.xlane.f32.xlu0 %v6710_v46  ;;  %v6707_v28 = vsel %vm235_vm9, %v6691_v17, 0.0  ;;  %12695 = vmatpush3.bf16.msra.mxu1 %v12692_v2 }
0x1f59   :  { %6708 = vadd.xlane.f32.xlu1 %v6707_v28  ;;  %v6694_v20 = vmul.f32 %v14749_v35, %v14749_v35  ;;  %12697 = vmatprep.subr.bf16.mxu1 %v12696_v27 }
0x1f5a   :  { %v6693_v14 = vmul.f32 %v14752_v29, %v14752_v29 }
0x1f5b   :  { %v6716_v56 = vsel %vm235_vm9, %v6694_v20, 0.0 }
0x1f5c   :  { %6717 = vadd.xlane.f32.xlu0 %v6716_v56  ;;  %v6713_v63 = vsel %vm235_vm9, %v6693_v14, 0.0  ;;  %12699 = vmatpush3.bf16.msra.mxu1 %v12696_v27 }
0x1f5d   :  { %6714 = vadd.xlane.f32.xlu1 %v6713_v63  ;;  %12709 = vmatprep.subr.bf16.mxu1 %v13551_v51 }
0x1fd6   :  { %v6700_v24 = vpop.xlane.xlu0 %6699 }
0x1fd7   :  { %v6720_v38 = vmul.f32 0.03125, %v6700_v24  ;;  %v6697_v37 = vpop.xlane.xlu1 %6696 }
0x1fd8   :  { %v6719_v49 = vmul.f32 0.03125, %v6697_v37 }
0x1fd9   :  { %v6728_v43 = vadd.f32 1e-05, %v6720_v38 }
0x1fda   :  { %v6727_v30 = vadd.f32 1e-05, %v6719_v49 }
0x1fdb   :  { %13142 = vrsqrt.f32 %v6728_v43 }
0x1fdc   :  { %13144 = vrsqrt.f32 %v6727_v30 }
0x1fe1   :  { %v6706_v13 = vpop.xlane.xlu0 %6705 }
0x1fe2   :  { %v6722_v60 = vmul.f32 0.03125, %v6706_v13  ;;  %v6703_v54 = vpop.xlane.xlu1 %6702 }
0x1fe3   :  { %v6721_v21 = vmul.f32 0.03125, %v6703_v54 }
0x1fe4   :  { %v6730_v34 = vadd.f32 1e-05, %v6722_v60 }
0x1fe5   :  { %v13143_v23 = vpop.eup %13142  ;;  %v6729_v11 = vadd.f32 1e-05, %v6721_v21  ;;  %v6712_v25 = vpop.xlane.xlu0 %6711 }
0x1fe6   :  { %v13145_v39 = vpop.eup %13144  ;;  %v6744_v9 = vmul.f32 %v13143_v23, %v14721_v58  ;;  %13146 = vrsqrt.f32 %v6730_v34  ;;  %v6724_v53 = vmul.f32 0.03125, %v6712_v25  ;;  %v6709_v15 = vpop.xlane.xlu1 %6708 }
0x1fe7   :  { %13148 = vrsqrt.f32 %v6729_v11  ;;  %v6723_v0 = vmul.f32 0.03125, %v6709_v15  ;;  %v6743_v6 = vmul.f32 %v13145_v39, %v14723_v40 }
0x1fe8   :  { %v6757_v3 = vmul.f32 %v10615_v8, %v6744_v9  ;;  %v6732_v7 = vadd.f32 1e-05, %v6724_v53 }
0x1fe9   :  { %v6731_v26 = vadd.f32 1e-05, %v6723_v0  ;;  %v6718_v41 = vpop.xlane.xlu0 %6717  ;;  %v6756_v50 = vmul.f32 %v10615_v8, %v6743_v6 }
0x1fea   :  { %13150 = vrsqrt.f32 %v6732_v7  ;;  %v6726_v16 = vmul.f32 0.03125, %v6718_v41  ;;  %v6715_v45 = vpop.xlane.xlu1 %6714  ;;  %v14766_v17 = vadd.f32 %v10616_v57, %v6757_v3 }
0x1feb   :  { %13152 = vrsqrt.f32 %v6731_v26  ;;  %v6725_v10 = vmul.f32 0.03125, %v6715_v45  ;;  %v14764_v4 = vadd.f32 %v10616_v57, %v6756_v50 }
0x1fec   :  { %v6734_v58 = vadd.f32 1e-05, %v6726_v16 }
0x1fed   :  { %v6733_v46 = vadd.f32 1e-05, %v6725_v10  ;;  %12093 = vmatprep.mubr.msk.f32.mxu1 %vm235_vm9, %v14764_v4 }
0x1fee   :  { %13154 = vrsqrt.f32 %v6734_v58  ;;  %12094 = vmatmul.mubr.msk.f32.vlgmr.msra.gmra.mrb[136].mxu1 %vm235_vm9, %v14766_v17 }
0x1fef   :  { %13156 = vrsqrt.f32 %v6733_v46  ;;  %12711 = vmatpush3.bf16.msra.mxu1 %v13551_v51 }
0x1ff0   :  { %v13147_v40 = vpop.eup %13146  ;;  %12713 = vmatprep.subr.bf16.mxu1 %v13557_v44 }
0x1ff1   :  { %v13149_v28 = vpop.eup %13148  ;;  %v6746_v20 = vmul.f32 %v13147_v40, %v14731_v5 }
0x1ff2   :  { %v6745_v14 = vmul.f32 %v13149_v28, %v14733_v36 }
0x1ff3   :  { %v6759_v56 = vmul.f32 %v10615_v8, %v6746_v20  ;;  %12715 = vmatpush3.bf16.msra.mxu1 %v13557_v44 }
0x1ff4   :  { %v13151_v63 = vpop.eup %13150  ;;  %v6758_v32 = vmul.f32 %v10615_v8, %v6745_v14  ;;  %12159 = vmatprep.subr.msk.mxu1 %vm1326_vm10, %v14695_v59 }
0x1ff5   :  { %v13153_v33 = vpop.eup %13152  ;;  %v6748_v2 = vmul.f32 %v13151_v63, %v14739_v48  ;;  %v14783_v27 = vadd.f32 %v10616_v57, %v6759_v56 }
0x1ff6   :  { %v14780_v62 = vadd.f32 %v10616_v57, %v6758_v32  ;;  %v6747_v42 = vmul.f32 %v13153_v33, %v14742_v55 }
0x1ff7   :  { %v6761_v5 = vmul.f32 %v10615_v8, %v6748_v2 }
0x1ff8   :  { %v13155_v24 = vpop.eup %13154  ;;  %12096 = vmatprep.mubr.msk.f32.mxu1 %vm235_vm9, %v14780_v62  ;;  %v6760_v36 = vmul.f32 %v10615_v8, %v6747_v42 }
0x1ff9   :  { %v13157_v38 = vpop.eup %13156  ;;  %12097 = vmatmul.mubr.msk.f32.gmra.mrb[138].mxu1 %vm235_vm9, %v14783_v27  ;;  %v6750_v37 = vmul.f32 %v13155_v24, %v14749_v35  ;;  %v14793_v43 = vadd.f32 %v10616_v57, %v6761_v5  ;;  %v10617_v35 = vld [vmem:[#allocation2 + $0x3e8] ss:$0 sm:$0xff] }
0x1ffa   :  { %v14790_v49 = vadd.f32 %v10616_v57, %v6760_v36  ;;  %v6749_v48 = vmul.f32 %v13157_v38, %v14752_v29 }
0x1ffb   :  { %v6763_v55 = vmul.f32 %v10615_v8, %v6750_v37  ;;  %v7631_v37 = vld [vmem:[#allocation2 + $0x3f0] sm:$0xff] }
0x1ffc   :  { %12099 = vmatprep.mubr.msk.f32.mxu1 %vm235_vm9, %v14790_v49  ;;  %v6762_v30 = vmul.f32 %v10615_v8, %v6749_v48  ;;  %v7632_v48 = vld [vmem:[#allocation2 + $0x3f8] sm:$0xff] }
0x1ffd   :  { %12100 = vmatmul.mubr.msk.f32.gmra.mrb[140].mxu1 %vm235_vm9, %v14793_v43  ;;  %v14801_v60 = vadd.f32 %v10616_v57, %v6763_v55  ;;  %v14843_v55 = vpack.c.bf16 %v7632_v48, %v7631_v37 }
0x1ffe   :  { %v14799_v13 = vadd.f32 %v10616_v57, %v6762_v30 }
0x2000   :  { %12102 = vmatprep.mubr.msk.f32.mxu1 %vm235_vm9, %v14799_v13 }
0x2001   :  { %12103 = vmatmul.mubr.msk.f32.gmra.mrb[142].mxu1 %vm235_vm9, %v14801_v60 }
0x20c1   :  { %v12095_v29 = vpop.f32.mrb[136].mxu1 }
0x20c2   :  { %v6882_v54 = vadd.f32 %v12095_v29, %v10617_v35  ;;  %v6876_v21 = vpop.f32.mrb[137].mxu1 }
0x20c3   :  { %v6877_v34 = vadd.f32 %v10617_v35, %v6876_v21 }
0x20c4   :  { %6925 = vrot.lane.b32.xlu1 %v6882_v54, %s13356_s0 }
0x20c8   :  { %6923 = vrot.lane.b32.xlu1 %v6877_v34, %s13356_s0 }
0x20cc   :  { %v12098_v23 = vpop.f32.mrb[138].mxu1 }
0x20cd   :  { %v6886_v8 = vpop.f32.mrb[139].mxu1  ;;  %v6892_v3 = vadd.f32 %v12098_v23, %v10617_v35 }
0x20ce   :  { %v6887_v0 = vadd.f32 %v10617_v35, %v6886_v8 }
0x20d0   :  { %v12101_v11 = vpop.f32.mrb[140].mxu1 }
0x20d1   :  { %v6902_v25 = vadd.f32 %v12101_v11, %v10617_v35  ;;  %v6896_v39 = vpop.f32.mrb[141].mxu1 }
0x20d2   :  { %v6897_v9 = vadd.f32 %v10617_v35, %v6896_v39 }
0x20d3   :  { %6933 = vrot.lane.b32.xlu1 %v6902_v25, %s13356_s0 }
0x20d4   :  { %6931 = vrot.lane.b32.xlu0 %v6897_v9, %s13356_s0  ;;  %v12104_v53 = vpop.f32.mrb[142].mxu1 }
0x20d5   :  { %v6906_v15 = vpop.f32.mrb[143].mxu1  ;;  %v6912_v7 = vadd.f32 %v12104_v53, %v10617_v35 }
0x20d6   :  { %v6907_v6 = vadd.f32 %v10617_v35, %v6906_v15 }
0x20d8   :  { %6927 = vrot.lane.b32.xlu0 %v6887_v0, %s13356_s0  ;;  %6935 = vrot.lane.b32.xlu1 %v6907_v6, %s13356_s0 }
0x20dc   :  { %6929 = vrot.lane.b32.xlu0 %v6892_v3, %s13356_s0  ;;  %6937 = vrot.lane.b32.xlu1 %v6912_v7, %s13356_s0 }
0x20e0   :  { %7454 = vrot.lane.b32.xlu0 %v6877_v34, %s13358_s11  ;;  %7462 = vrot.lane.b32.xlu1 %v6897_v9, %s13358_s11 }
0x20e4   :  { %7456 = vrot.lane.b32.xlu0 %v6882_v54, %s13358_s11  ;;  %7464 = vrot.lane.b32.xlu1 %v6902_v25, %s13358_s11 }
0x20e8   :  { %7458 = vrot.lane.b32.xlu0 %v6887_v0, %s13358_s11  ;;  %7466 = vrot.lane.b32.xlu1 %v6907_v6, %s13358_s11 }
0x20ec   :  { %7460 = vrot.lane.b32.xlu0 %v6892_v3, %s13358_s11  ;;  %7468 = vrot.lane.b32.xlu1 %v6912_v7, %s13358_s11 }
0x2136   :  { %v6926_v57 = vpop.permute.xlu1 %6925 }
0x2137   :  { %v6948_v50 = vmul.f32 %v6926_v57, %v6882_v54  ;;  %v7097_v42 = vmul.f32 %v6926_v57, %v6902_v25 }
0x213a   :  { %v6924_v26 = vpop.permute.xlu1 %6923 }
0x213b   :  { %v6947_v41 = vmul.f32 %v6924_v26, %v6877_v34  ;;  %v7096_v33 = vmul.f32 %v6924_v26, %v6897_v9 }
0x213d   :  { %12113 = vmatprep.mubr.msk.f32.mxu0 %vm235_vm9, %v6947_v41 }
0x213e   :  { %12114 = vmatmul.mubr.msk.f32.vlgmr.msra.gmra.mrb[140].mxu0 %vm235_vm9, %v6948_v50 }
0x213f   :  { %12146 = vmatpush3.msk.msra.mxu0 %vm1326_vm10, %v14695_v59 }
0x2140   :  { %12717 = vmatprep.subr.bf16.mxu0 %v14843_v55 }
0x2145   :  { %v6934_v16 = vpop.permute.xlu1 %6933 }
0x2146   :  { %v6932_v45 = vpop.permute.xlu0 %6931  ;;  %v7093_v58 = vmul.f32 %v6934_v16, %v6882_v54 }
0x2147   :  { %v7092_v10 = vmul.f32 %v6932_v45, %v6877_v34  ;;  %v6951_v2 = vmul.f32 %v6932_v45, %v6897_v9 }
0x2149   :  { %12133 = vmatprep.mubr.msk.f32.mxu1 %vm235_vm9, %v7092_v10 }
0x214a   :  { %v6928_v46 = vpop.permute.xlu0 %6927  ;;  %12134 = vmatmul.mubr.msk.f32.vlgmr.msra.gmra.mrb[144].mxu1 %vm235_vm9, %v7093_v58  ;;  %v6936_v40 = vpop.permute.xlu1 %6935 }
0x214b   :  { %v6949_v28 = vmul.f32 %v6928_v46, %v6887_v0  ;;  %v7094_v20 = vmul.f32 %v6936_v40, %v6887_v0  ;;  %12160 = vmatpush3.msk.msra.mxu1 %vm1326_vm10, %v14695_v59  ;;  %v6952_v59 = vmul.f32 %v6934_v16, %v6902_v25  ;;  %v7098_v5 = vmul.f32 %v6928_v46, %v6907_v6 }
0x214c   :  { %v6953_v24 = vmul.f32 %v6936_v40, %v6907_v6 }
0x214d   :  { %12116 = vmatprep.mubr.msk.f32.mxu0 %vm235_vm9, %v6949_v28  ;;  %12136 = vmatprep.mubr.msk.f32.mxu1 %vm235_vm9, %v7094_v20 }
0x214e   :  { %v6930_v14 = vpop.permute.xlu0 %6929  ;;  %v6938_v56 = vpop.permute.xlu1 %6937 }
0x214f   :  { %v6950_v63 = vmul.f32 %v6930_v14, %v6892_v3  ;;  %v7095_v32 = vmul.f32 %v6938_v56, %v6892_v3  ;;  %v7099_v36 = vmul.f32 %v6930_v14, %v6912_v7  ;;  %v6954_v38 = vmul.f32 %v6938_v56, %v6912_v7 }
0x2151   :  { %12117 = vmatmul.mubr.msk.f32.gmra.mrb[142].mxu0 %vm235_vm9, %v6950_v63  ;;  %12137 = vmatmul.mubr.msk.f32.gmra.mrb[146].mxu1 %vm235_vm9, %v7095_v32 }
0x2152   :  { %12119 = vmatprep.mubr.msk.f32.mxu0 %vm235_vm9, %v6951_v2  ;;  %12139 = vmatprep.mubr.msk.f32.mxu1 %vm235_vm9, %v7096_v33 }
0x2155   :  { %12120 = vmatmul.mubr.msk.f32.gmra.mrb[144].mxu0 %vm235_vm9, %v6952_v59  ;;  %12140 = vmatmul.mubr.msk.f32.gmra.mrb[148].mxu1 %vm235_vm9, %v7097_v42 }
0x2156   :  { %12122 = vmatprep.mubr.msk.f32.mxu0 %vm235_vm9, %v6953_v24  ;;  %12142 = vmatprep.mubr.msk.f32.mxu1 %vm235_vm9, %v7098_v5 }
0x2159   :  { %12123 = vmatmul.mubr.msk.f32.gmra.mrb[146].mxu0 %vm235_vm9, %v6954_v38  ;;  %12143 = vmatmul.mubr.msk.f32.gmra.mrb[150].mxu1 %vm235_vm9, %v7099_v36 }
0x2211   :  { %v12115_v30 = vpop.f32.mrb[140].mxu0 }
0x2212   :  { %v7045_v35 = vpop.f32.mrb[141].mxu0  ;;  %v7085_v54 = vmul.f32 0.35355338, %v12115_v30 }
0x2213   :  { %v7084_v23 = vmul.f32 0.35355338, %v7045_v35 }
0x221d   :  { %v12135_v29 = vpop.f32.mrb[144].mxu1 }
0x221e   :  { %v7230_v21 = vmul.f32 0.35355338, %v12135_v29  ;;  %v7190_v34 = vpop.f32.mrb[145].mxu1 }
0x221f   :  { %v7229_v8 = vmul.f32 0.35355338, %v7190_v34 }
0x2220   :  { %v7238_v11 = vmax.f32 %v7085_v54, %v7230_v21 }
0x2221   :  { %v7237_v25 = vmax.f32 %v7084_v23, %v7229_v8 }
0x2222   :  { %v7246_v39 = vsub.f32 %v7085_v54, %v7238_v11  ;;  %v7270_v9 = vsub.f32 %v7230_v21, %v7238_v11 }
0x2223   :  { %v7245_v53 = vsub.f32 %v7084_v23, %v7237_v25  ;;  %v7269_v15 = vsub.f32 %v7229_v8, %v7237_v25 }
0x2224   :  { %v7255_v0 = vmul.f32 1.442695, %v7246_v39  ;;  %v7279_v6 = vmul.f32 1.442695, %v7270_v9  ;;  %v12118_v3 = vpop.f32.mrb[142].mxu0  ;;  %v12138_v7 = vpop.f32.mrb[146].mxu1 }
0x2225   :  { %v7253_v57 = vmul.f32 1.442695, %v7245_v53  ;;  %v7277_v26 = vmul.f32 1.442695, %v7269_v15  ;;  %v7087_v41 = vmul.f32 0.35355338, %v12118_v3 }
0x2226   :  { %13158 = vpow2.f32 %v7255_v0  ;;  %v7232_v50 = vmul.f32 0.35355338, %v12138_v7  ;;  %v7055_v16 = vpop.f32.mrb[143].mxu0  ;;  %v7200_v45 = vpop.f32.mrb[147].mxu1 }
0x2227   :  { %13160 = vpow2.f32 %v7279_v6  ;;  %v7086_v10 = vmul.f32 0.35355338, %v7055_v16  ;;  %v7231_v58 = vmul.f32 0.35355338, %v7200_v45 }
0x2228   :  { %13162 = vpow2.f32 %v7253_v57  ;;  %v7240_v46 = vmax.f32 %v7087_v41, %v7232_v50  ;;  %v12121_v40 = vpop.f32.mrb[144].mxu0  ;;  %v12141_v28 = vpop.f32.mrb[148].mxu1 }
0x2229   :  { %13164 = vpow2.f32 %v7277_v26  ;;  %v7239_v20 = vmax.f32 %v7086_v10, %v7231_v58  ;;  %v7089_v14 = vmul.f32 0.35355338, %v12121_v40  ;;  %v7234_v56 = vmul.f32 0.35355338, %v12141_v28  ;;  %v7065_v63 = vpop.f32.mrb[145].mxu0  ;;  %v7210_v32 = vpop.f32.mrb[149].mxu1 }
0x222a   :  { %v7248_v33 = vsub.f32 %v7087_v41, %v7240_v46  ;;  %v7272_v2 = vsub.f32 %v7232_v50, %v7240_v46  ;;  %v7088_v42 = vmul.f32 0.35355338, %v7065_v63  ;;  %v7233_v59 = vmul.f32 0.35355338, %v7210_v32 }
0x222b   :  { %v7247_v5 = vsub.f32 %v7086_v10, %v7239_v20  ;;  %v7271_v24 = vsub.f32 %v7231_v58, %v7239_v20  ;;  %v7242_v36 = vmax.f32 %v7089_v14, %v7234_v56 }
0x222c   :  { %v7259_v38 = vmul.f32 1.442695, %v7248_v33  ;;  %v7283_v37 = vmul.f32 1.442695, %v7272_v2  ;;  %v7241_v48 = vmax.f32 %v7088_v42, %v7233_v59  ;;  %v12124_v30 = vpop.f32.mrb[146].mxu0  ;;  %v12144_v35 = vpop.f32.mrb[150].mxu1 }
0x222d   :  { %v7257_v29 = vmul.f32 1.442695, %v7247_v5  ;;  %v7281_v54 = vmul.f32 1.442695, %v7271_v24  ;;  %v7250_v21 = vsub.f32 %v7089_v14, %v7242_v36  ;;  %v7274_v34 = vsub.f32 %v7234_v56, %v7242_v36  ;;  %v7075_v23 = vpop.f32.mrb[147].mxu0  ;;  %v7220_v8 = vpop.f32.mrb[151].mxu1 }
0x222e   :  { %13166 = vpow2.f32 %v7259_v38  ;;  %v7249_v11 = vsub.f32 %v7088_v42, %v7241_v48  ;;  %v7273_v25 = vsub.f32 %v7233_v59, %v7241_v48  ;;  %v7091_v39 = vmul.f32 0.35355338, %v12124_v30 }
0x222f   :  { %13168 = vpow2.f32 %v7283_v37  ;;  %v7263_v9 = vmul.f32 1.442695, %v7250_v21  ;;  %v7287_v53 = vmul.f32 1.442695, %v7274_v34  ;;  %v7236_v15 = vmul.f32 0.35355338, %v12144_v35 }
0x2230   :  { %v13159_v0 = vpop.eup %13158  ;;  %13170 = vpow2.f32 %v7257_v29  ;;  %v7090_v6 = vmul.f32 0.35355338, %v7075_v23  ;;  %v7261_v7 = vmul.f32 1.442695, %v7249_v11  ;;  %v7235_v26 = vmul.f32 0.35355338, %v7220_v8 }
0x2231   :  { %v13161_v3 = vpop.eup %13160  ;;  %13172 = vpow2.f32 %v7281_v54  ;;  %v7244_v57 = vmax.f32 %v7091_v39, %v7236_v15  ;;  %v7285_v16 = vmul.f32 1.442695, %v7273_v25 }
0x2232   :  { %v13163_v41 = vpop.eup %13162  ;;  %v7294_v50 = vadd.f32 %v13161_v3, %v13159_v0  ;;  %13174 = vpow2.f32 %v7263_v9  ;;  %v7243_v46 = vmax.f32 %v7090_v6, %v7235_v26 }
0x2233   :  { %v13165_v45 = vpop.eup %13164  ;;  %13176 = vpow2.f32 %v7287_v53  ;;  %v7252_v10 = vsub.f32 %v7091_v39, %v7244_v57  ;;  %v7276_v58 = vsub.f32 %v7236_v15, %v7244_v57 }
0x2234   :  { %13178 = vrcp.f32 %v7294_v50  ;;  %v7293_v40 = vadd.f32 %v13165_v45, %v13163_v41  ;;  %v7251_v14 = vsub.f32 %v7090_v6, %v7243_v46  ;;  %v7275_v56 = vsub.f32 %v7235_v26, %v7243_v46 }
0x2235   :  { %13180 = vpow2.f32 %v7261_v7  ;;  %v7267_v28 = vmul.f32 1.442695, %v7252_v10  ;;  %v7291_v20 = vmul.f32 1.442695, %v7276_v58 }
0x2236   :  { %13182 = vrcp.f32 %v7293_v40  ;;  %v7265_v63 = vmul.f32 1.442695, %v7251_v14  ;;  %v7289_v33 = vmul.f32 1.442695, %v7275_v56  ;;  %v7633_v56 = vld [vmem:[#allocation2 + $0x400] sm:$0xff] }
0x2237   :  { %13184 = vpow2.f32 %v7285_v16 }
0x2238   :  { %v13167_v32 = vpop.eup %13166  ;;  %13186 = vpow2.f32 %v7267_v28 }
0x2239   :  { %v13169_v2 = vpop.eup %13168  ;;  %13188 = vpow2.f32 %v7291_v20 }
0x223a   :  { %v13171_v42 = vpop.eup %13170  ;;  %v7296_v59 = vadd.f32 %v13169_v2, %v13167_v32  ;;  %13190 = vpow2.f32 %v7265_v63  ;;  %v7634_v63 = vld [vmem:[#allocation2 + $0x408] sm:$0xff] }
0x223b   :  { %v13173_v5 = vpop.eup %13172  ;;  %13192 = vpow2.f32 %v7289_v33  ;;  %v8045_v33 = vld [vmem:[#allocation2 + $0x450] sm:$0xff] }
0x223c   :  { %v13175_v24 = vpop.eup %13174  ;;  %13194 = vrcp.f32 %v7296_v59  ;;  %v7295_v36 = vadd.f32 %v13173_v5, %v13171_v42  ;;  %v7455_v59 = vpop.permute.xlu0 %7454 }
0x223d   :  { %v13177_v38 = vpop.eup %13176 }
0x223e   :  { %v13179_v37 = vpop.eup %13178  ;;  %13196 = vrcp.f32 %v7295_v36  ;;  %v7298_v48 = vadd.f32 %v13177_v38, %v13175_v24 }
0x223f   :  { %v13181_v30 = vpop.eup %13180  ;;  %v7310_v35 = vmul.f32 %v13179_v37, %v13159_v0  ;;  %v7318_v29 = vmul.f32 %v13179_v37, %v13161_v3 }
0x2240   :  { %v13183_v54 = vpop.eup %13182  ;;  %13198 = vrcp.f32 %v7298_v48 }
0x2241   :  { %v13185_v21 = vpop.eup %13184  ;;  %v7309_v34 = vmul.f32 %v13183_v54, %v13163_v41  ;;  %v7317_v23 = vmul.f32 %v13183_v54, %v13165_v45 }
0x2242   :  { %v13187_v8 = vpop.eup %13186  ;;  %v7297_v11 = vadd.f32 %v13185_v21, %v13181_v30 }
0x2243   :  { %v13189_v25 = vpop.eup %13188  ;;  %12147 = vmatprep.mubr.msk.f32.mxu0 %vm1301_vm11, %v7309_v34  ;;  %12161 = vmatprep.mubr.msk.f32.mxu1 %vm1301_vm11, %v7317_v23 }
0x2244   :  { %v13191_v39 = vpop.eup %13190  ;;  %13200 = vrcp.f32 %v7297_v11  ;;  %v7300_v9 = vadd.f32 %v13189_v25, %v13187_v8  ;;  %12148 = vmatmul.mubr.msk.f32.vlgmr.msra.gmra.mrb[148].mxu0 %vm1301_vm11, %v7310_v35  ;;  %12162 = vmatmul.mubr.msk.f32.vlgmr.msra.gmra.mrb[152].mxu1 %vm1301_vm11, %v7318_v29  ;;  %v8048_v11 = vld [vmem:[#allocation2 + $0x468] sm:$0xff] }
0x2245   :  { %v13193_v53 = vpop.eup %13192  ;;  %12719 = vmatpush3.bf16.msra.mxu0 %v14843_v55 }
0x2246   :  { %v13195_v15 = vpop.eup %13194  ;;  %13202 = vrcp.f32 %v7300_v9  ;;  %v7299_v0 = vadd.f32 %v13193_v53, %v13191_v39 }
0x2247   :  { %v7312_v6 = vmul.f32 %v13195_v15, %v13167_v32  ;;  %v7320_v3 = vmul.f32 %v13195_v15, %v13169_v2  ;;  %v12720_v32 = vpack.c.bf16 %v7634_v63, %v7633_v56  ;;  %v8046_v2 = vld [vmem:[#allocation2 + $0x458] sm:$0xff] }
0x2248   :  { %v13197_v7 = vpop.eup %13196  ;;  %13204 = vrcp.f32 %v7299_v0 }
0x2249   :  { %v7311_v57 = vmul.f32 %v13197_v7, %v13171_v42  ;;  %v7319_v26 = vmul.f32 %v13197_v7, %v13173_v5  ;;  %12721 = vmatprep.subr.bf16.mxu0 %v12720_v32  ;;  %v12732_v42 = vpack.c.bf16 %v8046_v2, %v8045_v33  ;;  %v7463_v5 = vpop.permute.xlu1 %7462 }
0x224a   :  { %v13199_v41 = vpop.eup %13198  ;;  %12723 = vmatpush3.bf16.msra.mxu0 %v12720_v32 }
0x224b   :  { %12150 = vmatprep.mubr.msk.f32.mxu0 %vm1301_vm11, %v7311_v57  ;;  %12164 = vmatprep.mubr.msk.f32.mxu1 %vm1301_vm11, %v7319_v26  ;;  %v7314_v50 = vmul.f32 %v13199_v41, %v13175_v24  ;;  %v7322_v16 = vmul.f32 %v13199_v41, %v13177_v38  ;;  %v7457_v24 = vpop.permute.xlu0 %7456 }
0x224c   :  { %12151 = vmatmul.mubr.msk.f32.gmra.mrb[150].mxu0 %vm1301_vm11, %v7312_v6  ;;  %12165 = vmatmul.mubr.msk.f32.gmra.mrb[154].mxu1 %vm1301_vm11, %v7320_v3 }
0x224d   :  { %12733 = vmatprep.subr.bf16.mxu0 %v12732_v42  ;;  %v7465_v36 = vpop.permute.xlu1 %7464 }
0x224e   :  { %v13201_v55 = vpop.eup %13200 }
0x224f   :  { %v7313_v45 = vmul.f32 %v13201_v55, %v13181_v30  ;;  %v7321_v10 = vmul.f32 %v13201_v55, %v13185_v21  ;;  %v7459_v38 = vpop.permute.xlu0 %7458 }
0x2250   :  { %v13203_v58 = vpop.eup %13202 }
0x2251   :  { %12153 = vmatprep.mubr.msk.f32.mxu0 %vm1301_vm11, %v7313_v45  ;;  %12167 = vmatprep.mubr.msk.f32.mxu1 %vm1301_vm11, %v7321_v10  ;;  %v7316_v46 = vmul.f32 %v13203_v58, %v13187_v8  ;;  %v7324_v40 = vmul.f32 %v13203_v58, %v13189_v25  ;;  %v7467_v37 = vpop.permute.xlu1 %7466  ;;  %v8047_v8 = vld [vmem:[#allocation2 + $0x460] sm:$0xff] }
0x2252   :  { %v13205_v28 = vpop.eup %13204  ;;  %12154 = vmatmul.mubr.msk.f32.gmra.mrb[152].mxu0 %vm1301_vm11, %v7314_v50  ;;  %12168 = vmatmul.mubr.msk.f32.gmra.mrb[156].mxu1 %vm1301_vm11, %v7322_v16  ;;  %v12736_v9 = vpack.c.bf16 %v8048_v11, %v8047_v8 }
0x2253   :  { %v7315_v20 = vmul.f32 %v13205_v28, %v13191_v39  ;;  %v7323_v14 = vmul.f32 %v13205_v28, %v13193_v53  ;;  %v7461_v53 = vpop.permute.xlu0 %7460 }
0x2255   :  { %12156 = vmatprep.mubr.msk.f32.mxu0 %vm1301_vm11, %v7315_v20  ;;  %12170 = vmatprep.mubr.msk.f32.mxu1 %vm1301_vm11, %v7323_v14  ;;  %v7469_v15 = vpop.permute.xlu1 %7468 }
0x2256   :  { %12157 = vmatmul.mubr.msk.f32.gmra.mrb[154].mxu0 %vm1301_vm11, %v7316_v46  ;;  %12171 = vmatmul.mubr.msk.f32.gmra.mrb[158].mxu1 %vm1301_vm11, %v7324_v40 }
0x2317   :  { %v12149_v48 = vpop.f32.mrb[148].mxu0  ;;  %v12163_v30 = vpop.f32.mrb[152].mxu1 }
0x2318   :  { %v7479_v35 = vmul.f32 %v12149_v48, %v7457_v24  ;;  %v7616_v29 = vmul.f32 %v12163_v30, %v7465_v36  ;;  %v7415_v54 = vpop.f32.mrb[149].mxu0  ;;  %v7576_v21 = vpop.f32.mrb[153].mxu1 }
0x2319   :  { %v7478_v34 = vmul.f32 %v7455_v59, %v7415_v54  ;;  %v7615_v23 = vmul.f32 %v7576_v21, %v7463_v5 }
0x231a   :  { %v7624_v25 = vadd.f32 %v7616_v29, %v7479_v35 }
0x231b   :  { %v7623_v39 = vadd.f32 %v7615_v23, %v7478_v34 }
0x231d   :  { %12181 = vmatprep.mubr.msk.f32.mxu0 %vm235_vm9, %v7623_v39 }
0x231e   :  { %12182 = vmatmul.mubr.msk.f32.vlgmr.msra.gmra.mrb[156].mxu0 %vm235_vm9, %v7624_v25 }
0x231f   :  { %v12152_v0 = vpop.f32.mrb[150].mxu0  ;;  %v12166_v6 = vpop.f32.mrb[154].mxu1  ;;  %12735 = vmatpush3.bf16.msra.mxu0 %v12732_v42 }
0x2320   :  { %v7481_v3 = vmul.f32 %v12152_v0, %v7461_v53  ;;  %v7618_v7 = vmul.f32 %v12166_v6, %v7469_v15  ;;  %v7425_v57 = vpop.f32.mrb[151].mxu0  ;;  %v7586_v26 = vpop.f32.mrb[155].mxu1  ;;  %12737 = vmatprep.subr.bf16.mxu0 %v12736_v9 }
0x2321   :  { %v7480_v41 = vmul.f32 %v7459_v38, %v7425_v57  ;;  %v7617_v50 = vmul.f32 %v7586_v26, %v7467_v37 }
0x2322   :  { %v7626_v16 = vadd.f32 %v7618_v7, %v7481_v3 }
0x2323   :  { %v7625_v55 = vadd.f32 %v7617_v50, %v7480_v41  ;;  %12739 = vmatpush3.bf16.msra.mxu0 %v12736_v9 }
0x2324   :  { %12749 = vmatprep.subr.bf16.mxu0 %v13551_v51 }
0x2325   :  { %v12155_v45 = vpop.f32.mrb[152].mxu0  ;;  %v12169_v10 = vpop.f32.mrb[156].mxu1  ;;  %12184 = vmatprep.mubr.msk.f32.mxu0 %vm235_vm9, %v7625_v55 }
0x2326   :  { %v7483_v58 = vmul.f32 %v12155_v45, %v7465_v36  ;;  %v7620_v46 = vmul.f32 %v12169_v10, %v7457_v24  ;;  %v7435_v40 = vpop.f32.mrb[153].mxu0  ;;  %v7596_v28 = vpop.f32.mrb[157].mxu1  ;;  %12185 = vmatmul.mubr.msk.f32.gmra.mrb[158].mxu0 %vm235_vm9, %v7626_v16 }
0x2327   :  { %v7482_v20 = vmul.f32 %v7463_v5, %v7435_v40  ;;  %v7619_v14 = vmul.f32 %v7596_v28, %v7455_v59  ;;  %v14885_v59 = vld [vmem:[#allocation2 + $0x5c8] sm:$0xf] }
0x2328   :  { %v7628_v56 = vadd.f32 %v7620_v46, %v7483_v58 }
0x2329   :  { %v7627_v63 = vadd.f32 %v7619_v14, %v7482_v20  ;;  %v12158_v32 = vpop.f32.mrb[154].mxu0  ;;  %v12172_v33 = vpop.f32.mrb[158].mxu1 }
0x232a   :  { %v7485_v2 = vmul.f32 %v12158_v32, %v7469_v15  ;;  %v7622_v42 = vmul.f32 %v12172_v33, %v7461_v53  ;;  %v7445_v48 = vpop.f32.mrb[155].mxu0  ;;  %v7606_v30 = vpop.f32.mrb[159].mxu1 }
0x232b   :  { %v7484_v35 = vmul.f32 %v7467_v37, %v7445_v48  ;;  %v7621_v29 = vmul.f32 %v7606_v30, %v7459_v38  ;;  %12187 = vmatprep.mubr.msk.f32.mxu0 %vm235_vm9, %v7627_v63 }
0x232c   :  { %v7630_v36 = vadd.f32 %v7622_v42, %v7485_v2  ;;  %12188 = vmatmul.mubr.msk.f32.gmra.mrb[160].mxu0 %vm235_vm9, %v7628_v56 }
0x232d   :  { %v7629_v24 = vadd.f32 %v7621_v29, %v7484_v35 }
0x232f   :  { %12190 = vmatprep.mubr.msk.f32.mxu0 %vm235_vm9, %v7629_v24 }
0x2330   :  { %12191 = vmatmul.mubr.msk.f32.gmra.mrb[162].mxu0 %vm235_vm9, %v7630_v36 }
0x2331   :  { %12221 = vmatprep.mubr.msk.f32.mxu0 %vm235_vm9, %v14440_v1  ;;  %v10660_v1 = vld [vmem:[#allocation2 + $0x410] ss:$0 sm:$0xff] }
0x2334   :  { %12222 = vmatmul.mubr.msk.f32.vlgmr.msra.gmra.mrb[164].mxu0 %vm235_vm9, %v14445_v19 }
0x2335   :  { %12224 = vmatprep.mubr.msk.f32.mxu0 %vm235_vm9, %v14451_v61  ;;  %12751 = vmatpush3.bf16.msra.mxu0 %v13551_v51 }
0x2336   :  { %12753 = vmatprep.subr.bf16.mxu0 %v13557_v44 }
0x2338   :  { %12225 = vmatmul.mubr.msk.f32.gmra.mrb[166].mxu0 %vm235_vm9, %v14458_v52 }
0x2339   :  { %12227 = vmatprep.mubr.msk.f32.mxu0 %vm235_vm9, %v14464_v47  ;;  %12755 = vmatpush3.bf16.msra.mxu0 %v13557_v44 }
0x233a   :  { %12287 = vmatprep.subr.msk.mxu0 %vm1326_vm10, %v14885_v59 }
0x233c   :  { %12228 = vmatmul.mubr.msk.f32.gmra.mrb[168].mxu0 %vm235_vm9, %v14476_v18 }
0x233d   :  { %12230 = vmatprep.mubr.msk.f32.mxu0 %vm235_vm9, %v14482_v12 }
0x2340   :  { %12231 = vmatmul.mubr.msk.f32.gmra.mrb[170].mxu0 %vm235_vm9, %v14488_v22 }
0x23f1   :  { %v12183_v19 = vpop.f32.mrb[156].mxu0 }
0x23f2   :  { %v7736_v61 = vadd.f32 %v12183_v19, %v10660_v1  ;;  %v7730_v52 = vpop.f32.mrb[157].mxu0 }
0x23f3   :  { %v7731_v47 = vadd.f32 %v10660_v1, %v7730_v52 }
0x23f4   :  { %v7770_v5 = vadd.f32 %v7736_v61, %v14766_v17 }
0x23f5   :  { %v7769_v38 = vadd.f32 %v7731_v47, %v14764_v4 }
0x23f6   :  { %v7780_v37 = vsel %vm235_vm9, %v7770_v5, 0.0 }
0x23f7   :  { %7781 = vadd.xlane.f32.xlu1 %v7780_v37  ;;  %v7777_v18 = vsel %vm235_vm9, %v7769_v38, 0.0 }
0x23f8   :  { %7778 = vadd.xlane.f32.xlu0 %v7777_v18 }
0x23f9   :  { %v12186_v54 = vpop.f32.mrb[158].mxu0 }
0x23fa   :  { %v7740_v12 = vpop.f32.mrb[159].mxu0  ;;  %v7746_v21 = vadd.f32 %v12186_v54, %v10660_v1 }
0x23fb   :  { %v7741_v34 = vadd.f32 %v10660_v1, %v7740_v12 }
0x23fc   :  { %v7772_v23 = vadd.f32 %v7746_v21, %v14783_v27 }
0x23fd   :  { %v7771_v22 = vadd.f32 %v7741_v34, %v14780_v62 }
0x23fe   :  { %v7786_v15 = vsel %vm235_vm9, %v7772_v23, 0.0 }
0x23ff   :  { %v12189_v8 = vpop.f32.mrb[160].mxu0  ;;  %v7783_v11 = vsel %vm235_vm9, %v7771_v22, 0.0 }
0x2400   :  { %v7756_v17 = vadd.f32 %v12189_v8, %v10660_v1  ;;  %v7750_v25 = vpop.f32.mrb[161].mxu0  ;;  %7784 = vadd.xlane.f32.xlu0 %v7783_v11 }
0x2401   :  { %v7751_v4 = vadd.f32 %v10660_v1, %v7750_v25 }
0x2402   :  { %v7774_v39 = vadd.f32 %v7756_v17, %v14793_v43 }
0x2403   :  { %v7773_v9 = vadd.f32 %v7751_v4, %v14790_v49  ;;  %v12192_v53 = vpop.f32.mrb[162].mxu0 }
0x2404   :  { %v7766_v0 = vadd.f32 %v12192_v53, %v10660_v1  ;;  %v7760_v6 = vpop.f32.mrb[163].mxu0  ;;  %7787 = vadd.xlane.f32.xlu0 %v7786_v15  ;;  %v7792_v43 = vsel %vm235_vm9, %v7774_v39, 0.0  ;;  %v7908_v53 = vld [vmem:[#allocation2 + $0x430] sm:$0xff] }
0x2405   :  { %v7761_v62 = vadd.f32 %v10660_v1, %v7760_v6  ;;  %v7789_v27 = vsel %vm235_vm9, %v7773_v9, 0.0  ;;  %v7909_v6 = vld [vmem:[#allocation2 + $0x438] sm:$0xff] }
0x2406   :  { %7790 = vadd.xlane.f32.xlu1 %v7789_v27  ;;  %v7776_v3 = vadd.f32 %v7766_v0, %v14801_v60  ;;  %v10680_v0 = vld [vmem:[#allocation2 + $0x470] ss:$0 sm:$0xff] }
0x2407   :  { %v7775_v7 = vadd.f32 %v7761_v62, %v14799_v13  ;;  %v14908_v57 = vpop.f32.mrb[164].mxu0  ;;  %v7910_v62 = vld [vmem:[#allocation2 + $0x440] sm:$0xff] }
0x2408   :  { %v14911_v26 = vpop.f32.mrb[165].mxu0  ;;  %7793 = vadd.xlane.f32.xlu0 %v7792_v43  ;;  %v7798_v50 = vsel %vm235_vm9, %v7776_v3, 0.0 }
0x2409   :  { %v7795_v49 = vsel %vm235_vm9, %v7775_v7, 0.0  ;;  %v14968_v27 = vadd.f32 %v10680_v0, %v14911_v26 }
0x240a   :  { %7796 = vadd.xlane.f32.xlu1 %v7795_v49 }
0x240b   :  { %v14914_v41 = vpop.f32.mrb[166].mxu0 }
0x240c   :  { %v14917_v16 = vpop.f32.mrb[167].mxu0  ;;  %7799 = vadd.xlane.f32.xlu0 %v7798_v50  ;;  %v14999_v50 = vadd.f32 %v14914_v41, %v10680_v0 }
0x240f   :  { %v14919_v60 = vpop.f32.mrb[168].mxu0 }
0x2410   :  { %v14921_v13 = vpop.f32.mrb[169].mxu0  ;;  %v14982_v26 = vadd.f32 %v14919_v60, %v10680_v0 }
0x2411   :  { %v14979_v43 = vadd.f32 %v10680_v0, %v14921_v13 }
0x2413   :  { %v14923_v55 = vpop.f32.mrb[170].mxu0 }
0x2414   :  { %v14925_v45 = vpop.f32.mrb[171].mxu0  ;;  %v15002_v60 = vadd.f32 %v14923_v55, %v10680_v0 }
0x2415   :  { %v14992_v49 = vadd.f32 %v10680_v0, %v14925_v45 }
0x2484   :  { %v7782_v10 = vpop.xlane.xlu1 %7781 }
0x2485   :  { %v7802_v58 = vmul.f32 0.03125, %v7782_v10  ;;  %v7779_v46 = vpop.xlane.xlu0 %7778 }
0x2486   :  { %v7801_v40 = vmul.f32 0.03125, %v7779_v46 }
0x2487   :  { %v14927_v28 = vsub.f32 %v7770_v5, %v7802_v58 }
0x2488   :  { %v14929_v20 = vsub.f32 %v7769_v38, %v7801_v40 }
0x2489   :  { %v7818_v14 = vmul.f32 %v14927_v28, %v14927_v28 }
0x248a   :  { %v7817_v56 = vmul.f32 %v14929_v20, %v14929_v20 }
0x248b   :  { %v7828_v63 = vsel %vm235_vm9, %v7818_v14, 0.0 }
0x248c   :  { %7829 = vadd.xlane.f32.xlu0 %v7828_v63  ;;  %v7825_v32 = vsel %vm235_vm9, %v7817_v56, 0.0 }
0x248d   :  { %v7785_v33 = vpop.xlane.xlu0 %7784  ;;  %7826 = vadd.xlane.f32.xlu1 %v7825_v32  ;;  %v10669_v32 = vld [vmem:[#allocation2 + $0x418] ss:$0 sm:$0xff] }
0x248e   :  { %v7803_v2 = vmul.f32 0.03125, %v7785_v33 }
0x2490   :  { %v14937_v42 = vsub.f32 %v7771_v22, %v7803_v2 }
0x2491   :  { %v7788_v48 = vpop.xlane.xlu0 %7787 }
0x2492   :  { %v7804_v30 = vmul.f32 0.03125, %v7788_v48  ;;  %v7819_v35 = vmul.f32 %v14937_v42, %v14937_v42 }
0x2493   :  { %v7791_v29 = vpop.xlane.xlu1 %7790 }
0x2494   :  { %v14941_v36 = vsub.f32 %v7772_v23, %v7804_v30  ;;  %v7805_v24 = vmul.f32 0.03125, %v7791_v29  ;;  %v7831_v1 = vsel %vm235_vm9, %v7819_v35, 0.0 }
0x2495   :  { %7832 = vadd.xlane.f32.xlu1 %v7831_v1  ;;  %v7794_v19 = vpop.xlane.xlu0 %7793  ;;  %v10670_v1 = vld [vmem:[#allocation2 + $0x420] ss:$0 sm:$0xff] }
0x2496   :  { %v14944_v61 = vsub.f32 %v7773_v9, %v7805_v24  ;;  %v7806_v52 = vmul.f32 0.03125, %v7794_v19  ;;  %v7820_v47 = vmul.f32 %v14941_v36, %v14941_v36  ;;  %v7907_v9 = vld [vmem:[#allocation2 + $0x428] sm:$0xff] }
0x2497   :  { %v7797_v5 = vpop.xlane.xlu1 %7796  ;;  %v12724_v15 = vpack.c.bf16 %v7908_v53, %v7907_v9 }
0x2498   :  { %v14948_v38 = vsub.f32 %v7774_v39, %v7806_v52  ;;  %v7807_v37 = vmul.f32 0.03125, %v7797_v5  ;;  %v7834_v18 = vsel %vm235_vm9, %v7820_v47, 0.0  ;;  %v7821_v54 = vmul.f32 %v14944_v61, %v14944_v61 }
0x2499   :  { %v7800_v12 = vpop.xlane.xlu0 %7799  ;;  %7835 = vadd.xlane.f32.xlu0 %v7834_v18  ;;  %12725 = vmatprep.subr.bf16.mxu1 %v12724_v15 }
0x249a   :  { %v14953_v21 = vsub.f32 %v7775_v7, %v7807_v37  ;;  %v7808_v34 = vmul.f32 0.03125, %v7800_v12  ;;  %v7837_v22 = vsel %vm235_vm9, %v7821_v54, 0.0  ;;  %v7822_v23 = vmul.f32 %v14948_v38, %v14948_v38  ;;  %12727 = vmatpush3.bf16.msra.mxu1 %v12724_v15 }
0x249b   :  { %7838 = vadd.xlane.f32.xlu1 %v7837_v22  ;;  %v14973_v7 = vadd.f32 %v14908_v57, %v10680_v0  ;;  %v14989_v57 = vadd.f32 %v10680_v0, %v14917_v16 }
0x249c   :  { %v14958_v8 = vsub.f32 %v7776_v3, %v7808_v34  ;;  %v7840_v11 = vsel %vm235_vm9, %v7822_v23, 0.0  ;;  %v7823_v17 = vmul.f32 %v14953_v21, %v14953_v21  ;;  %v12728_v3 = vpack.c.bf16 %v7910_v62, %v7909_v6 }
0x249d   :  { %7841 = vadd.xlane.f32.xlu0 %v7840_v11 }
0x249e   :  { %v7843_v25 = vsel %vm235_vm9, %v7823_v17, 0.0  ;;  %v7824_v4 = vmul.f32 %v14958_v8, %v14958_v8  ;;  %12729 = vmatprep.subr.bf16.mxu1 %v12728_v3 }
0x249f   :  { %7844 = vadd.xlane.f32.xlu1 %v7843_v25  ;;  %12731 = vmatpush3.bf16.msra.mxu1 %v12728_v3 }
0x24a0   :  { %v7846_v39 = vsel %vm235_vm9, %v7824_v4, 0.0  ;;  %12741 = vmatprep.subr.bf16.mxu1 %v13551_v51 }
0x24a1   :  { %7847 = vadd.xlane.f32.xlu0 %v7846_v39 }
0x24b0   :  { %8674 = vrot.lane.b32.xlu1 %v14968_v27, %s13356_s0 }
0x24b4   :  { %8676 = vrot.lane.b32.xlu1 %v14973_v7, %s13356_s0 }
0x24b7   :  { %8682 = vrot.lane.b32.xlu0 %v14979_v43, %s13356_s0 }
0x24b8   :  { %8684 = vrot.lane.b32.xlu1 %v14982_v26, %s13356_s0 }
0x24bb   :  { %8678 = vrot.lane.b32.xlu0 %v14989_v57, %s13356_s0 }
0x24bc   :  { %8686 = vrot.lane.b32.xlu1 %v14992_v49, %s13356_s0 }
0x24bf   :  { %8680 = vrot.lane.b32.xlu0 %v14999_v50, %s13356_s0 }
0x24c0   :  { %8688 = vrot.lane.b32.xlu1 %v15002_v60, %s13356_s0 }
0x2519   :  { %v7830_v16 = vpop.xlane.xlu0 %7829 }
0x251a   :  { %v7850_v13 = vmul.f32 0.03125, %v7830_v16  ;;  %v7827_v45 = vpop.xlane.xlu1 %7826 }
0x251b   :  { %v7849_v10 = vmul.f32 0.03125, %v7827_v45 }
0x251c   :  { %v7858_v58 = vadd.f32 1e-05, %v7850_v13 }
0x251d   :  { %v7857_v46 = vadd.f32 1e-05, %v7849_v10 }
0x251e   :  { %13206 = vrsqrt.f32 %v7858_v58 }
0x251f   :  { %13208 = vrsqrt.f32 %v7857_v46 }
0x2522   :  { %v7833_v40 = vpop.xlane.xlu1 %7832 }
0x2523   :  { %v7851_v41 = vmul.f32 0.03125, %v7833_v40 }
0x2525   :  { %v7859_v14 = vadd.f32 1e-05, %v7851_v41 }
0x2526   :  { %v7836_v56 = vpop.xlane.xlu0 %7835 }
0x2527   :  { %13210 = vrsqrt.f32 %v7859_v14  ;;  %v7852_v55 = vmul.f32 0.03125, %v7836_v56 }
0x2528   :  { %v13207_v63 = vpop.eup %13206  ;;  %v7839_v33 = vpop.xlane.xlu1 %7838 }
0x2529   :  { %v13209_v2 = vpop.eup %13208  ;;  %v7874_v48 = vmul.f32 %v13207_v63, %v14927_v28  ;;  %v7860_v30 = vadd.f32 1e-05, %v7852_v55  ;;  %v7853_v35 = vmul.f32 0.03125, %v7839_v33 }
0x252a   :  { %v7842_v29 = vpop.xlane.xlu0 %7841  ;;  %v7873_v24 = vmul.f32 %v13209_v2, %v14929_v20 }
0x252b   :  { %v7887_v19 = vmul.f32 %v10669_v32, %v7874_v48  ;;  %13212 = vrsqrt.f32 %v7860_v30  ;;  %v7861_v52 = vadd.f32 1e-05, %v7853_v35  ;;  %v7854_v47 = vmul.f32 0.03125, %v7842_v29 }
0x252c   :  { %v7845_v5 = vpop.xlane.xlu1 %7844  ;;  %v7886_v37 = vmul.f32 %v10669_v32, %v7873_v24 }
0x252d   :  { %13214 = vrsqrt.f32 %v7861_v52  ;;  %v7862_v18 = vadd.f32 1e-05, %v7854_v47  ;;  %v7855_v54 = vmul.f32 0.03125, %v7845_v5  ;;  %v15012_v22 = vadd.f32 %v10670_v1, %v7887_v19 }
0x252e   :  { %v7848_v12 = vpop.xlane.xlu0 %7847  ;;  %v15010_v34 = vadd.f32 %v10670_v1, %v7886_v37 }
0x252f   :  { %13216 = vrsqrt.f32 %v7862_v18  ;;  %v7863_v28 = vadd.f32 1e-05, %v7855_v54  ;;  %v7856_v23 = vmul.f32 0.03125, %v7848_v12 }
0x2530   :  { %12201 = vmatprep.mubr.msk.f32.mxu1 %vm235_vm9, %v15010_v34 }
0x2531   :  { %v13211_v20 = vpop.eup %13210  ;;  %13218 = vrsqrt.f32 %v7863_v28  ;;  %v7864_v11 = vadd.f32 1e-05, %v7856_v23  ;;  %12202 = vmatmul.mubr.msk.f32.vlgmr.msra.gmra.mrb[160].mxu1 %vm235_vm9, %v15012_v22 }
0x2532   :  { %v7875_v17 = vmul.f32 %v13211_v20, %v14937_v42  ;;  %12743 = vmatpush3.bf16.msra.mxu1 %v13551_v51 }
0x2533   :  { %13220 = vrsqrt.f32 %v7864_v11  ;;  %12745 = vmatprep.subr.bf16.mxu1 %v13557_v44 }
0x2534   :  { %v7888_v25 = vmul.f32 %v10669_v32, %v7875_v17  ;;  %v8852_v17 = vld [vmem:[#allocation2 + $0x480] sm:$0xff] }
0x2535   :  { %v13213_v4 = vpop.eup %13212 }
0x2536   :  { %v15021_v39 = vadd.f32 %v10670_v1, %v7888_v25  ;;  %v7876_v9 = vmul.f32 %v13213_v4, %v14941_v36  ;;  %12747 = vmatpush3.bf16.msra.mxu1 %v13557_v44 }
0x2537   :  { %v13215_v53 = vpop.eup %13214  ;;  %12273 = vmatprep.subr.msk.mxu1 %vm1326_vm10, %v14885_v59 }
0x2538   :  { %12204 = vmatprep.mubr.msk.f32.mxu1 %vm235_vm9, %v15021_v39  ;;  %v7889_v42 = vmul.f32 %v10669_v32, %v7876_v9  ;;  %v7877_v51 = vmul.f32 %v13215_v53, %v14944_v61 }
0x2539   :  { %v13217_v15 = vpop.eup %13216 }
0x253a   :  { %v15030_v0 = vadd.f32 %v10670_v1, %v7889_v42  ;;  %v7890_v6 = vmul.f32 %v10669_v32, %v7877_v51  ;;  %v7878_v62 = vmul.f32 %v13217_v15, %v14948_v38 }
0x253b   :  { %v13219_v3 = vpop.eup %13218 }
0x253c   :  { %12205 = vmatmul.mubr.msk.f32.gmra.mrb[162].mxu1 %vm235_vm9, %v15030_v0  ;;  %v15035_v44 = vadd.f32 %v10670_v1, %v7890_v6  ;;  %v7891_v36 = vmul.f32 %v10669_v32, %v7878_v62  ;;  %v7879_v16 = vmul.f32 %v13219_v3, %v14953_v21  ;;  %v10671_v21 = vld [vmem:[#allocation2 + $0x448] ss:$0 sm:$0xff] }
0x253d   :  { %v13221_v13 = vpop.eup %13220 }
0x253e   :  { %12207 = vmatprep.mubr.msk.f32.mxu1 %vm235_vm9, %v15035_v44  ;;  %v15040_v61 = vadd.f32 %v10670_v1, %v7891_v36  ;;  %v7892_v45 = vmul.f32 %v10669_v32, %v7879_v16  ;;  %v7880_v10 = vmul.f32 %v13221_v13, %v14958_v8 }
0x2540   :  { %12208 = vmatmul.mubr.msk.f32.gmra.mrb[164].mxu1 %vm235_vm9, %v15040_v61  ;;  %v15045_v38 = vadd.f32 %v10670_v1, %v7892_v45  ;;  %v7893_v58 = vmul.f32 %v10669_v32, %v7880_v10 }
0x2542   :  { %12210 = vmatprep.mubr.msk.f32.mxu1 %vm235_vm9, %v15045_v38  ;;  %v15049_v46 = vadd.f32 %v10670_v1, %v7893_v58 }
0x2544   :  { %12211 = vmatmul.mubr.msk.f32.gmra.mrb[166].mxu1 %vm235_vm9, %v15049_v46 }
0x2604   :  { %v12203_v40 = vpop.f32.mrb[160].mxu1 }
0x2605   :  { %v8012_v41 = vadd.f32 %v12203_v40, %v10671_v21  ;;  %v8006_v14 = vpop.f32.mrb[161].mxu1 }
0x2606   :  { %v8007_v56 = vadd.f32 %v10671_v21, %v8006_v14 }
0x2607   :  { %v8160_v63 = vmul.f32 %v14973_v7, %v8012_v41  ;;  %v8305_v32 = vmul.f32 %v14982_v26, %v8012_v41 }
0x2608   :  { %v8159_v8 = vmul.f32 %v14968_v27, %v8007_v56  ;;  %v8304_v55 = vmul.f32 %v14979_v43, %v8007_v56 }
0x260a   :  { %12241 = vmatprep.mubr.msk.f32.mxu1 %vm235_vm9, %v8159_v8  ;;  %12261 = vmatprep.mubr.msk.f32.mxu0 %vm235_vm9, %v8304_v55 }
0x260b   :  { %12242 = vmatmul.mubr.msk.f32.vlgmr.msra.gmra.mrb[168].mxu1 %vm235_vm9, %v8160_v63  ;;  %12262 = vmatmul.mubr.msk.f32.vlgmr.msra.gmra.mrb[172].mxu0 %vm235_vm9, %v8305_v32 }
0x260c   :  { %12274 = vmatpush3.msk.msra.mxu1 %vm1326_vm10, %v14885_v59  ;;  %12288 = vmatpush3.msk.msra.mxu0 %vm1326_vm10, %v14885_v59 }
0x260f   :  { %v12206_v33 = vpop.f32.mrb[162].mxu1 }
0x2610   :  { %v8022_v2 = vadd.f32 %v12206_v33, %v10671_v21  ;;  %v8016_v48 = vpop.f32.mrb[163].mxu1 }
0x2611   :  { %v8017_v30 = vadd.f32 %v10671_v21, %v8016_v48 }
0x2612   :  { %v8162_v1 = vmul.f32 %v14999_v50, %v8022_v2  ;;  %v8307_v19 = vmul.f32 %v15002_v60, %v8022_v2 }
0x2613   :  { %v8161_v35 = vmul.f32 %v14989_v57, %v8017_v30  ;;  %v8306_v29 = vmul.f32 %v14992_v49, %v8017_v30  ;;  %v12209_v24 = vpop.f32.mrb[164].mxu1 }
0x2614   :  { %v8032_v52 = vadd.f32 %v12209_v24, %v10671_v21  ;;  %v8026_v47 = vpop.f32.mrb[165].mxu1 }
0x2615   :  { %v8027_v5 = vadd.f32 %v10671_v21, %v8026_v47  ;;  %12244 = vmatprep.mubr.msk.f32.mxu1 %vm235_vm9, %v8161_v35  ;;  %12264 = vmatprep.mubr.msk.f32.mxu0 %vm235_vm9, %v8306_v29 }
0x2616   :  { %12245 = vmatmul.mubr.msk.f32.gmra.mrb[170].mxu1 %vm235_vm9, %v8162_v1  ;;  %12265 = vmatmul.mubr.msk.f32.gmra.mrb[174].mxu0 %vm235_vm9, %v8307_v19  ;;  %v8164_v54 = vmul.f32 %v14982_v26, %v8032_v52  ;;  %v8309_v12 = vmul.f32 %v14973_v7, %v8032_v52  ;;  %v8851_v7 = vld [vmem:[#allocation2 + $0x478] sm:$0xff] }
0x2617   :  { %v8163_v59 = vmul.f32 %v14979_v43, %v8027_v5  ;;  %v8308_v37 = vmul.f32 %v14968_v27, %v8027_v5  ;;  %v12212_v18 = vpop.f32.mrb[166].mxu1  ;;  %v15089_v25 = vpack.c.bf16 %v8852_v17, %v8851_v7 }
0x2618   :  { %v8042_v28 = vadd.f32 %v12212_v18, %v10671_v21  ;;  %v8036_v23 = vpop.f32.mrb[167].mxu1 }
0x2619   :  { %v8037_v20 = vadd.f32 %v10671_v21, %v8036_v23  ;;  %12247 = vmatprep.mubr.msk.f32.mxu1 %vm235_vm9, %v8163_v59  ;;  %12267 = vmatprep.mubr.msk.f32.mxu0 %vm235_vm9, %v8308_v37 }
0x261a   :  { %12248 = vmatmul.mubr.msk.f32.gmra.mrb[172].mxu1 %vm235_vm9, %v8164_v54  ;;  %12268 = vmatmul.mubr.msk.f32.gmra.mrb[176].mxu0 %vm235_vm9, %v8309_v12  ;;  %v8166_v11 = vmul.f32 %v15002_v60, %v8042_v28  ;;  %v8311_v26 = vmul.f32 %v14999_v50, %v8042_v28 }
0x261b   :  { %v8165_v43 = vmul.f32 %v14992_v49, %v8037_v20  ;;  %v8310_v27 = vmul.f32 %v14989_v57, %v8037_v20  ;;  %12757 = vmatprep.subr.bf16.mxu1 %v15089_v25 }
0x261d   :  { %12250 = vmatprep.mubr.msk.f32.mxu1 %vm235_vm9, %v8165_v43  ;;  %12270 = vmatprep.mubr.msk.f32.mxu0 %vm235_vm9, %v8310_v27 }
0x261e   :  { %12251 = vmatmul.mubr.msk.f32.gmra.mrb[174].mxu1 %vm235_vm9, %v8166_v11  ;;  %12271 = vmatmul.mubr.msk.f32.gmra.mrb[178].mxu0 %vm235_vm9, %v8311_v26 }
0x26de   :  { %v12243_v49 = vpop.f32.mrb[168].mxu1  ;;  %v12263_v57 = vpop.f32.mrb[172].mxu0 }
0x26df   :  { %v8297_v4 = vmul.f32 0.35355338, %v12243_v49  ;;  %v8442_v60 = vmul.f32 0.35355338, %v12263_v57  ;;  %v8257_v9 = vpop.f32.mrb[169].mxu1  ;;  %v8402_v50 = vpop.f32.mrb[173].mxu0 }
0x26e0   :  { %v8296_v53 = vmul.f32 0.35355338, %v8257_v9  ;;  %v8441_v42 = vmul.f32 0.35355338, %v8402_v50 }
0x26e1   :  { %v8450_v51 = vmax.f32 %v8297_v4, %v8442_v60 }
0x26e2   :  { %v8449_v15 = vmax.f32 %v8296_v53, %v8441_v42 }
0x26e3   :  { %v8458_v6 = vsub.f32 %v8297_v4, %v8450_v51  ;;  %v8482_v62 = vsub.f32 %v8442_v60, %v8450_v51 }
0x26e4   :  { %v8457_v3 = vsub.f32 %v8296_v53, %v8449_v15  ;;  %v8481_v36 = vsub.f32 %v8441_v42, %v8449_v15 }
0x26e5   :  { %v8467_v16 = vmul.f32 1.442695, %v8458_v6  ;;  %v8491_v13 = vmul.f32 1.442695, %v8482_v62 }
0x26e6   :  { %v8465_v45 = vmul.f32 1.442695, %v8457_v3  ;;  %v8489_v10 = vmul.f32 1.442695, %v8481_v36 }
0x26e7   :  { %13222 = vpow2.f32 %v8467_v16 }
0x26e8   :  { %13224 = vpow2.f32 %v8491_v13 }
0x26e9   :  { %13226 = vpow2.f32 %v8465_v45  ;;  %v12246_v58 = vpop.f32.mrb[170].mxu1  ;;  %v12266_v21 = vpop.f32.mrb[174].mxu0 }
0x26ea   :  { %13228 = vpow2.f32 %v8489_v10  ;;  %v8299_v40 = vmul.f32 0.35355338, %v12246_v58  ;;  %v8444_v41 = vmul.f32 0.35355338, %v12266_v21  ;;  %v8267_v14 = vpop.f32.mrb[171].mxu1  ;;  %v8412_v56 = vpop.f32.mrb[175].mxu0 }
0x26eb   :  { %v8298_v8 = vmul.f32 0.35355338, %v8267_v14  ;;  %v8443_v55 = vmul.f32 0.35355338, %v8412_v56 }
0x26ec   :  { %v8452_v63 = vmax.f32 %v8299_v40, %v8444_v41 }
0x26ed   :  { %v8451_v32 = vmax.f32 %v8298_v8, %v8443_v55  ;;  %v12249_v33 = vpop.f32.mrb[172].mxu1  ;;  %v12269_v2 = vpop.f32.mrb[176].mxu0 }
0x26ee   :  { %v8460_v48 = vsub.f32 %v8299_v40, %v8452_v63  ;;  %v8484_v30 = vsub.f32 %v8444_v41, %v8452_v63  ;;  %v8301_v35 = vmul.f32 0.35355338, %v12249_v33  ;;  %v8446_v29 = vmul.f32 0.35355338, %v12269_v2  ;;  %v8277_v24 = vpop.f32.mrb[173].mxu1  ;;  %v8422_v1 = vpop.f32.mrb[177].mxu0 }
0x26ef   :  { %v8459_v19 = vsub.f32 %v8298_v8, %v8451_v32  ;;  %v8483_v52 = vsub.f32 %v8443_v55, %v8451_v32  ;;  %v8300_v47 = vmul.f32 0.35355338, %v8277_v24  ;;  %v8445_v5 = vmul.f32 0.35355338, %v8422_v1 }
0x26f0   :  { %v8471_v59 = vmul.f32 1.442695, %v8460_v48  ;;  %v8495_v37 = vmul.f32 1.442695, %v8484_v30  ;;  %v8454_v18 = vmax.f32 %v8301_v35, %v8446_v29 }
0x26f1   :  { %v13223_v54 = vpop.eup %13222  ;;  %v8469_v12 = vmul.f32 1.442695, %v8459_v19  ;;  %v8493_v28 = vmul.f32 1.442695, %v8483_v52  ;;  %v8453_v23 = vmax.f32 %v8300_v47, %v8445_v5  ;;  %v12252_v20 = vpop.f32.mrb[174].mxu1 }
0x26f2   :  { %v12272_v43 = vpop.f32.mrb[178].mxu0  ;;  %v13225_v27 = vpop.eup %13224  ;;  %13230 = vpow2.f32 %v8471_v59  ;;  %v8462_v11 = vsub.f32 %v8301_v35, %v8454_v18  ;;  %v8486_v26 = vsub.f32 %v8446_v29, %v8454_v18  ;;  %v8303_v7 = vmul.f32 0.35355338, %v12252_v20 }
0x26f3   :  { %v8287_v17 = vpop.f32.mrb[175].mxu1  ;;  %v8432_v49 = vpop.f32.mrb[179].mxu0  ;;  %v8506_v4 = vadd.f32 %v13225_v27, %v13223_v54  ;;  %13232 = vpow2.f32 %v8495_v37  ;;  %v8461_v60 = vsub.f32 %v8300_v47, %v8453_v23  ;;  %v8485_v9 = vsub.f32 %v8445_v5, %v8453_v23 }
0x26f4   :  { %v13227_v57 = vpop.eup %13226  ;;  %13234 = vpow2.f32 %v8469_v12  ;;  %v8475_v53 = vmul.f32 1.442695, %v8462_v11  ;;  %v8448_v42 = vmul.f32 0.35355338, %v12272_v43  ;;  %v8499_v15 = vmul.f32 1.442695, %v8486_v26 }
0x26f5   :  { %v13229_v50 = vpop.eup %13228  ;;  %13236 = vrcp.f32 %v8506_v4  ;;  %v8473_v6 = vmul.f32 1.442695, %v8461_v60  ;;  %v8302_v3 = vmul.f32 0.35355338, %v8287_v17  ;;  %v8447_v36 = vmul.f32 0.35355338, %v8432_v49 }
0x26f6   :  { %v8505_v51 = vadd.f32 %v13229_v50, %v13227_v57  ;;  %13238 = vpow2.f32 %v8493_v28  ;;  %v8456_v62 = vmax.f32 %v8303_v7, %v8448_v42  ;;  %v8497_v16 = vmul.f32 1.442695, %v8485_v9 }
0x26f7   :  { %v8455_v10 = vmax.f32 %v8302_v3, %v8447_v36 }
0x26f8   :  { %13240 = vrcp.f32 %v8505_v51  ;;  %v8464_v13 = vsub.f32 %v8303_v7, %v8456_v62  ;;  %v8488_v45 = vsub.f32 %v8448_v42, %v8456_v62  ;;  %v8853_v62 = vld [vmem:[#allocation2 + $0x488] sm:$0xff] }
0x26f9   :  { %13242 = vpow2.f32 %v8475_v53  ;;  %v8463_v40 = vsub.f32 %v8302_v3, %v8455_v10  ;;  %v8487_v41 = vsub.f32 %v8447_v36, %v8455_v10  ;;  %v8854_v3 = vld [vmem:[#allocation2 + $0x490] sm:$0xff] }
0x26fa   :  { %13244 = vpow2.f32 %v8499_v15  ;;  %v8479_v58 = vmul.f32 1.442695, %v8464_v13  ;;  %v8503_v21 = vmul.f32 1.442695, %v8488_v45  ;;  %v12760_v36 = vpack.c.bf16 %v8854_v3, %v8853_v62  ;;  %v8683_v45 = vpop.permute.xlu0 %8682 }
0x26fb   :  { %13246 = vpow2.f32 %v8473_v6  ;;  %v8477_v56 = vmul.f32 1.442695, %v8463_v40  ;;  %v8501_v55 = vmul.f32 1.442695, %v8487_v41 }
0x26fc   :  { %13248 = vpow2.f32 %v8497_v16  ;;  %v13231_v14 = vpop.eup %13230  ;;  %v8675_v16 = vpop.permute.xlu1 %8674 }
0x26fd   :  { %13250 = vpow2.f32 %v8479_v58  ;;  %v13233_v8 = vpop.eup %13232 }
0x26fe   :  { %13252 = vpow2.f32 %v8503_v21  ;;  %v13235_v63 = vpop.eup %13234  ;;  %v8508_v32 = vadd.f32 %v13233_v8, %v13231_v14 }
0x26ff   :  { %13254 = vpow2.f32 %v8477_v56  ;;  %v13237_v33 = vpop.eup %13236 }
0x2700   :  { %13256 = vpow2.f32 %v8501_v55  ;;  %v13239_v2 = vpop.eup %13238  ;;  %v8522_v48 = vmul.f32 %v13237_v33, %v13223_v54  ;;  %v8530_v30 = vmul.f32 %v13237_v33, %v13225_v27  ;;  %v8677_v13 = vpop.permute.xlu1 %8676 }
0x2701   :  { %13258 = vrcp.f32 %v8508_v32  ;;  %v8507_v29 = vadd.f32 %v13239_v2, %v13235_v63  ;;  %v8679_v33 = vpop.permute.xlu0 %8678 }
0x2702   :  { %v13241_v35 = vpop.eup %13240 }
0x2703   :  { %v13243_v24 = vpop.eup %13242  ;;  %v8521_v1 = vmul.f32 %v13241_v35, %v13227_v57  ;;  %v8529_v19 = vmul.f32 %v13241_v35, %v13229_v50  ;;  %13260 = vrcp.f32 %v8507_v29 }
0x2704   :  { %v13245_v52 = vpop.eup %13244  ;;  %v8685_v10 = vpop.permute.xlu1 %8684 }
0x2705   :  { %v13247_v47 = vpop.eup %13246  ;;  %v8510_v5 = vadd.f32 %v13245_v52, %v13243_v24  ;;  %12275 = vmatprep.mubr.msk.f32.mxu1 %vm1301_vm11, %v8521_v1  ;;  %12289 = vmatprep.mubr.msk.f32.mxu0 %vm1301_vm11, %v8529_v19 }
0x2706   :  { %v13249_v59 = vpop.eup %13248  ;;  %12276 = vmatmul.mubr.msk.f32.vlgmr.msra.gmra.mrb[176].mxu1 %vm1301_vm11, %v8522_v48  ;;  %12290 = vmatmul.mubr.msk.f32.vlgmr.msra.gmra.mrb[180].mxu0 %vm1301_vm11, %v8530_v30  ;;  %v8681_v48 = vpop.permute.xlu0 %8680 }
0x2707   :  { %v13251_v37 = vpop.eup %13250  ;;  %13262 = vrcp.f32 %v8510_v5  ;;  %v8509_v18 = vadd.f32 %v13249_v59, %v13247_v47  ;;  %12759 = vmatpush3.bf16.msra.mxu1 %v15089_v25 }
0x2708   :  { %v13253_v54 = vpop.eup %13252  ;;  %12761 = vmatprep.subr.bf16.mxu1 %v12760_v36 }
0x2709   :  { %v13255_v12 = vpop.eup %13254  ;;  %13264 = vrcp.f32 %v8509_v18  ;;  %v8512_v28 = vadd.f32 %v13253_v54, %v13251_v37 }
0x270a   :  { %v13257_v23 = vpop.eup %13256 }
0x270b   :  { %v13259_v20 = vpop.eup %13258  ;;  %13266 = vrcp.f32 %v8512_v28  ;;  %v8511_v43 = vadd.f32 %v13257_v23, %v13255_v12  ;;  %12763 = vmatpush3.bf16.msra.mxu1 %v12760_v36 }
0x270c   :  { %v8524_v27 = vmul.f32 %v13259_v20, %v13231_v14  ;;  %v8532_v11 = vmul.f32 %v13259_v20, %v13233_v8 }
0x270d   :  { %13268 = vrcp.f32 %v8511_v43  ;;  %v13261_v26 = vpop.eup %13260 }
0x270e   :  { %v8523_v7 = vmul.f32 %v13261_v26, %v13235_v63  ;;  %v8531_v17 = vmul.f32 %v13261_v26, %v13239_v2  ;;  %v8687_v2 = vpop.permute.xlu1 %8686 }
0x2710   :  { %12278 = vmatprep.mubr.msk.f32.mxu1 %vm1301_vm11, %v8523_v7  ;;  %12292 = vmatprep.mubr.msk.f32.mxu0 %vm1301_vm11, %v8531_v17 }
0x2711   :  { %v13263_v49 = vpop.eup %13262  ;;  %12279 = vmatmul.mubr.msk.f32.gmra.mrb[178].mxu1 %vm1301_vm11, %v8524_v27  ;;  %12293 = vmatmul.mubr.msk.f32.gmra.mrb[182].mxu0 %vm1301_vm11, %v8532_v11 }
0x2712   :  { %v8526_v25 = vmul.f32 %v13263_v49, %v13243_v24  ;;  %v8534_v57 = vmul.f32 %v13263_v49, %v13245_v52  ;;  %v8689_v30 = vpop.permute.xlu1 %8688 }
0x2713   :  { %v13265_v4 = vpop.eup %13264 }
0x2714   :  { %v8525_v60 = vmul.f32 %v13265_v4, %v13247_v47  ;;  %v8533_v9 = vmul.f32 %v13265_v4, %v13249_v59 }
0x2715   :  { %v13267_v50 = vpop.eup %13266 }
0x2716   :  { %12281 = vmatprep.mubr.msk.f32.mxu1 %vm1301_vm11, %v8525_v60  ;;  %12295 = vmatprep.mubr.msk.f32.mxu0 %vm1301_vm11, %v8533_v9  ;;  %v8528_v53 = vmul.f32 %v13267_v50, %v13251_v37  ;;  %v8536_v42 = vmul.f32 %v13267_v50, %v13253_v54 }
0x2717   :  { %v13269_v51 = vpop.eup %13268  ;;  %12282 = vmatmul.mubr.msk.f32.gmra.mrb[180].mxu1 %vm1301_vm11, %v8526_v25  ;;  %12296 = vmatmul.mubr.msk.f32.gmra.mrb[184].mxu0 %vm1301_vm11, %v8534_v57 }
0x2718   :  { %v8527_v15 = vmul.f32 %v13269_v51, %v13255_v12  ;;  %v8535_v6 = vmul.f32 %v13269_v51, %v13257_v23 }
0x271a   :  { %12284 = vmatprep.mubr.msk.f32.mxu1 %vm1301_vm11, %v8527_v15  ;;  %12298 = vmatprep.mubr.msk.f32.mxu0 %vm1301_vm11, %v8535_v6 }
0x271b   :  { %12285 = vmatmul.mubr.msk.f32.gmra.mrb[182].mxu1 %vm1301_vm11, %v8528_v53  ;;  %12299 = vmatmul.mubr.msk.f32.gmra.mrb[186].mxu0 %vm1301_vm11, %v8536_v42  ;;  %v10723_v42 = vld [vmem:[#allocation2 + $0x498] ss:$0 sm:$0xff] }
0x27d9   :  { %v12277_v58 = vpop.f32.mrb[176].mxu1  ;;  %v12291_v21 = vpop.f32.mrb[180].mxu0 }
0x27da   :  { %v8699_v40 = vmul.f32 %v12277_v58, %v8677_v13  ;;  %v8836_v41 = vmul.f32 %v12291_v21, %v8685_v10  ;;  %v8627_v14 = vpop.f32.mrb[177].mxu1  ;;  %v8796_v56 = vpop.f32.mrb[181].mxu0 }
0x27db   :  { %v8698_v8 = vmul.f32 %v8675_v16, %v8627_v14  ;;  %v8835_v55 = vmul.f32 %v8796_v56, %v8683_v45 }
0x27dc   :  { %v8844_v63 = vadd.f32 %v8836_v41, %v8699_v40 }
0x27dd   :  { %v8843_v32 = vadd.f32 %v8835_v55, %v8698_v8 }
0x27df   :  { %12309 = vmatprep.mubr.msk.f32.mxu1 %vm235_vm9, %v8843_v32 }
0x27e0   :  { %12310 = vmatmul.mubr.msk.f32.vlgmr.msra.gmra.mrb[184].mxu1 %vm235_vm9, %v8844_v63 }
0x27e4   :  { %v12280_v35 = vpop.f32.mrb[178].mxu1  ;;  %v12294_v29 = vpop.f32.mrb[182].mxu0 }
0x27e5   :  { %v8701_v24 = vmul.f32 %v12280_v35, %v8681_v48  ;;  %v8838_v1 = vmul.f32 %v12294_v29, %v8689_v30  ;;  %v8637_v19 = vpop.f32.mrb[179].mxu1  ;;  %v8806_v52 = vpop.f32.mrb[183].mxu0 }
0x27e6   :  { %v8700_v47 = vmul.f32 %v8679_v33, %v8637_v19  ;;  %v8837_v5 = vmul.f32 %v8806_v52, %v8687_v2 }
0x27e7   :  { %v8846_v59 = vadd.f32 %v8838_v1, %v8701_v24 }
0x27e8   :  { %v8845_v37 = vadd.f32 %v8837_v5, %v8700_v47 }
0x27ea   :  { %v12283_v18 = vpop.f32.mrb[180].mxu1  ;;  %v12297_v54 = vpop.f32.mrb[184].mxu0  ;;  %12312 = vmatprep.mubr.msk.f32.mxu1 %vm235_vm9, %v8845_v37 }
0x27eb   :  { %v8703_v12 = vmul.f32 %v12283_v18, %v8685_v10  ;;  %v8840_v28 = vmul.f32 %v12297_v54, %v8677_v13  ;;  %v8647_v23 = vpop.f32.mrb[181].mxu1  ;;  %v8816_v20 = vpop.f32.mrb[185].mxu0  ;;  %12313 = vmatmul.mubr.msk.f32.gmra.mrb[186].mxu1 %vm235_vm9, %v8846_v59 }
0x27ec   :  { %v8702_v43 = vmul.f32 %v8683_v45, %v8647_v23  ;;  %v8839_v27 = vmul.f32 %v8816_v20, %v8675_v16 }
0x27ed   :  { %v8848_v11 = vadd.f32 %v8840_v28, %v8703_v12 }
0x27ee   :  { %v8847_v26 = vadd.f32 %v8839_v27, %v8702_v43  ;;  %v12286_v7 = vpop.f32.mrb[182].mxu1  ;;  %v12300_v17 = vpop.f32.mrb[186].mxu0 }
0x27ef   :  { %v8705_v49 = vmul.f32 %v12286_v7, %v8689_v30  ;;  %v8842_v25 = vmul.f32 %v12300_v17, %v8681_v48  ;;  %v8657_v57 = vpop.f32.mrb[183].mxu1  ;;  %v8826_v4 = vpop.f32.mrb[187].mxu0 }
0x27f0   :  { %v8704_v60 = vmul.f32 %v8687_v2, %v8657_v57  ;;  %v8841_v9 = vmul.f32 %v8826_v4, %v8679_v33  ;;  %12315 = vmatprep.mubr.msk.f32.mxu1 %vm235_vm9, %v8847_v26 }
0x27f1   :  { %v8850_v50 = vadd.f32 %v8842_v25, %v8705_v49  ;;  %12316 = vmatmul.mubr.msk.f32.gmra.mrb[188].mxu1 %vm235_vm9, %v8848_v11 }
0x27f2   :  { %v8849_v53 = vadd.f32 %v8841_v9, %v8704_v60 }
0x27f4   :  { %12318 = vmatprep.mubr.msk.f32.mxu1 %vm235_vm9, %v8849_v53 }
0x27f5   :  { %12319 = vmatmul.mubr.msk.f32.gmra.mrb[190].mxu1 %vm235_vm9, %v8850_v50 }
0x28b3   :  { %v12311_v51 = vpop.f32.mrb[184].mxu1 }
0x28b4   :  { %v8956_v15 = vadd.f32 %v12311_v51, %v10723_v42  ;;  %v8950_v6 = vpop.f32.mrb[185].mxu1 }
0x28b5   :  { %v8951_v62 = vadd.f32 %v10723_v42, %v8950_v6 }
0x28b6   :  { %v8990_v3 = vadd.f32 %v8956_v15, %v15012_v22 }
0x28b7   :  { %v8989_v36 = vadd.f32 %v8951_v62, %v15010_v34 }
0x28b8   :  { %v9000_v16 = vsel %vm235_vm9, %v8990_v3, 0.0 }
0x28b9   :  { %9001 = vadd.xlane.f32.xlu1 %v9000_v16  ;;  %v8997_v13 = vsel %vm235_vm9, %v8989_v36, 0.0 }
0x28ba   :  { %8998 = vadd.xlane.f32.xlu0 %v8997_v13 }
0x28be   :  { %v12314_v45 = vpop.f32.mrb[186].mxu1 }
0x28bf   :  { %v8960_v10 = vpop.f32.mrb[187].mxu1  ;;  %v8966_v58 = vadd.f32 %v12314_v45, %v10723_v42 }
0x28c0   :  { %v8961_v21 = vadd.f32 %v10723_v42, %v8960_v10  ;;  %v9127_v10 = vld [vmem:[#allocation2 + $0x4b0] sm:$0xff] }
0x28c1   :  { %v8992_v14 = vadd.f32 %v8966_v58, %v15030_v0  ;;  %v9128_v58 = vld [vmem:[#allocation2 + $0x4b8] sm:$0xff] }
0x28c2   :  { %v8991_v40 = vadd.f32 %v8961_v21, %v15021_v39  ;;  %v12764_v21 = vpack.c.bf16 %v9128_v58, %v9127_v10 }
0x28c3   :  { %v9006_v48 = vsel %vm235_vm9, %v8992_v14, 0.0 }
0x28c4   :  { %v12317_v41 = vpop.f32.mrb[188].mxu1  ;;  %v9003_v22 = vsel %vm235_vm9, %v8991_v40, 0.0  ;;  %12765 = vmatprep.subr.bf16.mxu0 %v12764_v21 }
0x28c5   :  { %v8976_v56 = vadd.f32 %v12317_v41, %v10723_v42  ;;  %v8970_v8 = vpop.f32.mrb[189].mxu1  ;;  %9004 = vadd.xlane.f32.xlu0 %v9003_v22  ;;  %12767 = vmatpush3.bf16.msra.mxu0 %v12764_v21  ;;  %v9130_v41 = vld [vmem:[#allocation2 + $0x4c8] sm:$0xff] }
0x28c6   :  { %v8971_v34 = vadd.f32 %v10723_v42, %v8970_v8  ;;  %v9274_v8 = vld [vmem:[#allocation2 + $0x4e0] sm:$0xff]  ;;  %v9275_v22 = vld [vmem:[#allocation2 + $0x4e8] sm:$0xff] }
0x28c7   :  { %v8994_v32 = vadd.f32 %v8976_v56, %v15040_v61  ;;  %v9273_v56 = vld [vmem:[#allocation2 + $0x4d8] sm:$0xff] }
0x28c8   :  { %v8993_v55 = vadd.f32 %v8971_v34, %v15035_v44  ;;  %v12320_v63 = vpop.f32.mrb[190].mxu1  ;;  %v12772_v34 = vpack.c.bf16 %v9274_v8, %v9273_v56 }
0x28c9   :  { %v8986_v33 = vadd.f32 %v12320_v63, %v10723_v42  ;;  %v8980_v2 = vpop.f32.mrb[191].mxu1  ;;  %9007 = vadd.xlane.f32.xlu0 %v9006_v48  ;;  %v9012_v29 = vsel %vm235_vm9, %v8994_v32, 0.0 }
0x28ca   :  { %v8981_v30 = vadd.f32 %v10723_v42, %v8980_v2  ;;  %v9009_v39 = vsel %vm235_vm9, %v8993_v55, 0.0  ;;  %12773 = vmatprep.subr.bf16.mxu1 %v12772_v34 }
0x28cb   :  { %9010 = vadd.xlane.f32.xlu1 %v9009_v39  ;;  %v8996_v35 = vadd.f32 %v8986_v33, %v15049_v46  ;;  %v9278_v33 = vld [vmem:[#allocation2 + $0x500] sm:$0xff]  ;;  %12775 = vmatpush3.bf16.msra.mxu1 %v12772_v34 }
0x28cc   :  { %v8995_v0 = vadd.f32 %v8981_v30, %v15045_v38 }
0x28cd   :  { %9013 = vadd.xlane.f32.xlu0 %v9012_v29  ;;  %v9018_v61 = vsel %vm235_vm9, %v8996_v35, 0.0 }
0x28ce   :  { %v9015_v44 = vsel %vm235_vm9, %v8995_v0, 0.0 }
0x28cf   :  { %9016 = vadd.xlane.f32.xlu1 %v9015_v44 }
0x28d1   :  { %9019 = vadd.xlane.f32.xlu0 %v9018_v61 }
0x2946   :  { %v9002_v24 = vpop.xlane.xlu1 %9001 }
0x2947   :  { %v9022_v1 = vmul.f32 0.03125, %v9002_v24  ;;  %v8999_v19 = vpop.xlane.xlu0 %8998 }
0x2948   :  { %v9021_v52 = vmul.f32 0.03125, %v8999_v19 }
0x2949   :  { %v15133_v47 = vsub.f32 %v8990_v3, %v9022_v1  ;;  %v10732_v1 = vld [vmem:[#allocation2 + $0x4a0] ss:$0 sm:$0xff] }
0x294a   :  { %v15135_v5 = vsub.f32 %v8989_v36, %v9021_v52 }
0x294b   :  { %v9038_v38 = vmul.f32 %v15133_v47, %v15133_v47 }
0x294c   :  { %v9037_v46 = vmul.f32 %v15135_v5, %v15135_v5 }
0x294d   :  { %v9048_v59 = vsel %vm235_vm9, %v9038_v38, 0.0 }
0x294e   :  { %9049 = vadd.xlane.f32.xlu0 %v9048_v59  ;;  %v9045_v37 = vsel %vm235_vm9, %v9037_v46, 0.0 }
0x294f   :  { %9046 = vadd.xlane.f32.xlu1 %v9045_v37  ;;  %v10733_v37 = vld [vmem:[#allocation2 + $0x4a8] ss:$0 sm:$0xff] }
0x2952   :  { %v9005_v18 = vpop.xlane.xlu0 %9004 }
0x2953   :  { %v9023_v54 = vmul.f32 0.03125, %v9005_v18 }
0x2955   :  { %v15143_v12 = vsub.f32 %v8991_v40, %v9023_v54  ;;  %v9129_v40 = vld [vmem:[#allocation2 + $0x4c0] sm:$0xff] }
0x2956   :  { %v9008_v28 = vpop.xlane.xlu0 %9007 }
0x2957   :  { %v9024_v23 = vmul.f32 0.03125, %v9008_v28  ;;  %v9039_v43 = vmul.f32 %v15143_v12, %v15143_v12 }
0x2958   :  { %v9011_v20 = vpop.xlane.xlu1 %9010 }
0x2959   :  { %v9025_v27 = vmul.f32 0.03125, %v9011_v20  ;;  %v15147_v11 = vsub.f32 %v8992_v14, %v9024_v23  ;;  %v9051_v26 = vsel %vm235_vm9, %v9039_v43, 0.0  ;;  %v12768_v14 = vpack.c.bf16 %v9130_v41, %v9129_v40 }
0x295a   :  { %9052 = vadd.xlane.f32.xlu1 %v9051_v26  ;;  %v9014_v17 = vpop.xlane.xlu0 %9013 }
0x295b   :  { %v15150_v7 = vsub.f32 %v8993_v55, %v9025_v27  ;;  %v9026_v49 = vmul.f32 0.03125, %v9014_v17  ;;  %v9040_v57 = vmul.f32 %v15147_v11, %v15147_v11  ;;  %12769 = vmatprep.subr.bf16.mxu0 %v12768_v14  ;;  %v9276_v55 = vld [vmem:[#allocation2 + $0x4f0] sm:$0xff] }
0x295c   :  { %v9017_v25 = vpop.xlane.xlu1 %9016  ;;  %12771 = vmatpush3.bf16.msra.mxu0 %v12768_v14  ;;  %v12776_v63 = vpack.c.bf16 %v9276_v55, %v9275_v22 }
0x295d   :  { %v9027_v4 = vmul.f32 0.03125, %v9017_v25  ;;  %v9041_v60 = vmul.f32 %v15150_v7, %v15150_v7  ;;  %v15156_v9 = vsub.f32 %v8994_v32, %v9026_v49  ;;  %v9054_v50 = vsel %vm235_vm9, %v9040_v57, 0.0  ;;  %v9277_v32 = vld [vmem:[#allocation2 + $0x4f8] sm:$0xff] }
0x295e   :  { %v9020_v42 = vpop.xlane.xlu0 %9019  ;;  %9055 = vadd.xlane.f32.xlu0 %v9054_v50  ;;  %12777 = vmatprep.subr.bf16.mxu1 %v12776_v63  ;;  %v12780_v2 = vpack.c.bf16 %v9278_v33, %v9277_v32  ;;  %v9280_v32 = vld [vmem:[#allocation2 + $0x510] sm:$0xff] }
0x295f   :  { %v15159_v53 = vsub.f32 %v8995_v0, %v9027_v4  ;;  %v9057_v51 = vsel %vm235_vm9, %v9041_v60, 0.0  ;;  %v9028_v15 = vmul.f32 0.03125, %v9020_v42  ;;  %v9042_v6 = vmul.f32 %v15156_v9, %v15156_v9  ;;  %12779 = vmatpush3.bf16.msra.mxu1 %v12776_v63  ;;  %v9279_v63 = vld [vmem:[#allocation2 + $0x508] sm:$0xff] }
0x2960   :  { %9058 = vadd.xlane.f32.xlu1 %v9057_v51  ;;  %12781 = vmatprep.subr.bf16.mxu1 %v12780_v2  ;;  %v12784_v33 = vpack.c.bf16 %v9280_v32, %v9279_v63 }
0x2961   :  { %v9043_v62 = vmul.f32 %v15159_v53, %v15159_v53  ;;  %v15166_v3 = vsub.f32 %v8996_v35, %v9028_v15  ;;  %v9060_v36 = vsel %vm235_vm9, %v9042_v6, 0.0 }
0x2962   :  { %9061 = vadd.xlane.f32.xlu0 %v9060_v36 }
0x2963   :  { %v9063_v16 = vsel %vm235_vm9, %v9043_v62, 0.0  ;;  %v9044_v13 = vmul.f32 %v15166_v3, %v15166_v3  ;;  %12783 = vmatpush3.bf16.msra.mxu1 %v12780_v2 }
0x2964   :  { %9064 = vadd.xlane.f32.xlu1 %v9063_v16  ;;  %12785 = vmatprep.subr.bf16.mxu1 %v12784_v33 }
0x2965   :  { %v9066_v45 = vsel %vm235_vm9, %v9044_v13, 0.0 }
0x2966   :  { %9067 = vadd.xlane.f32.xlu0 %v9066_v45 }
0x2967   :  { %12787 = vmatpush3.bf16.msra.mxu1 %v12784_v33 }
0x29db   :  { %v9050_v48 = vpop.xlane.xlu0 %9049 }
0x29dc   :  { %v9070_v30 = vmul.f32 0.03125, %v9050_v48  ;;  %v9047_v39 = vpop.xlane.xlu1 %9046 }
0x29dd   :  { %v9069_v0 = vmul.f32 0.03125, %v9047_v39 }
0x29de   :  { %v9078_v35 = vadd.f32 1e-05, %v9070_v30 }
0x29df   :  { %v9077_v29 = vadd.f32 1e-05, %v9069_v0 }
0x29e0   :  { %13270 = vrsqrt.f32 %v9078_v35 }
0x29e1   :  { %13272 = vrsqrt.f32 %v9077_v29 }
0x29e7   :  { %v9053_v44 = vpop.xlane.xlu1 %9052 }
0x29e8   :  { %v9071_v61 = vmul.f32 0.03125, %v9053_v44 }
0x29ea   :  { %v13271_v24 = vpop.eup %13270  ;;  %v9079_v38 = vadd.f32 1e-05, %v9071_v61 }
0x29eb   :  { %v13273_v19 = vpop.eup %13272  ;;  %v9094_v52 = vmul.f32 %v13271_v24, %v15133_v47  ;;  %v9056_v46 = vpop.xlane.xlu0 %9055 }
0x29ec   :  { %v9093_v59 = vmul.f32 %v13273_v19, %v15135_v5  ;;  %13274 = vrsqrt.f32 %v9079_v38  ;;  %v9072_v54 = vmul.f32 0.03125, %v9056_v46 }
0x29ed   :  { %v9107_v18 = vmul.f32 %v10732_v1, %v9094_v52  ;;  %v9059_v28 = vpop.xlane.xlu1 %9058 }
0x29ee   :  { %v9073_v23 = vmul.f32 0.03125, %v9059_v28  ;;  %v9106_v20 = vmul.f32 %v10732_v1, %v9093_v59  ;;  %v9080_v43 = vadd.f32 1e-05, %v9072_v54 }
0x29ef   :  { %v9062_v26 = vpop.xlane.xlu0 %9061  ;;  %v15177_v49 = vadd.f32 %v10733_v37, %v9107_v18 }
0x29f0   :  { %v9081_v27 = vadd.f32 1e-05, %v9073_v23  ;;  %v15175_v17 = vadd.f32 %v10733_v37, %v9106_v20  ;;  %13276 = vrsqrt.f32 %v9080_v43  ;;  %v9074_v47 = vmul.f32 0.03125, %v9062_v26  ;;  %v10743_v26 = vld [vmem:[#allocation2 + $0x518] ss:$0 sm:$0xff] }
0x29f1   :  { %v9065_v25 = vpop.xlane.xlu1 %9064 }
0x29f2   :  { %13278 = vrsqrt.f32 %v9081_v27  ;;  %v9075_v57 = vmul.f32 0.03125, %v9065_v25  ;;  %12329 = vmatprep.mubr.msk.f32.mxu0 %vm235_vm9, %v15175_v17  ;;  %v9082_v5 = vadd.f32 1e-05, %v9074_v47 }
0x29f3   :  { %12330 = vmatmul.mubr.msk.f32.vlgmr.msra.gmra.mrb[188].mxu0 %vm235_vm9, %v15177_v49  ;;  %v9068_v60 = vpop.xlane.xlu0 %9067 }
0x29f4   :  { %v9083_v4 = vadd.f32 1e-05, %v9075_v57  ;;  %13280 = vrsqrt.f32 %v9082_v5  ;;  %v9076_v50 = vmul.f32 0.03125, %v9068_v60 }
0x29f6   :  { %13282 = vrsqrt.f32 %v9083_v4  ;;  %v13275_v42 = vpop.eup %13274  ;;  %v9084_v51 = vadd.f32 1e-05, %v9076_v50 }
0x29f7   :  { %v9095_v15 = vmul.f32 %v13275_v42, %v15143_v12 }
0x29f8   :  { %13284 = vrsqrt.f32 %v9084_v51 }
0x29f9   :  { %v9108_v6 = vmul.f32 %v10732_v1, %v9095_v15 }
0x29fa   :  { %v13277_v62 = vpop.eup %13276 }
0x29fb   :  { %v15184_v16 = vadd.f32 %v10733_v37, %v9108_v6  ;;  %v9096_v13 = vmul.f32 %v13277_v62, %v15147_v11 }
0x29fc   :  { %v13279_v36 = vpop.eup %13278 }
0x29fd   :  { %v9097_v45 = vmul.f32 %v13279_v36, %v15150_v7  ;;  %12332 = vmatprep.mubr.msk.f32.mxu0 %vm235_vm9, %v15184_v16  ;;  %v9109_v10 = vmul.f32 %v10732_v1, %v9096_v13 }
0x29fe   :  { %v13281_v58 = vpop.eup %13280 }
0x29ff   :  { %v9110_v21 = vmul.f32 %v10732_v1, %v9097_v45  ;;  %v15190_v41 = vadd.f32 %v10733_v37, %v9109_v10  ;;  %v9098_v12 = vmul.f32 %v13281_v58, %v15156_v9 }
0x2a00   :  { %v13283_v40 = vpop.eup %13282 }
0x2a01   :  { %v15193_v14 = vadd.f32 %v10733_v37, %v9110_v21  ;;  %v9099_v56 = vmul.f32 %v13283_v40, %v15159_v53  ;;  %12333 = vmatmul.mubr.msk.f32.gmra.mrb[190].mxu0 %vm235_vm9, %v15190_v41  ;;  %v9111_v11 = vmul.f32 %v10732_v1, %v9098_v12 }
0x2a02   :  { %v13285_v7 = vpop.eup %13284 }
0x2a03   :  { %12335 = vmatprep.mubr.msk.f32.mxu0 %vm235_vm9, %v15193_v14  ;;  %v9112_v8 = vmul.f32 %v10732_v1, %v9099_v56  ;;  %v15200_v22 = vadd.f32 %v10733_v37, %v9111_v11  ;;  %v9100_v34 = vmul.f32 %v13285_v7, %v15166_v3  ;;  %v10734_v3 = vld [vmem:[#allocation2 + $0x4d0] ss:$0 sm:$0xff] }
0x2a05   :  { %v15203_v55 = vadd.f32 %v10733_v37, %v9112_v8  ;;  %12336 = vmatmul.mubr.msk.f32.gmra.mrb[192].mxu0 %vm235_vm9, %v15200_v22  ;;  %v9113_v9 = vmul.f32 %v10732_v1, %v9100_v34 }
0x2a07   :  { %12338 = vmatprep.mubr.msk.f32.mxu0 %vm235_vm9, %v15203_v55  ;;  %v15209_v53 = vadd.f32 %v10733_v37, %v9113_v9 }
0x2a09   :  { %12339 = vmatmul.mubr.msk.f32.gmra.mrb[194].mxu0 %vm235_vm9, %v15209_v53 }
0x2ac6   :  { %v12331_v2 = vpop.f32.mrb[188].mxu0 }
0x2ac7   :  { %v9232_v48 = vadd.f32 %v12331_v2, %v10734_v3  ;;  %v9226_v30 = vpop.f32.mrb[189].mxu0 }
0x2ac8   :  { %v9227_v39 = vadd.f32 %v10734_v3, %v9226_v30 }
0x2ac9   :  { %v9266_v35 = vmax.f32 %v9232_v48, 0.0 }
0x2aca   :  { %v9265_v0 = vmax.f32 %v9227_v39, 0.0 }
0x2acc   :  { %12357 = vmatprep.mubr.msk.f32.mxu1 %vm96_vm0, %v9265_v0 }
0x2acd   :  { %12358 = vmatmul.mubr.msk.f32.vlgmr.msra.gmra.mrb[192].mxu1 %vm96_vm0, %v9266_v35 }
0x2ad4   :  { %v12334_v29 = vpop.f32.mrb[190].mxu0 }
0x2ad5   :  { %v9242_v44 = vadd.f32 %v12334_v29, %v10734_v3  ;;  %v9236_v61 = vpop.f32.mrb[191].mxu0 }
0x2ad6   :  { %v9237_v24 = vadd.f32 %v10734_v3, %v9236_v61 }
0x2ad7   :  { %v9268_v52 = vmax.f32 %v9242_v44, 0.0 }
0x2ad8   :  { %v9267_v1 = vmax.f32 %v9237_v24, 0.0  ;;  %v12337_v19 = vpop.f32.mrb[192].mxu0 }
0x2ad9   :  { %v9252_v38 = vadd.f32 %v12337_v19, %v10734_v3  ;;  %v9246_v46 = vpop.f32.mrb[193].mxu0 }
0x2ada   :  { %v9247_v59 = vadd.f32 %v10734_v3, %v9246_v46  ;;  %12360 = vmatprep.mubr.msk.f32.mxu1 %vm96_vm0, %v9267_v1 }
0x2adb   :  { %12361 = vmatmul.mubr.msk.f32.gmra.mrb[194].mxu1 %vm96_vm0, %v9268_v52  ;;  %v9270_v54 = vmax.f32 %v9252_v38, 0.0 }
0x2adc   :  { %v9269_v37 = vmax.f32 %v9247_v59, 0.0  ;;  %v12340_v18 = vpop.f32.mrb[194].mxu0 }
0x2add   :  { %v9262_v28 = vadd.f32 %v12340_v18, %v10734_v3  ;;  %v9256_v23 = vpop.f32.mrb[195].mxu0 }
0x2ade   :  { %v9257_v20 = vadd.f32 %v10734_v3, %v9256_v23  ;;  %12363 = vmatprep.mubr.msk.f32.mxu1 %vm96_vm0, %v9269_v37 }
0x2adf   :  { %12364 = vmatmul.mubr.msk.f32.gmra.mrb[196].mxu1 %vm96_vm0, %v9270_v54  ;;  %v9272_v27 = vmax.f32 %v9262_v28, 0.0 }
0x2ae0   :  { %v9271_v43 = vmax.f32 %v9257_v20, 0.0 }
0x2ae2   :  { %12366 = vmatprep.mubr.msk.f32.mxu1 %vm96_vm0, %v9271_v43 }
0x2ae3   :  { %12367 = vmatmul.mubr.msk.f32.gmra.mrb[198].mxu1 %vm96_vm0, %v9272_v27 }
0x2ba0   :  { %v12359_v47 = vpop.f32.mrb[192].mxu1 }
0x2ba1   :  { %v9382_v25 = vadd.f32 %v12359_v47, %v10743_v26  ;;  %v9376_v57 = vpop.f32.mrb[193].mxu1 }
0x2ba2   :  { %v9377_v5 = vadd.f32 %v10743_v26, %v9376_v57 }
0x2ba3   :  { %v9416_v4 = vadd.f32 %v9382_v25, %v15177_v49 }
0x2ba4   :  { %v9415_v60 = vadd.f32 %v9377_v5, %v15175_v17 }
0x2ba5   :  { %v9426_v50 = vsel %vm235_vm9, %v9416_v4, 0.0 }
0x2ba6   :  { %9427 = vadd.xlane.f32.xlu0 %v9426_v50  ;;  %v9423_v42 = vsel %vm235_vm9, %v9415_v60, 0.0 }
0x2ba7   :  { %9424 = vadd.xlane.f32.xlu1 %v9423_v42 }
0x2bae   :  { %v12362_v51 = vpop.f32.mrb[194].mxu1 }
0x2baf   :  { %v9392_v15 = vadd.f32 %v12362_v51, %v10743_v26  ;;  %v9386_v6 = vpop.f32.mrb[195].mxu1 }
0x2bb0   :  { %v9387_v62 = vadd.f32 %v10743_v26, %v9386_v6 }
0x2bb1   :  { %v9418_v36 = vadd.f32 %v9392_v15, %v15190_v41 }
0x2bb2   :  { %v9417_v13 = vadd.f32 %v9387_v62, %v15184_v16  ;;  %v12365_v45 = vpop.f32.mrb[196].mxu1 }
0x2bb3   :  { %v9402_v10 = vadd.f32 %v12365_v45, %v10743_v26  ;;  %v9396_v58 = vpop.f32.mrb[197].mxu1  ;;  %v9432_v49 = vsel %vm235_vm9, %v9418_v36, 0.0 }
0x2bb4   :  { %v9397_v17 = vadd.f32 %v10743_v26, %v9396_v58  ;;  %9433 = vadd.xlane.f32.xlu0 %v9432_v49  ;;  %v9429_v21 = vsel %vm235_vm9, %v9417_v13, 0.0  ;;  %v15269_v49 = vld [vmem:[#allocation2 + $0x520] ss:$0 sm:$0xff] }
0x2bb5   :  { %v9420_v40 = vadd.f32 %v9402_v10, %v15200_v22  ;;  %9430 = vadd.xlane.f32.xlu1 %v9429_v21 }
0x2bb6   :  { %v9419_v12 = vadd.f32 %v9397_v17, %v15193_v14  ;;  %v12368_v56 = vpop.f32.mrb[198].mxu1 }
0x2bb7   :  { %v9412_v11 = vadd.f32 %v12368_v56, %v10743_v26  ;;  %v9406_v7 = vpop.f32.mrb[199].mxu1  ;;  %v9438_v41 = vsel %vm235_vm9, %v9420_v40, 0.0 }
0x2bb8   :  { %v9407_v16 = vadd.f32 %v10743_v26, %v9406_v7  ;;  %9439 = vadd.xlane.f32.xlu0 %v9438_v41  ;;  %v9435_v8 = vsel %vm235_vm9, %v9419_v12, 0.0 }
0x2bb9   :  { %v9422_v34 = vadd.f32 %v9412_v11, %v15209_v53  ;;  %9436 = vadd.xlane.f32.xlu1 %v9435_v8  ;;  %v10753_v11 = vld [vmem:[#allocation2 + $0x528] ss:$0 sm:$0xff] }
0x2bba   :  { %v9421_v9 = vadd.f32 %v9407_v16, %v15203_v55 }
0x2bbb   :  { %v9444_v63 = vsel %vm235_vm9, %v9422_v34, 0.0 }
0x2bbc   :  { %9445 = vadd.xlane.f32.xlu0 %v9444_v63  ;;  %v9441_v22 = vsel %vm235_vm9, %v9421_v9, 0.0 }
0x2bbd   :  { %9442 = vadd.xlane.f32.xlu1 %v9441_v22 }
0x2c33   :  { %v9428_v14 = vpop.xlane.xlu0 %9427 }
0x2c34   :  { %v9448_v32 = vmul.f32 0.03125, %v9428_v14  ;;  %v9425_v33 = vpop.xlane.xlu1 %9424 }
0x2c35   :  { %v9447_v3 = vmul.f32 0.03125, %v9425_v33 }
0x2c36   :  { %v9456_v2 = vsub.f32 %v9416_v4, %v9448_v32 }
0x2c37   :  { %v9455_v48 = vsub.f32 %v9415_v60, %v9447_v3 }
0x2c38   :  { %v9464_v30 = vmul.f32 %v9456_v2, %v9456_v2 }
0x2c39   :  { %v9463_v39 = vmul.f32 %v9455_v48, %v9455_v48 }
0x2c3a   :  { %v9474_v0 = vsel %vm235_vm9, %v9464_v30, 0.0 }
0x2c3b   :  { %9475 = vadd.xlane.f32.xlu0 %v9474_v0  ;;  %v9471_v53 = vsel %vm235_vm9, %v9463_v39, 0.0 }
0x2c3c   :  { %9472 = vadd.xlane.f32.xlu1 %v9471_v53 }
0x2c41   :  { %v9434_v55 = vpop.xlane.xlu0 %9433 }
0x2c42   :  { %v9450_v35 = vmul.f32 0.03125, %v9434_v55  ;;  %v9431_v29 = vpop.xlane.xlu1 %9430 }
0x2c43   :  { %v9449_v44 = vmul.f32 0.03125, %v9431_v29 }
0x2c44   :  { %v15239_v61 = vsub.f32 %v9418_v36, %v9450_v35 }
0x2c45   :  { %v15241_v24 = vsub.f32 %v9417_v13, %v9449_v44  ;;  %v9440_v1 = vpop.xlane.xlu0 %9439 }
0x2c46   :  { %v9452_v19 = vmul.f32 0.03125, %v9440_v1  ;;  %v9437_v52 = vpop.xlane.xlu1 %9436  ;;  %v9466_v38 = vmul.f32 %v15239_v61, %v15239_v61 }
0x2c47   :  { %v9451_v46 = vmul.f32 0.03125, %v9437_v52  ;;  %v9465_v59 = vmul.f32 %v15241_v24, %v15241_v24 }
0x2c48   :  { %v15247_v37 = vsub.f32 %v9420_v40, %v9452_v19  ;;  %v9480_v18 = vsel %vm235_vm9, %v9466_v38, 0.0 }
0x2c49   :  { %v15250_v54 = vsub.f32 %v9419_v12, %v9451_v46  ;;  %9481 = vadd.xlane.f32.xlu0 %v9480_v18  ;;  %v9446_v28 = vpop.xlane.xlu0 %9445  ;;  %v9477_v23 = vsel %vm235_vm9, %v9465_v59, 0.0 }
0x2c4a   :  { %v9454_v20 = vmul.f32 0.03125, %v9446_v28  ;;  %9478 = vadd.xlane.f32.xlu1 %v9477_v23  ;;  %v9443_v43 = vpop.xlane.xlu1 %9442  ;;  %v9468_v27 = vmul.f32 %v15247_v37, %v15247_v37 }
0x2c4b   :  { %v9453_v26 = vmul.f32 0.03125, %v9443_v43  ;;  %v9467_v47 = vmul.f32 %v15250_v54, %v15250_v54 }
0x2c4c   :  { %v15257_v25 = vsub.f32 %v9422_v34, %v9454_v20  ;;  %v9486_v57 = vsel %vm235_vm9, %v9468_v27, 0.0 }
0x2c4d   :  { %v15260_v5 = vsub.f32 %v9421_v9, %v9453_v26  ;;  %9487 = vadd.xlane.f32.xlu0 %v9486_v57  ;;  %v9483_v4 = vsel %vm235_vm9, %v9467_v47, 0.0 }
0x2c4e   :  { %9484 = vadd.xlane.f32.xlu1 %v9483_v4  ;;  %v9470_v60 = vmul.f32 %v15257_v25, %v15257_v25 }
0x2c4f   :  { %v9469_v50 = vmul.f32 %v15260_v5, %v15260_v5 }
0x2c50   :  { %v9492_v42 = vsel %vm235_vm9, %v9470_v60, 0.0 }
0x2c51   :  { %9493 = vadd.xlane.f32.xlu0 %v9492_v42  ;;  %v9489_v51 = vsel %vm235_vm9, %v9469_v50, 0.0 }
0x2c52   :  { %9490 = vadd.xlane.f32.xlu1 %v9489_v51 }
0x2cc8   :  { %v9476_v15 = vpop.xlane.xlu0 %9475 }
0x2cc9   :  { %v9496_v6 = vmul.f32 0.03125, %v9476_v15  ;;  %v9473_v62 = vpop.xlane.xlu1 %9472 }
0x2cca   :  { %v9495_v36 = vmul.f32 0.03125, %v9473_v62 }
0x2ccb   :  { %v9504_v13 = vadd.f32 1e-05, %v9496_v6 }
0x2ccc   :  { %v9503_v45 = vadd.f32 1e-05, %v9495_v36 }
0x2ccd   :  { %13286 = vrsqrt.f32 %v9504_v13 }
0x2cce   :  { %13288 = vrsqrt.f32 %v9503_v45 }
0x2cd6   :  { %v9482_v58 = vpop.xlane.xlu0 %9481 }
0x2cd7   :  { %v13287_v10 = vpop.eup %13286  ;;  %v9498_v21 = vmul.f32 0.03125, %v9482_v58  ;;  %v9479_v40 = vpop.xlane.xlu1 %9478 }
0x2cd8   :  { %v13289_v17 = vpop.eup %13288  ;;  %v9520_v12 = vmul.f32 %v13287_v10, %v9456_v2  ;;  %v9497_v56 = vmul.f32 0.03125, %v9479_v40 }
0x2cd9   :  { %v9519_v7 = vmul.f32 %v13289_v17, %v9455_v48  ;;  %v9506_v41 = vadd.f32 1e-05, %v9498_v21 }
0x2cda   :  { %v9533_v16 = vmul.f32 %v15269_v49, %v9520_v12  ;;  %v9505_v8 = vadd.f32 1e-05, %v9497_v56  ;;  %v9488_v34 = vpop.xlane.xlu0 %9487 }
0x2cdb   :  { %v9532_v9 = vmul.f32 %v15269_v49, %v9519_v7  ;;  %13290 = vrsqrt.f32 %v9506_v41  ;;  %v9500_v63 = vmul.f32 0.03125, %v9488_v34  ;;  %v9485_v22 = vpop.xlane.xlu1 %9484 }
0x2cdc   :  { %v9546_v14 = vadd.f32 %v10753_v11, %v9533_v16  ;;  %13292 = vrsqrt.f32 %v9505_v8  ;;  %v9499_v32 = vmul.f32 0.03125, %v9485_v22 }
0x2cdd   :  { %v9545_v33 = vadd.f32 %v10753_v11, %v9532_v9  ;;  %v9508_v3 = vadd.f32 1e-05, %v9500_v63 }
0x2cde   :  { %v9556_v2 = vsel %vm235_vm9, %v9546_v14, 0.0  ;;  %v9507_v30 = vadd.f32 1e-05, %v9499_v32  ;;  %v9494_v39 = vpop.xlane.xlu0 %9493 }
0x2cdf   :  { %9557 = vadd.xlane.f32.xlu0 %v9556_v2  ;;  %v9553_v48 = vsel %vm235_vm9, %v9545_v33, 0.0  ;;  %13294 = vrsqrt.f32 %v9508_v3  ;;  %v9502_v0 = vmul.f32 0.03125, %v9494_v39  ;;  %v9491_v53 = vpop.xlane.xlu1 %9490 }
0x2ce0   :  { %9554 = vadd.xlane.f32.xlu1 %v9553_v48  ;;  %13296 = vrsqrt.f32 %v9507_v30  ;;  %v9501_v55 = vmul.f32 0.03125, %v9491_v53 }
0x2ce1   :  { %v9510_v35 = vadd.f32 1e-05, %v9502_v0 }
0x2ce2   :  { %v9509_v29 = vadd.f32 1e-05, %v9501_v55 }
0x2ce3   :  { %13298 = vrsqrt.f32 %v9510_v35 }
0x2ce4   :  { %13300 = vrsqrt.f32 %v9509_v29 }
0x2ce5   :  { %v13291_v44 = vpop.eup %13290 }
0x2ce6   :  { %v13293_v1 = vpop.eup %13292  ;;  %v9522_v19 = vmul.f32 %v13291_v44, %v15239_v61 }
0x2ce7   :  { %v9521_v52 = vmul.f32 %v13293_v1, %v15241_v24 }
0x2ce8   :  { %v9535_v38 = vmul.f32 %v15269_v49, %v9522_v19 }
0x2ce9   :  { %v13295_v46 = vpop.eup %13294  ;;  %v9534_v59 = vmul.f32 %v15269_v49, %v9521_v52 }
0x2cea   :  { %v13297_v18 = vpop.eup %13296  ;;  %v9548_v28 = vadd.f32 %v10753_v11, %v9535_v38  ;;  %v9524_v23 = vmul.f32 %v13295_v46, %v15247_v37 }
0x2ceb   :  { %v9547_v20 = vadd.f32 %v10753_v11, %v9534_v59  ;;  %v9523_v43 = vmul.f32 %v13297_v18, %v15250_v54  ;;  %v9683_v18 = vld [vmem:[#allocation2 + $0x540] sm:$0xff] }
0x2cec   :  { %v9562_v27 = vsel %vm235_vm9, %v9548_v28, 0.0  ;;  %v9537_v26 = vmul.f32 %v15269_v49, %v9524_v23 }
0x2ced   :  { %v13299_v47 = vpop.eup %13298  ;;  %9563 = vadd.xlane.f32.xlu0 %v9562_v27  ;;  %v9559_v61 = vsel %vm235_vm9, %v9547_v20, 0.0  ;;  %v9536_v24 = vmul.f32 %v15269_v49, %v9523_v43  ;;  %v9686_v43 = vld [vmem:[#allocation2 + $0x558] sm:$0xff] }
0x2cee   :  { %v13301_v57 = vpop.eup %13300  ;;  %9560 = vadd.xlane.f32.xlu1 %v9559_v61  ;;  %v9550_v4 = vadd.f32 %v10753_v11, %v9537_v26  ;;  %v9526_v60 = vmul.f32 %v13299_v47, %v15257_v25 }
0x2cef   :  { %v9549_v50 = vadd.f32 %v10753_v11, %v9536_v24  ;;  %v9525_v37 = vmul.f32 %v13301_v57, %v15260_v5 }
0x2cf0   :  { %v9568_v54 = vsel %vm235_vm9, %v9550_v4, 0.0  ;;  %v9539_v42 = vmul.f32 %v15269_v49, %v9526_v60 }
0x2cf1   :  { %9569 = vadd.xlane.f32.xlu0 %v9568_v54  ;;  %v9565_v51 = vsel %vm235_vm9, %v9549_v50, 0.0  ;;  %v9538_v15 = vmul.f32 %v15269_v49, %v9525_v37 }
0x2cf2   :  { %9566 = vadd.xlane.f32.xlu1 %v9565_v51  ;;  %v9552_v6 = vadd.f32 %v10753_v11, %v9539_v42 }
0x2cf3   :  { %v9551_v62 = vadd.f32 %v10753_v11, %v9538_v15 }
0x2cf4   :  { %v9574_v36 = vsel %vm235_vm9, %v9552_v6, 0.0 }
0x2cf5   :  { %9575 = vadd.xlane.f32.xlu0 %v9574_v36  ;;  %v9571_v25 = vsel %vm235_vm9, %v9551_v62, 0.0  ;;  %v10755_v36 = vld [vmem:[#allocation2 + $0x538] ss:$0 sm:$0xff] }
0x2cf6   :  { %9572 = vadd.xlane.f32.xlu1 %v9571_v25 }
0x2d6c   :  { %v9558_v13 = vpop.xlane.xlu0 %9557 }
0x2d6d   :  { %v9578_v5 = vmul.f32 0.03125, %v9558_v13  ;;  %v9555_v45 = vpop.xlane.xlu1 %9554 }
0x2d6e   :  { %v9577_v10 = vmul.f32 0.03125, %v9555_v45 }
0x2d6f   :  { %v15293_v58 = vsub.f32 %v9546_v14, %v9578_v5 }
0x2d70   :  { %v15295_v17 = vsub.f32 %v9545_v33, %v9577_v10 }
0x2d71   :  { %v9594_v49 = vmul.f32 %v15293_v58, %v15293_v58 }
0x2d72   :  { %v9593_v21 = vmul.f32 %v15295_v17, %v15295_v17 }
0x2d73   :  { %v9604_v40 = vsel %vm235_vm9, %v9594_v49, 0.0 }
0x2d74   :  { %9605 = vadd.xlane.f32.xlu0 %v9604_v40  ;;  %v9601_v12 = vsel %vm235_vm9, %v9593_v21, 0.0 }
0x2d75   :  { %9602 = vadd.xlane.f32.xlu1 %v9601_v12 }
0x2d7a   :  { %v9564_v56 = vpop.xlane.xlu0 %9563 }
0x2d7b   :  { %v9580_v11 = vmul.f32 0.03125, %v9564_v56  ;;  %v9561_v7 = vpop.xlane.xlu1 %9560 }
0x2d7c   :  { %v9579_v41 = vmul.f32 0.03125, %v9561_v7 }
0x2d7d   :  { %v15303_v16 = vsub.f32 %v9548_v28, %v9580_v11  ;;  %v9684_v28 = vld [vmem:[#allocation2 + $0x548] sm:$0xff] }
0x2d7e   :  { %v15305_v8 = vsub.f32 %v9547_v20, %v9579_v41  ;;  %v9570_v34 = vpop.xlane.xlu0 %9569  ;;  %v12788_v23 = vpack.c.bf16 %v9684_v28, %v9683_v18  ;;  %v9685_v20 = vld [vmem:[#allocation2 + $0x550] sm:$0xff] }
0x2d7f   :  { %v9582_v9 = vmul.f32 0.03125, %v9570_v34  ;;  %v9567_v63 = vpop.xlane.xlu1 %9566  ;;  %v9596_v22 = vmul.f32 %v15303_v16, %v15303_v16  ;;  %v12792_v27 = vpack.c.bf16 %v9686_v43, %v9685_v20  ;;  %v9845_v20 = vld [vmem:[#allocation2 + $0x568] sm:$0xff]  ;;  %v9846_v43 = vld [vmem:[#allocation2 + $0x570] sm:$0xff] }
0x2d80   :  { %v9581_v14 = vmul.f32 0.03125, %v9567_v63  ;;  %v9595_v32 = vmul.f32 %v15305_v8, %v15305_v8  ;;  %12789 = vmatprep.subr.bf16.mxu0 %v12788_v23 }
0x2d81   :  { %v15311_v33 = vsub.f32 %v9550_v4, %v9582_v9  ;;  %v9610_v3 = vsel %vm235_vm9, %v9596_v22, 0.0  ;;  %12791 = vmatpush3.bf16.msra.mxu0 %v12788_v23 }
0x2d82   :  { %v15314_v2 = vsub.f32 %v9549_v50, %v9581_v14  ;;  %9611 = vadd.xlane.f32.xlu0 %v9610_v3  ;;  %v9576_v30 = vpop.xlane.xlu0 %9575  ;;  %v9607_v39 = vsel %vm235_vm9, %v9595_v32, 0.0  ;;  %12793 = vmatprep.subr.bf16.mxu0 %v12792_v27  ;;  %v10754_v50 = vld [vmem:[#allocation2 + $0x530] ss:$0 sm:$0xff] }
0x2d83   :  { %v9584_v48 = vmul.f32 0.03125, %v9576_v30  ;;  %9608 = vadd.xlane.f32.xlu1 %v9607_v39  ;;  %v9573_v0 = vpop.xlane.xlu1 %9572  ;;  %v9598_v53 = vmul.f32 %v15311_v33, %v15311_v33 }
0x2d84   :  { %v9583_v55 = vmul.f32 0.03125, %v9573_v0  ;;  %v9597_v35 = vmul.f32 %v15314_v2, %v15314_v2 }
0x2d85   :  { %v15321_v29 = vsub.f32 %v9552_v6, %v9584_v48  ;;  %v9616_v44 = vsel %vm235_vm9, %v9598_v53, 0.0  ;;  %12795 = vmatpush3.bf16.msra.mxu0 %v12792_v27  ;;  %v12796_v27 = vpack.c.bf16 %v9846_v43, %v9845_v20  ;;  %v9985_v20 = vld [vmem:[#allocation2 + $0x600] sm:$0xff] }
0x2d86   :  { %v15324_v1 = vsub.f32 %v9551_v62, %v9583_v55  ;;  %9617 = vadd.xlane.f32.xlu0 %v9616_v44  ;;  %v9613_v19 = vsel %vm235_vm9, %v9597_v35, 0.0 }
0x2d87   :  { %9614 = vadd.xlane.f32.xlu1 %v9613_v19  ;;  %v9600_v52 = vmul.f32 %v15321_v29, %v15321_v29  ;;  %12797 = vmatprep.subr.bf16.mxu1 %v12796_v27 }
0x2d88   :  { %v9599_v38 = vmul.f32 %v15324_v1, %v15324_v1  ;;  %12799 = vmatpush3.bf16.msra.mxu1 %v12796_v27 }
0x2d89   :  { %v9622_v46 = vsel %vm235_vm9, %v9600_v52, 0.0 }
0x2d8a   :  { %9623 = vadd.xlane.f32.xlu0 %v9622_v46  ;;  %v9619_v59 = vsel %vm235_vm9, %v9599_v38, 0.0 }
0x2d8b   :  { %9620 = vadd.xlane.f32.xlu1 %v9619_v59 }
0x2e01   :  { %v9606_v26 = vpop.xlane.xlu0 %9605 }
0x2e02   :  { %v9626_v47 = vmul.f32 0.03125, %v9606_v26  ;;  %v9603_v61 = vpop.xlane.xlu1 %9602 }
0x2e03   :  { %v9625_v24 = vmul.f32 0.03125, %v9603_v61 }
0x2e04   :  { %v9634_v57 = vadd.f32 1e-05, %v9626_v47 }
0x2e05   :  { %v9633_v4 = vadd.f32 1e-05, %v9625_v24 }
0x2e06   :  { %13302 = vrsqrt.f32 %v9634_v57 }
0x2e07   :  { %13304 = vrsqrt.f32 %v9633_v4 }
0x2e0f   :  { %v9612_v37 = vpop.xlane.xlu0 %9611 }
0x2e10   :  { %v13303_v60 = vpop.eup %13302  ;;  %v9628_v51 = vmul.f32 0.03125, %v9612_v37  ;;  %v9609_v15 = vpop.xlane.xlu1 %9608 }
0x2e11   :  { %v13305_v54 = vpop.eup %13304  ;;  %v9650_v42 = vmul.f32 %v13303_v60, %v15293_v58  ;;  %v9627_v6 = vmul.f32 0.03125, %v9609_v15 }
0x2e12   :  { %v9649_v62 = vmul.f32 %v13305_v54, %v15295_v17  ;;  %v9636_v13 = vadd.f32 1e-05, %v9628_v51 }
0x2e13   :  { %v9663_v25 = vmul.f32 %v10754_v50, %v9650_v42  ;;  %v9635_v5 = vadd.f32 1e-05, %v9627_v6  ;;  %v9618_v45 = vpop.xlane.xlu0 %9617 }
0x2e14   :  { %v9662_v10 = vmul.f32 %v10754_v50, %v9649_v62  ;;  %13306 = vrsqrt.f32 %v9636_v13  ;;  %v9630_v49 = vmul.f32 0.03125, %v9618_v45  ;;  %v9615_v21 = vpop.xlane.xlu1 %9614 }
0x2e15   :  { %13308 = vrsqrt.f32 %v9635_v5  ;;  %v9629_v40 = vmul.f32 0.03125, %v9615_v21  ;;  %v9676_v56 = vadd.f32 %v10755_v36, %v9663_v25 }
0x2e16   :  { %v9675_v12 = vadd.f32 %v10755_v36, %v9662_v10  ;;  %v9638_v11 = vadd.f32 1e-05, %v9630_v49 }
0x2e17   :  { %v9637_v58 = vadd.f32 1e-05, %v9629_v40  ;;  %v9624_v7 = vpop.xlane.xlu0 %9623 }
0x2e18   :  { %12377 = vmatprep.mubr.msk.f32.mxu0 %vm235_vm9, %v9675_v12  ;;  %13310 = vrsqrt.f32 %v9638_v11  ;;  %v9632_v17 = vmul.f32 0.03125, %v9624_v7  ;;  %v9621_v41 = vpop.xlane.xlu1 %9620 }
0x2e19   :  { %12378 = vmatmul.mubr.msk.f32.vlgmr.msra.gmra.mrb[196].mxu0 %vm235_vm9, %v9676_v56  ;;  %13312 = vrsqrt.f32 %v9637_v58  ;;  %v9631_v34 = vmul.f32 0.03125, %v9621_v41 }
0x2e1a   :  { %v9640_v9 = vadd.f32 1e-05, %v9632_v17 }
0x2e1b   :  { %v9639_v63 = vadd.f32 1e-05, %v9631_v34  ;;  %v10765_v34 = vld [vmem:[#allocation2 + $0x578] ss:$0 sm:$0xff] }
0x2e1c   :  { %13314 = vrsqrt.f32 %v9640_v9 }
0x2e1d   :  { %13316 = vrsqrt.f32 %v9639_v63 }
0x2e1e   :  { %v13307_v22 = vpop.eup %13306 }
0x2e1f   :  { %v13309_v14 = vpop.eup %13308  ;;  %v9652_v32 = vmul.f32 %v13307_v22, %v15303_v16 }
0x2e20   :  { %v9651_v3 = vmul.f32 %v13309_v14, %v15305_v8 }
0x2e21   :  { %v9665_v30 = vmul.f32 %v10754_v50, %v9652_v32  ;;  %v13359_v32 = vmov 0.0|0.0  }
0x2e22   :  { %v13311_v39 = vpop.eup %13310  ;;  %v9664_v48 = vmul.f32 %v10754_v50, %v9651_v3  ;;  %12800 = vmatprep.subr.bf16.mxu0 %v13359_v32  ;;  %12812 = vmatprep.subr.bf16.mxu1 %v13359_v32 }
0x2e23   :  { %v13313_v0 = vpop.eup %13312  ;;  %v9654_v53 = vmul.f32 %v13311_v39, %v15311_v33  ;;  %v9678_v44 = vadd.f32 %v10755_v36, %v9665_v30 }
0x2e24   :  { %v9677_v55 = vadd.f32 %v10755_v36, %v9664_v48  ;;  %v9653_v35 = vmul.f32 %v13313_v0, %v15314_v2 }
0x2e25   :  { %v9667_v19 = vmul.f32 %v10754_v50, %v9654_v53 }
0x2e26   :  { %v13315_v52 = vpop.eup %13314  ;;  %12380 = vmatprep.mubr.msk.f32.mxu0 %vm235_vm9, %v9677_v55  ;;  %v9666_v38 = vmul.f32 %v10754_v50, %v9653_v35 }
0x2e27   :  { %v13317_v46 = vpop.eup %13316  ;;  %12381 = vmatmul.mubr.msk.f32.gmra.mrb[198].mxu0 %vm235_vm9, %v9678_v44  ;;  %v9656_v16 = vmul.f32 %v13315_v52, %v15321_v29  ;;  %v9680_v18 = vadd.f32 %v10755_v36, %v9667_v19  ;;  %v10756_v29 = vld [vmem:[#allocation2 + $0x560] ss:$0 sm:$0xff] }
0x2e28   :  { %v9679_v8 = vadd.f32 %v10755_v36, %v9666_v38  ;;  %v9655_v59 = vmul.f32 %v13317_v46, %v15324_v1  ;;  %v9984_v46 = vld [vmem:[#allocation2 + $0x5f8] sm:$0xff] }
0x2e29   :  { %v9669_v28 = vmul.f32 %v10754_v50, %v9656_v16  ;;  %v9983_v16 = vld [vmem:[#allocation2 + $0x5f0] sm:$0xff] }
0x2e2a   :  { %12383 = vmatprep.mubr.msk.f32.mxu0 %vm235_vm9, %v9679_v8  ;;  %v9668_v33 = vmul.f32 %v10754_v50, %v9655_v59 }
0x2e2b   :  { %12384 = vmatmul.mubr.msk.f32.gmra.mrb[200].mxu0 %vm235_vm9, %v9680_v18  ;;  %v9682_v23 = vadd.f32 %v10755_v36, %v9669_v28 }
0x2e2c   :  { %v9681_v2 = vadd.f32 %v10755_v36, %v9668_v33 }
0x2e2e   :  { %12386 = vmatprep.mubr.msk.f32.mxu0 %vm235_vm9, %v9681_v2 }
0x2e2f   :  { %12387 = vmatmul.mubr.msk.f32.gmra.mrb[202].mxu0 %vm235_vm9, %v9682_v23  ;;  %v9986_v23 = vld [vmem:[#allocation2 + $0x608] sm:$0xff] }
0x2e30   :  { %12421 = vmatprep.mubr.msk.f32.mxu0 %vm13360_vm6, %v13355_v31 }
0x2eec   :  { %v12379_v1 = vpop.f32.mrb[196].mxu0 }
0x2eed   :  { %v9788_v26 = vadd.f32 %v12379_v1, %v10756_v29  ;;  %v9782_v47 = vpop.f32.mrb[197].mxu0 }
0x2eee   :  { %v9783_v61 = vadd.f32 %v10756_v29, %v9782_v47  ;;  %v9988_v47 = vld [vmem:[#allocation2 + $0x618] sm:$0xff] }
0x2eef   :  { %v9830_v24 = vmul.f32 0.01, %v9788_v26  ;;  %vm9822_vm12 = vcmp.ge.f32.partialorder %v9788_v26, 0.0 }
0x2ef0   :  { %vm9821_vm13 = vcmp.ge.f32.partialorder %v9783_v61, 0.0  ;;  %v9829_v57 = vmul.f32 0.01, %v9783_v61 }
0x2ef1   :  { %v9838_v60 = vsel %vm9822_vm12, %v9788_v26, %v9830_v24  ;;  %v9987_v26 = vld [vmem:[#allocation2 + $0x610] sm:$0xff] }
0x2ef2   :  { %v9837_v4 = vsel %vm9821_vm13, %v9783_v61, %v9829_v57 }
0x2ef3   :  { %12393 = vmatprep.mubr.msk.f32.mxu1 %vm9852_vm14, %v9837_v4 }
0x2ef4   :  { %12394 = vmatmul.mubr.msk.f32.vlgmr.msra.gmra.mrb[200].mxu1 %vm9852_vm14, %v9838_v60  ;;  %v9989_v60 = vld [vmem:[#allocation2 + $0x620] sm:$0xff] }
0x2efa   :  { %v12382_v50 = vpop.f32.mrb[198].mxu0 }
0x2efb   :  { %v9798_v37 = vadd.f32 %v12382_v50, %v10756_v29  ;;  %v9792_v54 = vpop.f32.mrb[199].mxu0 }
0x2efc   :  { %v9793_v42 = vadd.f32 %v10756_v29, %v9792_v54 }
0x2efd   :  { %v9832_v51 = vmul.f32 0.01, %v9798_v37  ;;  %vm9824_vm15 = vcmp.ge.f32.partialorder %v9798_v37, 0.0 }
0x2efe   :  { %vm9823_vm1 = vcmp.ge.f32.partialorder %v9793_v42, 0.0  ;;  %v9831_v15 = vmul.f32 0.01, %v9793_v42  ;;  %v12385_v6 = vpop.f32.mrb[200].mxu0 }
0x2eff   :  { %v9808_v62 = vadd.f32 %v12385_v6, %v10756_v29  ;;  %v9802_v36 = vpop.f32.mrb[201].mxu0  ;;  %v9840_v45 = vsel %vm9824_vm15, %v9798_v37, %v9832_v51  ;;  %v9990_v37 = vld [vmem:[#allocation2 + $0x628] sm:$0xff] }
0x2f00   :  { %v9803_v25 = vadd.f32 %v10756_v29, %v9802_v36  ;;  %v9839_v13 = vsel %vm9823_vm1, %v9793_v42, %v9831_v15  ;;  %v10117_v36 = vld [vmem:[#allocation2 + $0x580] sm:$0xff] }
0x2f01   :  { %v9834_v5 = vmul.f32 0.01, %v9808_v62  ;;  %12396 = vmatprep.mubr.msk.f32.mxu1 %vm9852_vm14, %v9839_v13  ;;  %vm9826_vm2 = vcmp.ge.f32.partialorder %v9808_v62, 0.0 }
0x2f02   :  { %vm9825_vm3 = vcmp.ge.f32.partialorder %v9803_v25, 0.0  ;;  %v9833_v10 = vmul.f32 0.01, %v9803_v25  ;;  %v12388_v49 = vpop.f32.mrb[202].mxu0  ;;  %12397 = vmatmul.mubr.msk.f32.gmra.mrb[202].mxu1 %vm9852_vm14, %v9840_v45 }
0x2f03   :  { %v9818_v21 = vadd.f32 %v12388_v49, %v10756_v29  ;;  %v9812_v40 = vpop.f32.mrb[203].mxu0  ;;  %v9842_v58 = vsel %vm9826_vm2, %v9808_v62, %v9834_v5  ;;  %v9982_v62 = vld [vmem:[#allocation2 + $0x630] sm:$0x3] }
0x2f04   :  { %v9813_v12 = vadd.f32 %v10756_v29, %v9812_v40  ;;  %v9841_v56 = vsel %vm9825_vm3, %v9803_v25, %v9833_v10  ;;  %v10118_v25 = vld [vmem:[#allocation2 + $0x588] sm:$0xff]  ;;  %v10775_v40 = vld [vmem:[#allocation2 + $0x590] ss:$0 sm:$0xff] }
0x2f05   :  { %v9836_v11 = vmul.f32 0.01, %v9818_v21  ;;  %12399 = vmatprep.mubr.msk.f32.mxu1 %vm9852_vm14, %v9841_v56  ;;  %vm9828_vm4 = vcmp.ge.f32.partialorder %v9818_v21, 0.0  ;;  %v12813_v13 = vpack.c.bf16 %v10118_v25, %v10117_v36 }
0x2f06   :  { %vm9827_vm5 = vcmp.ge.f32.partialorder %v9813_v12, 0.0  ;;  %v9835_v7 = vmul.f32 0.01, %v9813_v12  ;;  %12400 = vmatmul.mubr.msk.f32.gmra.mrb[204].mxu1 %vm9852_vm14, %v9842_v58 }
0x2f07   :  { %v9844_v41 = vsel %vm9828_vm4, %v9818_v21, %v9836_v11  ;;  %12814 = vmatpush3.bf16.msra.mxu1 %v12813_v13  ;;  %v10200_v21 = vld [vmem:[#allocation2 + $0x598] sm:$0xff] }
0x2f08   :  { %v9843_v17 = vsel %vm9827_vm5, %v9813_v12, %v9835_v7  ;;  %v10777_v7 = vld [vmem:[#allocation2 + $0x5a0] ss:$0 sm:$0xff] }
0x2f09   :  { %12402 = vmatprep.mubr.msk.f32.mxu1 %vm9852_vm14, %v9843_v17 }
0x2f0a   :  { %12403 = vmatmul.mubr.msk.f32.gmra.mrb[206].mxu1 %vm9852_vm14, %v9844_v41 }
0x2f0b   :  { %12428 = vmatprep.mubr.msk.f32.mxu1 %vm13360_vm6, %v13355_v31 }
0x2fc7   :  { %v12395_v9 = vpop.f32.mrb[200].mxu1 }
0x2fc8   :  { %v9949_v63 = vadd.f32 %v12395_v9, %v10765_v34  ;;  %v9943_v22 = vpop.f32.mrb[201].mxu1 }
0x2fc9   :  { %v9944_v14 = vadd.f32 %v10765_v34, %v9943_v22 }
0x2fca   :  { %9998 = vperm.xlu0 %12826, %v9949_v63  }
0x2fcb   :  { %9993 = vperm.xlu1 %12827, %v9944_v14  }
0x2fd5   :  { %v12398_v3 = vpop.f32.mrb[202].mxu1 }
0x2fd6   :  { %v9959_v30 = vadd.f32 %v12398_v3, %v10765_v34  ;;  %v9953_v39 = vpop.f32.mrb[203].mxu1 }
0x2fd7   :  { %v9954_v0 = vadd.f32 %v10765_v34, %v9953_v39 }
0x2fd8   :  { %10008 = vperm.xlu1 %12827, %v9959_v30  }
0x2fd9   :  { %v12401_v48 = vpop.f32.mrb[204].mxu1 }
0x2fda   :  { %v9963_v53 = vpop.f32.mrb[205].mxu1  ;;  %v9969_v44 = vadd.f32 %v12401_v48, %v10765_v34 }
0x2fdb   :  { %v9964_v55 = vadd.f32 %v10765_v34, %v9963_v53 }
0x2fdc   :  { %10003 = vperm.xlu1 %12827, %v9954_v0  }
0x2fdd   :  { %10013 = vperm.xlu0 %12826, %v9964_v55   ;;  %v12404_v35 = vpop.f32.mrb[206].mxu1 }
0x2fde   :  { %v9973_v19 = vpop.f32.mrb[207].mxu1  ;;  %v9979_v38 = vadd.f32 %v12404_v35, %v10765_v34 }
0x2fdf   :  { %v9974_v52 = vadd.f32 %v10765_v34, %v9973_v19 }
0x2fe0   :  { %10018 = vperm.xlu1 %12827, %v9969_v44  }
0x2fe1   :  { %10023 = vperm.xlu0 %12826, %v9974_v52  }
0x2fe4   :  { %10028 = vperm.xlu1 %12827, %v9979_v38  }
0x3049   :  { %v9999_v8 = vpop.permute.xlu0 %9998 }
0x304a   :  { %v10032_v59 = vmul.f32 %v9999_v8, %v9984_v46  ;;  %v9994_v18 = vpop.permute.xlu1 %9993 }
0x304b   :  { %v10031_v28 = vmul.f32 %v9994_v18, %v9983_v16 }
0x304d   :  { %v12801_v33 = vpack.c.bf16 %v10032_v59, %v10031_v28 }
0x304f   :  { %12802 = vmatpush3.bf16.msra.mxu0 %v12801_v33 }
0x3050   :  { %12803 = vmatprep.subr.bf16.mxu0 %v13359_v32 }
0x3057   :  { %v10009_v2 = vpop.permute.xlu1 %10008 }
0x3058   :  { %v10034_v27 = vmul.f32 %v10009_v2, %v9986_v23 }
0x305b   :  { %v10004_v43 = vpop.permute.xlu1 %10003 }
0x305c   :  { %v10033_v29 = vmul.f32 %v10004_v43, %v9985_v20  ;;  %v10014_v1 = vpop.permute.xlu0 %10013 }
0x305d   :  { %v10035_v57 = vmul.f32 %v10014_v1, %v9987_v26 }
0x305e   :  { %v12804_v61 = vpack.c.bf16 %v10034_v27, %v10033_v29 }
0x305f   :  { %v10019_v24 = vpop.permute.xlu1 %10018 }
0x3060   :  { %v10036_v4 = vmul.f32 %v10019_v24, %v9988_v47  ;;  %12805 = vmatpush3.bf16.msra.mxu0 %v12804_v61  ;;  %v10024_v50 = vpop.permute.xlu0 %10023 }
0x3061   :  { %12806 = vmatprep.subr.bf16.mxu0 %v13359_v32  ;;  %v10037_v51 = vmul.f32 %v10024_v50, %v9989_v60 }
0x3062   :  { %v12807_v54 = vpack.c.bf16 %v10036_v4, %v10035_v57 }
0x3063   :  { %v10029_v42 = vpop.permute.xlu1 %10028 }
0x3064   :  { %v10038_v15 = vmul.f32 %v10029_v42, %v9990_v37  ;;  %12808 = vmatpush3.bf16.msra.mxu0 %v12807_v54 }
0x3065   :  { %12809 = vmatprep.subr.bf16.mxu0 %v13359_v32 }
0x3066   :  { %v12810_v6 = vpack.c.bf16 %v10038_v15, %v10037_v51 }
0x3068   :  { %12811 = vmatpush3.bf16.msra.mxu0 %v12810_v6 }
0x3069   :  { %12431 = vmatprep.subr.mxu0 %v13355_v31 }
0x306b   :  { %12422 = vmatmul.mubr.msk.f32.vlgmr.msra.gmra.mrb[204].mxu0 %vm96_vm0, %v9982_v62 }
0x306c   :  { %12433 = vmatprep.mubr.msk.f32.mxu0 %vm13360_vm6, %v13355_v31  ;;  %12432 = vmatpush3.msra.mxu0 %v10200_v21 }
0x313e   :  { %v10108_v5 = vpop.f32.mrb[204].mxu0 }
0x313f   :  { %10113 = vrot.lane.b32.xlu0 %v10108_v5, %s13361_s12  ;;  %v12423_v45 = vpop.f32.mrb[205].mxu0 }
0x31b1   :  { %v10114_v10 = vpop.permute.xlu0 %10113 }
0x31b2   :  { %v10116_v49 = vmul.f32 %v10114_v10, %v10108_v5 }
0x31b4   :  { %12429 = vmatmul.mubr.msk.f32.vlgmr.msra.gmra.mrb[208].mxu1 %vm9852_vm14, %v10116_v49 }
0x3287   :  { %v10193_v12 = vpop.f32.mrb[208].mxu1 }
0x3288   :  { %v10194_v56 = vadd.f32 %v10775_v40, %v10193_v12  ;;  %v12430_v11 = vpop.f32.mrb[209].mxu1 }
0x328a   :  { %vm10197_vm0 = vcmp.ge.f32.partialorder %v10194_v56, 0.0  ;;  %v10198_v31 = vmul.f32 0.01, %v10194_v56 }
0x328c   :  { %v10199_v58 = vsel %vm10197_vm0, %v10194_v56, %v10198_v31 }
0x328d   :  { %12434 = vmatmul.mubr.msk.f32.vlgmr.msra.gmra.mrb[206].mxu0 %vm10206_vm7, %v10199_v58 }
0x3360   :  { %v10276_v17 = vpop.f32.mrb[206].mxu0 }
0x3361   :  { %v10277_v41 = vadd.f32 %v10777_v7, %v10276_v17  ;;  %v12435_v34 = vpop.f32.mrb[207].mxu0 }
0x3363   :  { %v10280_v9 = vsub.f32 0.0, %v10277_v41 }
0x3365   :  { %v10281_v63 = vmul.f32 1.442695, %v10280_v9 }
0x3367   :  { %13318 = vpow2.f32 %v10281_v63 }
0x3371   :  { %v13319_v22 = vpop.eup %13318 }
0x3372   :  { %v10283_v14 = vadd.f32 1.0, %v13319_v22 }
0x3374   :  { %13320 = vrcp.f32 %v10283_v14 }
0x337e   :  { %v13321_v32 = vpop.eup %13320 }
0x337f   :  { %10286 = vst.msk [vmem:[%s15371_s2] sm:$0x3] %vm10285_vm8, %v13321_v32 }
0x3380   :  { %10291 = vsyncpa [#allocation3], 1 }

</bundles_post_ra>
